<compile_context>
chip_gen: v6e
topology: v6e:2x2x1
jax: 0.10.0
libtpu: 0.0.40
codegen_flags: <defaults>
</compile_context>

<pallas_src>
import jax
import jax.numpy as jnp
import numpy as np
from jax.experimental import pallas as pl
from jax.experimental.pallas import tpu as pltpu

D_IN, D_H1, D_H2, D_OUT = 2048, 1024, 512, 128
BN_EPS = 1e-5
NORM_EPS = 1e-12         # F.normalize default eps


def _batchnorm_relu(z, gamma, beta):
    # BatchNorm1d (training mode): biased per-feature batch statistics, in f32.
    mu = jnp.mean(z, axis=0, keepdims=True)
    var = jnp.mean((z - mu) ** 2, axis=0, keepdims=True)
    z = (z - mu) * jax.lax.rsqrt(var + BN_EPS) * gamma + beta
    return jnp.maximum(z, 0.0)


def simclr_head_kernel(h_ref, w1_ref, g1_ref, b1_ref,
                       w2_ref, g2_ref, b2_ref, w3_ref, o_ref):
    # Layer 1: bf16 MXU matmul, f32 accumulation.  h is f32 in HBM (tiny) and
    # cast to bf16 here, in-kernel, so no boundary cast materializes in HBM.
    h = h_ref[...].astype(jnp.bfloat16)
    z = jnp.dot(h, w1_ref[...], preferred_element_type=jnp.float32)
    z = _batchnorm_relu(z, g1_ref[...], b1_ref[...])

    # Layer 2.
    z = jnp.dot(z.astype(jnp.bfloat16), w2_ref[...],
                preferred_element_type=jnp.float32)
    z = _batchnorm_relu(z, g2_ref[...], b2_ref[...])

    # Layer 3.
    z = jnp.dot(z.astype(jnp.bfloat16), w3_ref[...],
                preferred_element_type=jnp.float32)

    # F.normalize(z, dim=-1): z / max(||z||_2, eps).  Single exact EUP rsqrt
    # on the clamped squared norm (identical clamp semantics in f32).
    inv = jax.lax.rsqrt(jnp.maximum(jnp.sum(z * z, axis=-1, keepdims=True),
                                    NORM_EPS * NORM_EPS))
    o_ref[...] = z * inv


def simclr_projection_head(h, w1, g1, b1, w2, g2, b2, w3):
    """Fused projection head.

    Expects w1/w2/w3 already stored in bf16 (done once at init, NOT per call);
    h and the BatchNorm affine params stay f32.  Single grid step: the whole
    problem (~5.5 MiB of inputs) is DMA'd into VMEM once and computed in one
    kernel body -- the workload is weight-DMA bound, so pipelining hides
    nothing and grid steps would be pure overhead.
    """
    B = h.shape[0]
    assert w1.dtype == jnp.bfloat16 and w2.dtype == jnp.bfloat16 \
        and w3.dtype == jnp.bfloat16, "store weights persistently in bf16"

    vmem = pl.BlockSpec(memory_space=pltpu.MemorySpace.VMEM)
    return pl.pallas_call(
        simclr_head_kernel,
        out_shape=jax.ShapeDtypeStruct((B, D_OUT), jnp.float32),
        in_specs=[vmem] * 8,           # whole arrays resident in VMEM, no grid
        out_specs=vmem,
        compiler_params=pltpu.CompilerParams(
            vmem_limit_bytes=32 << 20,  # ~5.5 MiB actual; headroom on v7x 64 MiB
        ),
    )(h, w1, g1, b1, w2, g2, b2, w3)


def _reference_f32(h, w1, g1, b1, w2, g2, b2, w3):
    # PyTorch-equivalent full-f32 reference (training-mode BatchNorm).
    hi = jax.lax.Precision.HIGHEST

    def bn_relu(z, g, b):
        mu = jnp.mean(z, axis=0, keepdims=True)
        var = jnp.mean((z - mu) ** 2, axis=0, keepdims=True)
        return jnp.maximum((z - mu) / jnp.sqrt(var + BN_EPS) * g + b, 0.0)

    z = bn_relu(jnp.dot(h, w1, precision=hi), g1, b1)
    z = bn_relu(jnp.dot(z, w2, precision=hi), g2, b2)
    z = jnp.dot(z, w3, precision=hi)
    nrm = jnp.sqrt(jnp.sum(z * z, axis=-1, keepdims=True))
    return z / jnp.maximum(nrm, NORM_EPS)


def _reference_bf16_path(h, w1, g1, b1, w2, g2, b2, w3):
    # Mirrors the kernel's own numerics (bf16 MXU inputs, f32 accumulation,
    # exact rsqrt tail) to tightly validate the kernel mechanics.
    bf, f32 = jnp.bfloat16, jnp.float32

    def bn_relu(z, g, b):
        mu = jnp.mean(z, axis=0, keepdims=True)
        var = jnp.mean((z - mu) ** 2, axis=0, keepdims=True)
        return jnp.maximum((z - mu) * jax.lax.rsqrt(var + BN_EPS) * g + b, 0.0)

    z = bn_relu(jnp.dot(h.astype(bf), w1, preferred_element_type=f32), g1, b1)
    z = bn_relu(jnp.dot(z.astype(bf), w2, preferred_element_type=f32), g2, b2)
    z = jnp.dot(z.astype(bf), w3, preferred_element_type=f32)
    inv = jax.lax.rsqrt(jnp.maximum(jnp.sum(z * z, axis=-1, keepdims=True),
                                    NORM_EPS * NORM_EPS))
    return z * inv


if __name__ == "__main__":
    key = jax.random.PRNGKey(0)
    k_h, k1, k2, k3, kg1, kb1, kg2, kb2 = jax.random.split(key, 8)

    B = 8  # small batch (>=2 needed for meaningful BatchNorm training stats)

    # Backbone feature (stand-in for flatten(resNet50(x))).
    h = jax.random.normal(k_h, (B, D_IN), dtype=jnp.float32)

    # Deterministic parameter init (Linear weights stored as (in, out), i.e.
    # the transpose of PyTorch's nn.Linear.weight; kernel computes h @ W).
    w1_f32 = jax.random.normal(k1, (D_IN, D_H1), jnp.float32) * (1.0 / np.sqrt(D_IN))
    w2_f32 = jax.random.normal(k2, (D_H1, D_H2), jnp.float32) * (1.0 / np.sqrt(D_H1))
    w3_f32 = jax.random.normal(k3, (D_H2, D_OUT), jnp.float32) * (1.0 / np.sqrt(D_H2))
    # BatchNorm affine params (PyTorch default gamma=1, beta=0; randomized so
    # the affine path is actually exercised).
    g1 = 1.0 + 0.1 * jax.random.normal(kg1, (1, D_H1), dtype=jnp.float32)
    b1 = 0.1 * jax.random.normal(kb1, (1, D_H1), dtype=jnp.float32)
    g2 = 1.0 + 0.1 * jax.random.normal(kg2, (1, D_H2), dtype=jnp.float32)
    b2 = 0.1 * jax.random.normal(kb2, (1, D_H2), dtype=jnp.float32)

    # One-time persistent bf16 weight storage (init-time, NOT per call).
    w1 = w1_f32.astype(jnp.bfloat16)
    w2 = w2_f32.astype(jnp.bfloat16)
    w3 = w3_f32.astype(jnp.bfloat16)

    z = simclr_projection_head(h, w1, g1, b1, w2, g2, b2, w3)
    z = jax.block_until_ready(z)
    assert z.shape == (B, D_OUT)

    # Tight check: kernel vs. a pure-JAX reference following the same
    # bf16-MXU / f32-statistics path (validates the kernel mechanics).
    z_bf = jax.block_until_ready(
        _reference_bf16_path(h, w1, g1, b1, w2, g2, b2, w3))
    np.testing.assert_allclose(np.asarray(z), np.asarray(z_bf),
                               rtol=1e-3, atol=1e-3)

    # Loose check: kernel vs. the full-f32 PyTorch-equivalent module.  The
    # only drift source is bf16 weight storage (f32 accumulation everywhere);
    # acceptable for SimCLR embeddings and bounded here.
    z_f32 = jax.block_until_ready(
        _reference_f32(h, w1_f32, g1, b1, w2_f32, g2, b2, w3_f32))
    np.testing.assert_allclose(np.asarray(z), np.asarray(z_f32),
                               rtol=3e-2, atol=3e-2)

    print("KERNEL_OK")
</pallas_src>

<mosaic_0001>
module attributes {stable_mosaic.version = 11 : i64} {
  func.func @simclr_head_kernel(%arg0: memref<8x2048xf32, #tpu.memory_space<vmem>>, %arg1: memref<2048x1024xbf16, #tpu.memory_space<vmem>>, %arg2: memref<1x1024xf32, #tpu.memory_space<vmem>>, %arg3: memref<1x1024xf32, #tpu.memory_space<vmem>>, %arg4: memref<1024x512xbf16, #tpu.memory_space<vmem>>, %arg5: memref<1x512xf32, #tpu.memory_space<vmem>>, %arg6: memref<1x512xf32, #tpu.memory_space<vmem>>, %arg7: memref<512x128xbf16, #tpu.memory_space<vmem>>, %arg8: memref<8x128xf32, #tpu.memory_space<vmem>>) attributes {dimension_semantics = [], scalar_prefetch = 0 : i64, scratch_operands = 0 : i64, tpu.core_type = #tpu.core_type<tc>} {
    %c0 = arith.constant 0 : index
    %c0_0 = arith.constant 0 : index
    %0 = vector.load %arg0[%c0, %c0_0] : memref<8x2048xf32, #tpu.memory_space<vmem>>, vector<8x2048xf32>
    %1 = arith.truncf %0 : vector<8x2048xf32> to vector<8x2048xbf16>
    %c0_1 = arith.constant 0 : index
    %c0_2 = arith.constant 0 : index
    %2 = vector.load %arg1[%c0_1, %c0_2] : memref<2048x1024xbf16, #tpu.memory_space<vmem>>, vector<2048x1024xbf16>
    %cst = arith.constant dense<0.000000e+00> : vector<8x1024xf32>
    %3 = tpu.matmul %1, %2, %cst {dimension_numbers = #tpu.dot_dimension_numbers<[1], [0], [0], [1], [0, 0, 1, 1], [], []>} : vector<8x2048xbf16>, vector<2048x1024xbf16>, vector<8x1024xf32> -> vector<8x1024xf32>
    %c0_3 = arith.constant 0 : index
    %c0_4 = arith.constant 0 : index
    %4 = vector.load %arg2[%c0_3, %c0_4] : memref<1x1024xf32, #tpu.memory_space<vmem>>, vector<1x1024xf32>
    %c0_5 = arith.constant 0 : index
    %c0_6 = arith.constant 0 : index
    %5 = vector.load %arg3[%c0_5, %c0_6] : memref<1x1024xf32, #tpu.memory_space<vmem>>, vector<1x1024xf32>
    %cst_7 = arith.constant dense<0.000000e+00> : vector<1024xf32>
    %6 = vector.multi_reduction <add>, %3, %cst_7 [0] : vector<8x1024xf32> to vector<1024xf32>
    %7 = vector.shape_cast %6 : vector<1024xf32> to vector<1x1024xf32>
    %cst_8 = arith.constant 8.000000e+00 : f32
    %8 = vector.broadcast %cst_8 : f32 to vector<1x1024xf32>
    %9 = arith.divf %7, %8 : vector<1x1024xf32>
    %10 = vector.broadcast %9 : vector<1x1024xf32> to vector<8x1024xf32>
    %11 = arith.subf %3, %10 : vector<8x1024xf32>
    %12 = arith.mulf %11, %11 : vector<8x1024xf32>
    %cst_9 = arith.constant dense<0.000000e+00> : vector<1024xf32>
    %13 = vector.multi_reduction <add>, %12, %cst_9 [0] : vector<8x1024xf32> to vector<1024xf32>
    %14 = vector.shape_cast %13 : vector<1024xf32> to vector<1x1024xf32>
    %cst_10 = arith.constant 8.000000e+00 : f32
    %15 = vector.broadcast %cst_10 : f32 to vector<1x1024xf32>
    %16 = arith.divf %14, %15 : vector<1x1024xf32>
    %17 = vector.broadcast %9 : vector<1x1024xf32> to vector<8x1024xf32>
    %18 = arith.subf %3, %17 : vector<8x1024xf32>
    %cst_11 = arith.constant 9.99999974E-6 : f32
    %19 = vector.broadcast %cst_11 : f32 to vector<1x1024xf32>
    %20 = arith.addf %16, %19 : vector<1x1024xf32>
    %21 = math.rsqrt %20 : vector<1x1024xf32>
    %22 = vector.broadcast %21 : vector<1x1024xf32> to vector<8x1024xf32>
    %23 = arith.mulf %18, %22 : vector<8x1024xf32>
    %24 = vector.broadcast %4 : vector<1x1024xf32> to vector<8x1024xf32>
    %25 = arith.mulf %23, %24 : vector<8x1024xf32>
    %26 = vector.broadcast %5 : vector<1x1024xf32> to vector<8x1024xf32>
    %27 = arith.addf %25, %26 : vector<8x1024xf32>
    %cst_12 = arith.constant 0.000000e+00 : f32
    %28 = vector.broadcast %cst_12 : f32 to vector<8x1024xf32>
    %29 = arith.maximumf %27, %28 : vector<8x1024xf32>
    %30 = arith.truncf %29 : vector<8x1024xf32> to vector<8x1024xbf16>
    %c0_13 = arith.constant 0 : index
    %c0_14 = arith.constant 0 : index
    %31 = vector.load %arg4[%c0_13, %c0_14] : memref<1024x512xbf16, #tpu.memory_space<vmem>>, vector<1024x512xbf16>
    %cst_15 = arith.constant dense<0.000000e+00> : vector<8x512xf32>
    %32 = tpu.matmul %30, %31, %cst_15 {dimension_numbers = #tpu.dot_dimension_numbers<[1], [0], [0], [1], [0, 0, 1, 1], [], []>} : vector<8x1024xbf16>, vector<1024x512xbf16>, vector<8x512xf32> -> vector<8x512xf32>
    %c0_16 = arith.constant 0 : index
    %c0_17 = arith.constant 0 : index
    %33 = vector.load %arg5[%c0_16, %c0_17] : memref<1x512xf32, #tpu.memory_space<vmem>>, vector<1x512xf32>
    %c0_18 = arith.constant 0 : index
    %c0_19 = arith.constant 0 : index
    %34 = vector.load %arg6[%c0_18, %c0_19] : memref<1x512xf32, #tpu.memory_space<vmem>>, vector<1x512xf32>
    %cst_20 = arith.constant dense<0.000000e+00> : vector<512xf32>
    %35 = vector.multi_reduction <add>, %32, %cst_20 [0] : vector<8x512xf32> to vector<512xf32>
    %36 = vector.shape_cast %35 : vector<512xf32> to vector<1x512xf32>
    %cst_21 = arith.constant 8.000000e+00 : f32
    %37 = vector.broadcast %cst_21 : f32 to vector<1x512xf32>
    %38 = arith.divf %36, %37 : vector<1x512xf32>
    %39 = vector.broadcast %38 : vector<1x512xf32> to vector<8x512xf32>
    %40 = arith.subf %32, %39 : vector<8x512xf32>
    %41 = arith.mulf %40, %40 : vector<8x512xf32>
    %cst_22 = arith.constant dense<0.000000e+00> : vector<512xf32>
    %42 = vector.multi_reduction <add>, %41, %cst_22 [0] : vector<8x512xf32> to vector<512xf32>
    %43 = vector.shape_cast %42 : vector<512xf32> to vector<1x512xf32>
    %cst_23 = arith.constant 8.000000e+00 : f32
    %44 = vector.broadcast %cst_23 : f32 to vector<1x512xf32>
    %45 = arith.divf %43, %44 : vector<1x512xf32>
    %46 = vector.broadcast %38 : vector<1x512xf32> to vector<8x512xf32>
    %47 = arith.subf %32, %46 : vector<8x512xf32>
    %cst_24 = arith.constant 9.99999974E-6 : f32
    %48 = vector.broadcast %cst_24 : f32 to vector<1x512xf32>
    %49 = arith.addf %45, %48 : vector<1x512xf32>
    %50 = math.rsqrt %49 : vector<1x512xf32>
    %51 = vector.broadcast %50 : vector<1x512xf32> to vector<8x512xf32>
    %52 = arith.mulf %47, %51 : vector<8x512xf32>
    %53 = vector.broadcast %33 : vector<1x512xf32> to vector<8x512xf32>
    %54 = arith.mulf %52, %53 : vector<8x512xf32>
    %55 = vector.broadcast %34 : vector<1x512xf32> to vector<8x512xf32>
    %56 = arith.addf %54, %55 : vector<8x512xf32>
    %cst_25 = arith.constant 0.000000e+00 : f32
    %57 = vector.broadcast %cst_25 : f32 to vector<8x512xf32>
    %58 = arith.maximumf %56, %57 : vector<8x512xf32>
    %59 = arith.truncf %58 : vector<8x512xf32> to vector<8x512xbf16>
    %c0_26 = arith.constant 0 : index
    %c0_27 = arith.constant 0 : index
    %60 = vector.load %arg7[%c0_26, %c0_27] : memref<512x128xbf16, #tpu.memory_space<vmem>>, vector<512x128xbf16>
    %cst_28 = arith.constant dense<0.000000e+00> : vector<8x128xf32>
    %61 = tpu.matmul %59, %60, %cst_28 {dimension_numbers = #tpu.dot_dimension_numbers<[1], [0], [0], [1], [0, 0, 1, 1], [], []>} : vector<8x512xbf16>, vector<512x128xbf16>, vector<8x128xf32> -> vector<8x128xf32>
    %62 = arith.mulf %61, %61 : vector<8x128xf32>
    %cst_29 = arith.constant dense<0.000000e+00> : vector<8xf32>
    %63 = vector.multi_reduction <add>, %62, %cst_29 [1] : vector<8x128xf32> to vector<8xf32>
    %64 = vector.shape_cast %63 : vector<8xf32> to vector<8x1xf32>
    %cst_30 = arith.constant 1.000000e-24 : f32
    %65 = vector.broadcast %cst_30 : f32 to vector<8x1xf32>
    %66 = arith.maximumf %64, %65 : vector<8x1xf32>
    %67 = math.rsqrt %66 : vector<8x1xf32>
    %68 = vector.broadcast %67 : vector<8x1xf32> to vector<8x128xf32>
    %69 = arith.mulf %61, %68 : vector<8x128xf32>
    %c0_31 = arith.constant 0 : index
    %c0_32 = arith.constant 0 : index
    %70 = vector.load %arg8[%c0_31, %c0_32] : memref<8x128xf32, #tpu.memory_space<vmem>>, vector<8x128xf32>
    tpu.vector_store %arg8[%c0_31, %c0_32], %69 {strides = array<i32>} : memref<8x128xf32, #tpu.memory_space<vmem>>, vector<8x128xf32>,
    return
  }
}

</mosaic_0001>

<bundles_post_ra>
// kernel: tpu_custom_call.1
= control target key start
LH: loop header
LB: loop body
LE: loop exit
PB: predicated region body
PF: predicated region fallthrough
CT: control target
= control target key end

     0   :  { %13 = vsyncpa [#allocation3], 0  ;;  %s12697_s0 = inlined_call_operand.hbm [shape: f32[8,2048], index: 0, kind: input, shape index: {}]   ;;  %s12698_s1 = inlined_call_operand.hbm [shape: bf16[2048,1024], index: 1, kind: input, shape index: {}]   ;;  %s12699_s2 = inlined_call_operand.hbm [shape: f32[1,1024], index: 2, kind: input, shape index: {}]   ;;  %s12700_s3 = inlined_call_operand.hbm [shape: f32[1,1024], index: 3, kind: input, shape index: {}]   ;;  %s12701_s4 = inlined_call_operand.hbm [shape: bf16[1024,512], index: 4, kind: input, shape index: {}]   ;;  %s12702_s5 = inlined_call_operand.hbm [shape: f32[1,512], index: 5, kind: input, shape index: {}]   ;;  %s12703_s6 = inlined_call_operand.hbm [shape: f32[1,512], index: 6, kind: input, shape index: {}]   ;;  %s12704_s7 = inlined_call_operand.hbm [shape: bf16[512,128], index: 7, kind: input, shape index: {}]   ;;  %s12705_s8 = inlined_call_operand.hbm [shape: f32[8,128], index: 8, kind: output, shape index: {}]  }
   0x1   :  { %14 = vsyncpa [#allocation6], 0 }
   0x2   :  { %15 = vsyncpa [#allocation9], 0 }
   0x3   :  { %16 = vsyncpa [#allocation12], 0 }
   0x4   :  { %17 = vsyncpa [#allocation15], 0 }
   0x5   :  { %18 = vsyncpa [#allocation4], 0  ;;  %s12256_s27 = smov [#allocation5]  }
   0x6   :  { %s34_s28 = sshll.u32 %s12256_s27, 4  ;;  %s35_s28 = int_to_ptr.vmem [resolvable:$true] %s34_s28 }
   0x7   :  { %s12072_s29 = scalar_lea.vmem %s35_s28, 131072  ;;  %p12077_p1 = scmp.lt.s32.totalorder %s35_s28, %s35_s28 }
   0x8   :  { %p12073_p0 = scmp.ne.s32.totalorder %s35_s28, %s12072_s29  ;;  %p12078_p2 = scmp.lt.s32.totalorder %s12072_s29, %s12072_s29 }
   0xa   :  { %p12079_p3 = por %p12078_p2, %p12077_p1 }
   0xc   :  { %p12080_p4 = pnand %p12079_p3, %p12073_p0 }
   0xe   :  { %12083 = shalt.err (!%p12080_p4)
}
   0xf   :  { %s12257_s30 = smov 512   ;;  %s12258_s9 = smov 32  }
  0x10   :  { %40 = dma.hbm_to_vmem [thread:$0]  %s12698_s1, 131072, %s35_s28, [#allocation6], %s12257_s30, %s12257_s30, %s12258_s9  }
  0x11   :  { %s12259_s12 = smov [#allocation8]   ;;  %s12260_s14 = smov [#allocation11]  }
  0x12   :  { %s57_s13 = sshll.u32 %s12259_s12, 4  ;;  %s79_s15 = sshll.u32 %s12260_s14, 4  ;;  %s58_s13 = int_to_ptr.vmem [resolvable:$true] %s57_s13  ;;  %s80_s15 = int_to_ptr.vmem [resolvable:$true] %s79_s15 }
  0x13   :  { %s12092_s16 = scalar_lea.vmem %s58_s13, 128  ;;  %p12097_p6 = scmp.lt.s32.totalorder %s58_s13, %s58_s13 }
  0x14   :  { %p12093_p5 = scmp.ne.s32.totalorder %s58_s13, %s12092_s16  ;;  %p12098_p7 = scmp.lt.s32.totalorder %s12092_s16, %s12092_s16 }
  0x16   :  { %p12099_p8 = por %p12098_p7, %p12097_p6 }
  0x18   :  { %p12100_p9 = pnand %p12099_p8, %p12093_p5 }
  0x1a   :  { %12103 = shalt.err (!%p12100_p9)
}
  0x1b   :  { %60 = dma.hbm_to_vmem [thread:$0]  %s12700_s3, 128, %s58_s13, [#allocation9]  }
  0x1c   :  { %s12112_s19 = scalar_lea.vmem %s80_s15, 64  ;;  %p12117_p11 = scmp.lt.s32.totalorder %s80_s15, %s80_s15 }
  0x1d   :  { %p12113_p10 = scmp.ne.s32.totalorder %s80_s15, %s12112_s19  ;;  %p12118_p12 = scmp.lt.s32.totalorder %s12112_s19, %s12112_s19 }
  0x1f   :  { %p12119_p13 = por %p12118_p12, %p12117_p11 }
  0x21   :  { %p12120_p0 = pnand %p12119_p13, %p12113_p10 }
  0x23   :  { %12123 = shalt.err (!%p12120_p0)
}
  0x24   :  { %82 = dma.hbm_to_vmem [thread:$0]  %s12702_s5, 64, %s80_s15, [#allocation12]  }
  0x25   :  { %s12261_s21 = smov [#allocation2]   ;;  %s12262_s23 = smov [#allocation7]  }
  0x26   :  { %s25_s22 = sshll.u32 %s12261_s21, 4  ;;  %s47_s24 = sshll.u32 %s12262_s23, 4  ;;  %s26_s22 = int_to_ptr.vmem [resolvable:$true] %s25_s22  ;;  %s48_s24 = int_to_ptr.vmem [resolvable:$true] %s47_s24 }
  0x27   :  { %s12132_s25 = scalar_lea.vmem %s26_s22, 2048  ;;  %p12137_p2 = scmp.lt.s32.totalorder %s26_s22, %s26_s22 }
  0x28   :  { %p12133_p1 = scmp.ne.s32.totalorder %s26_s22, %s12132_s25  ;;  %p12138_p3 = scmp.lt.s32.totalorder %s12132_s25, %s12132_s25 }
  0x2a   :  { %p12139_p4 = por %p12138_p3, %p12137_p2 }
  0x2c   :  { %p12140_p5 = pnand %p12139_p4, %p12133_p1 }
  0x2e   :  { %12143 = shalt.err (!%p12140_p5)
}
  0x2f   :  { %28 = dma.hbm_to_vmem [thread:$0]  %s12697_s0, 2048, %s26_s22, [#allocation3]  }
  0x30   :  { %s12152_s27 = scalar_lea.vmem %s48_s24, 128  ;;  %p12157_p7 = scmp.lt.s32.totalorder %s48_s24, %s48_s24 }
  0x31   :  { %p12153_p6 = scmp.ne.s32.totalorder %s48_s24, %s12152_s27  ;;  %p12158_p8 = scmp.lt.s32.totalorder %s12152_s27, %s12152_s27 }
  0x33   :  { %p12159_p9 = por %p12158_p8, %p12157_p7 }
  0x35   :  { %p12160_p10 = pnand %p12159_p9, %p12153_p6 }
  0x37   :  { %12163 = shalt.err (!%p12160_p10)
}
  0x38   :  { %50 = dma.hbm_to_vmem [thread:$0]  %s12699_s2, 128, %s48_s24, [#allocation6]  }
  0x39   :  { %s12263_s29 = smov [#allocation10]  }
  0x3a   :  { %s66_s30 = sshll.u32 %s12263_s29, 4  ;;  %s67_s30 = int_to_ptr.vmem [resolvable:$true] %s66_s30 }
  0x3b   :  { %s12172_s9 = scalar_lea.vmem %s67_s30, 32768  ;;  %p12177_p12 = scmp.lt.s32.totalorder %s67_s30, %s67_s30 }
  0x3c   :  { %p12173_p11 = scmp.ne.s32.totalorder %s67_s30, %s12172_s9  ;;  %p12178_p13 = scmp.lt.s32.totalorder %s12172_s9, %s12172_s9 }
  0x3e   :  { %p12179_p0 = por %p12178_p13, %p12177_p12 }
  0x40   :  { %p12180_p1 = pnand %p12179_p0, %p12173_p11 }
  0x42   :  { %12183 = shalt.err (!%p12180_p1)
}
  0x43   :  { %s12264_s0 = smov 256   ;;  %s12265_s10 = smov 16  }
  0x44   :  { %72 = dma.hbm_to_vmem [thread:$0]  %s12701_s4, 32768, %s67_s30, [#allocation9], %s12264_s0, %s12264_s0, %s12265_s10  }
  0x45   :  { %s12266_s13 = smov [#allocation13]   ;;  %s12267_s15 = smov [#allocation14]  }
  0x46   :  { %s89_s14 = sshll.u32 %s12266_s13, 4  ;;  %s98_s2 = sshll.u32 %s12267_s15, 4  ;;  %s90_s14 = int_to_ptr.vmem [resolvable:$true] %s89_s14  ;;  %s99_s2 = int_to_ptr.vmem [resolvable:$true] %s98_s2 }
  0x47   :  { %s12192_s16 = scalar_lea.vmem %s90_s14, 64  ;;  %p12197_p3 = scmp.lt.s32.totalorder %s90_s14, %s90_s14 }
  0x48   :  { %p12193_p2 = scmp.ne.s32.totalorder %s90_s14, %s12192_s16  ;;  %p12198_p4 = scmp.lt.s32.totalorder %s12192_s16, %s12192_s16 }
  0x4a   :  { %p12199_p5 = por %p12198_p4, %p12197_p3 }
  0x4c   :  { %p12200_p6 = pnand %p12199_p5, %p12193_p2 }
  0x4e   :  { %12203 = shalt.err (!%p12200_p6)
}
  0x4f   :  { %92 = dma.hbm_to_vmem [thread:$0]  %s12703_s6, 64, %s90_s14, [#allocation12]  }
  0x50   :  { %s12212_s19 = scalar_lea.vmem %s99_s2, 4096  ;;  %p12217_p8 = scmp.lt.s32.totalorder %s99_s2, %s99_s2 }
  0x51   :  { %p12213_p7 = scmp.ne.s32.totalorder %s99_s2, %s12212_s19  ;;  %p12218_p9 = scmp.lt.s32.totalorder %s12212_s19, %s12212_s19 }
  0x53   :  { %p12219_p10 = por %p12218_p9, %p12217_p8 }
  0x55   :  { %p12220_p11 = pnand %p12219_p10, %p12213_p7 }
  0x57   :  { %12223 = shalt.err (!%p12220_p11)
}
  0x58   :  { %s12268_s4 = smov 64   ;;  %s12269_s1 = smov 4  }
  0x59   :  { %104 = dma.hbm_to_vmem [thread:$0]  %s12704_s7, 4096, %s99_s2, [#allocation15], %s12268_s4, %s12268_s4, %s12269_s1  }
  0x5a   :  { %12244 = dma.done.wait [#allocation3], 2048  }
  0x5b   :  { %12245 = vsyncadd [#allocation3], 4294965248 }
  0x5c   :  { %12246 = dma.done.wait [#allocation6], 131200  }
  0x5d   :  { %12247 = vsyncadd [#allocation6], 4294836096 }
  0x5e   :  { %12248 = dma.done.wait [#allocation9], 32896  }
  0x5f   :  { %12249 = vsyncadd [#allocation9], 4294934400 }
  0x60   :  { %12250 = dma.done.wait [#allocation12], 128  }
  0x61   :  { %12251 = vsyncadd [#allocation12], 4294967168 }
  0x62   :  { %12252 = dma.done.wait [#allocation15], 4096  }
  0x63   :  { %12253 = vsyncadd [#allocation15], 4294963200  ;;  %v218_v0 = vld [vmem:[#allocation5 + $0x1c0] sm:$0xff]  ;;  %v131_v53 = vld [vmem:[#allocation2 + $0x8] sm:$0xff]  ;;  %s12270_s6 = smov [#allocation16]  }
  0x64   :  { %v222_v1 = vld [vmem:[#allocation5 + $0x1e0] sm:$0xff]  ;;  %v133_v54 = vld [vmem:[#allocation2 + $0x18] sm:$0xff]  ;;  %v12340_v58 = vpack.c.bf16 %v131_v53, %v131_v53  ;;  %s10236_s7 = sshll.u32 %s12270_s6, 4  ;;  %s10237_s7 = int_to_ptr.vmem [resolvable:$true] %s10236_s7 }
  0x65   :  { %v346_v2 = vld [vmem:[#allocation5 + $0x5c0] sm:$0xff]  ;;  %v10306_v3 = vcombine.high %v218_v0, %v222_v1  ;;  %v10305_v5 = vcombine.low %v218_v0, %v222_v1  ;;  %v12342_v59 = vpack.c.bf16 %v133_v54, %v133_v54  ;;  %s12224_s22 = scalar_lea.vmem %s10237_s7, 128  ;;  %p12229_p13 = scmp.lt.s32.totalorder %s10237_s7, %s10237_s7 }
  0x66   :  { %v350_v4 = vld [vmem:[#allocation5 + $0x5e0] sm:$0xff]  ;;  %6338 = vmatprep.mubr.bf16.mxu0 %v12340_v58  ;;  %p12225_p12 = scmp.ne.s32.totalorder %s10237_s7, %s12224_s22  ;;  %p12230_p0 = scmp.lt.s32.totalorder %s12224_s22, %s12224_s22 }
  0x67   :  { %v210_v6 = vld [vmem:[#allocation5 + $0x180] sm:$0xff]  ;;  %v10434_v8 = vcombine.high %v346_v2, %v350_v4  ;;  %v10433_v9 = vcombine.low %v346_v2, %v350_v4  ;;  %6306 = vmatprep.subr.bf16.mxu0 %v10306_v3  ;;  %6379 = vmatprep.mubr.bf16.mxu1 %v12342_v59 }
  0x68   :  { %v214_v7 = vld [vmem:[#allocation5 + $0x1a0] sm:$0xff]  ;;  %6307 = vmatpush1.bf16.msra.mxu0 %v10305_v5  ;;  %p12231_p1 = por %p12230_p0, %p12229_p13 }
  0x69   :  { %v10298_v10 = vcombine.high %v210_v6, %v214_v7  ;;  %v338_v11 = vld [vmem:[#allocation5 + $0x580] sm:$0xff]  ;;  %6347 = vmatprep.subr.bf16.mxu1 %v10434_v8  ;;  %v10297_v18 = vcombine.low %v210_v6, %v214_v7 }
  0x6a   :  { %v342_v12 = vld [vmem:[#allocation5 + $0x5a0] sm:$0xff]  ;;  %6348 = vmatpush1.bf16.msra.mxu1 %v10433_v9  ;;  %p12232_p2 = pnand %p12231_p1, %p12225_p12 }
  0x6b   :  { %v202_v13 = vld [vmem:[#allocation5 + $0x140] sm:$0xff]  ;;  %v10426_v14 = vcombine.high %v338_v11, %v342_v12  ;;  %6308 = vmatprep.subr.bf16.mxu0 %v10298_v10  ;;  %v10425_v19 = vcombine.low %v338_v11, %v342_v12 }
  0x6c   :  { %v206_v15 = vld [vmem:[#allocation5 + $0x160] sm:$0xff]  ;;  %6309 = vmatpush1.bf16.msra.mxu0 %v10297_v18 }
  0x6d   :  { %v330_v16 = vld [vmem:[#allocation5 + $0x540] sm:$0xff]  ;;  %v10290_v20 = vcombine.high %v202_v13, %v206_v15  ;;  %6349 = vmatprep.subr.bf16.mxu1 %v10426_v14  ;;  %v10289_v26 = vcombine.low %v202_v13, %v206_v15 }
  0x6e   :  { %v334_v17 = vld [vmem:[#allocation5 + $0x560] sm:$0xff]  ;;  %6350 = vmatpush1.bf16.msra.mxu1 %v10425_v19 }
  0x6f   :  { %v10418_v21 = vcombine.high %v330_v16, %v334_v17  ;;  %v194_v22 = vld [vmem:[#allocation5 + $0x100] sm:$0xff]  ;;  %6310 = vmatprep.subr.bf16.mxu0 %v10290_v20  ;;  %v10417_v27 = vcombine.low %v330_v16, %v334_v17 }
  0x70   :  { %v198_v23 = vld [vmem:[#allocation5 + $0x120] sm:$0xff]  ;;  %6311 = vmatpush1.bf16.msra.mxu0 %v10289_v26 }
  0x71   :  { %v322_v24 = vld [vmem:[#allocation5 + $0x500] sm:$0xff]  ;;  %v10282_v28 = vcombine.high %v194_v22, %v198_v23  ;;  %6351 = vmatprep.subr.bf16.mxu1 %v10418_v21  ;;  %v10281_v34 = vcombine.low %v194_v22, %v198_v23 }
  0x72   :  { %v326_v25 = vld [vmem:[#allocation5 + $0x520] sm:$0xff]  ;;  %6352 = vmatpush1.bf16.msra.mxu1 %v10417_v27 }
  0x73   :  { %v10410_v29 = vcombine.high %v322_v24, %v326_v25  ;;  %v186_v30 = vld [vmem:[#allocation5 + $0xc0] sm:$0xff]  ;;  %6312 = vmatprep.subr.bf16.mxu0 %v10282_v28  ;;  %v10409_v35 = vcombine.low %v322_v24, %v326_v25 }
  0x74   :  { %v190_v31 = vld [vmem:[#allocation5 + $0xe0] sm:$0xff]  ;;  %6313 = vmatpush1.bf16.msra.mxu0 %v10281_v34 }
  0x75   :  { %v314_v32 = vld [vmem:[#allocation5 + $0x4c0] sm:$0xff]  ;;  %v10274_v36 = vcombine.high %v186_v30, %v190_v31  ;;  %6353 = vmatprep.subr.bf16.mxu1 %v10410_v29  ;;  %v10273_v42 = vcombine.low %v186_v30, %v190_v31 }
  0x76   :  { %v318_v33 = vld [vmem:[#allocation5 + $0x4e0] sm:$0xff]  ;;  %6354 = vmatpush1.bf16.msra.mxu1 %v10409_v35 }
  0x77   :  { %v10402_v37 = vcombine.high %v314_v32, %v318_v33  ;;  %v178_v38 = vld [vmem:[#allocation5 + $0x80] sm:$0xff]  ;;  %6314 = vmatprep.subr.bf16.mxu0 %v10274_v36  ;;  %v10401_v43 = vcombine.low %v314_v32, %v318_v33 }
  0x78   :  { %v182_v39 = vld [vmem:[#allocation5 + $0xa0] sm:$0xff]  ;;  %6315 = vmatpush1.bf16.msra.mxu0 %v10273_v42 }
  0x79   :  { %v306_v40 = vld [vmem:[#allocation5 + $0x480] sm:$0xff]  ;;  %v10266_v44 = vcombine.high %v178_v38, %v182_v39  ;;  %6355 = vmatprep.subr.bf16.mxu1 %v10402_v37  ;;  %v10265_v50 = vcombine.low %v178_v38, %v182_v39 }
  0x7a   :  { %v310_v41 = vld [vmem:[#allocation5 + $0x4a0] sm:$0xff]  ;;  %6356 = vmatpush1.bf16.msra.mxu1 %v10401_v43 }
  0x7b   :  { %v10394_v45 = vcombine.high %v306_v40, %v310_v41  ;;  %v170_v46 = vld [vmem:[#allocation5 + $0x40] sm:$0xff]  ;;  %6316 = vmatprep.subr.bf16.mxu0 %v10266_v44  ;;  %v10393_v51 = vcombine.low %v306_v40, %v310_v41 }
  0x7c   :  { %v174_v47 = vld [vmem:[#allocation5 + $0x60] sm:$0xff]  ;;  %6317 = vmatpush1.bf16.msra.mxu0 %v10265_v50 }
  0x7d   :  { %v298_v48 = vld [vmem:[#allocation5 + $0x440] sm:$0xff]  ;;  %v10258_v52 = vcombine.high %v170_v46, %v174_v47  ;;  %6357 = vmatprep.subr.bf16.mxu1 %v10394_v45  ;;  %v10257_v62 = vcombine.low %v170_v46, %v174_v47 }
  0x7e   :  { %v302_v49 = vld [vmem:[#allocation5 + $0x460] sm:$0xff]  ;;  %6358 = vmatpush1.bf16.msra.mxu1 %v10393_v51 }
  0x7f   :  { %v10386_v55 = vcombine.high %v298_v48, %v302_v49  ;;  %v162_v56 = vld [vmem:[#allocation5] sm:$0xff]  ;;  %6318 = vmatprep.subr.bf16.mxu0 %v10258_v52  ;;  %v10385_v63 = vcombine.low %v298_v48, %v302_v49 }
  0x80   :  { %v166_v57 = vld [vmem:[#allocation5 + $0x20] sm:$0xff]  ;;  %6319 = vmatpush1.bf16.msra.mxu0 %v10257_v62 }
  0x81   :  { %v290_v60 = vld [vmem:[#allocation5 + $0x400] sm:$0xff]  ;;  %v10250_v0 = vcombine.high %v162_v56, %v166_v57  ;;  %6359 = vmatprep.subr.bf16.mxu1 %v10386_v55  ;;  %v10249_v6 = vcombine.low %v162_v56, %v166_v57 }
  0x82   :  { %v294_v61 = vld [vmem:[#allocation5 + $0x420] sm:$0xff]  ;;  %6360 = vmatpush1.bf16.msra.mxu1 %v10385_v63 }
  0x83   :  { %v10378_v1 = vcombine.high %v290_v60, %v294_v61  ;;  %v282_v2 = vld [vmem:[#allocation5 + $0x3c0] sm:$0xff]  ;;  %6320 = vmatprep.subr.bf16.mxu0 %v10250_v0  ;;  %v10377_v7 = vcombine.low %v290_v60, %v294_v61 }
  0x84   :  { %v286_v3 = vld [vmem:[#allocation5 + $0x3e0] sm:$0xff]  ;;  %6321 = vmatpush1.bf16.msra.mxu0 %v10249_v6 }
  0x85   :  { %v410_v4 = vld [vmem:[#allocation5 + $0x7c0] sm:$0xff]  ;;  %v10370_v8 = vcombine.high %v282_v2, %v286_v3  ;;  %6361 = vmatprep.subr.bf16.mxu1 %v10378_v1  ;;  %v10369_v14 = vcombine.low %v282_v2, %v286_v3 }
  0x86   :  { %v414_v5 = vld [vmem:[#allocation5 + $0x7e0] sm:$0xff]  ;;  %6362 = vmatpush1.bf16.msra.mxu1 %v10377_v7 }
  0x87   :  { %v10498_v9 = vcombine.high %v410_v4, %v414_v5  ;;  %v274_v10 = vld [vmem:[#allocation5 + $0x380] sm:$0xff]  ;;  %6322 = vmatprep.subr.bf16.mxu0 %v10370_v8  ;;  %v10497_v15 = vcombine.low %v410_v4, %v414_v5 }
  0x88   :  { %v278_v11 = vld [vmem:[#allocation5 + $0x3a0] sm:$0xff]  ;;  %6323 = vmatpush2.bf16.msra.mxu0 %v10369_v14 }
  0x89   :  { %v402_v12 = vld [vmem:[#allocation5 + $0x780] sm:$0xff]  ;;  %v10362_v16 = vcombine.high %v274_v10, %v278_v11  ;;  %6363 = vmatprep.subr.bf16.mxu1 %v10498_v9  ;;  %v10361_v22 = vcombine.low %v274_v10, %v278_v11  ;;  %v132_v11 = vld [vmem:[#allocation2 + $0x10] sm:$0xff] }
  0x8a   :  { %v406_v13 = vld [vmem:[#allocation5 + $0x7a0] sm:$0xff]  ;;  %6364 = vmatpush2.bf16.msra.mxu1 %v10497_v15 }
  0x8b   :  { %v10490_v17 = vcombine.high %v402_v12, %v406_v13  ;;  %v266_v18 = vld [vmem:[#allocation5 + $0x340] sm:$0xff]  ;;  %6324 = vmatprep.subr.bf16.mxu0 %v10362_v16  ;;  %v10489_v23 = vcombine.low %v402_v12, %v406_v13 }
  0x8c   :  { %v270_v19 = vld [vmem:[#allocation5 + $0x360] sm:$0xff]  ;;  %6325 = vmatpush2.bf16.msra.mxu0 %v10361_v22  ;;  %v137_v22 = vld [vmem:[#allocation2 + $0x38] sm:$0xff] }
  0x8d   :  { %v394_v20 = vld [vmem:[#allocation5 + $0x740] sm:$0xff]  ;;  %v10354_v24 = vcombine.high %v266_v18, %v270_v19  ;;  %6365 = vmatprep.subr.bf16.mxu1 %v10490_v17  ;;  %v10353_v30 = vcombine.low %v266_v18, %v270_v19  ;;  %v135_v19 = vld [vmem:[#allocation2 + $0x28] sm:$0xff] }
  0x8e   :  { %v398_v21 = vld [vmem:[#allocation5 + $0x760] sm:$0xff]  ;;  %6366 = vmatpush2.bf16.msra.mxu1 %v10489_v23 }
  0x8f   :  { %v10482_v25 = vcombine.high %v394_v20, %v398_v21  ;;  %v258_v26 = vld [vmem:[#allocation5 + $0x300] sm:$0xff]  ;;  %6326 = vmatprep.subr.bf16.mxu0 %v10354_v24  ;;  %v10481_v31 = vcombine.low %v394_v20, %v398_v21  ;;  %v12348_v20 = vpack.c.bf16 %v132_v11, %v132_v11 }
  0x90   :  { %v262_v27 = vld [vmem:[#allocation5 + $0x320] sm:$0xff]  ;;  %6327 = vmatpush2.bf16.msra.mxu0 %v10353_v30 }
  0x91   :  { %v386_v28 = vld [vmem:[#allocation5 + $0x700] sm:$0xff]  ;;  %v10346_v32 = vcombine.high %v258_v26, %v262_v27  ;;  %6367 = vmatprep.subr.bf16.mxu1 %v10482_v25  ;;  %v10345_v38 = vcombine.low %v258_v26, %v262_v27 }
  0x92   :  { %v390_v29 = vld [vmem:[#allocation5 + $0x720] sm:$0xff]  ;;  %6368 = vmatpush2.bf16.msra.mxu1 %v10481_v31  ;;  %v12353_v31 = vpack.c.bf16 %v137_v22, %v137_v22 }
  0x93   :  { %v10474_v33 = vcombine.high %v386_v28, %v390_v29  ;;  %v250_v34 = vld [vmem:[#allocation5 + $0x2c0] sm:$0xff]  ;;  %6328 = vmatprep.subr.bf16.mxu0 %v10346_v32  ;;  %v10473_v39 = vcombine.low %v386_v28, %v390_v29  ;;  %v12350_v28 = vpack.c.bf16 %v135_v19, %v135_v19 }
  0x94   :  { %v254_v35 = vld [vmem:[#allocation5 + $0x2e0] sm:$0xff]  ;;  %6329 = vmatpush2.bf16.msra.mxu0 %v10345_v38 }
  0x95   :  { %v378_v36 = vld [vmem:[#allocation5 + $0x6c0] sm:$0xff]  ;;  %v10338_v40 = vcombine.high %v250_v34, %v254_v35  ;;  %6369 = vmatprep.subr.bf16.mxu1 %v10474_v33  ;;  %v10337_v46 = vcombine.low %v250_v34, %v254_v35 }
  0x96   :  { %v382_v37 = vld [vmem:[#allocation5 + $0x6e0] sm:$0xff]  ;;  %6370 = vmatpush2.bf16.msra.mxu1 %v10473_v39 }
  0x97   :  { %v10466_v41 = vcombine.high %v378_v36, %v382_v37  ;;  %v242_v42 = vld [vmem:[#allocation5 + $0x280] sm:$0xff]  ;;  %6330 = vmatprep.subr.bf16.mxu0 %v10338_v40  ;;  %v10465_v47 = vcombine.low %v378_v36, %v382_v37 }
  0x98   :  { %v246_v43 = vld [vmem:[#allocation5 + $0x2a0] sm:$0xff]  ;;  %6331 = vmatpush2.bf16.msra.mxu0 %v10337_v46 }
  0x99   :  { %v370_v44 = vld [vmem:[#allocation5 + $0x680] sm:$0xff]  ;;  %v10330_v48 = vcombine.high %v242_v42, %v246_v43  ;;  %6371 = vmatprep.subr.bf16.mxu1 %v10466_v41  ;;  %v10329_v54 = vcombine.low %v242_v42, %v246_v43 }
  0x9a   :  { %v374_v45 = vld [vmem:[#allocation5 + $0x6a0] sm:$0xff]  ;;  %6372 = vmatpush2.bf16.msra.mxu1 %v10465_v47 }
  0x9b   :  { %v10458_v49 = vcombine.high %v370_v44, %v374_v45  ;;  %v234_v50 = vld [vmem:[#allocation5 + $0x240] sm:$0xff]  ;;  %6332 = vmatprep.subr.bf16.mxu0 %v10330_v48  ;;  %v10457_v55 = vcombine.low %v370_v44, %v374_v45 }
  0x9c   :  { %v238_v51 = vld [vmem:[#allocation5 + $0x260] sm:$0xff]  ;;  %6333 = vmatpush2.bf16.msra.mxu0 %v10329_v54 }
  0x9d   :  { %v362_v52 = vld [vmem:[#allocation5 + $0x640] sm:$0xff]  ;;  %v10322_v56 = vcombine.high %v234_v50, %v238_v51  ;;  %6373 = vmatprep.subr.bf16.mxu1 %v10458_v49  ;;  %v10321_v0 = vcombine.low %v234_v50, %v238_v51 }
  0x9e   :  { %v366_v53 = vld [vmem:[#allocation5 + $0x660] sm:$0xff]  ;;  %6374 = vmatpush2.bf16.msra.mxu1 %v10457_v55 }
  0x9f   :  { %v10450_v57 = vcombine.high %v362_v52, %v366_v53  ;;  %v226_v60 = vld [vmem:[#allocation5 + $0x200] sm:$0xff]  ;;  %6334 = vmatprep.subr.bf16.mxu0 %v10322_v56  ;;  %v10449_v1 = vcombine.low %v362_v52, %v366_v53 }
  0xa0   :  { %v230_v61 = vld [vmem:[#allocation5 + $0x220] sm:$0xff]  ;;  %6335 = vmatpush2.bf16.msra.mxu0 %v10321_v0 }
  0xa1   :  { %v354_v62 = vld [vmem:[#allocation5 + $0x600] sm:$0xff]  ;;  %v10314_v2 = vcombine.high %v226_v60, %v230_v61  ;;  %6375 = vmatprep.subr.bf16.mxu1 %v10450_v57  ;;  %v10313_v8 = vcombine.low %v226_v60, %v230_v61 }
  0xa2   :  { %v358_v63 = vld [vmem:[#allocation5 + $0x620] sm:$0xff]  ;;  %6376 = vmatpush2.bf16.msra.mxu1 %v10449_v1 }
  0xa3   :  { %v10442_v3 = vcombine.high %v354_v62, %v358_v63  ;;  %v474_v4 = vld [vmem:[#allocation5 + $0x9c0] sm:$0xff]  ;;  %6336 = vmatprep.subr.bf16.mxu0 %v10314_v2  ;;  %v10441_v10 = vcombine.low %v354_v62, %v358_v63 }
  0xa4   :  { %v478_v5 = vld [vmem:[#allocation5 + $0x9e0] sm:$0xff]  ;;  %6337 = vmatpush2.bf16.msra.mxu0 %v10313_v8 }
  0xa5   :  { %v602_v6 = vld [vmem:[#allocation5 + $0xdc0] sm:$0xff]  ;;  %v10562_v12 = vcombine.high %v474_v4, %v478_v5  ;;  %6377 = vmatprep.subr.bf16.mxu1 %v10442_v3  ;;  %v10561_v21 = vcombine.low %v474_v4, %v478_v5 }
  0xa6   :  { %v606_v7 = vld [vmem:[#allocation5 + $0xde0] sm:$0xff]  ;;  %6378 = vmatpush2.bf16.msra.mxu1 %v10441_v10 }
  0xa7   :  { %v130_v9 = vld [vmem:[#allocation2] sm:$0xff]  ;;  %v10690_v13 = vcombine.high %v602_v6, %v606_v7  ;;  %6388 = vmatprep.subr.bf16.mxu0 %v10562_v12  ;;  %v10689_v23 = vcombine.low %v602_v6, %v606_v7 }
  0xa8   :  { %v466_v14 = vld [vmem:[#allocation5 + $0x980] sm:$0xff]  ;;  %v12346_v16 = vpack.c.bf16 %v130_v9, %v130_v9 }
  0xa9   :  { %v470_v15 = vld [vmem:[#allocation5 + $0x9a0] sm:$0xff]  ;;  %6429 = vmatprep.subr.bf16.mxu1 %v10690_v13  ;;  %6380 = vmatmul.mubr.bf16.vlgmr.msra.gmra.mxu1 %v12348_v20 }
  0xaa   :  { %v594_v17 = vld [vmem:[#allocation5 + $0xd80] sm:$0xff]  ;;  %v10554_v24 = vcombine.high %v466_v14, %v470_v15  ;;  %6339 = vmatmul.mubr.bf16.vlgmr.msra.gmra.mxu0 %v12346_v16  ;;  %v10553_v32 = vcombine.low %v466_v14, %v470_v15  ;;  %6430 = vmatpush1.bf16.msra.mxu1 %v10689_v23 }
  0xab   :  { %v598_v18 = vld [vmem:[#allocation5 + $0xda0] sm:$0xff]  ;;  %6389 = vmatpush1.bf16.msra.mxu0 %v10561_v21  ;;  %6420 = vmatprep.mubr.bf16.mxu0 %v12350_v28 }
  0xac   :  { %v10682_v25 = vcombine.high %v594_v17, %v598_v18  ;;  %v458_v26 = vld [vmem:[#allocation5 + $0x940] sm:$0xff]  ;;  %6390 = vmatprep.subr.bf16.mxu0 %v10554_v24  ;;  %v10681_v33 = vcombine.low %v594_v17, %v598_v18  ;;  %6461 = vmatprep.mubr.bf16.mxu1 %v12353_v31 }
  0xad   :  { %v462_v27 = vld [vmem:[#allocation5 + $0x960] sm:$0xff] }
  0xae   :  { %v586_v29 = vld [vmem:[#allocation5 + $0xd40] sm:$0xff]  ;;  %v10546_v34 = vcombine.high %v458_v26, %v462_v27  ;;  %6431 = vmatprep.subr.bf16.mxu1 %v10682_v25  ;;  %v10545_v40 = vcombine.low %v458_v26, %v462_v27 }
  0xaf   :  { %v590_v30 = vld [vmem:[#allocation5 + $0xd60] sm:$0xff]  ;;  %6391 = vmatpush1.bf16.msra.mxu0 %v10553_v32  ;;  %6432 = vmatpush1.bf16.msra.mxu1 %v10681_v33 }
  0xb0   :  { %v450_v35 = vld [vmem:[#allocation5 + $0x900] sm:$0xff]  ;;  %v10674_v37 = vcombine.high %v586_v29, %v590_v30  ;;  %6392 = vmatprep.subr.bf16.mxu0 %v10546_v34  ;;  %v10673_v41 = vcombine.low %v586_v29, %v590_v30 }
  0xb1   :  { %v454_v36 = vld [vmem:[#allocation5 + $0x920] sm:$0xff] }
  0xb2   :  { %v578_v38 = vld [vmem:[#allocation5 + $0xd00] sm:$0xff]  ;;  %v10538_v42 = vcombine.high %v450_v35, %v454_v36  ;;  %6433 = vmatprep.subr.bf16.mxu1 %v10674_v37  ;;  %v10537_v48 = vcombine.low %v450_v35, %v454_v36 }
  0xb3   :  { %v582_v39 = vld [vmem:[#allocation5 + $0xd20] sm:$0xff]  ;;  %6393 = vmatpush1.bf16.msra.mxu0 %v10545_v40  ;;  %6434 = vmatpush1.bf16.msra.mxu1 %v10673_v41 }
  0xb4   :  { %v442_v43 = vld [vmem:[#allocation5 + $0x8c0] sm:$0xff]  ;;  %v10666_v46 = vcombine.high %v578_v38, %v582_v39  ;;  %6394 = vmatprep.subr.bf16.mxu0 %v10538_v42  ;;  %v10665_v49 = vcombine.low %v578_v38, %v582_v39 }
  0xb5   :  { %v446_v44 = vld [vmem:[#allocation5 + $0x8e0] sm:$0xff] }
  0xb6   :  { %v570_v45 = vld [vmem:[#allocation5 + $0xcc0] sm:$0xff]  ;;  %v10530_v50 = vcombine.high %v442_v43, %v446_v44  ;;  %6435 = vmatprep.subr.bf16.mxu1 %v10666_v46  ;;  %v10529_v56 = vcombine.low %v442_v43, %v446_v44 }
  0xb7   :  { %v574_v47 = vld [vmem:[#allocation5 + $0xce0] sm:$0xff]  ;;  %6395 = vmatpush1.bf16.msra.mxu0 %v10537_v48  ;;  %6436 = vmatpush1.bf16.msra.mxu1 %v10665_v49 }
  0xb8   :  { %v434_v51 = vld [vmem:[#allocation5 + $0x880] sm:$0xff]  ;;  %v10658_v54 = vcombine.high %v570_v45, %v574_v47  ;;  %6396 = vmatprep.subr.bf16.mxu0 %v10530_v50  ;;  %v10657_v57 = vcombine.low %v570_v45, %v574_v47 }
  0xb9   :  { %v438_v52 = vld [vmem:[#allocation5 + $0x8a0] sm:$0xff] }
  0xba   :  { %v562_v53 = vld [vmem:[#allocation5 + $0xc80] sm:$0xff]  ;;  %v10522_v60 = vcombine.high %v434_v51, %v438_v52  ;;  %6437 = vmatprep.subr.bf16.mxu1 %v10658_v54  ;;  %v10521_v2 = vcombine.low %v434_v51, %v438_v52 }
  0xbb   :  { %v566_v55 = vld [vmem:[#allocation5 + $0xca0] sm:$0xff]  ;;  %6397 = vmatpush1.bf16.msra.mxu0 %v10529_v56  ;;  %6438 = vmatpush1.bf16.msra.mxu1 %v10657_v57 }
  0xbc   :  { %v426_v61 = vld [vmem:[#allocation5 + $0x840] sm:$0xff]  ;;  %v10650_v0 = vcombine.high %v562_v53, %v566_v55  ;;  %6398 = vmatprep.subr.bf16.mxu0 %v10522_v60  ;;  %v10649_v3 = vcombine.low %v562_v53, %v566_v55 }
  0xbd   :  { %v430_v62 = vld [vmem:[#allocation5 + $0x860] sm:$0xff] }
  0xbe   :  { %v554_v63 = vld [vmem:[#allocation5 + $0xc40] sm:$0xff]  ;;  %v10514_v4 = vcombine.high %v426_v61, %v430_v62  ;;  %6439 = vmatprep.subr.bf16.mxu1 %v10650_v0  ;;  %v10513_v10 = vcombine.low %v426_v61, %v430_v62 }
  0xbf   :  { %v558_v1 = vld [vmem:[#allocation5 + $0xc60] sm:$0xff]  ;;  %6399 = vmatpush1.bf16.msra.mxu0 %v10521_v2  ;;  %6440 = vmatpush1.bf16.msra.mxu1 %v10649_v3 }
  0xc0   :  { %v418_v5 = vld [vmem:[#allocation5 + $0x800] sm:$0xff]  ;;  %v10642_v8 = vcombine.high %v554_v63, %v558_v1  ;;  %6400 = vmatprep.subr.bf16.mxu0 %v10514_v4  ;;  %v10641_v11 = vcombine.low %v554_v63, %v558_v1 }
  0xc1   :  { %v422_v6 = vld [vmem:[#allocation5 + $0x820] sm:$0xff] }
  0xc2   :  { %v546_v7 = vld [vmem:[#allocation5 + $0xc00] sm:$0xff]  ;;  %v10506_v12 = vcombine.high %v418_v5, %v422_v6  ;;  %6441 = vmatprep.subr.bf16.mxu1 %v10642_v8  ;;  %v10505_v19 = vcombine.low %v418_v5, %v422_v6 }
  0xc3   :  { %v550_v9 = vld [vmem:[#allocation5 + $0xc20] sm:$0xff]  ;;  %6401 = vmatpush1.bf16.msra.mxu0 %v10513_v10  ;;  %6442 = vmatpush1.bf16.msra.mxu1 %v10641_v11 }
  0xc4   :  { %v538_v13 = vld [vmem:[#allocation5 + $0xbc0] sm:$0xff]  ;;  %v10634_v17 = vcombine.high %v546_v7, %v550_v9  ;;  %6402 = vmatprep.subr.bf16.mxu0 %v10506_v12  ;;  %v10633_v21 = vcombine.low %v546_v7, %v550_v9 }
  0xc5   :  { %v542_v14 = vld [vmem:[#allocation5 + $0xbe0] sm:$0xff] }
  0xc6   :  { %v666_v15 = vld [vmem:[#allocation5 + $0xfc0] sm:$0xff]  ;;  %v10626_v22 = vcombine.high %v538_v13, %v542_v14  ;;  %6443 = vmatprep.subr.bf16.mxu1 %v10634_v17  ;;  %v10625_v29 = vcombine.low %v538_v13, %v542_v14 }
  0xc7   :  { %v670_v18 = vld [vmem:[#allocation5 + $0xfe0] sm:$0xff]  ;;  %6403 = vmatpush1.bf16.msra.mxu0 %v10505_v19  ;;  %6444 = vmatpush1.bf16.msra.mxu1 %v10633_v21 }
  0xc8   :  { %v530_v23 = vld [vmem:[#allocation5 + $0xb80] sm:$0xff]  ;;  %v10754_v26 = vcombine.high %v666_v15, %v670_v18  ;;  %6404 = vmatprep.subr.bf16.mxu0 %v10626_v22  ;;  %v10753_v30 = vcombine.low %v666_v15, %v670_v18 }
  0xc9   :  { %v534_v24 = vld [vmem:[#allocation5 + $0xba0] sm:$0xff] }
  0xca   :  { %v658_v25 = vld [vmem:[#allocation5 + $0xf80] sm:$0xff]  ;;  %v10618_v32 = vcombine.high %v530_v23, %v534_v24  ;;  %6445 = vmatprep.subr.bf16.mxu1 %v10754_v26  ;;  %v10617_v38 = vcombine.low %v530_v23, %v534_v24 }
  0xcb   :  { %v662_v27 = vld [vmem:[#allocation5 + $0xfa0] sm:$0xff]  ;;  %6405 = vmatpush2.bf16.msra.mxu0 %v10625_v29  ;;  %6446 = vmatpush2.bf16.msra.mxu1 %v10753_v30 }
  0xcc   :  { %v522_v33 = vld [vmem:[#allocation5 + $0xb40] sm:$0xff]  ;;  %v10746_v36 = vcombine.high %v658_v25, %v662_v27  ;;  %6406 = vmatprep.subr.bf16.mxu0 %v10618_v32  ;;  %v10745_v39 = vcombine.low %v658_v25, %v662_v27  ;;  %v136_v27 = vld [vmem:[#allocation2 + $0x30] sm:$0xff] }
  0xcd   :  { %v526_v34 = vld [vmem:[#allocation5 + $0xb60] sm:$0xff] }
  0xce   :  { %v650_v35 = vld [vmem:[#allocation5 + $0xf40] sm:$0xff]  ;;  %v10610_v40 = vcombine.high %v522_v33, %v526_v34  ;;  %6447 = vmatprep.subr.bf16.mxu1 %v10746_v36  ;;  %v10609_v46 = vcombine.low %v522_v33, %v526_v34 }
  0xcf   :  { %v654_v37 = vld [vmem:[#allocation5 + $0xf60] sm:$0xff]  ;;  %6407 = vmatpush2.bf16.msra.mxu0 %v10617_v38  ;;  %6448 = vmatpush2.bf16.msra.mxu1 %v10745_v39  ;;  %v139_v38 = vld [vmem:[#allocation2 + $0x48] sm:$0xff] }
  0xd0   :  { %v514_v41 = vld [vmem:[#allocation5 + $0xb00] sm:$0xff]  ;;  %v10738_v44 = vcombine.high %v650_v35, %v654_v37  ;;  %6408 = vmatprep.subr.bf16.mxu0 %v10610_v40  ;;  %v10737_v47 = vcombine.low %v650_v35, %v654_v37  ;;  %v12360_v40 = vpack.c.bf16 %v136_v27, %v136_v27 }
  0xd1   :  { %v518_v42 = vld [vmem:[#allocation5 + $0xb20] sm:$0xff] }
  0xd2   :  { %v642_v43 = vld [vmem:[#allocation5 + $0xf00] sm:$0xff]  ;;  %v10602_v48 = vcombine.high %v514_v41, %v518_v42  ;;  %6449 = vmatprep.subr.bf16.mxu1 %v10738_v44  ;;  %v10601_v54 = vcombine.low %v514_v41, %v518_v42  ;;  %v141_v42 = vld [vmem:[#allocation2 + $0x58] sm:$0xff] }
  0xd3   :  { %v646_v45 = vld [vmem:[#allocation5 + $0xf20] sm:$0xff]  ;;  %6409 = vmatpush2.bf16.msra.mxu0 %v10609_v46  ;;  %6450 = vmatpush2.bf16.msra.mxu1 %v10737_v47 }
  0xd4   :  { %v506_v49 = vld [vmem:[#allocation5 + $0xac0] sm:$0xff]  ;;  %v10730_v52 = vcombine.high %v642_v43, %v646_v45  ;;  %6410 = vmatprep.subr.bf16.mxu0 %v10602_v48  ;;  %v10729_v55 = vcombine.low %v642_v43, %v646_v45 }
  0xd5   :  { %v510_v50 = vld [vmem:[#allocation5 + $0xae0] sm:$0xff] }
  0xd6   :  { %v634_v51 = vld [vmem:[#allocation5 + $0xec0] sm:$0xff]  ;;  %v10594_v56 = vcombine.high %v506_v49, %v510_v50  ;;  %6451 = vmatprep.subr.bf16.mxu1 %v10730_v52  ;;  %v10593_v0 = vcombine.low %v506_v49, %v510_v50  ;;  %v12362_v50 = vpack.c.bf16 %v139_v38, %v139_v38 }
  0xd7   :  { %v638_v53 = vld [vmem:[#allocation5 + $0xee0] sm:$0xff]  ;;  %6411 = vmatpush2.bf16.msra.mxu0 %v10601_v54  ;;  %6452 = vmatpush2.bf16.msra.mxu1 %v10729_v55 }
  0xd8   :  { %v498_v57 = vld [vmem:[#allocation5 + $0xa80] sm:$0xff]  ;;  %v10722_v62 = vcombine.high %v634_v51, %v638_v53  ;;  %6412 = vmatprep.subr.bf16.mxu0 %v10594_v56  ;;  %v10721_v1 = vcombine.low %v634_v51, %v638_v53  ;;  %v12365_v51 = vpack.c.bf16 %v141_v42, %v141_v42 }
  0xd9   :  { %v502_v60 = vld [vmem:[#allocation5 + $0xaa0] sm:$0xff] }
  0xda   :  { %v626_v61 = vld [vmem:[#allocation5 + $0xe80] sm:$0xff]  ;;  %v10586_v2 = vcombine.high %v498_v57, %v502_v60  ;;  %6453 = vmatprep.subr.bf16.mxu1 %v10722_v62  ;;  %v10585_v8 = vcombine.low %v498_v57, %v502_v60 }
  0xdb   :  { %v630_v63 = vld [vmem:[#allocation5 + $0xea0] sm:$0xff]  ;;  %6413 = vmatpush2.bf16.msra.mxu0 %v10593_v0  ;;  %6454 = vmatpush2.bf16.msra.mxu1 %v10721_v1 }
  0xdc   :  { %v490_v3 = vld [vmem:[#allocation5 + $0xa40] sm:$0xff]  ;;  %v10714_v6 = vcombine.high %v626_v61, %v630_v63  ;;  %6414 = vmatprep.subr.bf16.mxu0 %v10586_v2  ;;  %v10713_v9 = vcombine.low %v626_v61, %v630_v63 }
  0xdd   :  { %v494_v4 = vld [vmem:[#allocation5 + $0xa60] sm:$0xff] }
  0xde   :  { %v618_v5 = vld [vmem:[#allocation5 + $0xe40] sm:$0xff]  ;;  %v10578_v10 = vcombine.high %v490_v3, %v494_v4  ;;  %6455 = vmatprep.subr.bf16.mxu1 %v10714_v6  ;;  %v10577_v17 = vcombine.low %v490_v3, %v494_v4 }
  0xdf   :  { %v622_v7 = vld [vmem:[#allocation5 + $0xe60] sm:$0xff]  ;;  %6415 = vmatpush2.bf16.msra.mxu0 %v10585_v8  ;;  %6456 = vmatpush2.bf16.msra.mxu1 %v10713_v9 }
  0xe0   :  { %v482_v11 = vld [vmem:[#allocation5 + $0xa00] sm:$0xff]  ;;  %v10706_v14 = vcombine.high %v618_v5, %v622_v7  ;;  %6416 = vmatprep.subr.bf16.mxu0 %v10578_v10  ;;  %v10705_v18 = vcombine.low %v618_v5, %v622_v7 }
  0xe1   :  { %v486_v12 = vld [vmem:[#allocation5 + $0xa20] sm:$0xff] }
  0xe2   :  { %v610_v13 = vld [vmem:[#allocation5 + $0xe00] sm:$0xff]  ;;  %v10570_v19 = vcombine.high %v482_v11, %v486_v12  ;;  %6457 = vmatprep.subr.bf16.mxu1 %v10706_v14  ;;  %v10569_v29 = vcombine.low %v482_v11, %v486_v12 }
  0xe3   :  { %v614_v15 = vld [vmem:[#allocation5 + $0xe20] sm:$0xff]  ;;  %6417 = vmatpush2.bf16.msra.mxu0 %v10577_v17  ;;  %6458 = vmatpush2.bf16.msra.mxu1 %v10705_v18 }
  0xe4   :  { %v730_v21 = vld [vmem:[#allocation5 + $0x11c0] sm:$0xff]  ;;  %v10698_v24 = vcombine.high %v610_v13, %v614_v15  ;;  %6418 = vmatprep.subr.bf16.mxu0 %v10570_v19  ;;  %v10697_v32 = vcombine.low %v610_v13, %v614_v15 }
  0xe5   :  { %v734_v22 = vld [vmem:[#allocation5 + $0x11e0] sm:$0xff] }
  0xe6   :  { %v858_v23 = vld [vmem:[#allocation5 + $0x15c0] sm:$0xff]  ;;  %v10818_v33 = vcombine.high %v730_v21, %v734_v22  ;;  %6459 = vmatprep.subr.bf16.mxu1 %v10698_v24  ;;  %v10817_v41 = vcombine.low %v730_v21, %v734_v22 }
  0xe7   :  { %v134_v25 = vld [vmem:[#allocation2 + $0x20] sm:$0xff]  ;;  %6419 = vmatpush2.bf16.msra.mxu0 %v10569_v29  ;;  %6460 = vmatpush2.bf16.msra.mxu1 %v10697_v32 }
  0xe8   :  { %v862_v26 = vld [vmem:[#allocation5 + $0x15e0] sm:$0xff]  ;;  %v12358_v39 = vpack.c.bf16 %v134_v25, %v134_v25  ;;  %6470 = vmatprep.subr.bf16.mxu0 %v10818_v33 }
  0xe9   :  { %v722_v30 = vld [vmem:[#allocation5 + $0x1180] sm:$0xff]  ;;  %v10946_v37 = vcombine.high %v858_v23, %v862_v26  ;;  %v10945_v43 = vcombine.low %v858_v23, %v862_v26 }
  0xea   :  { %v726_v34 = vld [vmem:[#allocation5 + $0x11a0] sm:$0xff]  ;;  %6421 = vmatmul.mubr.bf16.vlgmr.msra.gmra.mxu0 %v12358_v39  ;;  %6462 = vmatmul.mubr.bf16.vlgmr.msra.gmra.mxu1 %v12360_v40 }
  0xeb   :  { %v850_v35 = vld [vmem:[#allocation5 + $0x1580] sm:$0xff]  ;;  %v10810_v44 = vcombine.high %v722_v30, %v726_v34  ;;  %6511 = vmatprep.subr.bf16.mxu1 %v10946_v37  ;;  %6471 = vmatpush1.bf16.msra.mxu0 %v10817_v41  ;;  %v10809_v52 = vcombine.low %v722_v30, %v726_v34 }
  0xec   :  { %v854_v36 = vld [vmem:[#allocation5 + $0x15a0] sm:$0xff]  ;;  %6512 = vmatpush1.bf16.msra.mxu1 %v10945_v43  ;;  %6502 = vmatprep.mubr.bf16.mxu0 %v12362_v50 }
  0xed   :  { %v714_v45 = vld [vmem:[#allocation5 + $0x1140] sm:$0xff]  ;;  %v10938_v46 = vcombine.high %v850_v35, %v854_v36  ;;  %6472 = vmatprep.subr.bf16.mxu0 %v10810_v44  ;;  %v10937_v53 = vcombine.low %v850_v35, %v854_v36  ;;  %6543 = vmatprep.mubr.bf16.mxu1 %v12365_v51 }
  0xee   :  { %v718_v47 = vld [vmem:[#allocation5 + $0x1160] sm:$0xff] }
  0xef   :  { %v842_v48 = vld [vmem:[#allocation5 + $0x1540] sm:$0xff]  ;;  %v10802_v54 = vcombine.high %v714_v45, %v718_v47  ;;  %6513 = vmatprep.subr.bf16.mxu1 %v10938_v46  ;;  %6473 = vmatpush1.bf16.msra.mxu0 %v10809_v52  ;;  %v10801_v62 = vcombine.low %v714_v45, %v718_v47 }
  0xf0   :  { %v846_v49 = vld [vmem:[#allocation5 + $0x1560] sm:$0xff]  ;;  %6514 = vmatpush1.bf16.msra.mxu1 %v10937_v53 }
  0xf1   :  { %v706_v55 = vld [vmem:[#allocation5 + $0x1100] sm:$0xff]  ;;  %v10930_v60 = vcombine.high %v842_v48, %v846_v49  ;;  %6474 = vmatprep.subr.bf16.mxu0 %v10802_v54  ;;  %v10929_v63 = vcombine.low %v842_v48, %v846_v49 }
  0xf2   :  { %v710_v56 = vld [vmem:[#allocation5 + $0x1120] sm:$0xff] }
  0xf3   :  { %v834_v57 = vld [vmem:[#allocation5 + $0x1500] sm:$0xff]  ;;  %v10794_v0 = vcombine.high %v706_v55, %v710_v56  ;;  %6515 = vmatprep.subr.bf16.mxu1 %v10930_v60  ;;  %6475 = vmatpush1.bf16.msra.mxu0 %v10801_v62  ;;  %v10793_v6 = vcombine.low %v706_v55, %v710_v56 }
  0xf4   :  { %v838_v61 = vld [vmem:[#allocation5 + $0x1520] sm:$0xff]  ;;  %6516 = vmatpush1.bf16.msra.mxu1 %v10929_v63 }
  0xf5   :  { %v698_v1 = vld [vmem:[#allocation5 + $0x10c0] sm:$0xff]  ;;  %v10922_v4 = vcombine.high %v834_v57, %v838_v61  ;;  %6476 = vmatprep.subr.bf16.mxu0 %v10794_v0  ;;  %v10921_v7 = vcombine.low %v834_v57, %v838_v61 }
  0xf6   :  { %v702_v2 = vld [vmem:[#allocation5 + $0x10e0] sm:$0xff] }
  0xf7   :  { %v826_v3 = vld [vmem:[#allocation5 + $0x14c0] sm:$0xff]  ;;  %v10786_v8 = vcombine.high %v698_v1, %v702_v2  ;;  %6517 = vmatprep.subr.bf16.mxu1 %v10922_v4  ;;  %6477 = vmatpush1.bf16.msra.mxu0 %v10793_v6  ;;  %v10785_v14 = vcombine.low %v698_v1, %v702_v2 }
  0xf8   :  { %v830_v5 = vld [vmem:[#allocation5 + $0x14e0] sm:$0xff]  ;;  %6518 = vmatpush1.bf16.msra.mxu1 %v10921_v7 }
  0xf9   :  { %v690_v9 = vld [vmem:[#allocation5 + $0x1080] sm:$0xff]  ;;  %v10914_v12 = vcombine.high %v826_v3, %v830_v5  ;;  %6478 = vmatprep.subr.bf16.mxu0 %v10786_v8  ;;  %v10913_v15 = vcombine.low %v826_v3, %v830_v5 }
  0xfa   :  { %v694_v10 = vld [vmem:[#allocation5 + $0x10a0] sm:$0xff] }
  0xfb   :  { %v818_v11 = vld [vmem:[#allocation5 + $0x1480] sm:$0xff]  ;;  %v10778_v17 = vcombine.high %v690_v9, %v694_v10  ;;  %6519 = vmatprep.subr.bf16.mxu1 %v10914_v12  ;;  %6479 = vmatpush1.bf16.msra.mxu0 %v10785_v14  ;;  %v10777_v24 = vcombine.low %v690_v9, %v694_v10 }
  0xfc   :  { %v822_v13 = vld [vmem:[#allocation5 + $0x14a0] sm:$0xff]  ;;  %6520 = vmatpush1.bf16.msra.mxu1 %v10913_v15 }
  0xfd   :  { %v682_v18 = vld [vmem:[#allocation5 + $0x1040] sm:$0xff]  ;;  %v10906_v22 = vcombine.high %v818_v11, %v822_v13  ;;  %6480 = vmatprep.subr.bf16.mxu0 %v10778_v17  ;;  %v10905_v25 = vcombine.low %v818_v11, %v822_v13 }
  0xfe   :  { %v686_v19 = vld [vmem:[#allocation5 + $0x1060] sm:$0xff] }
  0xff   :  { %v810_v21 = vld [vmem:[#allocation5 + $0x1440] sm:$0xff]  ;;  %v10770_v26 = vcombine.high %v682_v18, %v686_v19  ;;  %6521 = vmatprep.subr.bf16.mxu1 %v10906_v22  ;;  %6481 = vmatpush1.bf16.msra.mxu0 %v10777_v24  ;;  %v10769_v34 = vcombine.low %v682_v18, %v686_v19 }
 0x100   :  { %v814_v23 = vld [vmem:[#allocation5 + $0x1460] sm:$0xff]  ;;  %6522 = vmatpush1.bf16.msra.mxu1 %v10905_v25 }
 0x101   :  { %v674_v27 = vld [vmem:[#allocation5 + $0x1000] sm:$0xff]  ;;  %v10898_v32 = vcombine.high %v810_v21, %v814_v23  ;;  %6482 = vmatprep.subr.bf16.mxu0 %v10770_v26  ;;  %v10897_v35 = vcombine.low %v810_v21, %v814_v23 }
 0x102   :  { %v678_v29 = vld [vmem:[#allocation5 + $0x1020] sm:$0xff] }
 0x103   :  { %v802_v30 = vld [vmem:[#allocation5 + $0x1400] sm:$0xff]  ;;  %v10762_v36 = vcombine.high %v674_v27, %v678_v29  ;;  %6523 = vmatprep.subr.bf16.mxu1 %v10898_v32  ;;  %6483 = vmatpush1.bf16.msra.mxu0 %v10769_v34  ;;  %v10761_v44 = vcombine.low %v674_v27, %v678_v29 }
 0x104   :  { %v806_v33 = vld [vmem:[#allocation5 + $0x1420] sm:$0xff]  ;;  %6524 = vmatpush1.bf16.msra.mxu1 %v10897_v35 }
 0x105   :  { %v794_v37 = vld [vmem:[#allocation5 + $0x13c0] sm:$0xff]  ;;  %v10890_v42 = vcombine.high %v802_v30, %v806_v33  ;;  %6484 = vmatprep.subr.bf16.mxu0 %v10762_v36  ;;  %v10889_v45 = vcombine.low %v802_v30, %v806_v33 }
 0x106   :  { %v798_v38 = vld [vmem:[#allocation5 + $0x13e0] sm:$0xff] }
 0x107   :  { %v922_v41 = vld [vmem:[#allocation5 + $0x17c0] sm:$0xff]  ;;  %v10882_v46 = vcombine.high %v794_v37, %v798_v38  ;;  %6525 = vmatprep.subr.bf16.mxu1 %v10890_v42  ;;  %6485 = vmatpush1.bf16.msra.mxu0 %v10761_v44  ;;  %v10881_v54 = vcombine.low %v794_v37, %v798_v38 }
 0x108   :  { %v926_v43 = vld [vmem:[#allocation5 + $0x17e0] sm:$0xff]  ;;  %6526 = vmatpush1.bf16.msra.mxu1 %v10889_v45 }
 0x109   :  { %v786_v47 = vld [vmem:[#allocation5 + $0x1380] sm:$0xff]  ;;  %v11010_v52 = vcombine.high %v922_v41, %v926_v43  ;;  %6486 = vmatprep.subr.bf16.mxu0 %v10882_v46  ;;  %v11009_v55 = vcombine.low %v922_v41, %v926_v43 }
 0x10a   :  { %v790_v48 = vld [vmem:[#allocation5 + $0x13a0] sm:$0xff] }
 0x10b   :  { %v914_v49 = vld [vmem:[#allocation5 + $0x1780] sm:$0xff]  ;;  %v10874_v56 = vcombine.high %v786_v47, %v790_v48  ;;  %6527 = vmatprep.subr.bf16.mxu1 %v11010_v52  ;;  %6487 = vmatpush2.bf16.msra.mxu0 %v10881_v54  ;;  %v10873_v0 = vcombine.low %v786_v47, %v790_v48 }
 0x10c   :  { %v918_v53 = vld [vmem:[#allocation5 + $0x17a0] sm:$0xff]  ;;  %6528 = vmatpush2.bf16.msra.mxu1 %v11009_v55 }
 0x10d   :  { %v778_v57 = vld [vmem:[#allocation5 + $0x1340] sm:$0xff]  ;;  %v11002_v62 = vcombine.high %v914_v49, %v918_v53  ;;  %6488 = vmatprep.subr.bf16.mxu0 %v10874_v56  ;;  %v11001_v1 = vcombine.low %v914_v49, %v918_v53 }
 0x10e   :  { %v782_v60 = vld [vmem:[#allocation5 + $0x1360] sm:$0xff] }
 0x10f   :  { %v906_v61 = vld [vmem:[#allocation5 + $0x1740] sm:$0xff]  ;;  %v10866_v2 = vcombine.high %v778_v57, %v782_v60  ;;  %6529 = vmatprep.subr.bf16.mxu1 %v11002_v62  ;;  %6489 = vmatpush2.bf16.msra.mxu0 %v10873_v0  ;;  %v10865_v8 = vcombine.low %v778_v57, %v782_v60  ;;  %v140_v57 = vld [vmem:[#allocation2 + $0x50] sm:$0xff] }
 0x110   :  { %v910_v63 = vld [vmem:[#allocation5 + $0x1760] sm:$0xff]  ;;  %6530 = vmatpush2.bf16.msra.mxu1 %v11001_v1 }
 0x111   :  { %v770_v3 = vld [vmem:[#allocation5 + $0x1300] sm:$0xff]  ;;  %v10994_v6 = vcombine.high %v906_v61, %v910_v63  ;;  %6490 = vmatprep.subr.bf16.mxu0 %v10866_v2  ;;  %v10993_v9 = vcombine.low %v906_v61, %v910_v63 }
 0x112   :  { %v774_v4 = vld [vmem:[#allocation5 + $0x1320] sm:$0xff] }
 0x113   :  { %v898_v5 = vld [vmem:[#allocation5 + $0x1700] sm:$0xff]  ;;  %v10858_v10 = vcombine.high %v770_v3, %v774_v4  ;;  %6531 = vmatprep.subr.bf16.mxu1 %v10994_v6  ;;  %6491 = vmatpush2.bf16.msra.mxu0 %v10865_v8  ;;  %v10857_v17 = vcombine.low %v770_v3, %v774_v4  ;;  %v143_v3 = vld [vmem:[#allocation2 + $0x68] sm:$0xff] }
 0x114   :  { %v902_v7 = vld [vmem:[#allocation5 + $0x1720] sm:$0xff]  ;;  %6532 = vmatpush2.bf16.msra.mxu1 %v10993_v9 }
 0x115   :  { %v762_v11 = vld [vmem:[#allocation5 + $0x12c0] sm:$0xff]  ;;  %v10986_v14 = vcombine.high %v898_v5, %v902_v7  ;;  %6492 = vmatprep.subr.bf16.mxu0 %v10858_v10  ;;  %v10985_v18 = vcombine.low %v898_v5, %v902_v7  ;;  %v145_v5 = vld [vmem:[#allocation2 + $0x78] sm:$0xff]  ;;  %v12372_v7 = vpack.c.bf16 %v140_v57, %v140_v57 }
 0x116   :  { %v766_v12 = vld [vmem:[#allocation5 + $0x12e0] sm:$0xff] }
 0x117   :  { %v890_v13 = vld [vmem:[#allocation5 + $0x16c0] sm:$0xff]  ;;  %v10850_v19 = vcombine.high %v762_v11, %v766_v12  ;;  %6533 = vmatprep.subr.bf16.mxu1 %v10986_v14  ;;  %6493 = vmatpush2.bf16.msra.mxu0 %v10857_v17  ;;  %v10849_v26 = vcombine.low %v762_v11, %v766_v12  ;;  %v12374_v17 = vpack.c.bf16 %v143_v3, %v143_v3 }
 0x118   :  { %v894_v15 = vld [vmem:[#allocation5 + $0x16e0] sm:$0xff]  ;;  %6534 = vmatpush2.bf16.msra.mxu1 %v10985_v18  ;;  %v12377_v18 = vpack.c.bf16 %v145_v5, %v145_v5 }
 0x119   :  { %v754_v21 = vld [vmem:[#allocation5 + $0x1280] sm:$0xff]  ;;  %v10978_v24 = vcombine.high %v890_v13, %v894_v15  ;;  %6494 = vmatprep.subr.bf16.mxu0 %v10850_v19  ;;  %v10977_v27 = vcombine.low %v890_v13, %v894_v15 }
 0x11a   :  { %v758_v22 = vld [vmem:[#allocation5 + $0x12a0] sm:$0xff] }
 0x11b   :  { %v882_v23 = vld [vmem:[#allocation5 + $0x1680] sm:$0xff]  ;;  %v10842_v29 = vcombine.high %v754_v21, %v758_v22  ;;  %6535 = vmatprep.subr.bf16.mxu1 %v10978_v24  ;;  %6495 = vmatpush2.bf16.msra.mxu0 %v10849_v26  ;;  %v10841_v36 = vcombine.low %v754_v21, %v758_v22 }
 0x11c   :  { %v886_v25 = vld [vmem:[#allocation5 + $0x16a0] sm:$0xff]  ;;  %6536 = vmatpush2.bf16.msra.mxu1 %v10977_v27 }
 0x11d   :  { %v746_v30 = vld [vmem:[#allocation5 + $0x1240] sm:$0xff]  ;;  %v10970_v34 = vcombine.high %v882_v23, %v886_v25  ;;  %6496 = vmatprep.subr.bf16.mxu0 %v10842_v29  ;;  %v10969_v37 = vcombine.low %v882_v23, %v886_v25 }
 0x11e   :  { %v750_v32 = vld [vmem:[#allocation5 + $0x1260] sm:$0xff] }
 0x11f   :  { %v874_v33 = vld [vmem:[#allocation5 + $0x1640] sm:$0xff]  ;;  %v10834_v38 = vcombine.high %v746_v30, %v750_v32  ;;  %6537 = vmatprep.subr.bf16.mxu1 %v10970_v34  ;;  %6497 = vmatpush2.bf16.msra.mxu0 %v10841_v36  ;;  %v10833_v46 = vcombine.low %v746_v30, %v750_v32 }
 0x120   :  { %v878_v35 = vld [vmem:[#allocation5 + $0x1660] sm:$0xff]  ;;  %6538 = vmatpush2.bf16.msra.mxu1 %v10969_v37 }
 0x121   :  { %v738_v41 = vld [vmem:[#allocation5 + $0x1200] sm:$0xff]  ;;  %v10962_v44 = vcombine.high %v874_v33, %v878_v35  ;;  %6498 = vmatprep.subr.bf16.mxu0 %v10834_v38  ;;  %v10961_v47 = vcombine.low %v874_v33, %v878_v35 }
 0x122   :  { %v742_v42 = vld [vmem:[#allocation5 + $0x1220] sm:$0xff] }
 0x123   :  { %v866_v43 = vld [vmem:[#allocation5 + $0x1600] sm:$0xff]  ;;  %v10826_v48 = vcombine.high %v738_v41, %v742_v42  ;;  %6539 = vmatprep.subr.bf16.mxu1 %v10962_v44  ;;  %6499 = vmatpush2.bf16.msra.mxu0 %v10833_v46  ;;  %v10825_v60 = vcombine.low %v738_v41, %v742_v42 }
 0x124   :  { %v870_v45 = vld [vmem:[#allocation5 + $0x1620] sm:$0xff]  ;;  %6540 = vmatpush2.bf16.msra.mxu1 %v10961_v47 }
 0x125   :  { %v986_v49 = vld [vmem:[#allocation5 + $0x19c0] sm:$0xff]  ;;  %v10954_v54 = vcombine.high %v866_v43, %v870_v45  ;;  %6500 = vmatprep.subr.bf16.mxu0 %v10826_v48  ;;  %v10953_v63 = vcombine.low %v866_v43, %v870_v45 }
 0x126   :  { %v990_v52 = vld [vmem:[#allocation5 + $0x19e0] sm:$0xff] }
 0x127   :  { %v1114_v53 = vld [vmem:[#allocation5 + $0x1dc0] sm:$0xff]  ;;  %v11074_v0 = vcombine.high %v986_v49, %v990_v52  ;;  %6541 = vmatprep.subr.bf16.mxu1 %v10954_v54  ;;  %6501 = vmatpush2.bf16.msra.mxu0 %v10825_v60  ;;  %v11073_v8 = vcombine.low %v986_v49, %v990_v52 }
 0x128   :  { %v138_v55 = vld [vmem:[#allocation2 + $0x40] sm:$0xff]  ;;  %6542 = vmatpush2.bf16.msra.mxu1 %v10953_v63 }
 0x129   :  { %v1118_v56 = vld [vmem:[#allocation5 + $0x1de0] sm:$0xff]  ;;  %v12370_v6 = vpack.c.bf16 %v138_v55, %v138_v55  ;;  %6552 = vmatprep.subr.bf16.mxu0 %v11074_v0 }
 0x12a   :  { %v978_v61 = vld [vmem:[#allocation5 + $0x1980] sm:$0xff]  ;;  %v11202_v4 = vcombine.high %v1114_v53, %v1118_v56  ;;  %v11201_v9 = vcombine.low %v1114_v53, %v1118_v56 }
 0x12b   :  { %v982_v62 = vld [vmem:[#allocation5 + $0x19a0] sm:$0xff]  ;;  %6503 = vmatmul.mubr.bf16.vlgmr.msra.gmra.mxu0 %v12370_v6  ;;  %6544 = vmatmul.mubr.bf16.vlgmr.msra.gmra.mxu1 %v12372_v7 }
 0x12c   :  { %v1106_v1 = vld [vmem:[#allocation5 + $0x1d80] sm:$0xff]  ;;  %v11066_v10 = vcombine.high %v978_v61, %v982_v62  ;;  %6593 = vmatprep.subr.bf16.mxu1 %v11202_v4  ;;  %6553 = vmatpush1.bf16.msra.mxu0 %v11073_v8  ;;  %v11065_v19 = vcombine.low %v978_v61, %v982_v62 }
 0x12d   :  { %v1110_v2 = vld [vmem:[#allocation5 + $0x1da0] sm:$0xff]  ;;  %6594 = vmatpush1.bf16.msra.mxu1 %v11201_v9  ;;  %6584 = vmatprep.mubr.bf16.mxu0 %v12374_v17 }
 0x12e   :  { %v970_v11 = vld [vmem:[#allocation5 + $0x1940] sm:$0xff]  ;;  %v11194_v14 = vcombine.high %v1106_v1, %v1110_v2  ;;  %6554 = vmatprep.subr.bf16.mxu0 %v11066_v10  ;;  %v11193_v21 = vcombine.low %v1106_v1, %v1110_v2  ;;  %6625 = vmatprep.mubr.bf16.mxu1 %v12377_v18 }
 0x12f   :  { %v974_v12 = vld [vmem:[#allocation5 + $0x1960] sm:$0xff] }
 0x130   :  { %v1098_v13 = vld [vmem:[#allocation5 + $0x1d40] sm:$0xff]  ;;  %v11058_v22 = vcombine.high %v970_v11, %v974_v12  ;;  %6595 = vmatprep.subr.bf16.mxu1 %v11194_v14  ;;  %6555 = vmatpush1.bf16.msra.mxu0 %v11065_v19  ;;  %v11057_v29 = vcombine.low %v970_v11, %v974_v12 }
 0x131   :  { %v1102_v15 = vld [vmem:[#allocation5 + $0x1d60] sm:$0xff]  ;;  %6596 = vmatpush1.bf16.msra.mxu1 %v11193_v21 }
 0x132   :  { %v962_v23 = vld [vmem:[#allocation5 + $0x1900] sm:$0xff]  ;;  %v11186_v26 = vcombine.high %v1098_v13, %v1102_v15  ;;  %6556 = vmatprep.subr.bf16.mxu0 %v11058_v22  ;;  %v11185_v30 = vcombine.low %v1098_v13, %v1102_v15 }
 0x133   :  { %v966_v24 = vld [vmem:[#allocation5 + $0x1920] sm:$0xff] }
 0x134   :  { %v1090_v25 = vld [vmem:[#allocation5 + $0x1d00] sm:$0xff]  ;;  %v11050_v32 = vcombine.high %v962_v23, %v966_v24  ;;  %6597 = vmatprep.subr.bf16.mxu1 %v11186_v26  ;;  %6557 = vmatpush1.bf16.msra.mxu0 %v11057_v29  ;;  %v11049_v38 = vcombine.low %v962_v23, %v966_v24 }
 0x135   :  { %v1094_v27 = vld [vmem:[#allocation5 + $0x1d20] sm:$0xff]  ;;  %6598 = vmatpush1.bf16.msra.mxu1 %v11185_v30 }
 0x136   :  { %v954_v33 = vld [vmem:[#allocation5 + $0x18c0] sm:$0xff]  ;;  %v11178_v36 = vcombine.high %v1090_v25, %v1094_v27  ;;  %6558 = vmatprep.subr.bf16.mxu0 %v11050_v32  ;;  %v11177_v41 = vcombine.low %v1090_v25, %v1094_v27 }
 0x137   :  { %v958_v34 = vld [vmem:[#allocation5 + $0x18e0] sm:$0xff] }
 0x138   :  { %v1082_v35 = vld [vmem:[#allocation5 + $0x1cc0] sm:$0xff]  ;;  %v11042_v42 = vcombine.high %v954_v33, %v958_v34  ;;  %6599 = vmatprep.subr.bf16.mxu1 %v11178_v36  ;;  %6559 = vmatpush1.bf16.msra.mxu0 %v11049_v38  ;;  %v11041_v48 = vcombine.low %v954_v33, %v958_v34 }
 0x139   :  { %v1086_v37 = vld [vmem:[#allocation5 + $0x1ce0] sm:$0xff]  ;;  %6600 = vmatpush1.bf16.msra.mxu1 %v11177_v41 }
 0x13a   :  { %v946_v43 = vld [vmem:[#allocation5 + $0x1880] sm:$0xff]  ;;  %v11170_v46 = vcombine.high %v1082_v35, %v1086_v37  ;;  %6560 = vmatprep.subr.bf16.mxu0 %v11042_v42  ;;  %v11169_v49 = vcombine.low %v1082_v35, %v1086_v37 }
 0x13b   :  { %v950_v44 = vld [vmem:[#allocation5 + $0x18a0] sm:$0xff] }
 0x13c   :  { %v1074_v45 = vld [vmem:[#allocation5 + $0x1c80] sm:$0xff]  ;;  %v11034_v52 = vcombine.high %v946_v43, %v950_v44  ;;  %6601 = vmatprep.subr.bf16.mxu1 %v11170_v46  ;;  %6561 = vmatpush1.bf16.msra.mxu0 %v11041_v48  ;;  %v11033_v60 = vcombine.low %v946_v43, %v950_v44 }
 0x13d   :  { %v1078_v47 = vld [vmem:[#allocation5 + $0x1ca0] sm:$0xff]  ;;  %6602 = vmatpush1.bf16.msra.mxu1 %v11169_v49 }
 0x13e   :  { %v938_v53 = vld [vmem:[#allocation5 + $0x1840] sm:$0xff]  ;;  %v11162_v56 = vcombine.high %v1074_v45, %v1078_v47  ;;  %6562 = vmatprep.subr.bf16.mxu0 %v11034_v52  ;;  %v11161_v61 = vcombine.low %v1074_v45, %v1078_v47 }
 0x13f   :  { %v942_v54 = vld [vmem:[#allocation5 + $0x1860] sm:$0xff] }
 0x140   :  { %v1066_v55 = vld [vmem:[#allocation5 + $0x1c40] sm:$0xff]  ;;  %v11026_v62 = vcombine.high %v938_v53, %v942_v54  ;;  %6603 = vmatprep.subr.bf16.mxu1 %v11162_v56  ;;  %6563 = vmatpush1.bf16.msra.mxu0 %v11033_v60  ;;  %v11025_v4 = vcombine.low %v938_v53, %v942_v54 }
 0x141   :  { %v1070_v57 = vld [vmem:[#allocation5 + $0x1c60] sm:$0xff]  ;;  %6604 = vmatpush1.bf16.msra.mxu1 %v11161_v61 }
 0x142   :  { %v930_v63 = vld [vmem:[#allocation5 + $0x1800] sm:$0xff]  ;;  %v11154_v2 = vcombine.high %v1066_v55, %v1070_v57  ;;  %6564 = vmatprep.subr.bf16.mxu0 %v11026_v62  ;;  %v11153_v5 = vcombine.low %v1066_v55, %v1070_v57 }
 0x143   :  { %v934_v0 = vld [vmem:[#allocation5 + $0x1820] sm:$0xff] }
 0x144   :  { %v1058_v1 = vld [vmem:[#allocation5 + $0x1c00] sm:$0xff]  ;;  %v11018_v8 = vcombine.high %v930_v63, %v934_v0  ;;  %6605 = vmatprep.subr.bf16.mxu1 %v11154_v2  ;;  %6565 = vmatpush1.bf16.msra.mxu0 %v11025_v4  ;;  %v11017_v14 = vcombine.low %v930_v63, %v934_v0 }
 0x145   :  { %v1062_v3 = vld [vmem:[#allocation5 + $0x1c20] sm:$0xff]  ;;  %6606 = vmatpush1.bf16.msra.mxu1 %v11153_v5 }
 0x146   :  { %v1050_v9 = vld [vmem:[#allocation5 + $0x1bc0] sm:$0xff]  ;;  %v11146_v12 = vcombine.high %v1058_v1, %v1062_v3  ;;  %6566 = vmatprep.subr.bf16.mxu0 %v11018_v8  ;;  %v11145_v15 = vcombine.low %v1058_v1, %v1062_v3 }
 0x147   :  { %v1054_v10 = vld [vmem:[#allocation5 + $0x1be0] sm:$0xff] }
 0x148   :  { %v1178_v11 = vld [vmem:[#allocation5 + $0x1fc0] sm:$0xff]  ;;  %v11138_v19 = vcombine.high %v1050_v9, %v1054_v10  ;;  %6607 = vmatprep.subr.bf16.mxu1 %v11146_v12  ;;  %6567 = vmatpush1.bf16.msra.mxu0 %v11017_v14  ;;  %v11137_v26 = vcombine.low %v1050_v9, %v1054_v10 }
 0x149   :  { %v1182_v13 = vld [vmem:[#allocation5 + $0x1fe0] sm:$0xff]  ;;  %6608 = vmatpush1.bf16.msra.mxu1 %v11145_v15 }
 0x14a   :  { %v1042_v21 = vld [vmem:[#allocation5 + $0x1b80] sm:$0xff]  ;;  %v11266_v24 = vcombine.high %v1178_v11, %v1182_v13  ;;  %6568 = vmatprep.subr.bf16.mxu0 %v11138_v19  ;;  %v11265_v27 = vcombine.low %v1178_v11, %v1182_v13 }
 0x14b   :  { %v1046_v22 = vld [vmem:[#allocation5 + $0x1ba0] sm:$0xff] }
 0x14c   :  { %v1170_v23 = vld [vmem:[#allocation5 + $0x1f80] sm:$0xff]  ;;  %v11130_v29 = vcombine.high %v1042_v21, %v1046_v22  ;;  %6609 = vmatprep.subr.bf16.mxu1 %v11266_v24  ;;  %6569 = vmatpush2.bf16.msra.mxu0 %v11137_v26  ;;  %v11129_v36 = vcombine.low %v1042_v21, %v1046_v22 }
 0x14d   :  { %v1174_v25 = vld [vmem:[#allocation5 + $0x1fa0] sm:$0xff]  ;;  %6610 = vmatpush2.bf16.msra.mxu1 %v11265_v27 }
 0x14e   :  { %v1034_v30 = vld [vmem:[#allocation5 + $0x1b40] sm:$0xff]  ;;  %v11258_v34 = vcombine.high %v1170_v23, %v1174_v25  ;;  %6570 = vmatprep.subr.bf16.mxu0 %v11130_v29  ;;  %v11257_v37 = vcombine.low %v1170_v23, %v1174_v25  ;;  %v219_v29 = vld [vmem:[#allocation5 + $0x1c8] sm:$0xff] }
 0x14f   :  { %v1038_v32 = vld [vmem:[#allocation5 + $0x1b60] sm:$0xff] }
 0x150   :  { %v1162_v33 = vld [vmem:[#allocation5 + $0x1f40] sm:$0xff]  ;;  %v11122_v38 = vcombine.high %v1034_v30, %v1038_v32  ;;  %6611 = vmatprep.subr.bf16.mxu1 %v11258_v34  ;;  %6571 = vmatpush2.bf16.msra.mxu0 %v11129_v36  ;;  %v11121_v46 = vcombine.low %v1034_v30, %v1038_v32  ;;  %v223_v30 = vld [vmem:[#allocation5 + $0x1e8] sm:$0xff] }
 0x151   :  { %v1166_v35 = vld [vmem:[#allocation5 + $0x1f60] sm:$0xff]  ;;  %6612 = vmatpush2.bf16.msra.mxu1 %v11257_v37  ;;  %v347_v32 = vld [vmem:[#allocation5 + $0x5c8] sm:$0xff]  ;;  %v144_v37 = vld [vmem:[#allocation2 + $0x70] sm:$0xff] }
 0x152   :  { %v1026_v41 = vld [vmem:[#allocation5 + $0x1b00] sm:$0xff]  ;;  %v11250_v44 = vcombine.high %v1162_v33, %v1166_v35  ;;  %6572 = vmatprep.subr.bf16.mxu0 %v11122_v38  ;;  %v11249_v47 = vcombine.low %v1162_v33, %v1166_v35  ;;  %v351_v33 = vld [vmem:[#allocation5 + $0x5e8] sm:$0xff]  ;;  %v10308_v38 = vcombine.high %v219_v29, %v223_v30 }
 0x153   :  { %v1030_v42 = vld [vmem:[#allocation5 + $0x1b20] sm:$0xff] }
 0x154   :  { %v1154_v43 = vld [vmem:[#allocation5 + $0x1f00] sm:$0xff]  ;;  %v11114_v48 = vcombine.high %v1026_v41, %v1030_v42  ;;  %6613 = vmatprep.subr.bf16.mxu1 %v11250_v44  ;;  %6573 = vmatpush2.bf16.msra.mxu0 %v11121_v46  ;;  %v11113_v56 = vcombine.low %v1026_v41, %v1030_v42  ;;  %v10436_v41 = vcombine.high %v347_v32, %v351_v33  ;;  %v211_v42 = vld [vmem:[#allocation5 + $0x188] sm:$0xff] }
 0x155   :  { %v1158_v45 = vld [vmem:[#allocation5 + $0x1f20] sm:$0xff]  ;;  %6614 = vmatpush2.bf16.msra.mxu1 %v11249_v47  ;;  %v343_v46 = vld [vmem:[#allocation5 + $0x5a8] sm:$0xff]  ;;  %v12384_v47 = vpack.c.bf16 %v144_v37, %v144_v37 }
 0x156   :  { %v11242_v49 = vcombine.high %v1154_v43, %v1158_v45  ;;  %v1018_v52 = vld [vmem:[#allocation5 + $0x1ac0] sm:$0xff]  ;;  %6574 = vmatprep.subr.bf16.mxu0 %v11114_v48  ;;  %v11241_v57 = vcombine.low %v1154_v43, %v1158_v45  ;;  %v215_v43 = vld [vmem:[#allocation5 + $0x1a8] sm:$0xff]  ;;  %v10307_v48 = vcombine.low %v219_v29, %v223_v30 }
 0x157   :  { %v1022_v53 = vld [vmem:[#allocation5 + $0x1ae0] sm:$0xff]  ;;  %v339_v45 = vld [vmem:[#allocation5 + $0x588] sm:$0xff] }
 0x158   :  { %v1146_v54 = vld [vmem:[#allocation5 + $0x1ec0] sm:$0xff]  ;;  %v11106_v60 = vcombine.high %v1018_v52, %v1022_v53  ;;  %6615 = vmatprep.subr.bf16.mxu1 %v11242_v49  ;;  %6575 = vmatpush2.bf16.msra.mxu0 %v11113_v56  ;;  %v11105_v2 = vcombine.low %v1018_v52, %v1022_v53  ;;  %v10435_v49 = vcombine.low %v347_v32, %v351_v33  ;;  %v311_v37 = vld [vmem:[#allocation5 + $0x4a8] sm:$0xff] }
 0x159   :  { %v1150_v55 = vld [vmem:[#allocation5 + $0x1ee0] sm:$0xff]  ;;  %6616 = vmatpush2.bf16.msra.mxu1 %v11241_v57  ;;  %v10300_v52 = vcombine.high %v211_v42, %v215_v43  ;;  %v10428_v53 = vcombine.high %v339_v45, %v343_v46  ;;  %v331_v57 = vld [vmem:[#allocation5 + $0x548] sm:$0xff] }
 0x15a   :  { %v11234_v61 = vcombine.high %v1146_v54, %v1150_v55  ;;  %v1010_v62 = vld [vmem:[#allocation5 + $0x1a80] sm:$0xff]  ;;  %6576 = vmatprep.subr.bf16.mxu0 %v11106_v60  ;;  %v11233_v3 = vcombine.low %v1146_v54, %v1150_v55  ;;  %v203_v54 = vld [vmem:[#allocation5 + $0x148] sm:$0xff] }
 0x15b   :  { %v1014_v63 = vld [vmem:[#allocation5 + $0x1aa0] sm:$0xff]  ;;  %v207_v55 = vld [vmem:[#allocation5 + $0x168] sm:$0xff] }
 0x15c   :  { %v1138_v0 = vld [vmem:[#allocation5 + $0x1e80] sm:$0xff]  ;;  %v11098_v4 = vcombine.high %v1010_v62, %v1014_v63  ;;  %6617 = vmatprep.subr.bf16.mxu1 %v11234_v61  ;;  %6577 = vmatpush2.bf16.msra.mxu0 %v11105_v2  ;;  %v11097_v12 = vcombine.low %v1010_v62, %v1014_v63  ;;  %v335_v60 = vld [vmem:[#allocation5 + $0x568] sm:$0xff]  ;;  %v10299_v62 = vcombine.low %v211_v42, %v215_v43 }
 0x15d   :  { %v1142_v1 = vld [vmem:[#allocation5 + $0x1ea0] sm:$0xff]  ;;  %6618 = vmatpush2.bf16.msra.mxu1 %v11233_v3  ;;  %v10292_v2 = vcombine.high %v203_v54, %v207_v55 }
 0x15e   :  { %v11226_v5 = vcombine.high %v1138_v0, %v1142_v1  ;;  %v1002_v8 = vld [vmem:[#allocation5 + $0x1a40] sm:$0xff]  ;;  %6578 = vmatprep.subr.bf16.mxu0 %v11098_v4  ;;  %v11225_v13 = vcombine.low %v1138_v0, %v1142_v1  ;;  %v10427_v1 = vcombine.low %v339_v45, %v343_v46  ;;  %v10420_v4 = vcombine.high %v331_v57, %v335_v60  ;;  %v171_v45 = vld [vmem:[#allocation5 + $0x48] sm:$0xff] }
 0x15f   :  { %v1006_v9 = vld [vmem:[#allocation5 + $0x1a60] sm:$0xff]  ;;  %v175_v46 = vld [vmem:[#allocation5 + $0x68] sm:$0xff] }
 0x160   :  { %v1130_v10 = vld [vmem:[#allocation5 + $0x1e40] sm:$0xff]  ;;  %v11090_v14 = vcombine.high %v1002_v8, %v1006_v9  ;;  %6619 = vmatprep.subr.bf16.mxu1 %v11226_v5  ;;  %6579 = vmatpush2.bf16.msra.mxu0 %v11097_v12  ;;  %v11089_v24 = vcombine.low %v1002_v8, %v1006_v9  ;;  %v195_v5 = vld [vmem:[#allocation5 + $0x108] sm:$0xff] }
 0x161   :  { %v1134_v11 = vld [vmem:[#allocation5 + $0x1e60] sm:$0xff]  ;;  %6620 = vmatpush2.bf16.msra.mxu1 %v11225_v13  ;;  %v199_v8 = vld [vmem:[#allocation5 + $0x128] sm:$0xff] }
 0x162   :  { %v11218_v15 = vcombine.high %v1130_v10, %v1134_v11  ;;  %v994_v19 = vld [vmem:[#allocation5 + $0x1a00] sm:$0xff]  ;;  %6580 = vmatprep.subr.bf16.mxu0 %v11090_v14  ;;  %v11217_v25 = vcombine.low %v1130_v10, %v1134_v11  ;;  %v323_v11 = vld [vmem:[#allocation5 + $0x508] sm:$0xff]  ;;  %v10291_v14 = vcombine.low %v203_v54, %v207_v55  ;;  %v10283_v29 = vcombine.low %v195_v5, %v199_v8 }
 0x163   :  { %v998_v21 = vld [vmem:[#allocation5 + $0x1a20] sm:$0xff]  ;;  %v327_v12 = vld [vmem:[#allocation5 + $0x528] sm:$0xff]  ;;  %v10260_v54 = vcombine.high %v171_v45, %v175_v46 }
 0x164   :  { %v1122_v22 = vld [vmem:[#allocation5 + $0x1e00] sm:$0xff]  ;;  %v11082_v26 = vcombine.high %v994_v19, %v998_v21  ;;  %6621 = vmatprep.subr.bf16.mxu1 %v11218_v15  ;;  %6581 = vmatpush2.bf16.msra.mxu0 %v11089_v24  ;;  %v11081_v34 = vcombine.low %v994_v19, %v998_v21  ;;  %v10419_v19 = vcombine.low %v331_v57, %v335_v60  ;;  %v187_v24 = vld [vmem:[#allocation5 + $0xc8] sm:$0xff] }
 0x165   :  { %v1126_v23 = vld [vmem:[#allocation5 + $0x1e20] sm:$0xff]  ;;  %6622 = vmatpush2.bf16.msra.mxu1 %v11217_v25  ;;  %v10284_v21 = vcombine.high %v195_v5, %v199_v8  ;;  %v191_v25 = vld [vmem:[#allocation5 + $0xe8] sm:$0xff]  ;;  %v10411_v30 = vcombine.low %v323_v11, %v327_v12 }
 0x166   :  { %v11210_v27 = vcombine.high %v1122_v22, %v1126_v23  ;;  %v142_v35 = vld [vmem:[#allocation2 + $0x60] sm:$0xff]  ;;  %6582 = vmatprep.subr.bf16.mxu0 %v11082_v26  ;;  %v11209_v36 = vcombine.low %v1122_v22, %v1126_v23  ;;  %v10412_v23 = vcombine.high %v323_v11, %v327_v12  ;;  %v315_v26 = vld [vmem:[#allocation5 + $0x4c8] sm:$0xff]  ;;  %v10276_v32 = vcombine.high %v187_v24, %v191_v25 }
 0x167   :  { %v12382_v44 = vpack.c.bf16 %v142_v35, %v142_v35  ;;  %v183_v35 = vld [vmem:[#allocation5 + $0xa8] sm:$0xff] }
 0x168   :  { %6623 = vmatprep.subr.bf16.mxu1 %v11210_v27  ;;  %6583 = vmatpush2.bf16.msra.mxu0 %v11081_v34  ;;  %v319_v27 = vld [vmem:[#allocation5 + $0x4e8] sm:$0xff] }
 0x169   :  { %6624 = vmatpush2.bf16.msra.mxu1 %v11209_v36  ;;  %6634 = vmatprep.subr.bf16.mxu0 %v10308_v38  ;;  %v6381_v61 = vpop.f32.mrf.mxu1  ;;  %v10404_v33 = vcombine.high %v315_v26, %v319_v27  ;;  %v179_v34 = vld [vmem:[#allocation5 + $0x88] sm:$0xff]  ;;  %v10275_v38 = vcombine.low %v187_v24, %v191_v25 }
 0x16a   :  { %6675 = vmatprep.subr.bf16.mxu1 %v10436_v41  ;;  %v6340_v56 = vpop.f32.mrf.mxu0  ;;  %v307_v36 = vld [vmem:[#allocation5 + $0x488] sm:$0xff]  ;;  %v10403_v41 = vcombine.low %v315_v26, %v319_v27  ;;  %v10268_v42 = vcombine.high %v179_v34, %v183_v35 }
 0x16b   :  { %6585 = vmatmul.mubr.bf16.vlgmr.msra.gmra.mxu0 %v12382_v44  ;;  %v12388_v63 = vadd.f32 %v6381_v61, %v6340_v56  ;;  %v6383_v3 = vpop.f32.mrf.mxu1  ;;  %v10396_v43 = vcombine.high %v307_v36, %v311_v37  ;;  %v163_v56 = vld [vmem:[#allocation5 + $0x8] sm:$0xff] }
 0x16c   :  { %6626 = vmatmul.mubr.bf16.vlgmr.msra.gmra.mxu1 %v12384_v47  ;;  %6635 = vmatpush1.bf16.msra.mxu0 %v10307_v48  ;;  %v6342_v0 = vpop.f32.mrf.mxu0  ;;  %v299_v48 = vld [vmem:[#allocation5 + $0x448] sm:$0xff] }
 0x16d   :  { %6676 = vmatpush1.bf16.msra.mxu1 %v10435_v49  ;;  %6636 = vmatprep.subr.bf16.mxu0 %v10300_v52  ;;  %v12391_v9 = vadd.f32 %v6383_v3, %v6342_v0  ;;  %v6385_v13 = vpop.f32.mrf.mxu1  ;;  %v303_v49 = vld [vmem:[#allocation5 + $0x468] sm:$0xff]  ;;  %v10267_v52 = vcombine.low %v179_v34, %v183_v35 }
 0x16e   :  { %6677 = vmatprep.subr.bf16.mxu1 %v10428_v53  ;;  %6666 = vmatprep.mubr.bf16.mxu0 %v12340_v58  ;;  %v6344_v10 = vpop.f32.mrf.mxu0  ;;  %v10395_v53 = vcombine.low %v307_v36, %v311_v37  ;;  %v10388_v55 = vcombine.high %v299_v48, %v303_v49  ;;  %v167_v57 = vld [vmem:[#allocation5 + $0x28] sm:$0xff]  ;;  %v10387_v0 = vcombine.low %v299_v48, %v303_v49 }
 0x16f   :  { %6707 = vmatprep.mubr.bf16.mxu1 %v12342_v59  ;;  %v6386_v22 = vpop.f32.mrf.mxu1  ;;  %v291_v60 = vld [vmem:[#allocation5 + $0x408] sm:$0xff]  ;;  %v10251_v10 = vcombine.low %v163_v56, %v167_v57 }
 0x170   :  { %6637 = vmatpush1.bf16.msra.mxu0 %v10299_v62  ;;  %v6345_v15 = vpop.f32.mrf.mxu0  ;;  %v295_v61 = vld [vmem:[#allocation5 + $0x428] sm:$0xff]  ;;  %v10259_v62 = vcombine.low %v171_v45, %v175_v46 }
 0x171   :  { %6678 = vmatpush1.bf16.msra.mxu1 %v10427_v1  ;;  %6638 = vmatprep.subr.bf16.mxu0 %v10292_v2  ;;  %v10252_v1 = vcombine.high %v163_v56, %v167_v57  ;;  %v10380_v2 = vcombine.high %v291_v60, %v295_v61  ;;  %v283_v3 = vld [vmem:[#allocation5 + $0x3c8] sm:$0xff]  ;;  %v10379_v11 = vcombine.low %v291_v60, %v295_v61 }
 0x172   :  { %6679 = vmatprep.subr.bf16.mxu1 %v10420_v4  ;;  %v287_v4 = vld [vmem:[#allocation5 + $0x3e8] sm:$0xff] }
 0x173   :  { %v411_v5 = vld [vmem:[#allocation5 + $0x7c8] sm:$0xff]  ;;  %v10372_v12 = vcombine.high %v283_v3, %v287_v4  ;;  %v10371_v22 = vcombine.low %v283_v3, %v287_v4 }
 0x174   :  { %6639 = vmatpush1.bf16.msra.mxu0 %v10291_v14  ;;  %v415_v8 = vld [vmem:[#allocation5 + $0x7e8] sm:$0xff] }
 0x175   :  { %6680 = vmatpush1.bf16.msra.mxu1 %v10419_v19  ;;  %6640 = vmatprep.subr.bf16.mxu0 %v10284_v21  ;;  %v10500_v13 = vcombine.high %v411_v5, %v415_v8  ;;  %v275_v14 = vld [vmem:[#allocation5 + $0x388] sm:$0xff] }
 0x176   :  { %6681 = vmatprep.subr.bf16.mxu1 %v10412_v23  ;;  %v279_v15 = vld [vmem:[#allocation5 + $0x3a8] sm:$0xff]  ;;  %v10499_v23 = vcombine.low %v411_v5, %v415_v8 }
 0x177   :  { %v403_v19 = vld [vmem:[#allocation5 + $0x788] sm:$0xff]  ;;  %v10364_v24 = vcombine.high %v275_v14, %v279_v15 }
 0x178   :  { %6641 = vmatpush1.bf16.msra.mxu0 %v10283_v29  ;;  %v407_v21 = vld [vmem:[#allocation5 + $0x7a8] sm:$0xff] }
 0x179   :  { %6682 = vmatpush1.bf16.msra.mxu1 %v10411_v30  ;;  %6642 = vmatprep.subr.bf16.mxu0 %v10276_v32  ;;  %v10492_v25 = vcombine.high %v403_v19, %v407_v21  ;;  %v267_v26 = vld [vmem:[#allocation5 + $0x348] sm:$0xff]  ;;  %v10363_v32 = vcombine.low %v275_v14, %v279_v15 }
 0x17a   :  { %6683 = vmatprep.subr.bf16.mxu1 %v10404_v33  ;;  %v271_v27 = vld [vmem:[#allocation5 + $0x368] sm:$0xff]  ;;  %v10491_v33 = vcombine.low %v403_v19, %v407_v21 }
 0x17b   :  { %v395_v29 = vld [vmem:[#allocation5 + $0x748] sm:$0xff]  ;;  %v10356_v34 = vcombine.high %v267_v26, %v271_v27 }
 0x17c   :  { %6643 = vmatpush1.bf16.msra.mxu0 %v10275_v38  ;;  %v399_v30 = vld [vmem:[#allocation5 + $0x768] sm:$0xff] }
 0x17d   :  { %6684 = vmatpush1.bf16.msra.mxu1 %v10403_v41  ;;  %6644 = vmatprep.subr.bf16.mxu0 %v10268_v42  ;;  %v10484_v35 = vcombine.high %v395_v29, %v399_v30  ;;  %v259_v36 = vld [vmem:[#allocation5 + $0x308] sm:$0xff]  ;;  %v10355_v42 = vcombine.low %v267_v26, %v271_v27 }
 0x17e   :  { %6685 = vmatprep.subr.bf16.mxu1 %v10396_v43  ;;  %v263_v37 = vld [vmem:[#allocation5 + $0x328] sm:$0xff]  ;;  %v10483_v43 = vcombine.low %v395_v29, %v399_v30 }
 0x17f   :  { %v387_v38 = vld [vmem:[#allocation5 + $0x708] sm:$0xff]  ;;  %v10348_v45 = vcombine.high %v259_v36, %v263_v37 }
 0x180   :  { %6645 = vmatpush1.bf16.msra.mxu0 %v10267_v52  ;;  %v391_v41 = vld [vmem:[#allocation5 + $0x728] sm:$0xff] }
 0x181   :  { %6686 = vmatpush1.bf16.msra.mxu1 %v10395_v53  ;;  %6646 = vmatprep.subr.bf16.mxu0 %v10260_v54  ;;  %v10476_v46 = vcombine.high %v387_v38, %v391_v41  ;;  %v251_v48 = vld [vmem:[#allocation5 + $0x2c8] sm:$0xff]  ;;  %v10347_v54 = vcombine.low %v259_v36, %v263_v37 }
 0x182   :  { %6687 = vmatprep.subr.bf16.mxu1 %v10388_v55  ;;  %v255_v49 = vld [vmem:[#allocation5 + $0x2e8] sm:$0xff]  ;;  %v10475_v55 = vcombine.low %v387_v38, %v391_v41 }
 0x183   :  { %v379_v52 = vld [vmem:[#allocation5 + $0x6c8] sm:$0xff]  ;;  %v10340_v56 = vcombine.high %v251_v48, %v255_v49 }
 0x184   :  { %6647 = vmatpush1.bf16.msra.mxu0 %v10259_v62  ;;  %v383_v53 = vld [vmem:[#allocation5 + $0x6e8] sm:$0xff] }
 0x185   :  { %6688 = vmatpush1.bf16.msra.mxu1 %v10387_v0  ;;  %6648 = vmatprep.subr.bf16.mxu0 %v10252_v1  ;;  %v10468_v57 = vcombine.high %v379_v52, %v383_v53  ;;  %v243_v60 = vld [vmem:[#allocation5 + $0x288] sm:$0xff]  ;;  %v10339_v1 = vcombine.low %v251_v48, %v255_v49 }
 0x186   :  { %6689 = vmatprep.subr.bf16.mxu1 %v10380_v2  ;;  %v247_v61 = vld [vmem:[#allocation5 + $0x2a8] sm:$0xff]  ;;  %v10467_v2 = vcombine.low %v379_v52, %v383_v53 }
 0x187   :  { %v371_v62 = vld [vmem:[#allocation5 + $0x688] sm:$0xff]  ;;  %v10332_v3 = vcombine.high %v243_v60, %v247_v61 }
 0x188   :  { %6649 = vmatpush1.bf16.msra.mxu0 %v10251_v10  ;;  %v375_v0 = vld [vmem:[#allocation5 + $0x6a8] sm:$0xff] }
 0x189   :  { %6690 = vmatpush1.bf16.msra.mxu1 %v10379_v11  ;;  %6650 = vmatprep.subr.bf16.mxu0 %v10372_v12  ;;  %v10460_v4 = vcombine.high %v371_v62, %v375_v0  ;;  %v235_v5 = vld [vmem:[#allocation5 + $0x248] sm:$0xff]  ;;  %v10331_v12 = vcombine.low %v243_v60, %v247_v61 }
 0x18a   :  { %6691 = vmatprep.subr.bf16.mxu1 %v10500_v13  ;;  %v239_v8 = vld [vmem:[#allocation5 + $0x268] sm:$0xff]  ;;  %v10459_v13 = vcombine.low %v371_v62, %v375_v0 }
 0x18b   :  { %v363_v10 = vld [vmem:[#allocation5 + $0x648] sm:$0xff]  ;;  %v10324_v14 = vcombine.high %v235_v5, %v239_v8 }
 0x18c   :  { %6651 = vmatpush2.bf16.msra.mxu0 %v10371_v22  ;;  %v367_v11 = vld [vmem:[#allocation5 + $0x668] sm:$0xff] }
 0x18d   :  { %6692 = vmatpush2.bf16.msra.mxu1 %v10499_v23  ;;  %6652 = vmatprep.subr.bf16.mxu0 %v10364_v24  ;;  %v10452_v15 = vcombine.high %v363_v10, %v367_v11  ;;  %v227_v19 = vld [vmem:[#allocation5 + $0x208] sm:$0xff]  ;;  %v10323_v24 = vcombine.low %v235_v5, %v239_v8 }
 0x18e   :  { %6693 = vmatprep.subr.bf16.mxu1 %v10492_v25  ;;  %v231_v21 = vld [vmem:[#allocation5 + $0x228] sm:$0xff]  ;;  %v10451_v25 = vcombine.low %v363_v10, %v367_v11 }
 0x18f   :  { %v355_v22 = vld [vmem:[#allocation5 + $0x608] sm:$0xff]  ;;  %v10316_v26 = vcombine.high %v227_v19, %v231_v21 }
 0x190   :  { %6653 = vmatpush2.bf16.msra.mxu0 %v10363_v32  ;;  %v359_v23 = vld [vmem:[#allocation5 + $0x628] sm:$0xff] }
 0x191   :  { %6694 = vmatpush2.bf16.msra.mxu1 %v10491_v33  ;;  %6654 = vmatprep.subr.bf16.mxu0 %v10356_v34  ;;  %v10444_v27 = vcombine.high %v355_v22, %v359_v23  ;;  %v475_v29 = vld [vmem:[#allocation5 + $0x9c8] sm:$0xff]  ;;  %v10315_v34 = vcombine.low %v227_v19, %v231_v21 }
 0x192   :  { %6695 = vmatprep.subr.bf16.mxu1 %v10484_v35  ;;  %v479_v30 = vld [vmem:[#allocation5 + $0x9e8] sm:$0xff]  ;;  %v10443_v35 = vcombine.low %v355_v22, %v359_v23 }
 0x193   :  { %v603_v32 = vld [vmem:[#allocation5 + $0xdc8] sm:$0xff]  ;;  %v10564_v36 = vcombine.high %v475_v29, %v479_v30 }
 0x194   :  { %6655 = vmatpush2.bf16.msra.mxu0 %v10355_v42  ;;  %v607_v33 = vld [vmem:[#allocation5 + $0xde8] sm:$0xff] }
 0x195   :  { %6696 = vmatpush2.bf16.msra.mxu1 %v10483_v43  ;;  %6656 = vmatprep.subr.bf16.mxu0 %v10348_v45  ;;  %v10692_v37 = vcombine.high %v603_v32, %v607_v33  ;;  %v467_v38 = vld [vmem:[#allocation5 + $0x988] sm:$0xff]  ;;  %v10563_v45 = vcombine.low %v475_v29, %v479_v30 }
 0x196   :  { %6697 = vmatprep.subr.bf16.mxu1 %v10476_v46  ;;  %v471_v41 = vld [vmem:[#allocation5 + $0x9a8] sm:$0xff]  ;;  %v10691_v46 = vcombine.low %v603_v32, %v607_v33 }
 0x197   :  { %v595_v42 = vld [vmem:[#allocation5 + $0xd88] sm:$0xff]  ;;  %v10556_v48 = vcombine.high %v467_v38, %v471_v41  ;;  %v10555_v61 = vcombine.low %v467_v38, %v471_v41 }
 0x198   :  { %6657 = vmatpush2.bf16.msra.mxu0 %v10347_v54  ;;  %v599_v43 = vld [vmem:[#allocation5 + $0xda8] sm:$0xff] }
 0x199   :  { %6698 = vmatpush2.bf16.msra.mxu1 %v10475_v55  ;;  %6658 = vmatprep.subr.bf16.mxu0 %v10340_v56  ;;  %v10684_v49 = vcombine.high %v595_v42, %v599_v43  ;;  %v459_v52 = vld [vmem:[#allocation5 + $0x948] sm:$0xff]  ;;  %v10683_v0 = vcombine.low %v595_v42, %v599_v43 }
 0x19a   :  { %6699 = vmatprep.subr.bf16.mxu1 %v10468_v57  ;;  %v463_v53 = vld [vmem:[#allocation5 + $0x968] sm:$0xff] }
 0x19b   :  { %v587_v55 = vld [vmem:[#allocation5 + $0xd48] sm:$0xff] }
 0x19c   :  { %6659 = vmatpush2.bf16.msra.mxu0 %v10339_v1  ;;  %v591_v56 = vld [vmem:[#allocation5 + $0xd68] sm:$0xff]  ;;  %v10548_v1 = vcombine.high %v459_v52, %v463_v53 }
 0x19d   :  { %6700 = vmatpush2.bf16.msra.mxu1 %v10467_v2  ;;  %6660 = vmatprep.subr.bf16.mxu0 %v10332_v3  ;;  %v10676_v5 = vcombine.high %v587_v55, %v591_v56  ;;  %v451_v8 = vld [vmem:[#allocation5 + $0x908] sm:$0xff] }
 0x19e   :  { %6701 = vmatprep.subr.bf16.mxu1 %v10460_v4  ;;  %v455_v10 = vld [vmem:[#allocation5 + $0x928] sm:$0xff] }
 0x19f   :  { %v579_v11 = vld [vmem:[#allocation5 + $0xd08] sm:$0xff]  ;;  %v10540_v21 = vcombine.high %v451_v8, %v455_v10  ;;  %v10539_v29 = vcombine.low %v451_v8, %v455_v10 }
 0x1a0   :  { %6661 = vmatpush2.bf16.msra.mxu0 %v10331_v12  ;;  %v583_v12 = vld [vmem:[#allocation5 + $0xd28] sm:$0xff] }
 0x1a1   :  { %6702 = vmatpush2.bf16.msra.mxu1 %v10459_v13  ;;  %6662 = vmatprep.subr.bf16.mxu0 %v10324_v14  ;;  %v10668_v23 = vcombine.high %v579_v11, %v583_v12  ;;  %v10667_v30 = vcombine.low %v579_v11, %v583_v12  ;;  %v667_v8 = vld [vmem:[#allocation5 + $0xfc8] sm:$0xff] }
 0x1a2   :  { %6703 = vmatprep.subr.bf16.mxu1 %v10452_v15  ;;  %v10547_v15 = vcombine.low %v459_v52, %v463_v53  ;;  %v671_v10 = vld [vmem:[#allocation5 + $0xfe8] sm:$0xff] }
 0x1a4   :  { %6663 = vmatpush2.bf16.msra.mxu0 %v10323_v24  ;;  %v443_v24 = vld [vmem:[#allocation5 + $0x8c8] sm:$0xff] }
 0x1a5   :  { %6704 = vmatpush2.bf16.msra.mxu1 %v10451_v25  ;;  %6664 = vmatprep.subr.bf16.mxu0 %v10316_v26  ;;  %v447_v25 = vld [vmem:[#allocation5 + $0x8e8] sm:$0xff] }
 0x1a6   :  { %6705 = vmatprep.subr.bf16.mxu1 %v10444_v27  ;;  %v571_v26 = vld [vmem:[#allocation5 + $0xcc8] sm:$0xff]  ;;  %v10532_v32 = vcombine.high %v443_v24, %v447_v25  ;;  %v10531_v38 = vcombine.low %v443_v24, %v447_v25 }
 0x1a7   :  { %v575_v27 = vld [vmem:[#allocation5 + $0xce8] sm:$0xff] }
 0x1a8   :  { %6665 = vmatpush2.bf16.msra.mxu0 %v10315_v34  ;;  %v10660_v33 = vcombine.high %v571_v26, %v575_v27  ;;  %v435_v34 = vld [vmem:[#allocation5 + $0x888] sm:$0xff]  ;;  %v10659_v41 = vcombine.low %v571_v26, %v575_v27 }
 0x1a9   :  { %6706 = vmatpush2.bf16.msra.mxu1 %v10443_v35  ;;  %6716 = vmatprep.subr.bf16.mxu0 %v10564_v36  ;;  %v439_v35 = vld [vmem:[#allocation5 + $0x8a8] sm:$0xff] }
 0x1aa   :  { %6757 = vmatprep.subr.bf16.mxu1 %v10692_v37  ;;  %v6422_v54 = vpop.f32.mrf.mxu0  ;;  %v6463_v60 = vpop.f32.mrf.mxu1  ;;  %v563_v36 = vld [vmem:[#allocation5 + $0xc88] sm:$0xff]  ;;  %v10524_v42 = vcombine.high %v435_v34, %v439_v35  ;;  %v10523_v52 = vcombine.low %v435_v34, %v439_v35 }
 0x1ab   :  { %6667 = vmatmul.mubr.bf16.vlgmr.msra.gmra.mxu0 %v12346_v16  ;;  %v6423_v57 = vadd.f32 %v6422_v54, %v12388_v63  ;;  %v567_v37 = vld [vmem:[#allocation5 + $0xca8] sm:$0xff] }
 0x1ac   :  { %6708 = vmatmul.mubr.bf16.vlgmr.msra.gmra.mxu1 %v12348_v20  ;;  %6717 = vmatpush1.bf16.msra.mxu0 %v10563_v45  ;;  %v6424_v62 = vpop.f32.mrf.mxu0  ;;  %v6465_v4 = vpop.f32.mrf.mxu1  ;;  %v10652_v43 = vcombine.high %v563_v36, %v567_v37  ;;  %v427_v45 = vld [vmem:[#allocation5 + $0x848] sm:$0xff]  ;;  %v10651_v53 = vcombine.low %v563_v36, %v567_v37 }
 0x1ad   :  { %6758 = vmatpush1.bf16.msra.mxu1 %v10691_v46  ;;  %6718 = vmatprep.subr.bf16.mxu0 %v10556_v48  ;;  %v12397_v2 = vadd.f32 %v6463_v60, %v6423_v57  ;;  %v6425_v3 = vadd.f32 %v6424_v62, %v12391_v9  ;;  %v10675_v9 = vcombine.low %v587_v55, %v591_v56  ;;  %v431_v46 = vld [vmem:[#allocation5 + $0x868] sm:$0xff] }
 0x1ae   :  { %6759 = vmatprep.subr.bf16.mxu1 %v10684_v49  ;;  %6748 = vmatprep.mubr.bf16.mxu0 %v12350_v28  ;;  %v6426_v63 = vpop.f32.mrf.mxu0  ;;  %v6467_v14 = vpop.f32.mrf.mxu1  ;;  %v555_v48 = vld [vmem:[#allocation5 + $0xc48] sm:$0xff]  ;;  %v10516_v54 = vcombine.high %v427_v45, %v431_v46  ;;  %v10515_v62 = vcombine.low %v427_v45, %v431_v46 }
 0x1af   :  { %6789 = vmatprep.mubr.bf16.mxu1 %v12353_v31  ;;  %v12402_v13 = vadd.f32 %v6465_v4, %v6425_v3  ;;  %v559_v49 = vld [vmem:[#allocation5 + $0xc68] sm:$0xff]  ;;  %v10756_v14 = vcombine.high %v667_v8, %v671_v10 }
 0x1b0   :  { %6719 = vmatpush1.bf16.msra.mxu0 %v10555_v61  ;;  %v6427_v19 = vpop.f32.mrf.mxu0  ;;  %v6468_v22 = vpop.f32.mrf.mxu1  ;;  %v10644_v55 = vcombine.high %v555_v48, %v559_v49  ;;  %v419_v56 = vld [vmem:[#allocation5 + $0x808] sm:$0xff] }
 0x1b1   :  { %6760 = vmatpush1.bf16.msra.mxu1 %v10683_v0  ;;  %6720 = vmatprep.subr.bf16.mxu0 %v10548_v1  ;;  %v423_v57 = vld [vmem:[#allocation5 + $0x828] sm:$0xff]  ;;  %v10643_v0 = vcombine.low %v555_v48, %v559_v49 }
 0x1b2   :  { %6761 = vmatprep.subr.bf16.mxu1 %v10676_v5  ;;  %v547_v60 = vld [vmem:[#allocation5 + $0xc08] sm:$0xff]  ;;  %v10508_v1 = vcombine.high %v419_v56, %v423_v57  ;;  %v10507_v63 = vcombine.low %v419_v56, %v423_v57 }
 0x1b3   :  { %v551_v61 = vld [vmem:[#allocation5 + $0xc28] sm:$0xff] }
 0x1b4   :  { %6721 = vmatpush1.bf16.msra.mxu0 %v10547_v15  ;;  %v10636_v3 = vcombine.high %v547_v60, %v551_v61  ;;  %v539_v4 = vld [vmem:[#allocation5 + $0xbc8] sm:$0xff]  ;;  %v10635_v11 = vcombine.low %v547_v60, %v551_v61 }
 0x1b5   :  { %6762 = vmatpush1.bf16.msra.mxu1 %v10675_v9  ;;  %6722 = vmatprep.subr.bf16.mxu0 %v10540_v21  ;;  %v543_v5 = vld [vmem:[#allocation5 + $0xbe8] sm:$0xff] }
 0x1b6   :  { %6763 = vmatprep.subr.bf16.mxu1 %v10668_v23  ;;  %v10628_v12 = vcombine.high %v539_v4, %v543_v5  ;;  %v531_v15 = vld [vmem:[#allocation5 + $0xb88] sm:$0xff]  ;;  %v10627_v22 = vcombine.low %v539_v4, %v543_v5  ;;  %v10755_v23 = vcombine.low %v667_v8, %v671_v10 }
 0x1b7   :  { %v535_v19 = vld [vmem:[#allocation5 + $0xba8] sm:$0xff] }
 0x1b8   :  { %6723 = vmatpush1.bf16.msra.mxu0 %v10539_v29  ;;  %v659_v9 = vld [vmem:[#allocation5 + $0xf88] sm:$0xff]  ;;  %v10620_v24 = vcombine.high %v531_v15, %v535_v19 }
 0x1b9   :  { %6764 = vmatpush1.bf16.msra.mxu1 %v10667_v30  ;;  %6724 = vmatprep.subr.bf16.mxu0 %v10532_v32  ;;  %v663_v21 = vld [vmem:[#allocation5 + $0xfa8] sm:$0xff]  ;;  %v10619_v32 = vcombine.low %v531_v15, %v535_v19 }
 0x1ba   :  { %6765 = vmatprep.subr.bf16.mxu1 %v10660_v33  ;;  %v10748_v25 = vcombine.high %v659_v9, %v663_v21  ;;  %v523_v26 = vld [vmem:[#allocation5 + $0xb48] sm:$0xff]  ;;  %v10747_v33 = vcombine.low %v659_v9, %v663_v21 }
 0x1bb   :  { %v527_v27 = vld [vmem:[#allocation5 + $0xb68] sm:$0xff] }
 0x1bc   :  { %6725 = vmatpush1.bf16.msra.mxu0 %v10531_v38  ;;  %v651_v29 = vld [vmem:[#allocation5 + $0xf48] sm:$0xff]  ;;  %v10612_v34 = vcombine.high %v523_v26, %v527_v27 }
 0x1bd   :  { %6766 = vmatpush1.bf16.msra.mxu1 %v10659_v41  ;;  %6726 = vmatprep.subr.bf16.mxu0 %v10524_v42  ;;  %v655_v30 = vld [vmem:[#allocation5 + $0xf68] sm:$0xff]  ;;  %v10611_v42 = vcombine.low %v523_v26, %v527_v27 }
 0x1be   :  { %6767 = vmatprep.subr.bf16.mxu1 %v10652_v43  ;;  %v10740_v35 = vcombine.high %v651_v29, %v655_v30  ;;  %v515_v36 = vld [vmem:[#allocation5 + $0xb08] sm:$0xff]  ;;  %v10739_v43 = vcombine.low %v651_v29, %v655_v30 }
 0x1bf   :  { %v519_v37 = vld [vmem:[#allocation5 + $0xb28] sm:$0xff] }
 0x1c0   :  { %6727 = vmatpush1.bf16.msra.mxu0 %v10523_v52  ;;  %v643_v38 = vld [vmem:[#allocation5 + $0xf08] sm:$0xff]  ;;  %v10604_v45 = vcombine.high %v515_v36, %v519_v37 }
 0x1c1   :  { %6768 = vmatpush1.bf16.msra.mxu1 %v10651_v53  ;;  %6728 = vmatprep.subr.bf16.mxu0 %v10516_v54  ;;  %v647_v41 = vld [vmem:[#allocation5 + $0xf28] sm:$0xff]  ;;  %v10603_v54 = vcombine.low %v515_v36, %v519_v37 }
 0x1c2   :  { %6769 = vmatprep.subr.bf16.mxu1 %v10644_v55  ;;  %v10732_v46 = vcombine.high %v643_v38, %v647_v41  ;;  %v507_v48 = vld [vmem:[#allocation5 + $0xac8] sm:$0xff]  ;;  %v10731_v55 = vcombine.low %v643_v38, %v647_v41 }
 0x1c3   :  { %v511_v49 = vld [vmem:[#allocation5 + $0xae8] sm:$0xff] }
 0x1c4   :  { %6729 = vmatpush1.bf16.msra.mxu0 %v10515_v62  ;;  %v635_v52 = vld [vmem:[#allocation5 + $0xec8] sm:$0xff]  ;;  %v10596_v56 = vcombine.high %v507_v48, %v511_v49 }
 0x1c5   :  { %6770 = vmatpush1.bf16.msra.mxu1 %v10643_v0  ;;  %6730 = vmatprep.subr.bf16.mxu0 %v10508_v1  ;;  %v639_v53 = vld [vmem:[#allocation5 + $0xee8] sm:$0xff]  ;;  %v10595_v1 = vcombine.low %v507_v48, %v511_v49 }
 0x1c6   :  { %6771 = vmatprep.subr.bf16.mxu1 %v10636_v3  ;;  %v10724_v57 = vcombine.high %v635_v52, %v639_v53  ;;  %v499_v60 = vld [vmem:[#allocation5 + $0xa88] sm:$0xff]  ;;  %v10723_v3 = vcombine.low %v635_v52, %v639_v53 }
 0x1c7   :  { %v503_v61 = vld [vmem:[#allocation5 + $0xaa8] sm:$0xff] }
 0x1c8   :  { %6731 = vmatpush1.bf16.msra.mxu0 %v10507_v63  ;;  %v627_v62 = vld [vmem:[#allocation5 + $0xe88] sm:$0xff]  ;;  %v10588_v4 = vcombine.high %v499_v60, %v503_v61 }
 0x1c9   :  { %6772 = vmatpush1.bf16.msra.mxu1 %v10635_v11  ;;  %6732 = vmatprep.subr.bf16.mxu0 %v10628_v12  ;;  %v631_v0 = vld [vmem:[#allocation5 + $0xea8] sm:$0xff]  ;;  %v10587_v12 = vcombine.low %v499_v60, %v503_v61 }
 0x1ca   :  { %6773 = vmatprep.subr.bf16.mxu1 %v10756_v14  ;;  %v10716_v5 = vcombine.high %v627_v62, %v631_v0  ;;  %v491_v8 = vld [vmem:[#allocation5 + $0xa48] sm:$0xff]  ;;  %v10715_v14 = vcombine.low %v627_v62, %v631_v0 }
 0x1cb   :  { %v495_v10 = vld [vmem:[#allocation5 + $0xa68] sm:$0xff] }
 0x1cc   :  { %6733 = vmatpush2.bf16.msra.mxu0 %v10627_v22  ;;  %v619_v63 = vld [vmem:[#allocation5 + $0xe48] sm:$0xff]  ;;  %v10580_v15 = vcombine.high %v491_v8, %v495_v10 }
 0x1cd   :  { %6774 = vmatpush2.bf16.msra.mxu1 %v10755_v23  ;;  %6734 = vmatprep.subr.bf16.mxu0 %v10620_v24  ;;  %v623_v11 = vld [vmem:[#allocation5 + $0xe68] sm:$0xff]  ;;  %v10579_v24 = vcombine.low %v491_v8, %v495_v10 }
 0x1ce   :  { %6775 = vmatprep.subr.bf16.mxu1 %v10748_v25  ;;  %v10708_v19 = vcombine.high %v619_v63, %v623_v11  ;;  %v483_v9 = vld [vmem:[#allocation5 + $0xa08] sm:$0xff]  ;;  %v10707_v25 = vcombine.low %v619_v63, %v623_v11 }
 0x1cf   :  { %v487_v21 = vld [vmem:[#allocation5 + $0xa28] sm:$0xff] }
 0x1d0   :  { %6735 = vmatpush2.bf16.msra.mxu0 %v10619_v32  ;;  %v611_v22 = vld [vmem:[#allocation5 + $0xe08] sm:$0xff]  ;;  %v10572_v26 = vcombine.high %v483_v9, %v487_v21 }
 0x1d1   :  { %6776 = vmatpush2.bf16.msra.mxu1 %v10747_v33  ;;  %6736 = vmatprep.subr.bf16.mxu0 %v10612_v34  ;;  %v615_v23 = vld [vmem:[#allocation5 + $0xe28] sm:$0xff]  ;;  %v10571_v34 = vcombine.low %v483_v9, %v487_v21 }
 0x1d2   :  { %6777 = vmatprep.subr.bf16.mxu1 %v10740_v35  ;;  %v10700_v27 = vcombine.high %v611_v22, %v615_v23  ;;  %v731_v29 = vld [vmem:[#allocation5 + $0x11c8] sm:$0xff]  ;;  %v10699_v35 = vcombine.low %v611_v22, %v615_v23 }
 0x1d3   :  { %v735_v30 = vld [vmem:[#allocation5 + $0x11e8] sm:$0xff] }
 0x1d4   :  { %6737 = vmatpush2.bf16.msra.mxu0 %v10611_v42  ;;  %v859_v32 = vld [vmem:[#allocation5 + $0x15c8] sm:$0xff]  ;;  %v10820_v36 = vcombine.high %v731_v29, %v735_v30 }
 0x1d5   :  { %6778 = vmatpush2.bf16.msra.mxu1 %v10739_v43  ;;  %6738 = vmatprep.subr.bf16.mxu0 %v10604_v45  ;;  %v863_v33 = vld [vmem:[#allocation5 + $0x15e8] sm:$0xff]  ;;  %v10819_v45 = vcombine.low %v731_v29, %v735_v30 }
 0x1d6   :  { %6779 = vmatprep.subr.bf16.mxu1 %v10732_v46  ;;  %v10948_v37 = vcombine.high %v859_v32, %v863_v33  ;;  %v723_v38 = vld [vmem:[#allocation5 + $0x1188] sm:$0xff]  ;;  %v10947_v46 = vcombine.low %v859_v32, %v863_v33 }
 0x1d7   :  { %v727_v41 = vld [vmem:[#allocation5 + $0x11a8] sm:$0xff] }
 0x1d8   :  { %6739 = vmatpush2.bf16.msra.mxu0 %v10603_v54  ;;  %v851_v42 = vld [vmem:[#allocation5 + $0x1588] sm:$0xff]  ;;  %v10812_v48 = vcombine.high %v723_v38, %v727_v41  ;;  %v10811_v61 = vcombine.low %v723_v38, %v727_v41 }
 0x1d9   :  { %6780 = vmatpush2.bf16.msra.mxu1 %v10731_v55  ;;  %6740 = vmatprep.subr.bf16.mxu0 %v10596_v56  ;;  %v855_v43 = vld [vmem:[#allocation5 + $0x15a8] sm:$0xff] }
 0x1da   :  { %6781 = vmatprep.subr.bf16.mxu1 %v10724_v57  ;;  %v10940_v49 = vcombine.high %v851_v42, %v855_v43  ;;  %v715_v52 = vld [vmem:[#allocation5 + $0x1148] sm:$0xff]  ;;  %v10939_v0 = vcombine.low %v851_v42, %v855_v43 }
 0x1db   :  { %v719_v53 = vld [vmem:[#allocation5 + $0x1168] sm:$0xff] }
 0x1dc   :  { %6741 = vmatpush2.bf16.msra.mxu0 %v10595_v1  ;;  %v843_v55 = vld [vmem:[#allocation5 + $0x1548] sm:$0xff]  ;;  %v10804_v1 = vcombine.high %v715_v52, %v719_v53 }
 0x1dd   :  { %6782 = vmatpush2.bf16.msra.mxu1 %v10723_v3  ;;  %6742 = vmatprep.subr.bf16.mxu0 %v10588_v4  ;;  %v847_v56 = vld [vmem:[#allocation5 + $0x1568] sm:$0xff] }
 0x1de   :  { %6783 = vmatprep.subr.bf16.mxu1 %v10716_v5  ;;  %v10932_v8 = vcombine.high %v843_v55, %v847_v56  ;;  %v707_v10 = vld [vmem:[#allocation5 + $0x1108] sm:$0xff] }
 0x1df   :  { %v711_v63 = vld [vmem:[#allocation5 + $0x1128] sm:$0xff] }
 0x1e0   :  { %6743 = vmatpush2.bf16.msra.mxu0 %v10587_v12  ;;  %v835_v11 = vld [vmem:[#allocation5 + $0x1508] sm:$0xff]  ;;  %v10796_v21 = vcombine.high %v707_v10, %v711_v63  ;;  %v10795_v29 = vcombine.low %v707_v10, %v711_v63 }
 0x1e1   :  { %6784 = vmatpush2.bf16.msra.mxu1 %v10715_v14  ;;  %6744 = vmatprep.subr.bf16.mxu0 %v10580_v15  ;;  %v839_v12 = vld [vmem:[#allocation5 + $0x1528] sm:$0xff] }
 0x1e2   :  { %6785 = vmatprep.subr.bf16.mxu1 %v10708_v19  ;;  %v10803_v19 = vcombine.low %v715_v52, %v719_v53  ;;  %v10924_v23 = vcombine.high %v835_v11, %v839_v12  ;;  %v10923_v30 = vcombine.low %v835_v11, %v839_v12  ;;  %v923_v10 = vld [vmem:[#allocation5 + $0x17c8] sm:$0xff] }
 0x1e3   :  { %v927_v63 = vld [vmem:[#allocation5 + $0x17e8] sm:$0xff] }
 0x1e4   :  { %6745 = vmatpush2.bf16.msra.mxu0 %v10579_v24  ;;  %v699_v24 = vld [vmem:[#allocation5 + $0x10c8] sm:$0xff] }
 0x1e5   :  { %6786 = vmatpush2.bf16.msra.mxu1 %v10707_v25  ;;  %6746 = vmatprep.subr.bf16.mxu0 %v10572_v26  ;;  %v703_v25 = vld [vmem:[#allocation5 + $0x10e8] sm:$0xff] }
 0x1e6   :  { %6787 = vmatprep.subr.bf16.mxu1 %v10700_v27  ;;  %v827_v26 = vld [vmem:[#allocation5 + $0x14c8] sm:$0xff]  ;;  %v10788_v32 = vcombine.high %v699_v24, %v703_v25  ;;  %v10787_v38 = vcombine.low %v699_v24, %v703_v25 }
 0x1e7   :  { %v831_v27 = vld [vmem:[#allocation5 + $0x14e8] sm:$0xff] }
 0x1e8   :  { %6747 = vmatpush2.bf16.msra.mxu0 %v10571_v34  ;;  %v10916_v33 = vcombine.high %v827_v26, %v831_v27  ;;  %v691_v34 = vld [vmem:[#allocation5 + $0x1088] sm:$0xff]  ;;  %v10915_v41 = vcombine.low %v827_v26, %v831_v27 }
 0x1e9   :  { %6788 = vmatpush2.bf16.msra.mxu1 %v10699_v35  ;;  %6798 = vmatprep.subr.bf16.mxu0 %v10820_v36  ;;  %v695_v35 = vld [vmem:[#allocation5 + $0x10a8] sm:$0xff] }
 0x1ea   :  { %6839 = vmatprep.subr.bf16.mxu1 %v10948_v37  ;;  %v819_v36 = vld [vmem:[#allocation5 + $0x1488] sm:$0xff]  ;;  %v10780_v42 = vcombine.high %v691_v34, %v695_v35  ;;  %v10779_v52 = vcombine.low %v691_v34, %v695_v35 }
 0x1eb   :  { %v6504_v54 = vpop.f32.mrf.mxu0  ;;  %6749 = vmatmul.mubr.bf16.vlgmr.msra.gmra.mxu0 %v12358_v39  ;;  %v6545_v60 = vpop.f32.mrf.mxu1  ;;  %v823_v37 = vld [vmem:[#allocation5 + $0x14a8] sm:$0xff] }
 0x1ec   :  { %v6505_v57 = vadd.f32 %v6504_v54, %v12397_v2  ;;  %6790 = vmatmul.mubr.bf16.vlgmr.msra.gmra.mxu1 %v12360_v40  ;;  %6799 = vmatpush1.bf16.msra.mxu0 %v10819_v45  ;;  %v10908_v43 = vcombine.high %v819_v36, %v823_v37  ;;  %v683_v45 = vld [vmem:[#allocation5 + $0x1048] sm:$0xff]  ;;  %v10907_v53 = vcombine.low %v819_v36, %v823_v37 }
 0x1ed   :  { %6840 = vmatpush1.bf16.msra.mxu1 %v10947_v46  ;;  %v6506_v62 = vpop.f32.mrf.mxu0  ;;  %6800 = vmatprep.subr.bf16.mxu0 %v10812_v48  ;;  %v6547_v5 = vpop.f32.mrf.mxu1  ;;  %v687_v46 = vld [vmem:[#allocation5 + $0x1068] sm:$0xff] }
 0x1ee   :  { %v12407_v3 = vadd.f32 %v6545_v60, %v6505_v57  ;;  %v6507_v4 = vadd.f32 %v6506_v62, %v12402_v13  ;;  %6841 = vmatprep.subr.bf16.mxu1 %v10940_v49  ;;  %6830 = vmatprep.mubr.bf16.mxu0 %v12362_v50  ;;  %v10931_v13 = vcombine.low %v843_v55, %v847_v56  ;;  %v811_v48 = vld [vmem:[#allocation5 + $0x1448] sm:$0xff] }
 0x1ef   :  { %v6508_v2 = vpop.f32.mrf.mxu0  ;;  %6871 = vmatprep.mubr.bf16.mxu1 %v12365_v51  ;;  %v6549_v15 = vpop.f32.mrf.mxu1  ;;  %v815_v49 = vld [vmem:[#allocation5 + $0x1468] sm:$0xff]  ;;  %v10772_v54 = vcombine.high %v683_v45, %v687_v46  ;;  %v10771_v62 = vcombine.low %v683_v45, %v687_v46 }
 0x1f0   :  { %v12412_v14 = vadd.f32 %v6547_v5, %v6507_v4  ;;  %6801 = vmatpush1.bf16.msra.mxu0 %v10811_v61  ;;  %v10900_v55 = vcombine.high %v811_v48, %v815_v49  ;;  %v675_v56 = vld [vmem:[#allocation5 + $0x1008] sm:$0xff]  ;;  %v11012_v15 = vcombine.high %v923_v10, %v927_v63 }
 0x1f1   :  { %6842 = vmatpush1.bf16.msra.mxu1 %v10939_v0  ;;  %v6509_v9 = vpop.f32.mrf.mxu0  ;;  %6802 = vmatprep.subr.bf16.mxu0 %v10804_v1  ;;  %v6550_v22 = vpop.f32.mrf.mxu1  ;;  %v679_v57 = vld [vmem:[#allocation5 + $0x1028] sm:$0xff]  ;;  %v10899_v0 = vcombine.low %v811_v48, %v815_v49 }
 0x1f2   :  { %6843 = vmatprep.subr.bf16.mxu1 %v10932_v8  ;;  %v803_v60 = vld [vmem:[#allocation5 + $0x1408] sm:$0xff]  ;;  %v10764_v1 = vcombine.high %v675_v56, %v679_v57  ;;  %v10763_v2 = vcombine.low %v675_v56, %v679_v57 }
 0x1f3   :  { %v807_v61 = vld [vmem:[#allocation5 + $0x1428] sm:$0xff] }
 0x1f4   :  { %6803 = vmatpush1.bf16.msra.mxu0 %v10803_v19  ;;  %v10892_v4 = vcombine.high %v803_v60, %v807_v61  ;;  %v795_v5 = vld [vmem:[#allocation5 + $0x13c8] sm:$0xff]  ;;  %v10891_v11 = vcombine.low %v803_v60, %v807_v61 }
 0x1f5   :  { %6844 = vmatpush1.bf16.msra.mxu1 %v10931_v13  ;;  %6804 = vmatprep.subr.bf16.mxu0 %v10796_v21  ;;  %v799_v8 = vld [vmem:[#allocation5 + $0x13e8] sm:$0xff] }
 0x1f6   :  { %6845 = vmatprep.subr.bf16.mxu1 %v10924_v23  ;;  %v10884_v12 = vcombine.high %v795_v5, %v799_v8  ;;  %v787_v19 = vld [vmem:[#allocation5 + $0x1388] sm:$0xff]  ;;  %v10883_v22 = vcombine.low %v795_v5, %v799_v8  ;;  %v11011_v23 = vcombine.low %v923_v10, %v927_v63 }
 0x1f7   :  { %v791_v9 = vld [vmem:[#allocation5 + $0x13a8] sm:$0xff] }
 0x1f8   :  { %6805 = vmatpush1.bf16.msra.mxu0 %v10795_v29  ;;  %v915_v13 = vld [vmem:[#allocation5 + $0x1788] sm:$0xff]  ;;  %v10876_v24 = vcombine.high %v787_v19, %v791_v9 }
 0x1f9   :  { %6846 = vmatpush1.bf16.msra.mxu1 %v10923_v30  ;;  %6806 = vmatprep.subr.bf16.mxu0 %v10788_v32  ;;  %v919_v21 = vld [vmem:[#allocation5 + $0x17a8] sm:$0xff]  ;;  %v10875_v32 = vcombine.low %v787_v19, %v791_v9 }
 0x1fa   :  { %6847 = vmatprep.subr.bf16.mxu1 %v10916_v33  ;;  %v11004_v25 = vcombine.high %v915_v13, %v919_v21  ;;  %v779_v26 = vld [vmem:[#allocation5 + $0x1348] sm:$0xff]  ;;  %v11003_v33 = vcombine.low %v915_v13, %v919_v21 }
 0x1fb   :  { %v783_v27 = vld [vmem:[#allocation5 + $0x1368] sm:$0xff] }
 0x1fc   :  { %6807 = vmatpush1.bf16.msra.mxu0 %v10787_v38  ;;  %v907_v29 = vld [vmem:[#allocation5 + $0x1748] sm:$0xff]  ;;  %v10868_v34 = vcombine.high %v779_v26, %v783_v27 }
 0x1fd   :  { %6848 = vmatpush1.bf16.msra.mxu1 %v10915_v41  ;;  %6808 = vmatprep.subr.bf16.mxu0 %v10780_v42  ;;  %v911_v30 = vld [vmem:[#allocation5 + $0x1768] sm:$0xff]  ;;  %v10867_v42 = vcombine.low %v779_v26, %v783_v27 }
 0x1fe   :  { %6849 = vmatprep.subr.bf16.mxu1 %v10908_v43  ;;  %v10996_v35 = vcombine.high %v907_v29, %v911_v30  ;;  %v771_v36 = vld [vmem:[#allocation5 + $0x1308] sm:$0xff]  ;;  %v10995_v43 = vcombine.low %v907_v29, %v911_v30 }
 0x1ff   :  { %v775_v37 = vld [vmem:[#allocation5 + $0x1328] sm:$0xff] }
 0x200   :  { %6809 = vmatpush1.bf16.msra.mxu0 %v10779_v52  ;;  %v899_v38 = vld [vmem:[#allocation5 + $0x1708] sm:$0xff]  ;;  %v10860_v45 = vcombine.high %v771_v36, %v775_v37 }
 0x201   :  { %6850 = vmatpush1.bf16.msra.mxu1 %v10907_v53  ;;  %6810 = vmatprep.subr.bf16.mxu0 %v10772_v54  ;;  %v903_v41 = vld [vmem:[#allocation5 + $0x1728] sm:$0xff]  ;;  %v10859_v54 = vcombine.low %v771_v36, %v775_v37 }
 0x202   :  { %6851 = vmatprep.subr.bf16.mxu1 %v10900_v55  ;;  %v10988_v46 = vcombine.high %v899_v38, %v903_v41  ;;  %v763_v48 = vld [vmem:[#allocation5 + $0x12c8] sm:$0xff]  ;;  %v10987_v55 = vcombine.low %v899_v38, %v903_v41 }
 0x203   :  { %v767_v49 = vld [vmem:[#allocation5 + $0x12e8] sm:$0xff] }
 0x204   :  { %6811 = vmatpush1.bf16.msra.mxu0 %v10771_v62  ;;  %v891_v52 = vld [vmem:[#allocation5 + $0x16c8] sm:$0xff]  ;;  %v10852_v56 = vcombine.high %v763_v48, %v767_v49 }
 0x205   :  { %6852 = vmatpush1.bf16.msra.mxu1 %v10899_v0  ;;  %6812 = vmatprep.subr.bf16.mxu0 %v10764_v1  ;;  %v895_v53 = vld [vmem:[#allocation5 + $0x16e8] sm:$0xff]  ;;  %v10851_v1 = vcombine.low %v763_v48, %v767_v49 }
 0x206   :  { %6853 = vmatprep.subr.bf16.mxu1 %v10892_v4  ;;  %v10980_v57 = vcombine.high %v891_v52, %v895_v53  ;;  %v755_v60 = vld [vmem:[#allocation5 + $0x1288] sm:$0xff]  ;;  %v10979_v4 = vcombine.low %v891_v52, %v895_v53 }
 0x207   :  { %v759_v61 = vld [vmem:[#allocation5 + $0x12a8] sm:$0xff] }
 0x208   :  { %6813 = vmatpush1.bf16.msra.mxu0 %v10763_v2  ;;  %v883_v62 = vld [vmem:[#allocation5 + $0x1688] sm:$0xff]  ;;  %v10844_v5 = vcombine.high %v755_v60, %v759_v61 }
 0x209   :  { %6854 = vmatpush1.bf16.msra.mxu1 %v10891_v11  ;;  %6814 = vmatprep.subr.bf16.mxu0 %v10884_v12  ;;  %v887_v0 = vld [vmem:[#allocation5 + $0x16a8] sm:$0xff]  ;;  %v10843_v12 = vcombine.low %v755_v60, %v759_v61 }
 0x20a   :  { %6855 = vmatprep.subr.bf16.mxu1 %v11012_v15  ;;  %v10972_v8 = vcombine.high %v883_v62, %v887_v0  ;;  %v747_v10 = vld [vmem:[#allocation5 + $0x1248] sm:$0xff]  ;;  %v10971_v15 = vcombine.low %v883_v62, %v887_v0 }
 0x20b   :  { %v751_v63 = vld [vmem:[#allocation5 + $0x1268] sm:$0xff] }
 0x20c   :  { %6815 = vmatpush2.bf16.msra.mxu0 %v10883_v22  ;;  %v875_v2 = vld [vmem:[#allocation5 + $0x1648] sm:$0xff]  ;;  %v10836_v19 = vcombine.high %v747_v10, %v751_v63 }
 0x20d   :  { %6856 = vmatpush2.bf16.msra.mxu1 %v11011_v23  ;;  %6816 = vmatprep.subr.bf16.mxu0 %v10876_v24  ;;  %v879_v11 = vld [vmem:[#allocation5 + $0x1668] sm:$0xff]  ;;  %v10835_v24 = vcombine.low %v747_v10, %v751_v63 }
 0x20e   :  { %6857 = vmatprep.subr.bf16.mxu1 %v11004_v25  ;;  %v10964_v9 = vcombine.high %v875_v2, %v879_v11  ;;  %v739_v13 = vld [vmem:[#allocation5 + $0x1208] sm:$0xff]  ;;  %v10963_v25 = vcombine.low %v875_v2, %v879_v11 }
 0x20f   :  { %v743_v21 = vld [vmem:[#allocation5 + $0x1228] sm:$0xff] }
 0x210   :  { %6817 = vmatpush2.bf16.msra.mxu0 %v10875_v32  ;;  %v867_v22 = vld [vmem:[#allocation5 + $0x1608] sm:$0xff]  ;;  %v10828_v26 = vcombine.high %v739_v13, %v743_v21 }
 0x211   :  { %6858 = vmatpush2.bf16.msra.mxu1 %v11003_v33  ;;  %6818 = vmatprep.subr.bf16.mxu0 %v10868_v34  ;;  %v871_v23 = vld [vmem:[#allocation5 + $0x1628] sm:$0xff]  ;;  %v10827_v34 = vcombine.low %v739_v13, %v743_v21 }
 0x212   :  { %6859 = vmatprep.subr.bf16.mxu1 %v10996_v35  ;;  %v10956_v27 = vcombine.high %v867_v22, %v871_v23  ;;  %v987_v29 = vld [vmem:[#allocation5 + $0x19c8] sm:$0xff]  ;;  %v10955_v35 = vcombine.low %v867_v22, %v871_v23 }
 0x213   :  { %v991_v30 = vld [vmem:[#allocation5 + $0x19e8] sm:$0xff] }
 0x214   :  { %6819 = vmatpush2.bf16.msra.mxu0 %v10867_v42  ;;  %v1115_v32 = vld [vmem:[#allocation5 + $0x1dc8] sm:$0xff]  ;;  %v11076_v36 = vcombine.high %v987_v29, %v991_v30 }
 0x215   :  { %6860 = vmatpush2.bf16.msra.mxu1 %v10995_v43  ;;  %6820 = vmatprep.subr.bf16.mxu0 %v10860_v45  ;;  %v1119_v33 = vld [vmem:[#allocation5 + $0x1de8] sm:$0xff]  ;;  %v11075_v45 = vcombine.low %v987_v29, %v991_v30 }
 0x216   :  { %6861 = vmatprep.subr.bf16.mxu1 %v10988_v46  ;;  %v11204_v37 = vcombine.high %v1115_v32, %v1119_v33  ;;  %v979_v38 = vld [vmem:[#allocation5 + $0x1988] sm:$0xff]  ;;  %v11203_v46 = vcombine.low %v1115_v32, %v1119_v33 }
 0x217   :  { %v983_v41 = vld [vmem:[#allocation5 + $0x19a8] sm:$0xff] }
 0x218   :  { %6821 = vmatpush2.bf16.msra.mxu0 %v10859_v54  ;;  %v1107_v42 = vld [vmem:[#allocation5 + $0x1d88] sm:$0xff]  ;;  %v11068_v48 = vcombine.high %v979_v38, %v983_v41  ;;  %v11067_v61 = vcombine.low %v979_v38, %v983_v41 }
 0x219   :  { %6862 = vmatpush2.bf16.msra.mxu1 %v10987_v55  ;;  %6822 = vmatprep.subr.bf16.mxu0 %v10852_v56  ;;  %v1111_v43 = vld [vmem:[#allocation5 + $0x1da8] sm:$0xff] }
 0x21a   :  { %6863 = vmatprep.subr.bf16.mxu1 %v10980_v57  ;;  %v11196_v49 = vcombine.high %v1107_v42, %v1111_v43  ;;  %v971_v52 = vld [vmem:[#allocation5 + $0x1948] sm:$0xff]  ;;  %v11195_v0 = vcombine.low %v1107_v42, %v1111_v43 }
 0x21b   :  { %v975_v53 = vld [vmem:[#allocation5 + $0x1968] sm:$0xff] }
 0x21c   :  { %6823 = vmatpush2.bf16.msra.mxu0 %v10851_v1  ;;  %v1099_v55 = vld [vmem:[#allocation5 + $0x1d48] sm:$0xff]  ;;  %v11060_v1 = vcombine.high %v971_v52, %v975_v53 }
 0x21d   :  { %6864 = vmatpush2.bf16.msra.mxu1 %v10979_v4  ;;  %6824 = vmatprep.subr.bf16.mxu0 %v10844_v5  ;;  %v1103_v56 = vld [vmem:[#allocation5 + $0x1d68] sm:$0xff] }
 0x21e   :  { %6865 = vmatprep.subr.bf16.mxu1 %v10972_v8  ;;  %v11188_v10 = vcombine.high %v1099_v55, %v1103_v56  ;;  %v963_v63 = vld [vmem:[#allocation5 + $0x1908] sm:$0xff] }
 0x21f   :  { %v967_v2 = vld [vmem:[#allocation5 + $0x1928] sm:$0xff] }
 0x220   :  { %6825 = vmatpush2.bf16.msra.mxu0 %v10843_v12  ;;  %v1091_v11 = vld [vmem:[#allocation5 + $0x1d08] sm:$0xff]  ;;  %v11052_v21 = vcombine.high %v963_v63, %v967_v2  ;;  %v11051_v29 = vcombine.low %v963_v63, %v967_v2 }
 0x221   :  { %6866 = vmatpush2.bf16.msra.mxu1 %v10971_v15  ;;  %6826 = vmatprep.subr.bf16.mxu0 %v10836_v19  ;;  %v1095_v12 = vld [vmem:[#allocation5 + $0x1d28] sm:$0xff] }
 0x222   :  { %6867 = vmatprep.subr.bf16.mxu1 %v10964_v9  ;;  %v11059_v9 = vcombine.low %v971_v52, %v975_v53  ;;  %v11180_v23 = vcombine.high %v1091_v11, %v1095_v12  ;;  %v11179_v30 = vcombine.low %v1091_v11, %v1095_v12  ;;  %v1179_v63 = vld [vmem:[#allocation5 + $0x1fc8] sm:$0xff] }
 0x223   :  { %v1183_v2 = vld [vmem:[#allocation5 + $0x1fe8] sm:$0xff] }
 0x224   :  { %6827 = vmatpush2.bf16.msra.mxu0 %v10835_v24  ;;  %v955_v24 = vld [vmem:[#allocation5 + $0x18c8] sm:$0xff] }
 0x225   :  { %6868 = vmatpush2.bf16.msra.mxu1 %v10963_v25  ;;  %6828 = vmatprep.subr.bf16.mxu0 %v10828_v26  ;;  %v959_v25 = vld [vmem:[#allocation5 + $0x18e8] sm:$0xff] }
 0x226   :  { %6869 = vmatprep.subr.bf16.mxu1 %v10956_v27  ;;  %v1083_v26 = vld [vmem:[#allocation5 + $0x1cc8] sm:$0xff]  ;;  %v11044_v32 = vcombine.high %v955_v24, %v959_v25  ;;  %v11043_v38 = vcombine.low %v955_v24, %v959_v25 }
 0x227   :  { %v1087_v27 = vld [vmem:[#allocation5 + $0x1ce8] sm:$0xff] }
 0x228   :  { %6829 = vmatpush2.bf16.msra.mxu0 %v10827_v34  ;;  %v11172_v33 = vcombine.high %v1083_v26, %v1087_v27  ;;  %v947_v34 = vld [vmem:[#allocation5 + $0x1888] sm:$0xff]  ;;  %v11171_v41 = vcombine.low %v1083_v26, %v1087_v27 }
 0x229   :  { %6870 = vmatpush2.bf16.msra.mxu1 %v10955_v35  ;;  %6880 = vmatprep.subr.bf16.mxu0 %v11076_v36  ;;  %v951_v35 = vld [vmem:[#allocation5 + $0x18a8] sm:$0xff] }
 0x22a   :  { %6921 = vmatprep.subr.bf16.mxu1 %v11204_v37  ;;  %v1075_v36 = vld [vmem:[#allocation5 + $0x1c88] sm:$0xff]  ;;  %v11036_v42 = vcombine.high %v947_v34, %v951_v35  ;;  %v11035_v52 = vcombine.low %v947_v34, %v951_v35 }
 0x22b   :  { %v6586_v54 = vpop.f32.mrf.mxu0  ;;  %6831 = vmatmul.mubr.bf16.vlgmr.msra.gmra.mxu0 %v12370_v6  ;;  %v1079_v37 = vld [vmem:[#allocation5 + $0x1ca8] sm:$0xff] }
 0x22c   :  { %v6587_v57 = vadd.f32 %v6586_v54, %v12407_v3  ;;  %v6627_v60 = vpop.f32.mrf.mxu1  ;;  %6872 = vmatmul.mubr.bf16.vlgmr.msra.gmra.mxu1 %v12372_v7  ;;  %6881 = vmatpush1.bf16.msra.mxu0 %v11075_v45  ;;  %v11164_v43 = vcombine.high %v1075_v36, %v1079_v37  ;;  %v939_v45 = vld [vmem:[#allocation5 + $0x1848] sm:$0xff]  ;;  %v11163_v53 = vcombine.low %v1075_v36, %v1079_v37 }
 0x22d   :  { %6922 = vmatpush1.bf16.msra.mxu1 %v11203_v46  ;;  %v6588_v62 = vpop.f32.mrf.mxu0  ;;  %6882 = vmatprep.subr.bf16.mxu0 %v11068_v48  ;;  %v943_v46 = vld [vmem:[#allocation5 + $0x1868] sm:$0xff] }
 0x22e   :  { %v12417_v4 = vadd.f32 %v6627_v60, %v6587_v57  ;;  %v6589_v5 = vadd.f32 %v6588_v62, %v12412_v14  ;;  %v6629_v8 = vpop.f32.mrf.mxu1  ;;  %6923 = vmatprep.subr.bf16.mxu1 %v11196_v49  ;;  %6912 = vmatprep.mubr.bf16.mxu0 %v12374_v17  ;;  %v11187_v14 = vcombine.low %v1099_v55, %v1103_v56  ;;  %v1067_v48 = vld [vmem:[#allocation5 + $0x1c48] sm:$0xff] }
 0x22f   :  { %v6590_v3 = vpop.f32.mrf.mxu0  ;;  %6953 = vmatprep.mubr.bf16.mxu1 %v12377_v18  ;;  %v1071_v49 = vld [vmem:[#allocation5 + $0x1c68] sm:$0xff]  ;;  %v11028_v54 = vcombine.high %v939_v45, %v943_v46  ;;  %v11027_v62 = vcombine.low %v939_v45, %v943_v46 }
 0x230   :  { %v12422_v15 = vadd.f32 %v6629_v8, %v6589_v5  ;;  %v6631_v19 = vpop.f32.mrf.mxu1  ;;  %6883 = vmatpush1.bf16.msra.mxu0 %v11067_v61  ;;  %v11156_v55 = vcombine.high %v1067_v48, %v1071_v49  ;;  %v931_v56 = vld [vmem:[#allocation5 + $0x1808] sm:$0xff] }
 0x231   :  { %6924 = vmatpush1.bf16.msra.mxu1 %v11195_v0  ;;  %v6591_v13 = vpop.f32.mrf.mxu0  ;;  %6884 = vmatprep.subr.bf16.mxu0 %v11060_v1  ;;  %v935_v57 = vld [vmem:[#allocation5 + $0x1828] sm:$0xff]  ;;  %v11155_v0 = vcombine.low %v1067_v48, %v1071_v49  ;;  %v11268_v19 = vcombine.high %v1179_v63, %v1183_v2 }
 0x232   :  { %v6632_v22 = vpop.f32.mrf.mxu1  ;;  %6925 = vmatprep.subr.bf16.mxu1 %v11188_v10  ;;  %v1059_v60 = vld [vmem:[#allocation5 + $0x1c08] sm:$0xff]  ;;  %v11020_v1 = vcombine.high %v931_v56, %v935_v57  ;;  %v11019_v3 = vcombine.low %v931_v56, %v935_v57 }
 0x233   :  { %v1063_v61 = vld [vmem:[#allocation5 + $0x1c28] sm:$0xff] }
 0x234   :  { %6885 = vmatpush1.bf16.msra.mxu0 %v11059_v9  ;;  %v11148_v5 = vcombine.high %v1059_v60, %v1063_v61  ;;  %v1051_v8 = vld [vmem:[#allocation5 + $0x1bc8] sm:$0xff]  ;;  %v11147_v11 = vcombine.low %v1059_v60, %v1063_v61 }
 0x235   :  { %6926 = vmatpush1.bf16.msra.mxu1 %v11187_v14  ;;  %6886 = vmatprep.subr.bf16.mxu0 %v11052_v21  ;;  %v1055_v10 = vld [vmem:[#allocation5 + $0x1be8] sm:$0xff] }
 0x236   :  { %6927 = vmatprep.subr.bf16.mxu1 %v11180_v23  ;;  %v11140_v12 = vcombine.high %v1051_v8, %v1055_v10  ;;  %v1043_v9 = vld [vmem:[#allocation5 + $0x1b88] sm:$0xff]  ;;  %v11139_v22 = vcombine.low %v1051_v8, %v1055_v10  ;;  %v11267_v23 = vcombine.low %v1179_v63, %v1183_v2 }
 0x237   :  { %v1047_v13 = vld [vmem:[#allocation5 + $0x1ba8] sm:$0xff] }
 0x238   :  { %6887 = vmatpush1.bf16.msra.mxu0 %v11051_v29  ;;  %v1171_v14 = vld [vmem:[#allocation5 + $0x1f88] sm:$0xff]  ;;  %v11132_v24 = vcombine.high %v1043_v9, %v1047_v13 }
 0x239   :  { %6928 = vmatpush1.bf16.msra.mxu1 %v11179_v30  ;;  %6888 = vmatprep.subr.bf16.mxu0 %v11044_v32  ;;  %v1175_v21 = vld [vmem:[#allocation5 + $0x1fa8] sm:$0xff]  ;;  %v11131_v32 = vcombine.low %v1043_v9, %v1047_v13 }
 0x23a   :  { %6929 = vmatprep.subr.bf16.mxu1 %v11172_v33  ;;  %v11260_v25 = vcombine.high %v1171_v14, %v1175_v21  ;;  %v1035_v26 = vld [vmem:[#allocation5 + $0x1b48] sm:$0xff]  ;;  %v11259_v33 = vcombine.low %v1171_v14, %v1175_v21 }
 0x23b   :  { %v1039_v27 = vld [vmem:[#allocation5 + $0x1b68] sm:$0xff] }
 0x23c   :  { %6889 = vmatpush1.bf16.msra.mxu0 %v11043_v38  ;;  %v1163_v29 = vld [vmem:[#allocation5 + $0x1f48] sm:$0xff]  ;;  %v11124_v34 = vcombine.high %v1035_v26, %v1039_v27 }
 0x23d   :  { %6930 = vmatpush1.bf16.msra.mxu1 %v11171_v41  ;;  %6890 = vmatprep.subr.bf16.mxu0 %v11036_v42  ;;  %v1167_v30 = vld [vmem:[#allocation5 + $0x1f68] sm:$0xff]  ;;  %v11123_v42 = vcombine.low %v1035_v26, %v1039_v27 }
 0x23e   :  { %6931 = vmatprep.subr.bf16.mxu1 %v11164_v43  ;;  %v11252_v35 = vcombine.high %v1163_v29, %v1167_v30  ;;  %v1027_v36 = vld [vmem:[#allocation5 + $0x1b08] sm:$0xff]  ;;  %v11251_v43 = vcombine.low %v1163_v29, %v1167_v30  ;;  %v220_v29 = vld [vmem:[#allocation5 + $0x1d0] sm:$0xff] }
 0x23f   :  { %v1031_v37 = vld [vmem:[#allocation5 + $0x1b28] sm:$0xff]  ;;  %v224_v30 = vld [vmem:[#allocation5 + $0x1f0] sm:$0xff] }
 0x240   :  { %6891 = vmatpush1.bf16.msra.mxu0 %v11035_v52  ;;  %v1155_v38 = vld [vmem:[#allocation5 + $0x1f08] sm:$0xff]  ;;  %v11116_v45 = vcombine.high %v1027_v36, %v1031_v37 }
 0x241   :  { %6932 = vmatpush1.bf16.msra.mxu1 %v11163_v53  ;;  %6892 = vmatprep.subr.bf16.mxu0 %v11028_v54  ;;  %v1159_v41 = vld [vmem:[#allocation5 + $0x1f28] sm:$0xff]  ;;  %v11115_v54 = vcombine.low %v1027_v36, %v1031_v37  ;;  %v10310_v36 = vcombine.high %v220_v29, %v224_v30 }
 0x242   :  { %6933 = vmatprep.subr.bf16.mxu1 %v11156_v55  ;;  %v11244_v46 = vcombine.high %v1155_v38, %v1159_v41  ;;  %v1019_v48 = vld [vmem:[#allocation5 + $0x1ac8] sm:$0xff]  ;;  %v11243_v55 = vcombine.low %v1155_v38, %v1159_v41  ;;  %v212_v38 = vld [vmem:[#allocation5 + $0x190] sm:$0xff] }
 0x243   :  { %v1023_v49 = vld [vmem:[#allocation5 + $0x1ae8] sm:$0xff]  ;;  %v216_v41 = vld [vmem:[#allocation5 + $0x1b0] sm:$0xff] }
 0x244   :  { %6893 = vmatpush1.bf16.msra.mxu0 %v11027_v62  ;;  %v1147_v52 = vld [vmem:[#allocation5 + $0x1ec8] sm:$0xff]  ;;  %v11108_v56 = vcombine.high %v1019_v48, %v1023_v49 }
 0x245   :  { %6934 = vmatpush1.bf16.msra.mxu1 %v11155_v0  ;;  %6894 = vmatprep.subr.bf16.mxu0 %v11020_v1  ;;  %v1151_v53 = vld [vmem:[#allocation5 + $0x1ee8] sm:$0xff]  ;;  %v11107_v1 = vcombine.low %v1019_v48, %v1023_v49  ;;  %v10302_v48 = vcombine.high %v212_v38, %v216_v41 }
 0x246   :  { %6935 = vmatprep.subr.bf16.mxu1 %v11148_v5  ;;  %v11236_v57 = vcombine.high %v1147_v52, %v1151_v53  ;;  %v1011_v60 = vld [vmem:[#allocation5 + $0x1a88] sm:$0xff]  ;;  %v11235_v5 = vcombine.low %v1147_v52, %v1151_v53  ;;  %v204_v52 = vld [vmem:[#allocation5 + $0x150] sm:$0xff] }
 0x247   :  { %v1015_v61 = vld [vmem:[#allocation5 + $0x1aa8] sm:$0xff]  ;;  %v208_v53 = vld [vmem:[#allocation5 + $0x170] sm:$0xff] }
 0x248   :  { %6895 = vmatpush1.bf16.msra.mxu0 %v11019_v3  ;;  %v1139_v62 = vld [vmem:[#allocation5 + $0x1e88] sm:$0xff]  ;;  %v11100_v8 = vcombine.high %v1011_v60, %v1015_v61 }
 0x249   :  { %6936 = vmatpush1.bf16.msra.mxu1 %v11147_v11  ;;  %6896 = vmatprep.subr.bf16.mxu0 %v11140_v12  ;;  %v1143_v0 = vld [vmem:[#allocation5 + $0x1ea8] sm:$0xff]  ;;  %v11099_v12 = vcombine.low %v1011_v60, %v1015_v61  ;;  %v10301_v60 = vcombine.low %v212_v38, %v216_v41 }
 0x24a   :  { %6937 = vmatprep.subr.bf16.mxu1 %v11268_v19  ;;  %v11228_v10 = vcombine.high %v1139_v62, %v1143_v0  ;;  %v1003_v63 = vld [vmem:[#allocation5 + $0x1a48] sm:$0xff]  ;;  %v11227_v19 = vcombine.low %v1139_v62, %v1143_v0 }
 0x24b   :  { %v1007_v2 = vld [vmem:[#allocation5 + $0x1a68] sm:$0xff] }
 0x24c   :  { %6897 = vmatpush2.bf16.msra.mxu0 %v11139_v22  ;;  %v1131_v3 = vld [vmem:[#allocation5 + $0x1e48] sm:$0xff]  ;;  %v11092_v9 = vcombine.high %v1003_v63, %v1007_v2 }
 0x24d   :  { %6938 = vmatpush2.bf16.msra.mxu1 %v11267_v23  ;;  %6898 = vmatprep.subr.bf16.mxu0 %v11132_v24  ;;  %v1135_v11 = vld [vmem:[#allocation5 + $0x1e68] sm:$0xff]  ;;  %v11091_v24 = vcombine.low %v1003_v63, %v1007_v2  ;;  %v200_v63 = vld [vmem:[#allocation5 + $0x130] sm:$0xff] }
 0x24e   :  { %6939 = vmatprep.subr.bf16.mxu1 %v11260_v25  ;;  %v11220_v13 = vcombine.high %v1131_v3, %v1135_v11  ;;  %v995_v14 = vld [vmem:[#allocation5 + $0x1a08] sm:$0xff]  ;;  %v11219_v25 = vcombine.low %v1131_v3, %v1135_v11  ;;  %v324_v11 = vld [vmem:[#allocation5 + $0x510] sm:$0xff] }
 0x24f   :  { %v999_v21 = vld [vmem:[#allocation5 + $0x1a28] sm:$0xff] }
 0x250   :  { %6899 = vmatpush2.bf16.msra.mxu0 %v11131_v32  ;;  %v1123_v22 = vld [vmem:[#allocation5 + $0x1e08] sm:$0xff]  ;;  %v11084_v26 = vcombine.high %v995_v14, %v999_v21  ;;  %v348_v32 = vld [vmem:[#allocation5 + $0x5d0] sm:$0xff] }
 0x251   :  { %6940 = vmatpush2.bf16.msra.mxu1 %v11259_v33  ;;  %6900 = vmatprep.subr.bf16.mxu0 %v11124_v34  ;;  %v1127_v23 = vld [vmem:[#allocation5 + $0x1e28] sm:$0xff]  ;;  %v352_v33 = vld [vmem:[#allocation5 + $0x5f0] sm:$0xff]  ;;  %v11083_v34 = vcombine.low %v995_v14, %v999_v21 }
 0x252   :  { %6941 = vmatprep.subr.bf16.mxu1 %v11252_v35  ;;  %v11212_v27 = vcombine.high %v1123_v22, %v1127_v23  ;;  %v11211_v35 = vcombine.low %v1123_v22, %v1127_v23  ;;  %v10438_v37 = vcombine.high %v348_v32, %v352_v33 }
 0x254   :  { %6901 = vmatpush2.bf16.msra.mxu0 %v11123_v42  ;;  %v340_v42 = vld [vmem:[#allocation5 + $0x590] sm:$0xff] }
 0x255   :  { %6942 = vmatpush2.bf16.msra.mxu1 %v11251_v43  ;;  %6902 = vmatprep.subr.bf16.mxu0 %v11116_v45  ;;  %v344_v43 = vld [vmem:[#allocation5 + $0x5b0] sm:$0xff]  ;;  %v10309_v45 = vcombine.low %v220_v29, %v224_v30 }
 0x256   :  { %6943 = vmatprep.subr.bf16.mxu1 %v11244_v46  ;;  %v10437_v46 = vcombine.low %v348_v32, %v352_v33  ;;  %v10430_v49 = vcombine.high %v340_v42, %v344_v43  ;;  %v10429_v0 = vcombine.low %v340_v42, %v344_v43 }
 0x258   :  { %6903 = vmatpush2.bf16.msra.mxu0 %v11115_v54 }
 0x259   :  { %6944 = vmatpush2.bf16.msra.mxu1 %v11243_v55  ;;  %6904 = vmatprep.subr.bf16.mxu0 %v11108_v56  ;;  %v332_v55 = vld [vmem:[#allocation5 + $0x550] sm:$0xff] }
 0x25a   :  { %6945 = vmatprep.subr.bf16.mxu1 %v11236_v57  ;;  %v336_v56 = vld [vmem:[#allocation5 + $0x570] sm:$0xff] }
 0x25b   :  { %v10421_v14 = vcombine.low %v332_v55, %v336_v56 }
 0x25c   :  { %6905 = vmatpush2.bf16.msra.mxu0 %v11107_v1  ;;  %v10294_v1 = vcombine.high %v204_v52, %v208_v53 }
 0x25d   :  { %6946 = vmatpush2.bf16.msra.mxu1 %v11235_v5  ;;  %6906 = vmatprep.subr.bf16.mxu0 %v11100_v8  ;;  %v10422_v8 = vcombine.high %v332_v55, %v336_v56  ;;  %v164_v56 = vld [vmem:[#allocation5 + $0x10] sm:$0xff] }
 0x25e   :  { %6947 = vmatprep.subr.bf16.mxu1 %v11228_v10  ;;  %v196_v10 = vld [vmem:[#allocation5 + $0x110] sm:$0xff] }
 0x25f   :  { %v10286_v21 = vcombine.high %v196_v10, %v200_v63  ;;  %v10285_v29 = vcombine.low %v196_v10, %v200_v63  ;;  %v284_v10 = vld [vmem:[#allocation5 + $0x3d0] sm:$0xff] }
 0x260   :  { %6907 = vmatpush2.bf16.msra.mxu0 %v11099_v12  ;;  %v328_v12 = vld [vmem:[#allocation5 + $0x530] sm:$0xff] }
 0x261   :  { %6948 = vmatpush2.bf16.msra.mxu1 %v11227_v19  ;;  %6908 = vmatprep.subr.bf16.mxu0 %v11092_v9  ;;  %v10293_v9 = vcombine.low %v204_v52, %v208_v53  ;;  %v10414_v23 = vcombine.high %v324_v11, %v328_v12  ;;  %v10413_v30 = vcombine.low %v324_v11, %v328_v12  ;;  %v288_v63 = vld [vmem:[#allocation5 + $0x3f0] sm:$0xff] }
 0x262   :  { %6949 = vmatprep.subr.bf16.mxu1 %v11220_v13  ;;  %v416_v11 = vld [vmem:[#allocation5 + $0x7f0] sm:$0xff] }
 0x264   :  { %6909 = vmatpush2.bf16.msra.mxu0 %v11091_v24  ;;  %v188_v24 = vld [vmem:[#allocation5 + $0xd0] sm:$0xff] }
 0x265   :  { %6950 = vmatpush2.bf16.msra.mxu1 %v11219_v25  ;;  %6910 = vmatprep.subr.bf16.mxu0 %v11084_v26  ;;  %v192_v25 = vld [vmem:[#allocation5 + $0xf0] sm:$0xff] }
 0x266   :  { %6951 = vmatprep.subr.bf16.mxu1 %v11212_v27  ;;  %v316_v26 = vld [vmem:[#allocation5 + $0x4d0] sm:$0xff]  ;;  %v10278_v32 = vcombine.high %v188_v24, %v192_v25  ;;  %v10277_v38 = vcombine.low %v188_v24, %v192_v25  ;;  %v10373_v24 = vcombine.low %v284_v10, %v288_v63 }
 0x267   :  { %v320_v27 = vld [vmem:[#allocation5 + $0x4f0] sm:$0xff] }
 0x268   :  { %6911 = vmatpush2.bf16.msra.mxu0 %v11083_v34  ;;  %v10406_v33 = vcombine.high %v316_v26, %v320_v27  ;;  %v180_v34 = vld [vmem:[#allocation5 + $0x90] sm:$0xff]  ;;  %v10405_v41 = vcombine.low %v316_v26, %v320_v27 }
 0x269   :  { %6952 = vmatpush2.bf16.msra.mxu1 %v11211_v35  ;;  %6962 = vmatprep.subr.bf16.mxu0 %v10310_v36  ;;  %v184_v35 = vld [vmem:[#allocation5 + $0xb0] sm:$0xff] }
 0x26a   :  { %7003 = vmatprep.subr.bf16.mxu1 %v10438_v37  ;;  %v308_v36 = vld [vmem:[#allocation5 + $0x490] sm:$0xff]  ;;  %v10270_v42 = vcombine.high %v180_v34, %v184_v35  ;;  %v10269_v52 = vcombine.low %v180_v34, %v184_v35 }
 0x26b   :  { %v6668_v54 = vpop.f32.mrf.mxu0  ;;  %6913 = vmatmul.mubr.bf16.vlgmr.msra.gmra.mxu0 %v12382_v44  ;;  %v312_v37 = vld [vmem:[#allocation5 + $0x4b0] sm:$0xff] }
 0x26c   :  { %v6709_v57 = vpop.f32.mrf.mxu1  ;;  %6954 = vmatmul.mubr.bf16.vlgmr.msra.gmra.mxu1 %v12384_v47  ;;  %6963 = vmatpush1.bf16.msra.mxu0 %v10309_v45  ;;  %v10398_v43 = vcombine.high %v308_v36, %v312_v37  ;;  %v172_v45 = vld [vmem:[#allocation5 + $0x50] sm:$0xff]  ;;  %v10397_v53 = vcombine.low %v308_v36, %v312_v37 }
 0x26d   :  { %v12426_v61 = vadd.f32 %v6709_v57, %v6668_v54  ;;  %7004 = vmatpush1.bf16.msra.mxu1 %v10437_v46  ;;  %v6670_v62 = vpop.f32.mrf.mxu0  ;;  %6964 = vmatprep.subr.bf16.mxu0 %v10302_v48  ;;  %v176_v46 = vld [vmem:[#allocation5 + $0x70] sm:$0xff] }
 0x26e   :  { %v6711_v5 = vpop.f32.mrf.mxu1  ;;  %7005 = vmatprep.subr.bf16.mxu1 %v10430_v49  ;;  %6994 = vmatprep.mubr.bf16.mxu0 %v12340_v58  ;;  %v300_v48 = vld [vmem:[#allocation5 + $0x450] sm:$0xff]  ;;  %v10262_v54 = vcombine.high %v172_v45, %v176_v46 }
 0x26f   :  { %v12429_v2 = vadd.f32 %v6711_v5, %v6670_v62  ;;  %v6672_v3 = vpop.f32.mrf.mxu0  ;;  %7035 = vmatprep.mubr.bf16.mxu1 %v12342_v59  ;;  %v304_v49 = vld [vmem:[#allocation5 + $0x470] sm:$0xff] }
 0x270   :  { %v6713_v19 = vpop.f32.mrf.mxu1  ;;  %6965 = vmatpush1.bf16.msra.mxu0 %v10301_v60  ;;  %v10390_v55 = vcombine.high %v300_v48, %v304_v49  ;;  %v168_v57 = vld [vmem:[#allocation5 + $0x30] sm:$0xff] }
 0x271   :  { %7006 = vmatpush1.bf16.msra.mxu1 %v10429_v0  ;;  %v6673_v13 = vpop.f32.mrf.mxu0  ;;  %6966 = vmatprep.subr.bf16.mxu0 %v10294_v1  ;;  %v292_v60 = vld [vmem:[#allocation5 + $0x410] sm:$0xff]  ;;  %v10261_v0 = vcombine.low %v172_v45, %v176_v46  ;;  %v10389_v1 = vcombine.low %v300_v48, %v304_v49  ;;  %v10254_v5 = vcombine.high %v164_v56, %v168_v57 }
 0x272   :  { %v6714_v22 = vpop.f32.mrf.mxu1  ;;  %7007 = vmatprep.subr.bf16.mxu1 %v10422_v8  ;;  %v296_v62 = vld [vmem:[#allocation5 + $0x430] sm:$0xff]  ;;  %v10253_v12 = vcombine.low %v164_v56, %v168_v57 }
 0x273   :  { %v10382_v8 = vcombine.high %v292_v60, %v296_v62  ;;  %v412_v3 = vld [vmem:[#allocation5 + $0x7d0] sm:$0xff]  ;;  %v10381_v19 = vcombine.low %v292_v60, %v296_v62 }
 0x274   :  { %6967 = vmatpush1.bf16.msra.mxu0 %v10293_v9  ;;  %v10374_v9 = vcombine.high %v284_v10, %v288_v63  ;;  %v10502_v13 = vcombine.high %v412_v3, %v416_v11  ;;  %v404_v22 = vld [vmem:[#allocation5 + $0x790] sm:$0xff]  ;;  %v10501_v25 = vcombine.low %v412_v3, %v416_v11 }
 0x275   :  { %7008 = vmatpush1.bf16.msra.mxu1 %v10421_v14  ;;  %6968 = vmatprep.subr.bf16.mxu0 %v10286_v21  ;;  %v276_v14 = vld [vmem:[#allocation5 + $0x390] sm:$0xff] }
 0x276   :  { %7009 = vmatprep.subr.bf16.mxu1 %v10414_v23  ;;  %v280_v21 = vld [vmem:[#allocation5 + $0x3b0] sm:$0xff] }
 0x277   :  { %v408_v23 = vld [vmem:[#allocation5 + $0x7b0] sm:$0xff]  ;;  %v10366_v26 = vcombine.high %v276_v14, %v280_v21  ;;  %v10365_v34 = vcombine.low %v276_v14, %v280_v21 }
 0x278   :  { %6969 = vmatpush1.bf16.msra.mxu0 %v10285_v29  ;;  %v10494_v27 = vcombine.high %v404_v22, %v408_v23  ;;  %v268_v29 = vld [vmem:[#allocation5 + $0x350] sm:$0xff]  ;;  %v10493_v35 = vcombine.low %v404_v22, %v408_v23 }
 0x279   :  { %7010 = vmatpush1.bf16.msra.mxu1 %v10413_v30  ;;  %6970 = vmatprep.subr.bf16.mxu0 %v10278_v32  ;;  %v272_v30 = vld [vmem:[#allocation5 + $0x370] sm:$0xff] }
 0x27a   :  { %7011 = vmatprep.subr.bf16.mxu1 %v10406_v33  ;;  %v396_v32 = vld [vmem:[#allocation5 + $0x750] sm:$0xff]  ;;  %v10358_v36 = vcombine.high %v268_v29, %v272_v30  ;;  %v10357_v45 = vcombine.low %v268_v29, %v272_v30 }
 0x27b   :  { %v400_v33 = vld [vmem:[#allocation5 + $0x770] sm:$0xff] }
 0x27c   :  { %6971 = vmatpush1.bf16.msra.mxu0 %v10277_v38  ;;  %v10486_v37 = vcombine.high %v396_v32, %v400_v33  ;;  %v260_v38 = vld [vmem:[#allocation5 + $0x310] sm:$0xff]  ;;  %v10485_v46 = vcombine.low %v396_v32, %v400_v33 }
 0x27d   :  { %7012 = vmatpush1.bf16.msra.mxu1 %v10405_v41  ;;  %6972 = vmatprep.subr.bf16.mxu0 %v10270_v42  ;;  %v264_v41 = vld [vmem:[#allocation5 + $0x330] sm:$0xff] }
 0x27e   :  { %7013 = vmatprep.subr.bf16.mxu1 %v10398_v43  ;;  %v388_v42 = vld [vmem:[#allocation5 + $0x710] sm:$0xff]  ;;  %v10350_v48 = vcombine.high %v260_v38, %v264_v41  ;;  %v10349_v56 = vcombine.low %v260_v38, %v264_v41 }
 0x27f   :  { %v392_v43 = vld [vmem:[#allocation5 + $0x730] sm:$0xff] }
 0x280   :  { %6973 = vmatpush1.bf16.msra.mxu0 %v10269_v52  ;;  %v10478_v49 = vcombine.high %v388_v42, %v392_v43  ;;  %v252_v52 = vld [vmem:[#allocation5 + $0x2d0] sm:$0xff]  ;;  %v10477_v57 = vcombine.low %v388_v42, %v392_v43 }
 0x281   :  { %7014 = vmatpush1.bf16.msra.mxu1 %v10397_v53  ;;  %6974 = vmatprep.subr.bf16.mxu0 %v10262_v54  ;;  %v256_v53 = vld [vmem:[#allocation5 + $0x2f0] sm:$0xff] }
 0x282   :  { %7015 = vmatprep.subr.bf16.mxu1 %v10390_v55  ;;  %v380_v54 = vld [vmem:[#allocation5 + $0x6d0] sm:$0xff]  ;;  %v10342_v60 = vcombine.high %v252_v52, %v256_v53  ;;  %v10341_v10 = vcombine.low %v252_v52, %v256_v53 }
 0x283   :  { %v384_v55 = vld [vmem:[#allocation5 + $0x6f0] sm:$0xff] }
 0x284   :  { %6975 = vmatpush1.bf16.msra.mxu0 %v10261_v0  ;;  %v10470_v62 = vcombine.high %v380_v54, %v384_v55  ;;  %v244_v0 = vld [vmem:[#allocation5 + $0x290] sm:$0xff]  ;;  %v10469_v63 = vcombine.low %v380_v54, %v384_v55 }
 0x285   :  { %7016 = vmatpush1.bf16.msra.mxu1 %v10389_v1  ;;  %6976 = vmatprep.subr.bf16.mxu0 %v10254_v5  ;;  %v248_v1 = vld [vmem:[#allocation5 + $0x2b0] sm:$0xff] }
 0x286   :  { %7017 = vmatprep.subr.bf16.mxu1 %v10382_v8  ;;  %v372_v5 = vld [vmem:[#allocation5 + $0x690] sm:$0xff]  ;;  %v10334_v3 = vcombine.high %v244_v0, %v248_v1  ;;  %v10333_v14 = vcombine.low %v244_v0, %v248_v1 }
 0x287   :  { %v376_v8 = vld [vmem:[#allocation5 + $0x6b0] sm:$0xff] }
 0x288   :  { %6977 = vmatpush1.bf16.msra.mxu0 %v10253_v12  ;;  %v10462_v11 = vcombine.high %v372_v5, %v376_v8  ;;  %v236_v12 = vld [vmem:[#allocation5 + $0x250] sm:$0xff]  ;;  %v10461_v21 = vcombine.low %v372_v5, %v376_v8 }
 0x289   :  { %7018 = vmatpush1.bf16.msra.mxu1 %v10381_v19  ;;  %6978 = vmatprep.subr.bf16.mxu0 %v10374_v9  ;;  %v240_v19 = vld [vmem:[#allocation5 + $0x270] sm:$0xff] }
 0x28a   :  { %7019 = vmatprep.subr.bf16.mxu1 %v10502_v13  ;;  %v364_v9 = vld [vmem:[#allocation5 + $0x650] sm:$0xff]  ;;  %v10326_v22 = vcombine.high %v236_v12, %v240_v19  ;;  %v10325_v29 = vcombine.low %v236_v12, %v240_v19 }
 0x28b   :  { %v368_v13 = vld [vmem:[#allocation5 + $0x670] sm:$0xff] }
 0x28c   :  { %6979 = vmatpush2.bf16.msra.mxu0 %v10373_v24  ;;  %v10454_v23 = vcombine.high %v364_v9, %v368_v13  ;;  %v228_v24 = vld [vmem:[#allocation5 + $0x210] sm:$0xff]  ;;  %v10453_v30 = vcombine.low %v364_v9, %v368_v13 }
 0x28d   :  { %7020 = vmatpush2.bf16.msra.mxu1 %v10501_v25  ;;  %6980 = vmatprep.subr.bf16.mxu0 %v10366_v26  ;;  %v232_v25 = vld [vmem:[#allocation5 + $0x230] sm:$0xff] }
 0x28e   :  { %7021 = vmatprep.subr.bf16.mxu1 %v10494_v27  ;;  %v356_v26 = vld [vmem:[#allocation5 + $0x610] sm:$0xff]  ;;  %v10318_v32 = vcombine.high %v228_v24, %v232_v25  ;;  %v10317_v38 = vcombine.low %v228_v24, %v232_v25 }
 0x28f   :  { %v360_v27 = vld [vmem:[#allocation5 + $0x630] sm:$0xff] }
 0x290   :  { %6981 = vmatpush2.bf16.msra.mxu0 %v10365_v34  ;;  %v10446_v33 = vcombine.high %v356_v26, %v360_v27  ;;  %v476_v34 = vld [vmem:[#allocation5 + $0x9d0] sm:$0xff]  ;;  %v10445_v41 = vcombine.low %v356_v26, %v360_v27 }
 0x291   :  { %7022 = vmatpush2.bf16.msra.mxu1 %v10493_v35  ;;  %6982 = vmatprep.subr.bf16.mxu0 %v10358_v36  ;;  %v480_v35 = vld [vmem:[#allocation5 + $0x9f0] sm:$0xff] }
 0x292   :  { %7023 = vmatprep.subr.bf16.mxu1 %v10486_v37  ;;  %v604_v36 = vld [vmem:[#allocation5 + $0xdd0] sm:$0xff]  ;;  %v10566_v42 = vcombine.high %v476_v34, %v480_v35  ;;  %v10565_v52 = vcombine.low %v476_v34, %v480_v35 }
 0x293   :  { %v608_v37 = vld [vmem:[#allocation5 + $0xdf0] sm:$0xff] }
 0x294   :  { %6983 = vmatpush2.bf16.msra.mxu0 %v10357_v45  ;;  %v10694_v43 = vcombine.high %v604_v36, %v608_v37  ;;  %v468_v45 = vld [vmem:[#allocation5 + $0x990] sm:$0xff]  ;;  %v10693_v53 = vcombine.low %v604_v36, %v608_v37 }
 0x295   :  { %7024 = vmatpush2.bf16.msra.mxu1 %v10485_v46  ;;  %6984 = vmatprep.subr.bf16.mxu0 %v10350_v48  ;;  %v472_v46 = vld [vmem:[#allocation5 + $0x9b0] sm:$0xff] }
 0x296   :  { %7025 = vmatprep.subr.bf16.mxu1 %v10478_v49  ;;  %v596_v48 = vld [vmem:[#allocation5 + $0xd90] sm:$0xff]  ;;  %v10558_v54 = vcombine.high %v468_v45, %v472_v46  ;;  %v10557_v8 = vcombine.low %v468_v45, %v472_v46 }
 0x297   :  { %v600_v49 = vld [vmem:[#allocation5 + $0xdb0] sm:$0xff] }
 0x298   :  { %6985 = vmatpush2.bf16.msra.mxu0 %v10349_v56  ;;  %v10686_v55 = vcombine.high %v596_v48, %v600_v49  ;;  %v460_v56 = vld [vmem:[#allocation5 + $0x950] sm:$0xff] }
 0x299   :  { %7026 = vmatpush2.bf16.msra.mxu1 %v10477_v57  ;;  %6986 = vmatprep.subr.bf16.mxu0 %v10342_v60  ;;  %v464_v57 = vld [vmem:[#allocation5 + $0x970] sm:$0xff] }
 0x29a   :  { %7027 = vmatprep.subr.bf16.mxu1 %v10470_v62  ;;  %v588_v62 = vld [vmem:[#allocation5 + $0xd50] sm:$0xff]  ;;  %v10549_v25 = vcombine.low %v460_v56, %v464_v57 }
 0x29b   :  { %v592_v0 = vld [vmem:[#allocation5 + $0xd70] sm:$0xff] }
 0x29c   :  { %6987 = vmatpush2.bf16.msra.mxu0 %v10341_v10  ;;  %v10678_v9 = vcombine.high %v588_v62, %v592_v0  ;;  %v452_v13 = vld [vmem:[#allocation5 + $0x910] sm:$0xff] }
 0x29d   :  { %7028 = vmatpush2.bf16.msra.mxu1 %v10469_v63  ;;  %6988 = vmatprep.subr.bf16.mxu0 %v10334_v3  ;;  %v10685_v63 = vcombine.low %v596_v48, %v600_v49  ;;  %v10550_v3 = vcombine.high %v460_v56, %v464_v57  ;;  %v572_v34 = vld [vmem:[#allocation5 + $0xcd0] sm:$0xff] }
 0x29e   :  { %7029 = vmatprep.subr.bf16.mxu1 %v10462_v11  ;;  %v576_v35 = vld [vmem:[#allocation5 + $0xcf0] sm:$0xff] }
 0x29f   :  { %v564_v45 = vld [vmem:[#allocation5 + $0xc90] sm:$0xff]  ;;  %v10661_v49 = vcombine.low %v572_v34, %v576_v35 }
 0x2a0   :  { %6989 = vmatpush2.bf16.msra.mxu0 %v10333_v14  ;;  %v456_v14 = vld [vmem:[#allocation5 + $0x930] sm:$0xff] }
 0x2a1   :  { %7030 = vmatpush2.bf16.msra.mxu1 %v10461_v21  ;;  %6990 = vmatprep.subr.bf16.mxu0 %v10326_v22  ;;  %v580_v21 = vld [vmem:[#allocation5 + $0xd10] sm:$0xff]  ;;  %v10542_v27 = vcombine.high %v452_v13, %v456_v14  ;;  %v10541_v36 = vcombine.low %v452_v13, %v456_v14 }
 0x2a2   :  { %7031 = vmatprep.subr.bf16.mxu1 %v10454_v23  ;;  %v584_v22 = vld [vmem:[#allocation5 + $0xd30] sm:$0xff] }
 0x2a3   :  { %v10669_v37 = vcombine.low %v580_v21, %v584_v22  ;;  %v568_v46 = vld [vmem:[#allocation5 + $0xcb0] sm:$0xff] }
 0x2a4   :  { %6991 = vmatpush2.bf16.msra.mxu0 %v10325_v29  ;;  %v556_v56 = vld [vmem:[#allocation5 + $0xc50] sm:$0xff] }
 0x2a5   :  { %7032 = vmatpush2.bf16.msra.mxu1 %v10453_v30  ;;  %6992 = vmatprep.subr.bf16.mxu0 %v10318_v32  ;;  %v10670_v30 = vcombine.high %v580_v21, %v584_v22  ;;  %v444_v32 = vld [vmem:[#allocation5 + $0x8d0] sm:$0xff] }
 0x2a6   :  { %7033 = vmatprep.subr.bf16.mxu1 %v10446_v33  ;;  %v448_v33 = vld [vmem:[#allocation5 + $0x8f0] sm:$0xff] }
 0x2a7   :  { %v10533_v48 = vcombine.low %v444_v32, %v448_v33  ;;  %v560_v57 = vld [vmem:[#allocation5 + $0xc70] sm:$0xff] }
 0x2a8   :  { %6993 = vmatpush2.bf16.msra.mxu0 %v10317_v38  ;;  %v10534_v38 = vcombine.high %v444_v32, %v448_v33  ;;  %v540_v13 = vld [vmem:[#allocation5 + $0xbd0] sm:$0xff] }
 0x2a9   :  { %7034 = vmatpush2.bf16.msra.mxu1 %v10445_v41  ;;  %7044 = vmatprep.subr.bf16.mxu0 %v10566_v42  ;;  %v10662_v41 = vcombine.high %v572_v34, %v576_v35  ;;  %v436_v42 = vld [vmem:[#allocation5 + $0x890] sm:$0xff] }
 0x2aa   :  { %7085 = vmatprep.subr.bf16.mxu1 %v10694_v43  ;;  %v440_v43 = vld [vmem:[#allocation5 + $0x8b0] sm:$0xff] }
 0x2ab   :  { %v6750_v60 = vpop.f32.mrf.mxu0  ;;  %6995 = vmatmul.mubr.bf16.vlgmr.msra.gmra.mxu0 %v12346_v16  ;;  %v544_v14 = vld [vmem:[#allocation5 + $0xbf0] sm:$0xff] }
 0x2ac   :  { %v6751_v1 = vadd.f32 %v6750_v60, %v12426_v61  ;;  %v6791_v5 = vpop.f32.mrf.mxu1  ;;  %7036 = vmatmul.mubr.bf16.vlgmr.msra.gmra.mxu1 %v12348_v20  ;;  %7045 = vmatpush1.bf16.msra.mxu0 %v10565_v52  ;;  %v10526_v52 = vcombine.high %v436_v42, %v440_v43  ;;  %v10525_v60 = vcombine.low %v436_v42, %v440_v43  ;;  %v672_v21 = vld [vmem:[#allocation5 + $0xff0] sm:$0xff] }
 0x2ad   :  { %7086 = vmatpush1.bf16.msra.mxu1 %v10693_v53  ;;  %v6752_v10 = vpop.f32.mrf.mxu0  ;;  %7046 = vmatprep.subr.bf16.mxu0 %v10558_v54  ;;  %v10654_v53 = vcombine.high %v564_v45, %v568_v46  ;;  %v428_v54 = vld [vmem:[#allocation5 + $0x850] sm:$0xff]  ;;  %v10629_v32 = vcombine.low %v540_v13, %v544_v14 }
 0x2ae   :  { %v12435_v11 = vadd.f32 %v6791_v5, %v6751_v1  ;;  %v6753_v12 = vadd.f32 %v6752_v10, %v12429_v2  ;;  %v6793_v19 = vpop.f32.mrf.mxu1  ;;  %7087 = vmatprep.subr.bf16.mxu1 %v10686_v55  ;;  %7076 = vmatprep.mubr.bf16.mxu0 %v12350_v28  ;;  %v10677_v2 = vcombine.low %v588_v62, %v592_v0  ;;  %v432_v55 = vld [vmem:[#allocation5 + $0x870] sm:$0xff] }
 0x2af   :  { %v6754_v61 = vpop.f32.mrf.mxu0  ;;  %7117 = vmatprep.mubr.bf16.mxu1 %v12353_v31  ;;  %v10653_v62 = vcombine.low %v564_v45, %v568_v46  ;;  %v10518_v0 = vcombine.high %v428_v54, %v432_v55  ;;  %v10646_v1 = vcombine.high %v556_v56, %v560_v57  ;;  %v420_v5 = vld [vmem:[#allocation5 + $0x810] sm:$0xff] }
 0x2b0   :  { %v12440_v23 = vadd.f32 %v6793_v19, %v6753_v12  ;;  %v6795_v24 = vpop.f32.mrf.mxu1  ;;  %7047 = vmatpush1.bf16.msra.mxu0 %v10557_v8  ;;  %v424_v8 = vld [vmem:[#allocation5 + $0x830] sm:$0xff]  ;;  %v10645_v12 = vcombine.low %v556_v56, %v560_v57 }
 0x2b1   :  { %7088 = vmatpush1.bf16.msra.mxu1 %v10685_v63  ;;  %v6755_v26 = vpop.f32.mrf.mxu0  ;;  %7048 = vmatprep.subr.bf16.mxu0 %v10550_v3  ;;  %v548_v10 = vld [vmem:[#allocation5 + $0xc10] sm:$0xff]  ;;  %v10517_v3 = vcombine.low %v428_v54, %v432_v55  ;;  %v10510_v19 = vcombine.high %v420_v5, %v424_v8  ;;  %v10509_v22 = vcombine.low %v420_v5, %v424_v8 }
 0x2b2   :  { %v6796_v29 = vpop.f32.mrf.mxu1  ;;  %7089 = vmatprep.subr.bf16.mxu1 %v10678_v9  ;;  %v552_v63 = vld [vmem:[#allocation5 + $0xc30] sm:$0xff] }
 0x2b3   :  { %v10638_v9 = vcombine.high %v548_v10, %v552_v63  ;;  %v668_v61 = vld [vmem:[#allocation5 + $0xfd0] sm:$0xff]  ;;  %v10637_v24 = vcombine.low %v548_v10, %v552_v63 }
 0x2b4   :  { %7049 = vmatpush1.bf16.msra.mxu0 %v10549_v25  ;;  %v10630_v25 = vcombine.high %v540_v13, %v544_v14  ;;  %v10758_v26 = vcombine.high %v668_v61, %v672_v21  ;;  %v660_v29 = vld [vmem:[#allocation5 + $0xf90] sm:$0xff]  ;;  %v10757_v33 = vcombine.low %v668_v61, %v672_v21 }
 0x2b5   :  { %7090 = vmatpush1.bf16.msra.mxu1 %v10677_v2  ;;  %7050 = vmatprep.subr.bf16.mxu0 %v10542_v27  ;;  %v532_v2 = vld [vmem:[#allocation5 + $0xb90] sm:$0xff] }
 0x2b6   :  { %7091 = vmatprep.subr.bf16.mxu1 %v10670_v30  ;;  %v536_v27 = vld [vmem:[#allocation5 + $0xbb0] sm:$0xff] }
 0x2b7   :  { %v664_v30 = vld [vmem:[#allocation5 + $0xfb0] sm:$0xff]  ;;  %v10622_v34 = vcombine.high %v532_v2, %v536_v27  ;;  %v10621_v42 = vcombine.low %v532_v2, %v536_v27 }
 0x2b8   :  { %7051 = vmatpush1.bf16.msra.mxu0 %v10541_v36  ;;  %v10750_v35 = vcombine.high %v660_v29, %v664_v30  ;;  %v524_v36 = vld [vmem:[#allocation5 + $0xb50] sm:$0xff]  ;;  %v10749_v43 = vcombine.low %v660_v29, %v664_v30 }
 0x2b9   :  { %7092 = vmatpush1.bf16.msra.mxu1 %v10669_v37  ;;  %7052 = vmatprep.subr.bf16.mxu0 %v10534_v38  ;;  %v528_v37 = vld [vmem:[#allocation5 + $0xb70] sm:$0xff] }
 0x2ba   :  { %7093 = vmatprep.subr.bf16.mxu1 %v10662_v41  ;;  %v652_v38 = vld [vmem:[#allocation5 + $0xf50] sm:$0xff]  ;;  %v10614_v45 = vcombine.high %v524_v36, %v528_v37  ;;  %v10613_v54 = vcombine.low %v524_v36, %v528_v37 }
 0x2bb   :  { %v656_v41 = vld [vmem:[#allocation5 + $0xf70] sm:$0xff] }
 0x2bc   :  { %7053 = vmatpush1.bf16.msra.mxu0 %v10533_v48  ;;  %v10742_v46 = vcombine.high %v652_v38, %v656_v41  ;;  %v516_v48 = vld [vmem:[#allocation5 + $0xb10] sm:$0xff]  ;;  %v10741_v55 = vcombine.low %v652_v38, %v656_v41 }
 0x2bd   :  { %7094 = vmatpush1.bf16.msra.mxu1 %v10661_v49  ;;  %7054 = vmatprep.subr.bf16.mxu0 %v10526_v52  ;;  %v520_v49 = vld [vmem:[#allocation5 + $0xb30] sm:$0xff] }
 0x2be   :  { %7095 = vmatprep.subr.bf16.mxu1 %v10654_v53  ;;  %v644_v52 = vld [vmem:[#allocation5 + $0xf10] sm:$0xff]  ;;  %v10606_v56 = vcombine.high %v516_v48, %v520_v49  ;;  %v10605_v5 = vcombine.low %v516_v48, %v520_v49 }
 0x2bf   :  { %v648_v53 = vld [vmem:[#allocation5 + $0xf30] sm:$0xff] }
 0x2c0   :  { %7055 = vmatpush1.bf16.msra.mxu0 %v10525_v60  ;;  %v10734_v57 = vcombine.high %v644_v52, %v648_v53  ;;  %v508_v60 = vld [vmem:[#allocation5 + $0xad0] sm:$0xff]  ;;  %v10733_v8 = vcombine.low %v644_v52, %v648_v53 }
 0x2c1   :  { %7096 = vmatpush1.bf16.msra.mxu1 %v10653_v62  ;;  %7056 = vmatprep.subr.bf16.mxu0 %v10518_v0  ;;  %v512_v62 = vld [vmem:[#allocation5 + $0xaf0] sm:$0xff] }
 0x2c2   :  { %7097 = vmatprep.subr.bf16.mxu1 %v10646_v1  ;;  %v636_v0 = vld [vmem:[#allocation5 + $0xed0] sm:$0xff]  ;;  %v10598_v10 = vcombine.high %v508_v60, %v512_v62  ;;  %v10597_v13 = vcombine.low %v508_v60, %v512_v62 }
 0x2c3   :  { %v640_v1 = vld [vmem:[#allocation5 + $0xef0] sm:$0xff] }
 0x2c4   :  { %7057 = vmatpush1.bf16.msra.mxu0 %v10517_v3  ;;  %v10726_v63 = vcombine.high %v636_v0, %v640_v1  ;;  %v500_v3 = vld [vmem:[#allocation5 + $0xa90] sm:$0xff]  ;;  %v10725_v14 = vcombine.low %v636_v0, %v640_v1 }
 0x2c5   :  { %7098 = vmatpush1.bf16.msra.mxu1 %v10645_v12  ;;  %7058 = vmatprep.subr.bf16.mxu0 %v10510_v19  ;;  %v504_v12 = vld [vmem:[#allocation5 + $0xab0] sm:$0xff] }
 0x2c6   :  { %7099 = vmatprep.subr.bf16.mxu1 %v10638_v9  ;;  %v628_v19 = vld [vmem:[#allocation5 + $0xe90] sm:$0xff]  ;;  %v10590_v61 = vcombine.high %v500_v3, %v504_v12  ;;  %v10589_v2 = vcombine.low %v500_v3, %v504_v12 }
 0x2c7   :  { %v632_v9 = vld [vmem:[#allocation5 + $0xeb0] sm:$0xff] }
 0x2c8   :  { %7059 = vmatpush1.bf16.msra.mxu0 %v10509_v22  ;;  %v10718_v21 = vcombine.high %v628_v19, %v632_v9  ;;  %v492_v22 = vld [vmem:[#allocation5 + $0xa50] sm:$0xff]  ;;  %v10717_v27 = vcombine.low %v628_v19, %v632_v9 }
 0x2c9   :  { %7100 = vmatpush1.bf16.msra.mxu1 %v10637_v24  ;;  %7060 = vmatprep.subr.bf16.mxu0 %v10630_v25  ;;  %v496_v24 = vld [vmem:[#allocation5 + $0xa70] sm:$0xff] }
 0x2ca   :  { %7101 = vmatprep.subr.bf16.mxu1 %v10758_v26  ;;  %v620_v25 = vld [vmem:[#allocation5 + $0xe50] sm:$0xff]  ;;  %v10582_v29 = vcombine.high %v492_v22, %v496_v24  ;;  %v10581_v36 = vcombine.low %v492_v22, %v496_v24 }
 0x2cb   :  { %v624_v26 = vld [vmem:[#allocation5 + $0xe70] sm:$0xff] }
 0x2cc   :  { %7061 = vmatpush2.bf16.msra.mxu0 %v10629_v32  ;;  %v10710_v30 = vcombine.high %v620_v25, %v624_v26  ;;  %v484_v32 = vld [vmem:[#allocation5 + $0xa10] sm:$0xff]  ;;  %v10709_v37 = vcombine.low %v620_v25, %v624_v26 }
 0x2cd   :  { %7102 = vmatpush2.bf16.msra.mxu1 %v10757_v33  ;;  %7062 = vmatprep.subr.bf16.mxu0 %v10622_v34  ;;  %v488_v33 = vld [vmem:[#allocation5 + $0xa30] sm:$0xff] }
 0x2ce   :  { %7103 = vmatprep.subr.bf16.mxu1 %v10750_v35  ;;  %v612_v34 = vld [vmem:[#allocation5 + $0xe10] sm:$0xff]  ;;  %v10574_v38 = vcombine.high %v484_v32, %v488_v33  ;;  %v10573_v48 = vcombine.low %v484_v32, %v488_v33 }
 0x2cf   :  { %v616_v35 = vld [vmem:[#allocation5 + $0xe30] sm:$0xff] }
 0x2d0   :  { %7063 = vmatpush2.bf16.msra.mxu0 %v10621_v42  ;;  %v10702_v41 = vcombine.high %v612_v34, %v616_v35  ;;  %v732_v42 = vld [vmem:[#allocation5 + $0x11d0] sm:$0xff]  ;;  %v10701_v49 = vcombine.low %v612_v34, %v616_v35 }
 0x2d1   :  { %7104 = vmatpush2.bf16.msra.mxu1 %v10749_v43  ;;  %7064 = vmatprep.subr.bf16.mxu0 %v10614_v45  ;;  %v736_v43 = vld [vmem:[#allocation5 + $0x11f0] sm:$0xff] }
 0x2d2   :  { %7105 = vmatprep.subr.bf16.mxu1 %v10742_v46  ;;  %v860_v45 = vld [vmem:[#allocation5 + $0x15d0] sm:$0xff]  ;;  %v10822_v52 = vcombine.high %v732_v42, %v736_v43  ;;  %v10821_v60 = vcombine.low %v732_v42, %v736_v43 }
 0x2d3   :  { %v864_v46 = vld [vmem:[#allocation5 + $0x15f0] sm:$0xff] }
 0x2d4   :  { %7065 = vmatpush2.bf16.msra.mxu0 %v10613_v54  ;;  %v10950_v53 = vcombine.high %v860_v45, %v864_v46  ;;  %v724_v54 = vld [vmem:[#allocation5 + $0x1190] sm:$0xff]  ;;  %v10949_v62 = vcombine.low %v860_v45, %v864_v46 }
 0x2d5   :  { %7106 = vmatpush2.bf16.msra.mxu1 %v10741_v55  ;;  %7066 = vmatprep.subr.bf16.mxu0 %v10606_v56  ;;  %v728_v55 = vld [vmem:[#allocation5 + $0x11b0] sm:$0xff] }
 0x2d6   :  { %7107 = vmatprep.subr.bf16.mxu1 %v10734_v57  ;;  %v852_v56 = vld [vmem:[#allocation5 + $0x1590] sm:$0xff]  ;;  %v10814_v0 = vcombine.high %v724_v54, %v728_v55  ;;  %v10813_v9 = vcombine.low %v724_v54, %v728_v55 }
 0x2d7   :  { %v856_v57 = vld [vmem:[#allocation5 + $0x15b0] sm:$0xff] }
 0x2d8   :  { %7067 = vmatpush2.bf16.msra.mxu0 %v10605_v5  ;;  %v10942_v1 = vcombine.high %v852_v56, %v856_v57  ;;  %v716_v5 = vld [vmem:[#allocation5 + $0x1150] sm:$0xff] }
 0x2d9   :  { %7108 = vmatpush2.bf16.msra.mxu1 %v10733_v8  ;;  %7068 = vmatprep.subr.bf16.mxu0 %v10598_v10  ;;  %v720_v8 = vld [vmem:[#allocation5 + $0x1170] sm:$0xff] }
 0x2da   :  { %7109 = vmatprep.subr.bf16.mxu1 %v10726_v63  ;;  %v844_v63 = vld [vmem:[#allocation5 + $0x1550] sm:$0xff]  ;;  %v10805_v33 = vcombine.low %v716_v5, %v720_v8 }
 0x2db   :  { %v848_v3 = vld [vmem:[#allocation5 + $0x1570] sm:$0xff] }
 0x2dc   :  { %7069 = vmatpush2.bf16.msra.mxu0 %v10597_v13  ;;  %v10934_v25 = vcombine.high %v844_v63, %v848_v3  ;;  %v708_v26 = vld [vmem:[#allocation5 + $0x1110] sm:$0xff] }
 0x2dd   :  { %7110 = vmatpush2.bf16.msra.mxu1 %v10725_v14  ;;  %7070 = vmatprep.subr.bf16.mxu0 %v10590_v61  ;;  %v10941_v14 = vcombine.low %v852_v56, %v856_v57  ;;  %v10806_v61 = vcombine.high %v716_v5, %v720_v8  ;;  %v828_v42 = vld [vmem:[#allocation5 + $0x14d0] sm:$0xff] }
 0x2de   :  { %7111 = vmatprep.subr.bf16.mxu1 %v10718_v21  ;;  %v832_v43 = vld [vmem:[#allocation5 + $0x14f0] sm:$0xff] }
 0x2df   :  { %v820_v54 = vld [vmem:[#allocation5 + $0x1490] sm:$0xff]  ;;  %v10917_v57 = vcombine.low %v828_v42, %v832_v43 }
 0x2e0   :  { %7071 = vmatpush2.bf16.msra.mxu0 %v10589_v2  ;;  %v712_v2 = vld [vmem:[#allocation5 + $0x1130] sm:$0xff] }
 0x2e1   :  { %7112 = vmatpush2.bf16.msra.mxu1 %v10717_v27  ;;  %7072 = vmatprep.subr.bf16.mxu0 %v10582_v29  ;;  %v836_v27 = vld [vmem:[#allocation5 + $0x1510] sm:$0xff]  ;;  %v10798_v35 = vcombine.high %v708_v26, %v712_v2  ;;  %v10797_v45 = vcombine.low %v708_v26, %v712_v2 }
 0x2e2   :  { %7113 = vmatprep.subr.bf16.mxu1 %v10710_v30  ;;  %v840_v29 = vld [vmem:[#allocation5 + $0x1530] sm:$0xff] }
 0x2e3   :  { %v10925_v46 = vcombine.low %v836_v27, %v840_v29  ;;  %v824_v55 = vld [vmem:[#allocation5 + $0x14b0] sm:$0xff] }
 0x2e4   :  { %7073 = vmatpush2.bf16.msra.mxu0 %v10581_v36  ;;  %v812_v5 = vld [vmem:[#allocation5 + $0x1450] sm:$0xff] }
 0x2e5   :  { %7114 = vmatpush2.bf16.msra.mxu1 %v10709_v37  ;;  %7074 = vmatprep.subr.bf16.mxu0 %v10574_v38  ;;  %v10926_v37 = vcombine.high %v836_v27, %v840_v29  ;;  %v700_v38 = vld [vmem:[#allocation5 + $0x10d0] sm:$0xff] }
 0x2e6   :  { %7115 = vmatprep.subr.bf16.mxu1 %v10702_v41  ;;  %v704_v41 = vld [vmem:[#allocation5 + $0x10f0] sm:$0xff] }
 0x2e7   :  { %v10789_v56 = vcombine.low %v700_v38, %v704_v41  ;;  %v816_v8 = vld [vmem:[#allocation5 + $0x1470] sm:$0xff] }
 0x2e8   :  { %7075 = vmatpush2.bf16.msra.mxu0 %v10573_v48  ;;  %v10790_v48 = vcombine.high %v700_v38, %v704_v41  ;;  %v796_v26 = vld [vmem:[#allocation5 + $0x13d0] sm:$0xff] }
 0x2e9   :  { %7116 = vmatpush2.bf16.msra.mxu1 %v10701_v49  ;;  %7126 = vmatprep.subr.bf16.mxu0 %v10822_v52  ;;  %v10918_v49 = vcombine.high %v828_v42, %v832_v43  ;;  %v692_v52 = vld [vmem:[#allocation5 + $0x1090] sm:$0xff] }
 0x2ea   :  { %7167 = vmatprep.subr.bf16.mxu1 %v10950_v53  ;;  %v696_v53 = vld [vmem:[#allocation5 + $0x10b0] sm:$0xff] }
 0x2eb   :  { %v6832_v10 = vpop.f32.mrf.mxu0  ;;  %7077 = vmatmul.mubr.bf16.vlgmr.msra.gmra.mxu0 %v12358_v39  ;;  %v800_v2 = vld [vmem:[#allocation5 + $0x13f0] sm:$0xff] }
 0x2ec   :  { %v6833_v12 = vadd.f32 %v6832_v10, %v12435_v11  ;;  %v6873_v19 = vpop.f32.mrf.mxu1  ;;  %7118 = vmatmul.mubr.bf16.vlgmr.msra.gmra.mxu1 %v12360_v40  ;;  %7127 = vmatpush1.bf16.msra.mxu0 %v10821_v60  ;;  %v10782_v60 = vcombine.high %v692_v52, %v696_v53  ;;  %v10781_v10 = vcombine.low %v692_v52, %v696_v53  ;;  %v928_v27 = vld [vmem:[#allocation5 + $0x17f0] sm:$0xff] }
 0x2ed   :  { %7168 = vmatpush1.bf16.msra.mxu1 %v10949_v62  ;;  %v6834_v13 = vpop.f32.mrf.mxu0  ;;  %7128 = vmatprep.subr.bf16.mxu0 %v10814_v0  ;;  %v10910_v62 = vcombine.high %v820_v54, %v824_v55  ;;  %v684_v0 = vld [vmem:[#allocation5 + $0x1050] sm:$0xff]  ;;  %v10885_v38 = vcombine.low %v796_v26, %v800_v2 }
 0x2ee   :  { %v12445_v21 = vadd.f32 %v6873_v19, %v6833_v12  ;;  %v6835_v22 = vadd.f32 %v6834_v13, %v12440_v23  ;;  %v6875_v24 = vpop.f32.mrf.mxu1  ;;  %7169 = vmatprep.subr.bf16.mxu1 %v10942_v1  ;;  %7158 = vmatprep.mubr.bf16.mxu0 %v12362_v50  ;;  %v10933_v23 = vcombine.low %v844_v63, %v848_v3  ;;  %v688_v1 = vld [vmem:[#allocation5 + $0x1070] sm:$0xff] }
 0x2ef   :  { %v6836_v11 = vpop.f32.mrf.mxu0  ;;  %7199 = vmatprep.mubr.bf16.mxu1 %v12365_v51  ;;  %v10909_v63 = vcombine.low %v820_v54, %v824_v55  ;;  %v10774_v3 = vcombine.high %v684_v0, %v688_v1  ;;  %v10902_v12 = vcombine.high %v812_v5, %v816_v8  ;;  %v676_v19 = vld [vmem:[#allocation5 + $0x1010] sm:$0xff] }
 0x2f0   :  { %v12450_v30 = vadd.f32 %v6875_v24, %v6835_v22  ;;  %v6877_v32 = vpop.f32.mrf.mxu1  ;;  %7129 = vmatpush1.bf16.msra.mxu0 %v10813_v9  ;;  %v680_v9 = vld [vmem:[#allocation5 + $0x1030] sm:$0xff]  ;;  %v10901_v22 = vcombine.low %v812_v5, %v816_v8 }
 0x2f1   :  { %7170 = vmatpush1.bf16.msra.mxu1 %v10941_v14  ;;  %v6837_v34 = vpop.f32.mrf.mxu0  ;;  %7130 = vmatprep.subr.bf16.mxu0 %v10806_v61  ;;  %v804_v13 = vld [vmem:[#allocation5 + $0x1410] sm:$0xff]  ;;  %v10773_v61 = vcombine.low %v684_v0, %v688_v1  ;;  %v10766_v24 = vcombine.high %v676_v19, %v680_v9  ;;  %v10765_v29 = vcombine.low %v676_v19, %v680_v9 }
 0x2f2   :  { %v6878_v36 = vpop.f32.mrf.mxu1  ;;  %7171 = vmatprep.subr.bf16.mxu1 %v10934_v25  ;;  %v808_v14 = vld [vmem:[#allocation5 + $0x1430] sm:$0xff] }
 0x2f3   :  { %v10894_v25 = vcombine.high %v804_v13, %v808_v14  ;;  %v924_v11 = vld [vmem:[#allocation5 + $0x17d0] sm:$0xff]  ;;  %v10893_v32 = vcombine.low %v804_v13, %v808_v14 }
 0x2f4   :  { %7131 = vmatpush1.bf16.msra.mxu0 %v10805_v33  ;;  %v10886_v33 = vcombine.high %v796_v26, %v800_v2  ;;  %v11014_v34 = vcombine.high %v924_v11, %v928_v27  ;;  %v916_v36 = vld [vmem:[#allocation5 + $0x1790] sm:$0xff]  ;;  %v11013_v41 = vcombine.low %v924_v11, %v928_v27 }
 0x2f5   :  { %7172 = vmatpush1.bf16.msra.mxu1 %v10933_v23  ;;  %7132 = vmatprep.subr.bf16.mxu0 %v10798_v35  ;;  %v788_v23 = vld [vmem:[#allocation5 + $0x1390] sm:$0xff] }
 0x2f6   :  { %7173 = vmatprep.subr.bf16.mxu1 %v10926_v37  ;;  %v792_v35 = vld [vmem:[#allocation5 + $0x13b0] sm:$0xff] }
 0x2f7   :  { %v920_v37 = vld [vmem:[#allocation5 + $0x17b0] sm:$0xff]  ;;  %v10878_v42 = vcombine.high %v788_v23, %v792_v35  ;;  %v10877_v52 = vcombine.low %v788_v23, %v792_v35 }
 0x2f8   :  { %7133 = vmatpush1.bf16.msra.mxu0 %v10797_v45  ;;  %v11006_v43 = vcombine.high %v916_v36, %v920_v37  ;;  %v780_v45 = vld [vmem:[#allocation5 + $0x1350] sm:$0xff]  ;;  %v11005_v53 = vcombine.low %v916_v36, %v920_v37 }
 0x2f9   :  { %7174 = vmatpush1.bf16.msra.mxu1 %v10925_v46  ;;  %7134 = vmatprep.subr.bf16.mxu0 %v10790_v48  ;;  %v784_v46 = vld [vmem:[#allocation5 + $0x1370] sm:$0xff] }
 0x2fa   :  { %7175 = vmatprep.subr.bf16.mxu1 %v10918_v49  ;;  %v908_v48 = vld [vmem:[#allocation5 + $0x1750] sm:$0xff]  ;;  %v10870_v54 = vcombine.high %v780_v45, %v784_v46  ;;  %v10869_v0 = vcombine.low %v780_v45, %v784_v46 }
 0x2fb   :  { %v912_v49 = vld [vmem:[#allocation5 + $0x1770] sm:$0xff] }
 0x2fc   :  { %7135 = vmatpush1.bf16.msra.mxu0 %v10789_v56  ;;  %v10998_v55 = vcombine.high %v908_v48, %v912_v49  ;;  %v772_v56 = vld [vmem:[#allocation5 + $0x1310] sm:$0xff]  ;;  %v10997_v1 = vcombine.low %v908_v48, %v912_v49 }
 0x2fd   :  { %7176 = vmatpush1.bf16.msra.mxu1 %v10917_v57  ;;  %7136 = vmatprep.subr.bf16.mxu0 %v10782_v60  ;;  %v776_v57 = vld [vmem:[#allocation5 + $0x1330] sm:$0xff] }
 0x2fe   :  { %7177 = vmatprep.subr.bf16.mxu1 %v10910_v62  ;;  %v900_v60 = vld [vmem:[#allocation5 + $0x1710] sm:$0xff]  ;;  %v10862_v5 = vcombine.high %v772_v56, %v776_v57  ;;  %v10861_v19 = vcombine.low %v772_v56, %v776_v57 }
 0x2ff   :  { %v904_v62 = vld [vmem:[#allocation5 + $0x1730] sm:$0xff] }
 0x300   :  { %7137 = vmatpush1.bf16.msra.mxu0 %v10781_v10  ;;  %v10990_v8 = vcombine.high %v900_v60, %v904_v62  ;;  %v764_v10 = vld [vmem:[#allocation5 + $0x12d0] sm:$0xff]  ;;  %v10989_v9 = vcombine.low %v900_v60, %v904_v62 }
 0x301   :  { %7178 = vmatpush1.bf16.msra.mxu1 %v10909_v63  ;;  %7138 = vmatprep.subr.bf16.mxu0 %v10774_v3  ;;  %v768_v63 = vld [vmem:[#allocation5 + $0x12f0] sm:$0xff] }
 0x302   :  { %7179 = vmatprep.subr.bf16.mxu1 %v10902_v12  ;;  %v892_v3 = vld [vmem:[#allocation5 + $0x16d0] sm:$0xff]  ;;  %v10854_v13 = vcombine.high %v764_v10, %v768_v63  ;;  %v10853_v26 = vcombine.low %v764_v10, %v768_v63 }
 0x303   :  { %v896_v12 = vld [vmem:[#allocation5 + $0x16f0] sm:$0xff] }
 0x304   :  { %7139 = vmatpush1.bf16.msra.mxu0 %v10773_v61  ;;  %v10982_v14 = vcombine.high %v892_v3, %v896_v12  ;;  %v756_v61 = vld [vmem:[#allocation5 + $0x1290] sm:$0xff]  ;;  %v10981_v2 = vcombine.low %v892_v3, %v896_v12 }
 0x305   :  { %7180 = vmatpush1.bf16.msra.mxu1 %v10901_v22  ;;  %7140 = vmatprep.subr.bf16.mxu0 %v10766_v24  ;;  %v760_v22 = vld [vmem:[#allocation5 + $0x12b0] sm:$0xff] }
 0x306   :  { %7181 = vmatprep.subr.bf16.mxu1 %v10894_v25  ;;  %v884_v24 = vld [vmem:[#allocation5 + $0x1690] sm:$0xff]  ;;  %v10846_v11 = vcombine.high %v756_v61, %v760_v22  ;;  %v10845_v23 = vcombine.low %v756_v61, %v760_v22 }
 0x307   :  { %v888_v25 = vld [vmem:[#allocation5 + $0x16b0] sm:$0xff] }
 0x308   :  { %7141 = vmatpush1.bf16.msra.mxu0 %v10765_v29  ;;  %v10974_v27 = vcombine.high %v884_v24, %v888_v25  ;;  %v748_v29 = vld [vmem:[#allocation5 + $0x1250] sm:$0xff]  ;;  %v10973_v35 = vcombine.low %v884_v24, %v888_v25 }
 0x309   :  { %7182 = vmatpush1.bf16.msra.mxu1 %v10893_v32  ;;  %7142 = vmatprep.subr.bf16.mxu0 %v10886_v33  ;;  %v752_v32 = vld [vmem:[#allocation5 + $0x1270] sm:$0xff] }
 0x30a   :  { %7183 = vmatprep.subr.bf16.mxu1 %v11014_v34  ;;  %v876_v33 = vld [vmem:[#allocation5 + $0x1650] sm:$0xff]  ;;  %v10838_v36 = vcombine.high %v748_v29, %v752_v32  ;;  %v10837_v45 = vcombine.low %v748_v29, %v752_v32 }
 0x30b   :  { %v880_v34 = vld [vmem:[#allocation5 + $0x1670] sm:$0xff] }
 0x30c   :  { %7143 = vmatpush2.bf16.msra.mxu0 %v10885_v38  ;;  %v10966_v37 = vcombine.high %v876_v33, %v880_v34  ;;  %v740_v38 = vld [vmem:[#allocation5 + $0x1210] sm:$0xff]  ;;  %v10965_v46 = vcombine.low %v876_v33, %v880_v34 }
 0x30d   :  { %7184 = vmatpush2.bf16.msra.mxu1 %v11013_v41  ;;  %7144 = vmatprep.subr.bf16.mxu0 %v10878_v42  ;;  %v744_v41 = vld [vmem:[#allocation5 + $0x1230] sm:$0xff] }
 0x30e   :  { %7185 = vmatprep.subr.bf16.mxu1 %v11006_v43  ;;  %v868_v42 = vld [vmem:[#allocation5 + $0x1610] sm:$0xff]  ;;  %v10830_v48 = vcombine.high %v740_v38, %v744_v41  ;;  %v10829_v56 = vcombine.low %v740_v38, %v744_v41 }
 0x30f   :  { %v872_v43 = vld [vmem:[#allocation5 + $0x1630] sm:$0xff] }
 0x310   :  { %7145 = vmatpush2.bf16.msra.mxu0 %v10877_v52  ;;  %v10958_v49 = vcombine.high %v868_v42, %v872_v43  ;;  %v988_v52 = vld [vmem:[#allocation5 + $0x19d0] sm:$0xff]  ;;  %v10957_v57 = vcombine.low %v868_v42, %v872_v43 }
 0x311   :  { %7186 = vmatpush2.bf16.msra.mxu1 %v11005_v53  ;;  %7146 = vmatprep.subr.bf16.mxu0 %v10870_v54  ;;  %v992_v53 = vld [vmem:[#allocation5 + $0x19f0] sm:$0xff] }
 0x312   :  { %7187 = vmatprep.subr.bf16.mxu1 %v10998_v55  ;;  %v1116_v54 = vld [vmem:[#allocation5 + $0x1dd0] sm:$0xff]  ;;  %v11078_v60 = vcombine.high %v988_v52, %v992_v53  ;;  %v11077_v10 = vcombine.low %v988_v52, %v992_v53 }
 0x313   :  { %v1120_v55 = vld [vmem:[#allocation5 + $0x1df0] sm:$0xff] }
 0x314   :  { %7147 = vmatpush2.bf16.msra.mxu0 %v10869_v0  ;;  %v11206_v62 = vcombine.high %v1116_v54, %v1120_v55  ;;  %v980_v0 = vld [vmem:[#allocation5 + $0x1990] sm:$0xff]  ;;  %v11205_v63 = vcombine.low %v1116_v54, %v1120_v55 }
 0x315   :  { %7188 = vmatpush2.bf16.msra.mxu1 %v10997_v1  ;;  %7148 = vmatprep.subr.bf16.mxu0 %v10862_v5  ;;  %v984_v1 = vld [vmem:[#allocation5 + $0x19b0] sm:$0xff] }
 0x316   :  { %7189 = vmatprep.subr.bf16.mxu1 %v10990_v8  ;;  %v1108_v5 = vld [vmem:[#allocation5 + $0x1d90] sm:$0xff]  ;;  %v11070_v3 = vcombine.high %v980_v0, %v984_v1  ;;  %v11069_v25 = vcombine.low %v980_v0, %v984_v1 }
 0x317   :  { %v1112_v8 = vld [vmem:[#allocation5 + $0x1db0] sm:$0xff] }
 0x318   :  { %7149 = vmatpush2.bf16.msra.mxu0 %v10861_v19  ;;  %v11198_v12 = vcombine.high %v1108_v5, %v1112_v8  ;;  %v972_v19 = vld [vmem:[#allocation5 + $0x1950] sm:$0xff] }
 0x319   :  { %7190 = vmatpush2.bf16.msra.mxu1 %v10989_v9  ;;  %7150 = vmatprep.subr.bf16.mxu0 %v10854_v13  ;;  %v976_v9 = vld [vmem:[#allocation5 + $0x1970] sm:$0xff] }
 0x31a   :  { %7191 = vmatprep.subr.bf16.mxu1 %v10982_v14  ;;  %v1100_v14 = vld [vmem:[#allocation5 + $0x1d50] sm:$0xff]  ;;  %v11061_v41 = vcombine.low %v972_v19, %v976_v9 }
 0x31b   :  { %v1104_v61 = vld [vmem:[#allocation5 + $0x1d70] sm:$0xff] }
 0x31c   :  { %7151 = vmatpush2.bf16.msra.mxu0 %v10853_v26  ;;  %v11190_v33 = vcombine.high %v1100_v14, %v1104_v61  ;;  %v964_v34 = vld [vmem:[#allocation5 + $0x1910] sm:$0xff] }
 0x31d   :  { %7192 = vmatpush2.bf16.msra.mxu1 %v10981_v2  ;;  %7152 = vmatprep.subr.bf16.mxu0 %v10846_v11  ;;  %v11197_v2 = vcombine.low %v1108_v5, %v1112_v8  ;;  %v11062_v11 = vcombine.high %v972_v19, %v976_v9  ;;  %v1084_v52 = vld [vmem:[#allocation5 + $0x1cd0] sm:$0xff] }
 0x31e   :  { %7193 = vmatprep.subr.bf16.mxu1 %v10974_v27  ;;  %v1088_v53 = vld [vmem:[#allocation5 + $0x1cf0] sm:$0xff] }
 0x31f   :  { %v1076_v0 = vld [vmem:[#allocation5 + $0x1c90] sm:$0xff]  ;;  %v11173_v8 = vcombine.low %v1084_v52, %v1088_v53 }
 0x320   :  { %7153 = vmatpush2.bf16.msra.mxu0 %v10845_v23  ;;  %v968_v23 = vld [vmem:[#allocation5 + $0x1930] sm:$0xff] }
 0x321   :  { %7194 = vmatpush2.bf16.msra.mxu1 %v10973_v35  ;;  %7154 = vmatprep.subr.bf16.mxu0 %v10838_v36  ;;  %v1092_v35 = vld [vmem:[#allocation5 + $0x1d10] sm:$0xff]  ;;  %v11054_v43 = vcombine.high %v964_v34, %v968_v23  ;;  %v11053_v54 = vcombine.low %v964_v34, %v968_v23 }
 0x322   :  { %7195 = vmatprep.subr.bf16.mxu1 %v10966_v37  ;;  %v1096_v36 = vld [vmem:[#allocation5 + $0x1d30] sm:$0xff] }
 0x323   :  { %v11181_v55 = vcombine.low %v1092_v35, %v1096_v36  ;;  %v1080_v1 = vld [vmem:[#allocation5 + $0x1cb0] sm:$0xff] }
 0x324   :  { %7155 = vmatpush2.bf16.msra.mxu0 %v10837_v45  ;;  %v1068_v19 = vld [vmem:[#allocation5 + $0x1c50] sm:$0xff] }
 0x325   :  { %7196 = vmatpush2.bf16.msra.mxu1 %v10965_v46  ;;  %7156 = vmatprep.subr.bf16.mxu0 %v10830_v48  ;;  %v11182_v46 = vcombine.high %v1092_v35, %v1096_v36  ;;  %v956_v48 = vld [vmem:[#allocation5 + $0x18d0] sm:$0xff] }
 0x326   :  { %7197 = vmatprep.subr.bf16.mxu1 %v10958_v49  ;;  %v960_v49 = vld [vmem:[#allocation5 + $0x18f0] sm:$0xff] }
 0x327   :  { %v11045_v5 = vcombine.low %v956_v48, %v960_v49  ;;  %v1072_v9 = vld [vmem:[#allocation5 + $0x1c70] sm:$0xff] }
 0x328   :  { %7157 = vmatpush2.bf16.msra.mxu0 %v10829_v56  ;;  %v11046_v56 = vcombine.high %v956_v48, %v960_v49  ;;  %v1052_v34 = vld [vmem:[#allocation5 + $0x1bd0] sm:$0xff] }
 0x329   :  { %7198 = vmatpush2.bf16.msra.mxu1 %v10957_v57  ;;  %7208 = vmatprep.subr.bf16.mxu0 %v11078_v60  ;;  %v11174_v57 = vcombine.high %v1084_v52, %v1088_v53  ;;  %v948_v60 = vld [vmem:[#allocation5 + $0x1890] sm:$0xff] }
 0x32a   :  { %7249 = vmatprep.subr.bf16.mxu1 %v11206_v62  ;;  %v952_v62 = vld [vmem:[#allocation5 + $0x18b0] sm:$0xff] }
 0x32b   :  { %v6914_v13 = vpop.f32.mrf.mxu0  ;;  %7159 = vmatmul.mubr.bf16.vlgmr.msra.gmra.mxu0 %v12370_v6  ;;  %v1056_v23 = vld [vmem:[#allocation5 + $0x1bf0] sm:$0xff] }
 0x32c   :  { %v6915_v22 = vadd.f32 %v6914_v13, %v12445_v21  ;;  %v6955_v24 = vpop.f32.mrf.mxu1  ;;  %7200 = vmatmul.mubr.bf16.vlgmr.msra.gmra.mxu1 %v12372_v7  ;;  %7209 = vmatpush1.bf16.msra.mxu0 %v11077_v10  ;;  %v11038_v10 = vcombine.high %v948_v60, %v952_v62  ;;  %v11037_v13 = vcombine.low %v948_v60, %v952_v62  ;;  %v1184_v35 = vld [vmem:[#allocation5 + $0x1ff0] sm:$0xff] }
 0x32d   :  { %7250 = vmatpush1.bf16.msra.mxu1 %v11205_v63  ;;  %v6916_v26 = vpop.f32.mrf.mxu0  ;;  %7210 = vmatprep.subr.bf16.mxu0 %v11070_v3  ;;  %v11166_v63 = vcombine.high %v1076_v0, %v1080_v1  ;;  %v940_v3 = vld [vmem:[#allocation5 + $0x1850] sm:$0xff]  ;;  %v11141_v48 = vcombine.low %v1052_v34, %v1056_v23 }
 0x32e   :  { %v12455_v27 = vadd.f32 %v6955_v24, %v6915_v22  ;;  %v6917_v29 = vadd.f32 %v6916_v26, %v12450_v30  ;;  %v6957_v32 = vpop.f32.mrf.mxu1  ;;  %7251 = vmatprep.subr.bf16.mxu1 %v11198_v12  ;;  %7240 = vmatprep.mubr.bf16.mxu0 %v12374_v17  ;;  %v11189_v30 = vcombine.low %v1100_v14, %v1104_v61  ;;  %v944_v12 = vld [vmem:[#allocation5 + $0x1870] sm:$0xff] }
 0x32f   :  { %v6918_v21 = vpop.f32.mrf.mxu0  ;;  %7281 = vmatprep.mubr.bf16.mxu1 %v12377_v18  ;;  %v11165_v14 = vcombine.low %v1076_v0, %v1080_v1  ;;  %v11030_v61 = vcombine.high %v940_v3, %v944_v12  ;;  %v11158_v22 = vcombine.high %v1068_v19, %v1072_v9  ;;  %v932_v24 = vld [vmem:[#allocation5 + $0x1810] sm:$0xff] }
 0x330   :  { %v12460_v37 = vadd.f32 %v6957_v32, %v6917_v29  ;;  %v6959_v38 = vpop.f32.mrf.mxu1  ;;  %7211 = vmatpush1.bf16.msra.mxu0 %v11069_v25  ;;  %v936_v25 = vld [vmem:[#allocation5 + $0x1830] sm:$0xff]  ;;  %v11157_v29 = vcombine.low %v1068_v19, %v1072_v9 }
 0x331   :  { %7252 = vmatpush1.bf16.msra.mxu1 %v11197_v2  ;;  %v6919_v42 = vpop.f32.mrf.mxu0  ;;  %7212 = vmatprep.subr.bf16.mxu0 %v11062_v11  ;;  %v1060_v26 = vld [vmem:[#allocation5 + $0x1c10] sm:$0xff]  ;;  %v11029_v11 = vcombine.low %v940_v3, %v944_v12  ;;  %v11022_v32 = vcombine.high %v932_v24, %v936_v25  ;;  %v11021_v36 = vcombine.low %v932_v24, %v936_v25 }
 0x332   :  { %v6960_v45 = vpop.f32.mrf.mxu1  ;;  %7253 = vmatprep.subr.bf16.mxu1 %v11190_v33  ;;  %v1064_v2 = vld [vmem:[#allocation5 + $0x1c30] sm:$0xff] }
 0x333   :  { %v11150_v33 = vcombine.high %v1060_v26, %v1064_v2  ;;  %v1180_v21 = vld [vmem:[#allocation5 + $0x1fd0] sm:$0xff]  ;;  %v11149_v38 = vcombine.low %v1060_v26, %v1064_v2 }
 0x334   :  { %7213 = vmatpush1.bf16.msra.mxu0 %v11061_v41  ;;  %v11142_v41 = vcombine.high %v1052_v34, %v1056_v23  ;;  %v11270_v42 = vcombine.high %v1180_v21, %v1184_v35  ;;  %v1172_v45 = vld [vmem:[#allocation5 + $0x1f90] sm:$0xff]  ;;  %v11269_v49 = vcombine.low %v1180_v21, %v1184_v35 }
 0x335   :  { %7254 = vmatpush1.bf16.msra.mxu1 %v11189_v30  ;;  %7214 = vmatprep.subr.bf16.mxu0 %v11054_v43  ;;  %v1044_v30 = vld [vmem:[#allocation5 + $0x1b90] sm:$0xff] }
 0x336   :  { %7255 = vmatprep.subr.bf16.mxu1 %v11182_v46  ;;  %v1048_v43 = vld [vmem:[#allocation5 + $0x1bb0] sm:$0xff] }
 0x337   :  { %v1176_v46 = vld [vmem:[#allocation5 + $0x1fb0] sm:$0xff]  ;;  %v11134_v52 = vcombine.high %v1044_v30, %v1048_v43  ;;  %v11133_v60 = vcombine.low %v1044_v30, %v1048_v43 }
 0x338   :  { %7215 = vmatpush1.bf16.msra.mxu0 %v11053_v54  ;;  %v11262_v53 = vcombine.high %v1172_v45, %v1176_v46  ;;  %v1036_v54 = vld [vmem:[#allocation5 + $0x1b50] sm:$0xff]  ;;  %v11261_v62 = vcombine.low %v1172_v45, %v1176_v46 }
 0x339   :  { %7256 = vmatpush1.bf16.msra.mxu1 %v11181_v55  ;;  %7216 = vmatprep.subr.bf16.mxu0 %v11046_v56  ;;  %v1040_v55 = vld [vmem:[#allocation5 + $0x1b70] sm:$0xff] }
 0x33a   :  { %7257 = vmatprep.subr.bf16.mxu1 %v11174_v57  ;;  %v1164_v56 = vld [vmem:[#allocation5 + $0x1f50] sm:$0xff]  ;;  %v11126_v0 = vcombine.high %v1036_v54, %v1040_v55  ;;  %v11125_v3 = vcombine.low %v1036_v54, %v1040_v55 }
 0x33b   :  { %v1168_v57 = vld [vmem:[#allocation5 + $0x1f70] sm:$0xff] }
 0x33c   :  { %7217 = vmatpush1.bf16.msra.mxu0 %v11045_v5  ;;  %v11254_v1 = vcombine.high %v1164_v56, %v1168_v57  ;;  %v1028_v5 = vld [vmem:[#allocation5 + $0x1b10] sm:$0xff]  ;;  %v11253_v12 = vcombine.low %v1164_v56, %v1168_v57 }
 0x33d   :  { %7258 = vmatpush1.bf16.msra.mxu1 %v11173_v8  ;;  %7218 = vmatprep.subr.bf16.mxu0 %v11038_v10  ;;  %v1032_v8 = vld [vmem:[#allocation5 + $0x1b30] sm:$0xff] }
 0x33e   :  { %7259 = vmatprep.subr.bf16.mxu1 %v11166_v63  ;;  %v1156_v10 = vld [vmem:[#allocation5 + $0x1f10] sm:$0xff]  ;;  %v11118_v19 = vcombine.high %v1028_v5, %v1032_v8  ;;  %v11117_v24 = vcombine.low %v1028_v5, %v1032_v8 }
 0x33f   :  { %v1160_v63 = vld [vmem:[#allocation5 + $0x1f30] sm:$0xff] }
 0x340   :  { %7219 = vmatpush1.bf16.msra.mxu0 %v11037_v13  ;;  %v11246_v9 = vcombine.high %v1156_v10, %v1160_v63  ;;  %v1020_v13 = vld [vmem:[#allocation5 + $0x1ad0] sm:$0xff]  ;;  %v11245_v25 = vcombine.low %v1156_v10, %v1160_v63 }
 0x341   :  { %7260 = vmatpush1.bf16.msra.mxu1 %v11165_v14  ;;  %7220 = vmatprep.subr.bf16.mxu0 %v11030_v61  ;;  %v1024_v14 = vld [vmem:[#allocation5 + $0x1af0] sm:$0xff] }
 0x342   :  { %7261 = vmatprep.subr.bf16.mxu1 %v11158_v22  ;;  %v1148_v61 = vld [vmem:[#allocation5 + $0x1ed0] sm:$0xff]  ;;  %v11110_v26 = vcombine.high %v1020_v13, %v1024_v14  ;;  %v11109_v34 = vcombine.low %v1020_v13, %v1024_v14 }
 0x343   :  { %v1152_v22 = vld [vmem:[#allocation5 + $0x1ef0] sm:$0xff] }
 0x344   :  { %7221 = vmatpush1.bf16.msra.mxu0 %v11029_v11  ;;  %v11238_v2 = vcombine.high %v1148_v61, %v1152_v22  ;;  %v1012_v11 = vld [vmem:[#allocation5 + $0x1a90] sm:$0xff]  ;;  %v11237_v23 = vcombine.low %v1148_v61, %v1152_v22 }
 0x345   :  { %7262 = vmatpush1.bf16.msra.mxu1 %v11157_v29  ;;  %7222 = vmatprep.subr.bf16.mxu0 %v11022_v32  ;;  %v1016_v29 = vld [vmem:[#allocation5 + $0x1ab0] sm:$0xff] }
 0x346   :  { %7263 = vmatprep.subr.bf16.mxu1 %v11150_v33  ;;  %v1140_v32 = vld [vmem:[#allocation5 + $0x1e90] sm:$0xff]  ;;  %v11102_v21 = vcombine.high %v1012_v11, %v1016_v29  ;;  %v11101_v30 = vcombine.low %v1012_v11, %v1016_v29  ;;  %v337_v11 = vld [vmem:[#allocation5 + $0x578] sm:$0xff] }
 0x347   :  { %v1144_v33 = vld [vmem:[#allocation5 + $0x1eb0] sm:$0xff] }
 0x348   :  { %7223 = vmatpush1.bf16.msra.mxu0 %v11021_v36  ;;  %v11230_v35 = vcombine.high %v1140_v32, %v1144_v33  ;;  %v1004_v36 = vld [vmem:[#allocation5 + $0x1a50] sm:$0xff]  ;;  %v11229_v43 = vcombine.low %v1140_v32, %v1144_v33 }
 0x349   :  { %7264 = vmatpush1.bf16.msra.mxu1 %v11149_v38  ;;  %7224 = vmatprep.subr.bf16.mxu0 %v11142_v41  ;;  %v1008_v38 = vld [vmem:[#allocation5 + $0x1a70] sm:$0xff] }
 0x34a   :  { %7265 = vmatprep.subr.bf16.mxu1 %v11270_v42  ;;  %v1132_v41 = vld [vmem:[#allocation5 + $0x1e50] sm:$0xff]  ;;  %v11094_v45 = vcombine.high %v1004_v36, %v1008_v38  ;;  %v11093_v54 = vcombine.low %v1004_v36, %v1008_v38  ;;  %v197_v38 = vld [vmem:[#allocation5 + $0x118] sm:$0xff] }
 0x34b   :  { %v1136_v42 = vld [vmem:[#allocation5 + $0x1e70] sm:$0xff] }
 0x34c   :  { %7225 = vmatpush2.bf16.msra.mxu0 %v11141_v48  ;;  %v11222_v46 = vcombine.high %v1132_v41, %v1136_v42  ;;  %v996_v48 = vld [vmem:[#allocation5 + $0x1a10] sm:$0xff]  ;;  %v11221_v55 = vcombine.low %v1132_v41, %v1136_v42  ;;  %v201_v41 = vld [vmem:[#allocation5 + $0x138] sm:$0xff] }
 0x34d   :  { %7266 = vmatpush2.bf16.msra.mxu1 %v11269_v49  ;;  %7226 = vmatprep.subr.bf16.mxu0 %v11134_v52  ;;  %v1000_v49 = vld [vmem:[#allocation5 + $0x1a30] sm:$0xff] }
 0x34e   :  { %7267 = vmatprep.subr.bf16.mxu1 %v11262_v53  ;;  %v1124_v52 = vld [vmem:[#allocation5 + $0x1e10] sm:$0xff]  ;;  %v11086_v56 = vcombine.high %v996_v48, %v1000_v49  ;;  %v11085_v5 = vcombine.low %v996_v48, %v1000_v49 }
 0x34f   :  { %v1128_v53 = vld [vmem:[#allocation5 + $0x1e30] sm:$0xff] }
 0x350   :  { %7227 = vmatpush2.bf16.msra.mxu0 %v11133_v60  ;;  %v11214_v57 = vcombine.high %v1124_v52, %v1128_v53  ;;  %v221_v60 = vld [vmem:[#allocation5 + $0x1d8] sm:$0xff]  ;;  %v11213_v8 = vcombine.low %v1124_v52, %v1128_v53  ;;  %v10288_v53 = vcombine.high %v197_v38, %v201_v41 }
 0x351   :  { %7268 = vmatpush2.bf16.msra.mxu1 %v11261_v62  ;;  %7228 = vmatprep.subr.bf16.mxu0 %v11126_v0  ;;  %v225_v62 = vld [vmem:[#allocation5 + $0x1f8] sm:$0xff] }
 0x352   :  { %7269 = vmatprep.subr.bf16.mxu1 %v11254_v1  ;;  %v349_v0 = vld [vmem:[#allocation5 + $0x5d8] sm:$0xff]  ;;  %v10312_v10 = vcombine.high %v221_v60, %v225_v62  ;;  %v10311_v13 = vcombine.low %v221_v60, %v225_v62  ;;  %v10287_v62 = vcombine.low %v197_v38, %v201_v41 }
 0x353   :  { %v353_v1 = vld [vmem:[#allocation5 + $0x5f8] sm:$0xff] }
 0x354   :  { %7229 = vmatpush2.bf16.msra.mxu0 %v11125_v3  ;;  %v10440_v63 = vcombine.high %v349_v0, %v353_v1  ;;  %v213_v3 = vld [vmem:[#allocation5 + $0x198] sm:$0xff]  ;;  %v10439_v14 = vcombine.low %v349_v0, %v353_v1 }
 0x355   :  { %7270 = vmatpush2.bf16.msra.mxu1 %v11253_v12  ;;  %7230 = vmatprep.subr.bf16.mxu0 %v11118_v19  ;;  %v217_v12 = vld [vmem:[#allocation5 + $0x1b8] sm:$0xff] }
 0x356   :  { %7271 = vmatprep.subr.bf16.mxu1 %v11246_v9  ;;  %v341_v19 = vld [vmem:[#allocation5 + $0x598] sm:$0xff]  ;;  %v10304_v61 = vcombine.high %v213_v3, %v217_v12  ;;  %v10303_v32 = vcombine.low %v213_v3, %v217_v12 }
 0x357   :  { %v345_v9 = vld [vmem:[#allocation5 + $0x5b8] sm:$0xff] }
 0x358   :  { %7231 = vmatpush2.bf16.msra.mxu0 %v11117_v24  ;;  %v10432_v22 = vcombine.high %v341_v19, %v345_v9  ;;  %v205_v24 = vld [vmem:[#allocation5 + $0x158] sm:$0xff] }
 0x359   :  { %7272 = vmatpush2.bf16.msra.mxu1 %v11245_v25  ;;  %7232 = vmatprep.subr.bf16.mxu0 %v11110_v26  ;;  %v209_v25 = vld [vmem:[#allocation5 + $0x178] sm:$0xff] }
 0x35a   :  { %7273 = vmatprep.subr.bf16.mxu1 %v11238_v2  ;;  %v333_v2 = vld [vmem:[#allocation5 + $0x558] sm:$0xff]  ;;  %v10295_v48 = vcombine.low %v205_v24, %v209_v25 }
 0x35b   :  { %v10424_v36 = vcombine.high %v333_v2, %v337_v11  ;;  %v10423_v52 = vcombine.low %v333_v2, %v337_v11  ;;  %v321_v60 = vld [vmem:[#allocation5 + $0x4f8] sm:$0xff] }
 0x35c   :  { %7233 = vmatpush2.bf16.msra.mxu0 %v11109_v34  ;;  %v165_v11 = vld [vmem:[#allocation5 + $0x18] sm:$0xff] }
 0x35d   :  { %7274 = vmatpush2.bf16.msra.mxu1 %v11237_v23  ;;  %7234 = vmatprep.subr.bf16.mxu0 %v11102_v21  ;;  %v10431_v23 = vcombine.low %v341_v19, %v345_v9  ;;  %v10296_v21 = vcombine.high %v205_v24, %v209_v25  ;;  %v285_v38 = vld [vmem:[#allocation5 + $0x3d8] sm:$0xff] }
 0x35e   :  { %7275 = vmatprep.subr.bf16.mxu1 %v11230_v35  ;;  %v289_v41 = vld [vmem:[#allocation5 + $0x3f8] sm:$0xff] }
 0x360   :  { %7235 = vmatpush2.bf16.msra.mxu0 %v11101_v30 }
 0x361   :  { %7276 = vmatpush2.bf16.msra.mxu1 %v11229_v43  ;;  %7236 = vmatprep.subr.bf16.mxu0 %v11094_v45  ;;  %v325_v43 = vld [vmem:[#allocation5 + $0x518] sm:$0xff] }
 0x362   :  { %7277 = vmatprep.subr.bf16.mxu1 %v11222_v46  ;;  %v329_v45 = vld [vmem:[#allocation5 + $0x538] sm:$0xff] }
 0x364   :  { %7237 = vmatpush2.bf16.msra.mxu0 %v11093_v54 }
 0x365   :  { %7278 = vmatpush2.bf16.msra.mxu1 %v11221_v55  ;;  %7238 = vmatprep.subr.bf16.mxu0 %v11086_v56  ;;  %v10416_v55 = vcombine.high %v325_v43, %v329_v45  ;;  %v189_v56 = vld [vmem:[#allocation5 + $0xd8] sm:$0xff] }
 0x366   :  { %7279 = vmatprep.subr.bf16.mxu1 %v11214_v57  ;;  %v317_v57 = vld [vmem:[#allocation5 + $0x4d8] sm:$0xff] }
 0x367   :  { %v10408_v1 = vcombine.high %v317_v57, %v321_v60  ;;  %v10407_v12 = vcombine.low %v317_v57, %v321_v60 }
 0x368   :  { %7239 = vmatpush2.bf16.msra.mxu0 %v11085_v5  ;;  %v181_v5 = vld [vmem:[#allocation5 + $0x98] sm:$0xff] }
 0x369   :  { %7280 = vmatpush2.bf16.msra.mxu1 %v11213_v8  ;;  %7290 = vmatprep.subr.bf16.mxu0 %v10312_v10  ;;  %v185_v8 = vld [vmem:[#allocation5 + $0xb8] sm:$0xff] }
 0x36a   :  { %7331 = vmatprep.subr.bf16.mxu1 %v10440_v63  ;;  %v309_v10 = vld [vmem:[#allocation5 + $0x498] sm:$0xff]  ;;  %v10272_v19 = vcombine.high %v181_v5, %v185_v8  ;;  %v10271_v24 = vcombine.low %v181_v5, %v185_v8 }
 0x36b   :  { %v6996_v26 = vpop.f32.mrf.mxu0  ;;  %7241 = vmatmul.mubr.bf16.vlgmr.msra.gmra.mxu0 %v12382_v44  ;;  %v313_v63 = vld [vmem:[#allocation5 + $0x4b8] sm:$0xff] }
 0x36c   :  { %v7037_v29 = vpop.f32.mrf.mxu1  ;;  %7282 = vmatmul.mubr.bf16.vlgmr.msra.gmra.mxu1 %v12384_v47  ;;  %7291 = vmatpush1.bf16.msra.mxu0 %v10311_v13  ;;  %v10400_v9 = vcombine.high %v309_v10, %v313_v63  ;;  %v173_v13 = vld [vmem:[#allocation5 + $0x58] sm:$0xff]  ;;  %v10399_v25 = vcombine.low %v309_v10, %v313_v63 }
 0x36d   :  { %v12464_v33 = vadd.f32 %v7037_v29, %v6996_v26  ;;  %7332 = vmatpush1.bf16.msra.mxu1 %v10439_v14  ;;  %v6998_v34 = vpop.f32.mrf.mxu0  ;;  %7292 = vmatprep.subr.bf16.mxu0 %v10304_v61  ;;  %v177_v14 = vld [vmem:[#allocation5 + $0x78] sm:$0xff] }
 0x36e   :  { %v7039_v35 = vpop.f32.mrf.mxu1  ;;  %7333 = vmatprep.subr.bf16.mxu1 %v10432_v22  ;;  %7322 = vmatprep.mubr.bf16.mxu0 %v12340_v58  ;;  %v193_v58 = vld [vmem:[#allocation5 + $0xf8] sm:$0xff]  ;;  %v10264_v26 = vcombine.high %v173_v13, %v177_v14 }
 0x36f   :  { %v12467_v42 = vadd.f32 %v7039_v35, %v6998_v34  ;;  %v7000_v30 = vpop.f32.mrf.mxu0  ;;  %7363 = vmatprep.mubr.bf16.mxu1 %v12342_v59  ;;  %v10415_v59 = vcombine.low %v325_v43, %v329_v45  ;;  %v10280_v0 = vcombine.high %v189_v56, %v193_v58  ;;  %v10279_v3 = vcombine.low %v189_v56, %v193_v58  ;;  %v301_v61 = vld [vmem:[#allocation5 + $0x458] sm:$0xff] }
 0x370   :  { %v7041_v46 = vpop.f32.mrf.mxu1  ;;  %7293 = vmatpush1.bf16.msra.mxu0 %v10303_v32  ;;  %v305_v22 = vld [vmem:[#allocation5 + $0x478] sm:$0xff]  ;;  %v10375_v56 = vcombine.low %v285_v38, %v289_v41 }
 0x371   :  { %7334 = vmatpush1.bf16.msra.mxu1 %v10431_v23  ;;  %v7001_v49 = vpop.f32.mrf.mxu0  ;;  %7294 = vmatprep.subr.bf16.mxu0 %v10296_v21  ;;  %v10392_v2 = vcombine.high %v301_v61, %v305_v22  ;;  %v169_v29 = vld [vmem:[#allocation5 + $0x38] sm:$0xff]  ;;  %v10263_v23 = vcombine.low %v173_v13, %v177_v14  ;;  %v10391_v21 = vcombine.low %v301_v61, %v305_v22 }
 0x372   :  { %v7042_v54 = vpop.f32.mrf.mxu1  ;;  %7335 = vmatprep.subr.bf16.mxu1 %v10424_v36  ;;  %v293_v32 = vld [vmem:[#allocation5 + $0x418] sm:$0xff]  ;;  %v10256_v35 = vcombine.high %v165_v11, %v169_v29  ;;  %v10255_v45 = vcombine.low %v165_v11, %v169_v29 }
 0x373   :  { %v297_v34 = vld [vmem:[#allocation5 + $0x438] sm:$0xff] }
 0x374   :  { %7295 = vmatpush1.bf16.msra.mxu0 %v10295_v48  ;;  %v10384_v36 = vcombine.high %v293_v32, %v297_v34  ;;  %v413_v30 = vld [vmem:[#allocation5 + $0x7d8] sm:$0xff]  ;;  %v10383_v46 = vcombine.low %v293_v32, %v297_v34  ;;  %v10376_v48 = vcombine.high %v285_v38, %v289_v41 }
 0x375   :  { %7336 = vmatpush1.bf16.msra.mxu1 %v10423_v52  ;;  %7296 = vmatprep.subr.bf16.mxu0 %v10288_v53  ;;  %v417_v43 = vld [vmem:[#allocation5 + $0x7f8] sm:$0xff] }
 0x376   :  { %7337 = vmatprep.subr.bf16.mxu1 %v10416_v55  ;;  %v10504_v49 = vcombine.high %v413_v30, %v417_v43  ;;  %v277_v52 = vld [vmem:[#allocation5 + $0x398] sm:$0xff]  ;;  %v10503_v58 = vcombine.low %v413_v30, %v417_v43 }
 0x377   :  { %v281_v53 = vld [vmem:[#allocation5 + $0x3b8] sm:$0xff] }
 0x378   :  { %7297 = vmatpush1.bf16.msra.mxu0 %v10287_v62  ;;  %v405_v54 = vld [vmem:[#allocation5 + $0x798] sm:$0xff]  ;;  %v10368_v57 = vcombine.high %v277_v52, %v281_v53  ;;  %v10367_v5 = vcombine.low %v277_v52, %v281_v53 }
 0x379   :  { %7338 = vmatpush1.bf16.msra.mxu1 %v10415_v59  ;;  %7298 = vmatprep.subr.bf16.mxu0 %v10280_v0  ;;  %v409_v55 = vld [vmem:[#allocation5 + $0x7b8] sm:$0xff] }
 0x37a   :  { %7339 = vmatprep.subr.bf16.mxu1 %v10408_v1  ;;  %v10496_v60 = vcombine.high %v405_v54, %v409_v55  ;;  %v269_v62 = vld [vmem:[#allocation5 + $0x358] sm:$0xff]  ;;  %v10495_v8 = vcombine.low %v405_v54, %v409_v55 }
 0x37b   :  { %v273_v59 = vld [vmem:[#allocation5 + $0x378] sm:$0xff] }
 0x37c   :  { %7299 = vmatpush1.bf16.msra.mxu0 %v10279_v3  ;;  %v397_v0 = vld [vmem:[#allocation5 + $0x758] sm:$0xff]  ;;  %v10360_v10 = vcombine.high %v269_v62, %v273_v59  ;;  %v10359_v13 = vcombine.low %v269_v62, %v273_v59 }
 0x37d   :  { %7340 = vmatpush1.bf16.msra.mxu1 %v10407_v12  ;;  %7300 = vmatprep.subr.bf16.mxu0 %v10272_v19  ;;  %v401_v1 = vld [vmem:[#allocation5 + $0x778] sm:$0xff] }
 0x37e   :  { %7341 = vmatprep.subr.bf16.mxu1 %v10400_v9  ;;  %v10488_v63 = vcombine.high %v397_v0, %v401_v1  ;;  %v261_v3 = vld [vmem:[#allocation5 + $0x318] sm:$0xff]  ;;  %v10487_v14 = vcombine.low %v397_v0, %v401_v1 }
 0x37f   :  { %v265_v12 = vld [vmem:[#allocation5 + $0x338] sm:$0xff] }
 0x380   :  { %7301 = vmatpush1.bf16.msra.mxu0 %v10271_v24  ;;  %v389_v19 = vld [vmem:[#allocation5 + $0x718] sm:$0xff]  ;;  %v10352_v61 = vcombine.high %v261_v3, %v265_v12  ;;  %v10351_v11 = vcombine.low %v261_v3, %v265_v12 }
 0x381   :  { %7342 = vmatpush1.bf16.msra.mxu1 %v10399_v25  ;;  %7302 = vmatprep.subr.bf16.mxu0 %v10264_v26  ;;  %v393_v9 = vld [vmem:[#allocation5 + $0x738] sm:$0xff] }
 0x382   :  { %7343 = vmatprep.subr.bf16.mxu1 %v10392_v2  ;;  %v10480_v22 = vcombine.high %v389_v19, %v393_v9  ;;  %v253_v24 = vld [vmem:[#allocation5 + $0x2d8] sm:$0xff]  ;;  %v10479_v29 = vcombine.low %v389_v19, %v393_v9 }
 0x383   :  { %v257_v25 = vld [vmem:[#allocation5 + $0x2f8] sm:$0xff] }
 0x384   :  { %7303 = vmatpush1.bf16.msra.mxu0 %v10263_v23  ;;  %v381_v26 = vld [vmem:[#allocation5 + $0x6d8] sm:$0xff]  ;;  %v10344_v32 = vcombine.high %v253_v24, %v257_v25  ;;  %v10343_v38 = vcombine.low %v253_v24, %v257_v25 }
 0x385   :  { %7344 = vmatpush1.bf16.msra.mxu1 %v10391_v21  ;;  %7304 = vmatprep.subr.bf16.mxu0 %v10256_v35  ;;  %v385_v2 = vld [vmem:[#allocation5 + $0x6f8] sm:$0xff] }
 0x386   :  { %7345 = vmatprep.subr.bf16.mxu1 %v10384_v36  ;;  %v10472_v34 = vcombine.high %v381_v26, %v385_v2  ;;  %v245_v23 = vld [vmem:[#allocation5 + $0x298] sm:$0xff]  ;;  %v10471_v41 = vcombine.low %v381_v26, %v385_v2 }
 0x387   :  { %v249_v21 = vld [vmem:[#allocation5 + $0x2b8] sm:$0xff] }
 0x388   :  { %7305 = vmatpush1.bf16.msra.mxu0 %v10255_v45  ;;  %v373_v35 = vld [vmem:[#allocation5 + $0x698] sm:$0xff]  ;;  %v10336_v30 = vcombine.high %v245_v23, %v249_v21  ;;  %v10335_v52 = vcombine.low %v245_v23, %v249_v21 }
 0x389   :  { %7346 = vmatpush1.bf16.msra.mxu1 %v10383_v46  ;;  %7306 = vmatprep.subr.bf16.mxu0 %v10376_v48  ;;  %v377_v36 = vld [vmem:[#allocation5 + $0x6b8] sm:$0xff] }
 0x38a   :  { %7347 = vmatprep.subr.bf16.mxu1 %v10504_v49  ;;  %v10464_v43 = vcombine.high %v373_v35, %v377_v36  ;;  %v237_v45 = vld [vmem:[#allocation5 + $0x258] sm:$0xff]  ;;  %v10463_v53 = vcombine.low %v373_v35, %v377_v36 }
 0x38b   :  { %v241_v46 = vld [vmem:[#allocation5 + $0x278] sm:$0xff] }
 0x38c   :  { %7307 = vmatpush2.bf16.msra.mxu0 %v10375_v56  ;;  %v365_v48 = vld [vmem:[#allocation5 + $0x658] sm:$0xff]  ;;  %v10328_v54 = vcombine.high %v237_v45, %v241_v46  ;;  %v10327_v62 = vcombine.low %v237_v45, %v241_v46 }
 0x38d   :  { %7348 = vmatpush2.bf16.msra.mxu1 %v10503_v58  ;;  %7308 = vmatprep.subr.bf16.mxu0 %v10368_v57  ;;  %v369_v49 = vld [vmem:[#allocation5 + $0x678] sm:$0xff] }
 0x38e   :  { %7349 = vmatprep.subr.bf16.mxu1 %v10496_v60  ;;  %v10456_v55 = vcombine.high %v365_v48, %v369_v49  ;;  %v229_v56 = vld [vmem:[#allocation5 + $0x218] sm:$0xff]  ;;  %v10455_v59 = vcombine.low %v365_v48, %v369_v49 }
 0x38f   :  { %v233_v58 = vld [vmem:[#allocation5 + $0x238] sm:$0xff] }
 0x390   :  { %7309 = vmatpush2.bf16.msra.mxu0 %v10367_v5  ;;  %v357_v57 = vld [vmem:[#allocation5 + $0x618] sm:$0xff]  ;;  %v10320_v0 = vcombine.high %v229_v56, %v233_v58  ;;  %v10319_v3 = vcombine.low %v229_v56, %v233_v58 }
 0x391   :  { %7350 = vmatpush2.bf16.msra.mxu1 %v10495_v8  ;;  %7310 = vmatprep.subr.bf16.mxu0 %v10360_v10  ;;  %v361_v60 = vld [vmem:[#allocation5 + $0x638] sm:$0xff] }
 0x392   :  { %7351 = vmatprep.subr.bf16.mxu1 %v10488_v63  ;;  %v10448_v1 = vcombine.high %v357_v57, %v361_v60  ;;  %v477_v5 = vld [vmem:[#allocation5 + $0x9d8] sm:$0xff]  ;;  %v10447_v12 = vcombine.low %v357_v57, %v361_v60 }
 0x393   :  { %v481_v8 = vld [vmem:[#allocation5 + $0x9f8] sm:$0xff] }
 0x394   :  { %7311 = vmatpush2.bf16.msra.mxu0 %v10359_v13  ;;  %v605_v10 = vld [vmem:[#allocation5 + $0xdd8] sm:$0xff]  ;;  %v10568_v19 = vcombine.high %v477_v5, %v481_v8  ;;  %v10567_v24 = vcombine.low %v477_v5, %v481_v8 }
 0x395   :  { %7352 = vmatpush2.bf16.msra.mxu1 %v10487_v14  ;;  %7312 = vmatprep.subr.bf16.mxu0 %v10352_v61  ;;  %v609_v63 = vld [vmem:[#allocation5 + $0xdf8] sm:$0xff] }
 0x396   :  { %7353 = vmatprep.subr.bf16.mxu1 %v10480_v22  ;;  %v10696_v9 = vcombine.high %v605_v10, %v609_v63  ;;  %v469_v13 = vld [vmem:[#allocation5 + $0x998] sm:$0xff]  ;;  %v10695_v25 = vcombine.low %v605_v10, %v609_v63 }
 0x397   :  { %v473_v14 = vld [vmem:[#allocation5 + $0x9b8] sm:$0xff] }
 0x398   :  { %7313 = vmatpush2.bf16.msra.mxu0 %v10351_v11  ;;  %v597_v61 = vld [vmem:[#allocation5 + $0xd98] sm:$0xff]  ;;  %v10560_v26 = vcombine.high %v469_v13, %v473_v14  ;;  %v10559_v36 = vcombine.low %v469_v13, %v473_v14 }
 0x399   :  { %7354 = vmatpush2.bf16.msra.mxu1 %v10479_v29  ;;  %7314 = vmatprep.subr.bf16.mxu0 %v10344_v32  ;;  %v601_v22 = vld [vmem:[#allocation5 + $0xdb8] sm:$0xff] }
 0x39a   :  { %7355 = vmatprep.subr.bf16.mxu1 %v10472_v34  ;;  %v10688_v2 = vcombine.high %v597_v61, %v601_v22  ;;  %v461_v11 = vld [vmem:[#allocation5 + $0x958] sm:$0xff] }
 0x39b   :  { %v465_v29 = vld [vmem:[#allocation5 + $0x978] sm:$0xff] }
 0x39c   :  { %7315 = vmatpush2.bf16.msra.mxu0 %v10343_v38  ;;  %v589_v34 = vld [vmem:[#allocation5 + $0xd58] sm:$0xff] }
 0x39d   :  { %7356 = vmatpush2.bf16.msra.mxu1 %v10471_v41  ;;  %7316 = vmatprep.subr.bf16.mxu0 %v10336_v30  ;;  %v593_v23 = vld [vmem:[#allocation5 + $0xd78] sm:$0xff]  ;;  %v10687_v41 = vcombine.low %v597_v61, %v601_v22  ;;  %v10552_v30 = vcombine.high %v461_v11, %v465_v29 }
 0x39e   :  { %7357 = vmatprep.subr.bf16.mxu1 %v10464_v43  ;;  %v453_v48 = vld [vmem:[#allocation5 + $0x918] sm:$0xff] }
 0x39f   :  { %v457_v49 = vld [vmem:[#allocation5 + $0x938] sm:$0xff] }
 0x3a0   :  { %7317 = vmatpush2.bf16.msra.mxu0 %v10335_v52  ;;  %v585_v52 = vld [vmem:[#allocation5 + $0xd38] sm:$0xff]  ;;  %v10544_v58 = vcombine.high %v453_v48, %v457_v49 }
 0x3a1   :  { %7358 = vmatpush2.bf16.msra.mxu1 %v10463_v53  ;;  %7318 = vmatprep.subr.bf16.mxu0 %v10328_v54  ;;  %v437_v10 = vld [vmem:[#allocation5 + $0x898] sm:$0xff] }
 0x3a2   :  { %7359 = vmatprep.subr.bf16.mxu1 %v10456_v55  ;;  %v10551_v55 = vcombine.low %v461_v11, %v465_v29  ;;  %v441_v63 = vld [vmem:[#allocation5 + $0x8b8] sm:$0xff] }
 0x3a3   :  { %v10528_v13 = vcombine.high %v437_v10, %v441_v63  ;;  %v429_v61 = vld [vmem:[#allocation5 + $0x858] sm:$0xff] }
 0x3a4   :  { %7319 = vmatpush2.bf16.msra.mxu0 %v10327_v62  ;;  %v445_v62 = vld [vmem:[#allocation5 + $0x8d8] sm:$0xff] }
 0x3a5   :  { %7360 = vmatpush2.bf16.msra.mxu1 %v10455_v59  ;;  %7320 = vmatprep.subr.bf16.mxu0 %v10320_v0  ;;  %v573_v59 = vld [vmem:[#allocation5 + $0xcd8] sm:$0xff] }
 0x3a6   :  { %7361 = vmatprep.subr.bf16.mxu1 %v10448_v1  ;;  %v577_v0 = vld [vmem:[#allocation5 + $0xcf8] sm:$0xff]  ;;  %v10543_v1 = vcombine.low %v453_v48, %v457_v49 }
 0x3a7   :  { %v10664_v8 = vcombine.high %v573_v59, %v577_v0  ;;  %v433_v22 = vld [vmem:[#allocation5 + $0x878] sm:$0xff] }
 0x3a8   :  { %7321 = vmatpush2.bf16.msra.mxu0 %v10319_v3  ;;  %v565_v3 = vld [vmem:[#allocation5 + $0xc98] sm:$0xff]  ;;  %v10520_v11 = vcombine.high %v429_v61, %v433_v22 }
 0x3a9   :  { %7362 = vmatpush2.bf16.msra.mxu1 %v10447_v12  ;;  %7372 = vmatprep.subr.bf16.mxu0 %v10568_v19  ;;  %v569_v12 = vld [vmem:[#allocation5 + $0xcb8] sm:$0xff] }
 0x3aa   :  { %7413 = vmatprep.subr.bf16.mxu1 %v10696_v9  ;;  %v10663_v9 = vcombine.low %v573_v59, %v577_v0  ;;  %v10656_v14 = vcombine.high %v565_v3, %v569_v12  ;;  %v653_v59 = vld [vmem:[#allocation5 + $0xf58] sm:$0xff] }
 0x3ab   :  { %v7078_v32 = vpop.f32.mrf.mxu0  ;;  %7323 = vmatmul.mubr.bf16.vlgmr.msra.gmra.mxu0 %v12346_v16  ;;  %v10680_v16 = vcombine.high %v589_v34, %v593_v23  ;;  %v657_v0 = vld [vmem:[#allocation5 + $0xf78] sm:$0xff] }
 0x3ac   :  { %v7079_v21 = vadd.f32 %v7078_v32, %v12464_v33  ;;  %v7119_v35 = vpop.f32.mrf.mxu1  ;;  %7364 = vmatmul.mubr.bf16.vlgmr.msra.gmra.mxu1 %v12348_v20  ;;  %7373 = vmatpush1.bf16.msra.mxu0 %v10567_v24  ;;  %v581_v20 = vld [vmem:[#allocation5 + $0xd18] sm:$0xff] }
 0x3ad   :  { %7414 = vmatpush1.bf16.msra.mxu1 %v10695_v25  ;;  %v7080_v38 = vpop.f32.mrf.mxu0  ;;  %7374 = vmatprep.subr.bf16.mxu0 %v10560_v26  ;;  %v10672_v60 = vcombine.high %v581_v20, %v585_v52  ;;  %v557_v24 = vld [vmem:[#allocation5 + $0xc58] sm:$0xff]  ;;  %v10527_v26 = vcombine.low %v437_v10, %v441_v63 }
 0x3ae   :  { %v12473_v43 = vadd.f32 %v7119_v35, %v7079_v21  ;;  %v7081_v45 = vadd.f32 %v7080_v38, %v12467_v42  ;;  %v7121_v46 = vpop.f32.mrf.mxu1  ;;  %7415 = vmatprep.subr.bf16.mxu1 %v10688_v2  ;;  %7404 = vmatprep.mubr.bf16.mxu0 %v12350_v28  ;;  %v10679_v42 = vcombine.low %v589_v34, %v593_v23  ;;  %v449_v28 = vld [vmem:[#allocation5 + $0x8f8] sm:$0xff] }
 0x3af   :  { %v7082_v33 = vpop.f32.mrf.mxu0  ;;  %7445 = vmatprep.mubr.bf16.mxu1 %v12353_v31  ;;  %v10671_v31 = vcombine.low %v581_v20, %v585_v52  ;;  %v10536_v5 = vcombine.high %v445_v62, %v449_v28  ;;  %v10535_v19 = vcombine.low %v445_v62, %v449_v28  ;;  %v561_v25 = vld [vmem:[#allocation5 + $0xc78] sm:$0xff]  ;;  %v10655_v2 = vcombine.low %v565_v3, %v569_v12 }
 0x3b0   :  { %v12478_v53 = vadd.f32 %v7121_v46, %v7081_v45  ;;  %v7123_v54 = vpop.f32.mrf.mxu1  ;;  %7375 = vmatpush1.bf16.msra.mxu0 %v10559_v36  ;;  %v10648_v29 = vcombine.high %v557_v24, %v561_v25  ;;  %v421_v32 = vld [vmem:[#allocation5 + $0x818] sm:$0xff]  ;;  %v10519_v35 = vcombine.low %v429_v61, %v433_v22  ;;  %v10647_v36 = vcombine.low %v557_v24, %v561_v25 }
 0x3b1   :  { %7416 = vmatpush1.bf16.msra.mxu1 %v10687_v41  ;;  %v7083_v56 = vpop.f32.mrf.mxu0  ;;  %7376 = vmatprep.subr.bf16.mxu0 %v10552_v30  ;;  %v425_v34 = vld [vmem:[#allocation5 + $0x838] sm:$0xff] }
 0x3b2   :  { %v7124_v57 = vpop.f32.mrf.mxu1  ;;  %7417 = vmatprep.subr.bf16.mxu1 %v10680_v16  ;;  %v549_v23 = vld [vmem:[#allocation5 + $0xc18] sm:$0xff]  ;;  %v10512_v38 = vcombine.high %v421_v32, %v425_v34  ;;  %v10511_v48 = vcombine.low %v421_v32, %v425_v34 }
 0x3b3   :  { %v553_v21 = vld [vmem:[#allocation5 + $0xc38] sm:$0xff] }
 0x3b4   :  { %7377 = vmatpush1.bf16.msra.mxu0 %v10551_v55  ;;  %v10640_v41 = vcombine.high %v549_v23, %v553_v21  ;;  %v541_v30 = vld [vmem:[#allocation5 + $0xbd8] sm:$0xff]  ;;  %v10639_v49 = vcombine.low %v549_v23, %v553_v21 }
 0x3b5   :  { %7418 = vmatpush1.bf16.msra.mxu1 %v10679_v42  ;;  %7378 = vmatprep.subr.bf16.mxu0 %v10544_v58  ;;  %v545_v45 = vld [vmem:[#allocation5 + $0xbf8] sm:$0xff] }
 0x3b6   :  { %7419 = vmatprep.subr.bf16.mxu1 %v10672_v60  ;;  %v669_v46 = vld [vmem:[#allocation5 + $0xfd8] sm:$0xff]  ;;  %v10632_v33 = vcombine.high %v541_v30, %v545_v45  ;;  %v10631_v42 = vcombine.low %v541_v30, %v545_v45 }
 0x3b7   :  { %v673_v16 = vld [vmem:[#allocation5 + $0xff8] sm:$0xff] }
 0x3b8   :  { %7379 = vmatpush1.bf16.msra.mxu0 %v10543_v1  ;;  %v10760_v20 = vcombine.high %v669_v46, %v673_v16  ;;  %v533_v52 = vld [vmem:[#allocation5 + $0xb98] sm:$0xff]  ;;  %v10759_v58 = vcombine.low %v669_v46, %v673_v16 }
 0x3b9   :  { %7420 = vmatpush1.bf16.msra.mxu1 %v10671_v31  ;;  %7380 = vmatprep.subr.bf16.mxu0 %v10536_v5  ;;  %v537_v54 = vld [vmem:[#allocation5 + $0xbb8] sm:$0xff] }
 0x3ba   :  { %7421 = vmatprep.subr.bf16.mxu1 %v10664_v8  ;;  %v661_v55 = vld [vmem:[#allocation5 + $0xf98] sm:$0xff]  ;;  %v10624_v57 = vcombine.high %v533_v52, %v537_v54  ;;  %v10623_v1 = vcombine.low %v533_v52, %v537_v54  ;;  %v10744_v8 = vcombine.high %v653_v59, %v657_v0 }
 0x3bb   :  { %v665_v56 = vld [vmem:[#allocation5 + $0xfb8] sm:$0xff] }
 0x3bc   :  { %7381 = vmatpush1.bf16.msra.mxu0 %v10535_v19  ;;  %v10752_v60 = vcombine.high %v661_v55, %v665_v56  ;;  %v525_v62 = vld [vmem:[#allocation5 + $0xb58] sm:$0xff]  ;;  %v10751_v31 = vcombine.low %v661_v55, %v665_v56 }
 0x3bd   :  { %7422 = vmatpush1.bf16.msra.mxu1 %v10663_v9  ;;  %7382 = vmatprep.subr.bf16.mxu0 %v10528_v13  ;;  %v529_v28 = vld [vmem:[#allocation5 + $0xb78] sm:$0xff]  ;;  %v10743_v9 = vcombine.low %v653_v59, %v657_v0 }
 0x3be   :  { %7423 = vmatprep.subr.bf16.mxu1 %v10656_v14  ;;  %v10616_v5 = vcombine.high %v525_v62, %v529_v28  ;;  %v517_v10 = vld [vmem:[#allocation5 + $0xb18] sm:$0xff]  ;;  %v10615_v19 = vcombine.low %v525_v62, %v529_v28 }
 0x3bf   :  { %v521_v63 = vld [vmem:[#allocation5 + $0xb38] sm:$0xff] }
 0x3c0   :  { %7383 = vmatpush1.bf16.msra.mxu0 %v10527_v26  ;;  %v645_v3 = vld [vmem:[#allocation5 + $0xf18] sm:$0xff]  ;;  %v10608_v13 = vcombine.high %v517_v10, %v521_v63  ;;  %v10607_v26 = vcombine.low %v517_v10, %v521_v63 }
 0x3c1   :  { %7424 = vmatpush1.bf16.msra.mxu1 %v10655_v2  ;;  %7384 = vmatprep.subr.bf16.mxu0 %v10520_v11  ;;  %v649_v12 = vld [vmem:[#allocation5 + $0xf38] sm:$0xff] }
 0x3c2   :  { %7425 = vmatprep.subr.bf16.mxu1 %v10648_v29  ;;  %v10736_v14 = vcombine.high %v645_v3, %v649_v12  ;;  %v509_v61 = vld [vmem:[#allocation5 + $0xad8] sm:$0xff]  ;;  %v10735_v2 = vcombine.low %v645_v3, %v649_v12 }
 0x3c3   :  { %v513_v22 = vld [vmem:[#allocation5 + $0xaf8] sm:$0xff] }
 0x3c4   :  { %7385 = vmatpush1.bf16.msra.mxu0 %v10519_v35  ;;  %v637_v24 = vld [vmem:[#allocation5 + $0xed8] sm:$0xff]  ;;  %v10600_v11 = vcombine.high %v509_v61, %v513_v22  ;;  %v10599_v35 = vcombine.low %v509_v61, %v513_v22 }
 0x3c5   :  { %7426 = vmatpush1.bf16.msra.mxu1 %v10647_v36  ;;  %7386 = vmatprep.subr.bf16.mxu0 %v10512_v38  ;;  %v641_v25 = vld [vmem:[#allocation5 + $0xef8] sm:$0xff] }
 0x3c6   :  { %7427 = vmatprep.subr.bf16.mxu1 %v10640_v41  ;;  %v10728_v29 = vcombine.high %v637_v24, %v641_v25  ;;  %v501_v32 = vld [vmem:[#allocation5 + $0xa98] sm:$0xff]  ;;  %v10727_v36 = vcombine.low %v637_v24, %v641_v25 }
 0x3c7   :  { %v505_v34 = vld [vmem:[#allocation5 + $0xab8] sm:$0xff] }
 0x3c8   :  { %7387 = vmatpush1.bf16.msra.mxu0 %v10511_v48  ;;  %v629_v23 = vld [vmem:[#allocation5 + $0xe98] sm:$0xff]  ;;  %v10592_v38 = vcombine.high %v501_v32, %v505_v34  ;;  %v10591_v48 = vcombine.low %v501_v32, %v505_v34 }
 0x3c9   :  { %7428 = vmatpush1.bf16.msra.mxu1 %v10639_v49  ;;  %7388 = vmatprep.subr.bf16.mxu0 %v10632_v33  ;;  %v633_v21 = vld [vmem:[#allocation5 + $0xeb8] sm:$0xff] }
 0x3ca   :  { %7429 = vmatprep.subr.bf16.mxu1 %v10760_v20  ;;  %v10720_v41 = vcombine.high %v629_v23, %v633_v21  ;;  %v493_v30 = vld [vmem:[#allocation5 + $0xa58] sm:$0xff]  ;;  %v10719_v49 = vcombine.low %v629_v23, %v633_v21 }
 0x3cb   :  { %v497_v45 = vld [vmem:[#allocation5 + $0xa78] sm:$0xff] }
 0x3cc   :  { %7389 = vmatpush2.bf16.msra.mxu0 %v10631_v42  ;;  %v621_v46 = vld [vmem:[#allocation5 + $0xe58] sm:$0xff]  ;;  %v10584_v33 = vcombine.high %v493_v30, %v497_v45  ;;  %v10583_v42 = vcombine.low %v493_v30, %v497_v45 }
 0x3cd   :  { %7430 = vmatpush2.bf16.msra.mxu1 %v10759_v58  ;;  %7390 = vmatprep.subr.bf16.mxu0 %v10624_v57  ;;  %v625_v16 = vld [vmem:[#allocation5 + $0xe78] sm:$0xff] }
 0x3ce   :  { %7431 = vmatprep.subr.bf16.mxu1 %v10752_v60  ;;  %v10712_v20 = vcombine.high %v621_v46, %v625_v16  ;;  %v485_v52 = vld [vmem:[#allocation5 + $0xa18] sm:$0xff]  ;;  %v10711_v58 = vcombine.low %v621_v46, %v625_v16 }
 0x3cf   :  { %v489_v54 = vld [vmem:[#allocation5 + $0xa38] sm:$0xff] }
 0x3d0   :  { %7391 = vmatpush2.bf16.msra.mxu0 %v10623_v1  ;;  %v613_v55 = vld [vmem:[#allocation5 + $0xe18] sm:$0xff]  ;;  %v10576_v57 = vcombine.high %v485_v52, %v489_v54  ;;  %v10575_v1 = vcombine.low %v485_v52, %v489_v54 }
 0x3d1   :  { %7432 = vmatpush2.bf16.msra.mxu1 %v10751_v31  ;;  %7392 = vmatprep.subr.bf16.mxu0 %v10616_v5  ;;  %v617_v56 = vld [vmem:[#allocation5 + $0xe38] sm:$0xff] }
 0x3d2   :  { %7433 = vmatprep.subr.bf16.mxu1 %v10744_v8  ;;  %v10704_v60 = vcombine.high %v613_v55, %v617_v56  ;;  %v733_v62 = vld [vmem:[#allocation5 + $0x11d8] sm:$0xff]  ;;  %v10703_v31 = vcombine.low %v613_v55, %v617_v56 }
 0x3d3   :  { %v737_v28 = vld [vmem:[#allocation5 + $0x11f8] sm:$0xff] }
 0x3d4   :  { %7393 = vmatpush2.bf16.msra.mxu0 %v10615_v19  ;;  %v861_v59 = vld [vmem:[#allocation5 + $0x15d8] sm:$0xff]  ;;  %v10824_v5 = vcombine.high %v733_v62, %v737_v28  ;;  %v10823_v19 = vcombine.low %v733_v62, %v737_v28 }
 0x3d5   :  { %7434 = vmatpush2.bf16.msra.mxu1 %v10743_v9  ;;  %7394 = vmatprep.subr.bf16.mxu0 %v10608_v13  ;;  %v865_v0 = vld [vmem:[#allocation5 + $0x15f8] sm:$0xff] }
 0x3d6   :  { %7435 = vmatprep.subr.bf16.mxu1 %v10736_v14  ;;  %v10952_v8 = vcombine.high %v861_v59, %v865_v0  ;;  %v725_v10 = vld [vmem:[#allocation5 + $0x1198] sm:$0xff]  ;;  %v10951_v9 = vcombine.low %v861_v59, %v865_v0 }
 0x3d7   :  { %v729_v63 = vld [vmem:[#allocation5 + $0x11b8] sm:$0xff] }
 0x3d8   :  { %7395 = vmatpush2.bf16.msra.mxu0 %v10607_v26  ;;  %v853_v3 = vld [vmem:[#allocation5 + $0x1598] sm:$0xff]  ;;  %v10816_v13 = vcombine.high %v725_v10, %v729_v63 }
 0x3d9   :  { %7436 = vmatpush2.bf16.msra.mxu1 %v10735_v2  ;;  %7396 = vmatprep.subr.bf16.mxu0 %v10600_v11  ;;  %v857_v12 = vld [vmem:[#allocation5 + $0x15b8] sm:$0xff] }
 0x3da   :  { %7437 = vmatprep.subr.bf16.mxu1 %v10728_v29  ;;  %v10944_v14 = vcombine.high %v853_v3, %v857_v12  ;;  %v717_v61 = vld [vmem:[#allocation5 + $0x1158] sm:$0xff]  ;;  %v10815_v29 = vcombine.low %v725_v10, %v729_v63  ;;  %v10943_v34 = vcombine.low %v853_v3, %v857_v12 }
 0x3db   :  { %v721_v22 = vld [vmem:[#allocation5 + $0x1178] sm:$0xff] }
 0x3dc   :  { %7397 = vmatpush2.bf16.msra.mxu0 %v10599_v35  ;;  %v845_v25 = vld [vmem:[#allocation5 + $0x1558] sm:$0xff]  ;;  %v10808_v23 = vcombine.high %v717_v61, %v721_v22  ;;  %v10807_v16 = vcombine.low %v717_v61, %v721_v22 }
 0x3dd   :  { %7438 = vmatpush2.bf16.msra.mxu1 %v10727_v36  ;;  %7398 = vmatprep.subr.bf16.mxu0 %v10592_v38  ;;  %v849_v26 = vld [vmem:[#allocation5 + $0x1578] sm:$0xff] }
 0x3de   :  { %7439 = vmatprep.subr.bf16.mxu1 %v10720_v41  ;;  %v709_v38 = vld [vmem:[#allocation5 + $0x1118] sm:$0xff] }
 0x3df   :  { %v713_v41 = vld [vmem:[#allocation5 + $0x1138] sm:$0xff] }
 0x3e0   :  { %7399 = vmatpush2.bf16.msra.mxu0 %v10591_v48  ;;  %v841_v30 = vld [vmem:[#allocation5 + $0x1538] sm:$0xff]  ;;  %v10799_v56 = vcombine.low %v709_v38, %v713_v41 }
 0x3e1   :  { %7440 = vmatpush2.bf16.msra.mxu1 %v10719_v49  ;;  %7400 = vmatprep.subr.bf16.mxu0 %v10584_v33  ;;  %v10800_v49 = vcombine.high %v709_v38, %v713_v41  ;;  %v701_v52 = vld [vmem:[#allocation5 + $0x10d8] sm:$0xff] }
 0x3e2   :  { %7441 = vmatprep.subr.bf16.mxu1 %v10712_v20  ;;  %v829_v54 = vld [vmem:[#allocation5 + $0x14d8] sm:$0xff] }
 0x3e3   :  { %v833_v55 = vld [vmem:[#allocation5 + $0x14f8] sm:$0xff] }
 0x3e4   :  { %7401 = vmatpush2.bf16.msra.mxu0 %v10583_v42  ;;  %v821_v62 = vld [vmem:[#allocation5 + $0x1498] sm:$0xff]  ;;  %v10919_v0 = vcombine.low %v829_v54, %v833_v55 }
 0x3e5   :  { %7442 = vmatpush2.bf16.msra.mxu1 %v10711_v58  ;;  %7402 = vmatprep.subr.bf16.mxu0 %v10576_v57  ;;  %v10920_v58 = vcombine.high %v829_v54, %v833_v55  ;;  %v693_v57 = vld [vmem:[#allocation5 + $0x1098] sm:$0xff] }
 0x3e6   :  { %7443 = vmatprep.subr.bf16.mxu1 %v10704_v60  ;;  %v697_v60 = vld [vmem:[#allocation5 + $0x10b8] sm:$0xff] }
 0x3e7   :  { %v825_v28 = vld [vmem:[#allocation5 + $0x14b8] sm:$0xff]  ;;  %v10783_v3 = vcombine.low %v693_v57, %v697_v60 }
 0x3e8   :  { %7403 = vmatpush2.bf16.msra.mxu0 %v10575_v1  ;;  %v10784_v1 = vcombine.high %v693_v57, %v697_v60  ;;  %v813_v10 = vld [vmem:[#allocation5 + $0x1458] sm:$0xff]  ;;  %v10911_v12 = vcombine.low %v821_v62, %v825_v28 }
 0x3e9   :  { %7444 = vmatpush2.bf16.msra.mxu1 %v10703_v31  ;;  %7454 = vmatprep.subr.bf16.mxu0 %v10824_v5  ;;  %v10912_v31 = vcombine.high %v821_v62, %v825_v28  ;;  %v685_v5 = vld [vmem:[#allocation5 + $0x1058] sm:$0xff] }
 0x3ea   :  { %7495 = vmatprep.subr.bf16.mxu1 %v10952_v8  ;;  %v689_v8 = vld [vmem:[#allocation5 + $0x1078] sm:$0xff] }
 0x3eb   :  { %v7160_v24 = vpop.f32.mrf.mxu0  ;;  %7405 = vmatmul.mubr.bf16.vlgmr.msra.gmra.mxu0 %v12358_v39  ;;  %v10936_v39 = vcombine.high %v845_v25, %v849_v26  ;;  %v817_v63 = vld [vmem:[#allocation5 + $0x1478] sm:$0xff] }
 0x3ec   :  { %v7161_v2 = vadd.f32 %v7160_v24, %v12473_v43  ;;  %v7201_v11 = vpop.f32.mrf.mxu1  ;;  %7446 = vmatmul.mubr.bf16.vlgmr.msra.gmra.mxu1 %v12360_v40  ;;  %7455 = vmatpush1.bf16.msra.mxu0 %v10823_v19  ;;  %v837_v40 = vld [vmem:[#allocation5 + $0x1518] sm:$0xff]  ;;  %v10776_v19 = vcombine.high %v685_v5, %v689_v8  ;;  %v10775_v24 = vcombine.low %v685_v5, %v689_v8 }
 0x3ed   :  { %7496 = vmatpush1.bf16.msra.mxu1 %v10951_v9  ;;  %v7162_v32 = vpop.f32.mrf.mxu0  ;;  %7456 = vmatprep.subr.bf16.mxu0 %v10816_v13  ;;  %v10928_v20 = vcombine.high %v837_v40, %v841_v30  ;;  %v10904_v9 = vcombine.high %v813_v10, %v817_v63  ;;  %v677_v13 = vld [vmem:[#allocation5 + $0x1018] sm:$0xff] }
 0x3ee   :  { %v12483_v21 = vadd.f32 %v7201_v11, %v7161_v2  ;;  %v7163_v35 = vadd.f32 %v7162_v32, %v12478_v53  ;;  %v7203_v36 = vpop.f32.mrf.mxu1  ;;  %7497 = vmatprep.subr.bf16.mxu1 %v10944_v14  ;;  %7486 = vmatprep.mubr.bf16.mxu0 %v12362_v50  ;;  %v10935_v53 = vcombine.low %v845_v25, %v849_v26  ;;  %v705_v50 = vld [vmem:[#allocation5 + $0x10f8] sm:$0xff] }
 0x3ef   :  { %v7164_v43 = vpop.f32.mrf.mxu0  ;;  %7527 = vmatprep.mubr.bf16.mxu1 %v12365_v51  ;;  %v10927_v51 = vcombine.low %v837_v40, %v841_v30  ;;  %v10792_v42 = vcombine.high %v701_v52, %v705_v50  ;;  %v10791_v59 = vcombine.low %v701_v52, %v705_v50  ;;  %v681_v14 = vld [vmem:[#allocation5 + $0x1038] sm:$0xff]  ;;  %v10903_v25 = vcombine.low %v813_v10, %v817_v63 }
 0x3f0   :  { %v12488_v45 = vadd.f32 %v7203_v36, %v7163_v35  ;;  %v7205_v46 = vpop.f32.mrf.mxu1  ;;  %7457 = vmatpush1.bf16.msra.mxu0 %v10815_v29  ;;  %v805_v61 = vld [vmem:[#allocation5 + $0x1418] sm:$0xff]  ;;  %v10768_v26 = vcombine.high %v677_v13, %v681_v14  ;;  %v7626_v43 = vrot.slane %v12422_v15, 4 }
 0x3f1   :  { %7498 = vmatpush1.bf16.msra.mxu1 %v10943_v34  ;;  %v7165_v48 = vpop.f32.mrf.mxu0  ;;  %7458 = vmatprep.subr.bf16.mxu0 %v10808_v23  ;;  %v809_v22 = vld [vmem:[#allocation5 + $0x1438] sm:$0xff]  ;;  %v10767_v23 = vcombine.low %v677_v13, %v681_v14  ;;  %v7638_v46 = vrot.slane %v12460_v37, 4 }
 0x3f2   :  { %v7206_v33 = vpop.f32.mrf.mxu1  ;;  %7499 = vmatprep.subr.bf16.mxu1 %v10936_v39  ;;  %v10896_v2 = vcombine.high %v805_v61, %v809_v22  ;;  %v797_v11 = vld [vmem:[#allocation5 + $0x13d8] sm:$0xff]  ;;  %v10895_v35 = vcombine.low %v805_v61, %v809_v22  ;;  %v7627_v52 = vadd.f32 %v7626_v43, %v12422_v15 }
 0x3f3   :  { %v801_v29 = vld [vmem:[#allocation5 + $0x13f8] sm:$0xff]  ;;  %v7639_v55 = vadd.f32 %v7638_v46, %v12460_v37 }
 0x3f4   :  { %7459 = vmatpush1.bf16.msra.mxu0 %v10807_v16  ;;  %v925_v32 = vld [vmem:[#allocation5 + $0x17d8] sm:$0xff]  ;;  %v10888_v36 = vcombine.high %v797_v11, %v801_v29  ;;  %v10887_v16 = vcombine.low %v797_v11, %v801_v29  ;;  %v7628_v62 = vrot.slane %v7627_v52, 2 }
 0x3f5   :  { %7500 = vmatpush1.bf16.msra.mxu1 %v10935_v53  ;;  %7460 = vmatprep.subr.bf16.mxu0 %v10800_v49  ;;  %v929_v34 = vld [vmem:[#allocation5 + $0x17f8] sm:$0xff] }
 0x3f6   :  { %7501 = vmatprep.subr.bf16.mxu1 %v10928_v20  ;;  %v11016_v39 = vcombine.high %v925_v32, %v929_v34  ;;  %v789_v38 = vld [vmem:[#allocation5 + $0x1398] sm:$0xff]  ;;  %v11015_v48 = vcombine.low %v925_v32, %v929_v34 }
 0x3f7   :  { %v793_v41 = vld [vmem:[#allocation5 + $0x13b8] sm:$0xff] }
 0x3f8   :  { %7461 = vmatpush1.bf16.msra.mxu0 %v10799_v56  ;;  %v917_v40 = vld [vmem:[#allocation5 + $0x1798] sm:$0xff]  ;;  %v10880_v53 = vcombine.high %v789_v38, %v793_v41  ;;  %v10879_v56 = vcombine.low %v789_v38, %v793_v41 }
 0x3f9   :  { %7502 = vmatpush1.bf16.msra.mxu1 %v10927_v51  ;;  %7462 = vmatprep.subr.bf16.mxu0 %v10792_v42  ;;  %v921_v30 = vld [vmem:[#allocation5 + $0x17b8] sm:$0xff] }
 0x3fa   :  { %7503 = vmatprep.subr.bf16.mxu1 %v10920_v58  ;;  %v11008_v49 = vcombine.high %v917_v40, %v921_v30  ;;  %v781_v33 = vld [vmem:[#allocation5 + $0x1358] sm:$0xff]  ;;  %v11007_v51 = vcombine.low %v917_v40, %v921_v30 }
 0x3fb   :  { %v785_v20 = vld [vmem:[#allocation5 + $0x1378] sm:$0xff] }
 0x3fc   :  { %7463 = vmatpush1.bf16.msra.mxu0 %v10791_v59  ;;  %v909_v50 = vld [vmem:[#allocation5 + $0x1758] sm:$0xff]  ;;  %v10872_v42 = vcombine.high %v781_v33, %v785_v20 }
 0x3fd   :  { %7504 = vmatpush1.bf16.msra.mxu1 %v10919_v0  ;;  %7464 = vmatprep.subr.bf16.mxu0 %v10784_v1  ;;  %v913_v54 = vld [vmem:[#allocation5 + $0x1778] sm:$0xff]  ;;  %v7640_v0 = vrot.slane %v7639_v55, 2  ;;  %v10871_v1 = vcombine.low %v781_v33, %v785_v20 }
 0x3fe   :  { %7505 = vmatprep.subr.bf16.mxu1 %v10912_v31  ;;  %v11000_v58 = vcombine.high %v909_v50, %v913_v54  ;;  %v773_v57 = vld [vmem:[#allocation5 + $0x1318] sm:$0xff]  ;;  %v10999_v31 = vcombine.low %v909_v50, %v913_v54 }
 0x3ff   :  { %v777_v60 = vld [vmem:[#allocation5 + $0x1338] sm:$0xff] }
 0x400   :  { %7465 = vmatpush1.bf16.msra.mxu0 %v10783_v3  ;;  %v901_v28 = vld [vmem:[#allocation5 + $0x1718] sm:$0xff]  ;;  %v10864_v5 = vcombine.high %v773_v57, %v777_v60  ;;  %v7629_v3 = vadd.f32 %v7628_v62, %v7627_v52  ;;  %v10863_v13 = vcombine.low %v773_v57, %v777_v60 }
 0x401   :  { %7506 = vmatpush1.bf16.msra.mxu1 %v10911_v12  ;;  %7466 = vmatprep.subr.bf16.mxu0 %v10776_v19  ;;  %v905_v59 = vld [vmem:[#allocation5 + $0x1738] sm:$0xff] }
 0x402   :  { %7507 = vmatprep.subr.bf16.mxu1 %v10904_v9  ;;  %v10992_v8 = vcombine.high %v901_v28, %v905_v59  ;;  %v765_v10 = vld [vmem:[#allocation5 + $0x12d8] sm:$0xff]  ;;  %v7641_v9 = vadd.f32 %v7640_v0, %v7639_v55  ;;  %v10991_v14 = vcombine.low %v901_v28, %v905_v59 }
 0x403   :  { %v769_v63 = vld [vmem:[#allocation5 + $0x12f8] sm:$0xff] }
 0x404   :  { %7467 = vmatpush1.bf16.msra.mxu0 %v10775_v24  ;;  %v893_v12 = vld [vmem:[#allocation5 + $0x16d8] sm:$0xff]  ;;  %v10856_v61 = vcombine.high %v765_v10, %v769_v63  ;;  %v7642_v29 = vrot.slane %v7641_v9, 1  ;;  %v10855_v32 = vcombine.low %v765_v10, %v769_v63 }
 0x405   :  { %7508 = vmatpush1.bf16.msra.mxu1 %v10903_v25  ;;  %7468 = vmatprep.subr.bf16.mxu0 %v10768_v26  ;;  %v897_v19 = vld [vmem:[#allocation5 + $0x16f8] sm:$0xff]  ;;  %v7630_v26 = vrot.slane %v7629_v3, 1 }
 0x406   :  { %7509 = vmatprep.subr.bf16.mxu1 %v10896_v2  ;;  %v10984_v22 = vcombine.high %v893_v12, %v897_v19  ;;  %v757_v24 = vld [vmem:[#allocation5 + $0x1298] sm:$0xff]  ;;  %v10983_v34 = vcombine.low %v893_v12, %v897_v19  ;;  %v7643_v40 = vadd.f32 %v7642_v29, %v7641_v9 }
 0x407   :  { %v761_v25 = vld [vmem:[#allocation5 + $0x12b8] sm:$0xff]  ;;  %v7631_v38 = vadd.f32 %v7630_v26, %v7629_v3 }
 0x408   :  { %7469 = vmatpush1.bf16.msra.mxu0 %v10767_v23  ;;  %v885_v2 = vld [vmem:[#allocation5 + $0x1698] sm:$0xff]  ;;  %v10848_v23 = vcombine.high %v757_v24, %v761_v25  ;;  %v10847_v30 = vcombine.low %v757_v24, %v761_v25  ;;  %v7672_v50 = vmul.f32 0.125, %v7643_v40 }
 0x409   :  { %7510 = vmatpush1.bf16.msra.mxu1 %v10895_v35  ;;  %7470 = vmatprep.subr.bf16.mxu0 %v10888_v36  ;;  %v889_v11 = vld [vmem:[#allocation5 + $0x16b8] sm:$0xff]  ;;  %v7670_v33 = vmul.f32 0.125, %v7631_v38 }
 0x40a   :  { %7511 = vmatprep.subr.bf16.mxu1 %v11016_v39  ;;  %v10976_v35 = vcombine.high %v885_v2, %v889_v11  ;;  %v749_v36 = vld [vmem:[#allocation5 + $0x1258] sm:$0xff]  ;;  %v10975_v46 = vcombine.low %v885_v2, %v889_v11  ;;  %v12498_v28 = vsub.f32 %v12460_v37, %v7672_v50 }
 0x40b   :  { %v753_v39 = vld [vmem:[#allocation5 + $0x1278] sm:$0xff]  ;;  %v12495_v57 = vsub.f32 %v12422_v15, %v7670_v33 }
 0x40c   :  { %7471 = vmatpush2.bf16.msra.mxu0 %v10887_v16  ;;  %v877_v41 = vld [vmem:[#allocation5 + $0x1658] sm:$0xff]  ;;  %v10840_v16 = vcombine.high %v749_v36, %v753_v39  ;;  %v10839_v54 = vcombine.low %v749_v36, %v753_v39  ;;  %v7688_v3 = vmul.f32 %v12498_v28, %v12498_v28 }
 0x40d   :  { %7512 = vmatpush2.bf16.msra.mxu1 %v11015_v48  ;;  %7472 = vmatprep.subr.bf16.mxu0 %v10880_v53  ;;  %v881_v43 = vld [vmem:[#allocation5 + $0x1678] sm:$0xff]  ;;  %v7686_v10 = vmul.f32 %v12495_v57, %v12495_v57 }
 0x40e   :  { %7513 = vmatprep.subr.bf16.mxu1 %v11008_v49  ;;  %v10968_v48 = vcombine.high %v877_v41, %v881_v43  ;;  %v741_v53 = vld [vmem:[#allocation5 + $0x1218] sm:$0xff]  ;;  %v10967_v55 = vcombine.low %v877_v41, %v881_v43  ;;  %v7711_v26 = vrot.slane %v7688_v3, 4 }
 0x40f   :  { %v745_v49 = vld [vmem:[#allocation5 + $0x1238] sm:$0xff] }
 0x410   :  { %7473 = vmatpush2.bf16.msra.mxu0 %v10879_v56  ;;  %v869_v20 = vld [vmem:[#allocation5 + $0x1618] sm:$0xff]  ;;  %v10832_v56 = vcombine.high %v741_v53, %v745_v49  ;;  %v10831_v59 = vcombine.low %v741_v53, %v745_v49 }
 0x411   :  { %7514 = vmatpush2.bf16.msra.mxu1 %v11007_v51  ;;  %7474 = vmatprep.subr.bf16.mxu0 %v10872_v42  ;;  %v873_v52 = vld [vmem:[#allocation5 + $0x1638] sm:$0xff] }
 0x412   :  { %7515 = vmatprep.subr.bf16.mxu1 %v11000_v58  ;;  %v10960_v51 = vcombine.high %v869_v20, %v873_v52  ;;  %v989_v42 = vld [vmem:[#allocation5 + $0x19d8] sm:$0xff]  ;;  %v10959_v0 = vcombine.low %v869_v20, %v873_v52 }
 0x413   :  { %v993_v58 = vld [vmem:[#allocation5 + $0x19f8] sm:$0xff] }
 0x414   :  { %7475 = vmatpush2.bf16.msra.mxu0 %v10871_v1  ;;  %v1117_v60 = vld [vmem:[#allocation5 + $0x1dd8] sm:$0xff]  ;;  %v11080_v1 = vcombine.high %v989_v42, %v993_v58  ;;  %v11079_v37 = vcombine.low %v989_v42, %v993_v58 }
 0x415   :  { %7516 = vmatpush2.bf16.msra.mxu1 %v10999_v31  ;;  %7476 = vmatprep.subr.bf16.mxu0 %v10864_v5  ;;  %v1121_v62 = vld [vmem:[#allocation5 + $0x1df8] sm:$0xff] }
 0x416   :  { %7517 = vmatprep.subr.bf16.mxu1 %v10992_v8  ;;  %v11208_v31 = vcombine.high %v1117_v60, %v1121_v62  ;;  %v981_v5 = vld [vmem:[#allocation5 + $0x1998] sm:$0xff]  ;;  %v11207_v12 = vcombine.low %v1117_v60, %v1121_v62 }
 0x417   :  { %v985_v8 = vld [vmem:[#allocation5 + $0x19b8] sm:$0xff] }
 0x418   :  { %7477 = vmatpush2.bf16.msra.mxu0 %v10863_v13  ;;  %v1109_v15 = vld [vmem:[#allocation5 + $0x1d98] sm:$0xff]  ;;  %v11072_v19 = vcombine.high %v981_v5, %v985_v8  ;;  %v11071_v29 = vcombine.low %v981_v5, %v985_v8 }
 0x419   :  { %7518 = vmatpush2.bf16.msra.mxu1 %v10991_v14  ;;  %7478 = vmatprep.subr.bf16.mxu0 %v10856_v61  ;;  %v1113_v63 = vld [vmem:[#allocation5 + $0x1db8] sm:$0xff]  ;;  %v7699_v61 = vrot.slane %v7686_v10, 4 }
 0x41a   :  { %7519 = vmatprep.subr.bf16.mxu1 %v10984_v22  ;;  %v11200_v9 = vcombine.high %v1109_v15, %v1113_v63  ;;  %v973_v13 = vld [vmem:[#allocation5 + $0x1958] sm:$0xff] }
 0x41b   :  { %v977_v14 = vld [vmem:[#allocation5 + $0x1978] sm:$0xff] }
 0x41c   :  { %7479 = vmatpush2.bf16.msra.mxu0 %v10855_v32  ;;  %v1101_v24 = vld [vmem:[#allocation5 + $0x1d58] sm:$0xff] }
 0x41d   :  { %7520 = vmatpush2.bf16.msra.mxu1 %v10983_v34  ;;  %7480 = vmatprep.subr.bf16.mxu0 %v10848_v23  ;;  %v1105_v25 = vld [vmem:[#allocation5 + $0x1d78] sm:$0xff]  ;;  %v11199_v34 = vcombine.low %v1109_v15, %v1113_v63  ;;  %v11064_v23 = vcombine.high %v973_v13, %v977_v14 }
 0x41e   :  { %7521 = vmatprep.subr.bf16.mxu1 %v10976_v35  ;;  %v11192_v39 = vcombine.high %v1101_v24, %v1105_v25  ;;  %v965_v38 = vld [vmem:[#allocation5 + $0x1918] sm:$0xff]  ;;  %v11191_v53 = vcombine.low %v1101_v24, %v1105_v25 }
 0x41f   :  { %v969_v41 = vld [vmem:[#allocation5 + $0x1938] sm:$0xff] }
 0x420   :  { %7481 = vmatpush2.bf16.msra.mxu0 %v10847_v30  ;;  %v1093_v43 = vld [vmem:[#allocation5 + $0x1d18] sm:$0xff]  ;;  %v7712_v30 = vadd.f32 %v7711_v26, %v7688_v3  ;;  %v11056_v49 = vcombine.high %v965_v38, %v969_v41 }
 0x421   :  { %7522 = vmatpush2.bf16.msra.mxu1 %v10975_v46  ;;  %7482 = vmatprep.subr.bf16.mxu0 %v10840_v16  ;;  %v1097_v40 = vld [vmem:[#allocation5 + $0x1d38] sm:$0xff] }
 0x422   :  { %7523 = vmatprep.subr.bf16.mxu1 %v10968_v48  ;;  %v11063_v48 = vcombine.low %v973_v13, %v977_v14  ;;  %v957_v20 = vld [vmem:[#allocation5 + $0x18d8] sm:$0xff] }
 0x423   :  { %v961_v52 = vld [vmem:[#allocation5 + $0x18f8] sm:$0xff] }
 0x424   :  { %7483 = vmatpush2.bf16.msra.mxu0 %v10839_v54  ;;  %v1085_v54 = vld [vmem:[#allocation5 + $0x1cd8] sm:$0xff]  ;;  %v11048_v42 = vcombine.high %v957_v20, %v961_v52  ;;  %v11047_v5 = vcombine.low %v957_v20, %v961_v52 }
 0x425   :  { %7524 = vmatpush2.bf16.msra.mxu1 %v10967_v55  ;;  %7484 = vmatprep.subr.bf16.mxu0 %v10832_v56  ;;  %v1089_v55 = vld [vmem:[#allocation5 + $0x1cf8] sm:$0xff]  ;;  %v11055_v56 = vcombine.low %v965_v38, %v969_v41 }
 0x426   :  { %7525 = vmatprep.subr.bf16.mxu1 %v10960_v51  ;;  %v11183_v51 = vcombine.low %v1093_v43, %v1097_v40  ;;  %v11176_v58 = vcombine.high %v1085_v54, %v1089_v55  ;;  %v949_v60 = vld [vmem:[#allocation5 + $0x1898] sm:$0xff]  ;;  %v11175_v8 = vcombine.low %v1085_v54, %v1089_v55 }
 0x427   :  { %v953_v62 = vld [vmem:[#allocation5 + $0x18b8] sm:$0xff] }
 0x428   :  { %7485 = vmatpush2.bf16.msra.mxu0 %v10831_v59  ;;  %v941_v63 = vld [vmem:[#allocation5 + $0x1858] sm:$0xff]  ;;  %v11039_v13 = vcombine.low %v949_v60, %v953_v62 }
 0x429   :  { %7526 = vmatpush2.bf16.msra.mxu1 %v10959_v0  ;;  %7536 = vmatprep.subr.bf16.mxu0 %v11080_v1  ;;  %v1077_v0 = vld [vmem:[#allocation5 + $0x1c98] sm:$0xff] }
 0x42a   :  { %7577 = vmatprep.subr.bf16.mxu1 %v11208_v31  ;;  %v1081_v1 = vld [vmem:[#allocation5 + $0x1cb8] sm:$0xff] }
 0x42b   :  { %v7242_v22 = vpop.f32.mrf.mxu0  ;;  %7487 = vmatmul.mubr.bf16.vlgmr.msra.gmra.mxu0 %v12370_v6  ;;  %v11168_v15 = vcombine.high %v1077_v0, %v1081_v1  ;;  %v945_v3 = vld [vmem:[#allocation5 + $0x1878] sm:$0xff]  ;;  %v11167_v14 = vcombine.low %v1077_v0, %v1081_v1 }
 0x42c   :  { %v7243_v2 = vadd.f32 %v7242_v22, %v12483_v21  ;;  %v7283_v11 = vpop.f32.mrf.mxu1  ;;  %7528 = vmatmul.mubr.bf16.vlgmr.msra.gmra.mxu1 %v12372_v7  ;;  %7537 = vmatpush1.bf16.msra.mxu0 %v11079_v37  ;;  %v7700_v21 = vadd.f32 %v7699_v61, %v7686_v10  ;;  %v11040_v10 = vcombine.high %v949_v60, %v953_v62  ;;  %v933_v24 = vld [vmem:[#allocation5 + $0x1818] sm:$0xff] }
 0x42d   :  { %7578 = vmatpush1.bf16.msra.mxu1 %v11207_v12  ;;  %v7244_v32 = vpop.f32.mrf.mxu0  ;;  %7538 = vmatprep.subr.bf16.mxu0 %v11072_v19  ;;  %v1069_v12 = vld [vmem:[#allocation5 + $0x1c58] sm:$0xff]  ;;  %v11032_v61 = vcombine.high %v941_v63, %v945_v3 }
 0x42e   :  { %v12507_v35 = vadd.f32 %v7283_v11, %v7243_v2  ;;  %v7245_v36 = vadd.f32 %v7244_v32, %v12488_v45  ;;  %v7285_v6 = vpop.f32.mrf.mxu1  ;;  %7579 = vmatprep.subr.bf16.mxu1 %v11200_v9  ;;  %7568 = vmatprep.mubr.bf16.mxu0 %v12374_v17  ;;  %v11184_v17 = vcombine.high %v1093_v43, %v1097_v40  ;;  %v7701_v50 = vrot.slane %v7700_v21, 2  ;;  %v1073_v19 = vld [vmem:[#allocation5 + $0x1c78] sm:$0xff] }
 0x42f   :  { %v7246_v7 = vpop.f32.mrf.mxu0  ;;  %7609 = vmatprep.mubr.bf16.mxu1 %v12377_v18  ;;  %v7713_v18 = vrot.slane %v7712_v30, 2  ;;  %v11160_v22 = vcombine.high %v1069_v12, %v1073_v19  ;;  %v937_v25 = vld [vmem:[#allocation5 + $0x1838] sm:$0xff]  ;;  %v11031_v32 = vcombine.low %v941_v63, %v945_v3 }
 0x430   :  { %v12512_v46 = vadd.f32 %v7285_v6, %v7245_v36  ;;  %v7287_v16 = vpop.f32.mrf.mxu1  ;;  %7539 = vmatpush1.bf16.msra.mxu0 %v11071_v29  ;;  %v7702_v59 = vadd.f32 %v7701_v50, %v7700_v21  ;;  %v1061_v2 = vld [vmem:[#allocation5 + $0x1c18] sm:$0xff]  ;;  %v7620_v7 = vrot.slane %v12417_v4, 4  ;;  %v11023_v40 = vcombine.low %v933_v24, %v937_v25 }
 0x431   :  { %7580 = vmatpush1.bf16.msra.mxu1 %v11199_v34  ;;  %v7247_v45 = vpop.f32.mrf.mxu0  ;;  %7540 = vmatprep.subr.bf16.mxu0 %v11064_v23  ;;  %v7714_v31 = vadd.f32 %v7713_v18, %v7712_v30  ;;  %v1065_v11 = vld [vmem:[#allocation5 + $0x1c38] sm:$0xff]  ;;  %v11159_v34 = vcombine.low %v1069_v12, %v1073_v19  ;;  %v11024_v23 = vcombine.high %v933_v24, %v937_v25 }
 0x432   :  { %v7288_v33 = vpop.f32.mrf.mxu1  ;;  %7581 = vmatprep.subr.bf16.mxu1 %v11192_v39  ;;  %v7703_v37 = vrot.slane %v7702_v59, 1  ;;  %v11152_v36 = vcombine.high %v1061_v2, %v1065_v11  ;;  %v1053_v6 = vld [vmem:[#allocation5 + $0x1bd8] sm:$0xff]  ;;  %v11151_v30 = vcombine.low %v1061_v2, %v1065_v11  ;;  %v7621_v50 = vadd.f32 %v7620_v7, %v12417_v4 }
 0x433   :  { %v7715_v9 = vrot.slane %v7714_v31, 1  ;;  %v1057_v39 = vld [vmem:[#allocation5 + $0x1bf8] sm:$0xff] }
 0x434   :  { %7541 = vmatpush1.bf16.msra.mxu0 %v11063_v48  ;;  %v7704_v26 = vadd.f32 %v7703_v37, %v7702_v59  ;;  %v1181_v41 = vld [vmem:[#allocation5 + $0x1fd8] sm:$0xff]  ;;  %v11144_v16 = vcombine.high %v1053_v6, %v1057_v39  ;;  %v7632_v48 = vrot.slane %v12455_v27, 4  ;;  %v11143_v55 = vcombine.low %v1053_v6, %v1057_v39 }
 0x435   :  { %7582 = vmatpush1.bf16.msra.mxu1 %v11191_v53  ;;  %7542 = vmatprep.subr.bf16.mxu0 %v11056_v49  ;;  %v7716_v29 = vadd.f32 %v7715_v9, %v7714_v31  ;;  %v1185_v21 = vld [vmem:[#allocation5 + $0x1ff8] sm:$0xff]  ;;  %v7622_v1 = vrot.slane %v7621_v50, 2 }
 0x436   :  { %7583 = vmatprep.subr.bf16.mxu1 %v11184_v17  ;;  %v7742_v38 = vmul.f32 0.125, %v7704_v26  ;;  %v11272_v45 = vcombine.high %v1181_v41, %v1185_v21  ;;  %v1045_v53 = vld [vmem:[#allocation5 + $0x1b98] sm:$0xff]  ;;  %v7650_v17 = vrot.slane %v12512_v46, 4  ;;  %v11271_v18 = vcombine.low %v1181_v41, %v1185_v21 }
 0x437   :  { %v7744_v43 = vmul.f32 0.125, %v7716_v29  ;;  %v1049_v49 = vld [vmem:[#allocation5 + $0x1bb8] sm:$0xff]  ;;  %v7623_v9 = vadd.f32 %v7622_v1, %v7621_v50 }
 0x438   :  { %7543 = vmatpush1.bf16.msra.mxu0 %v11055_v56  ;;  %v7750_v33 = vadd.f32 1e-05, %v7742_v38  ;;  %v1173_v20 = vld [vmem:[#allocation5 + $0x1f98] sm:$0xff]  ;;  %v11136_v56 = vcombine.high %v1045_v53, %v1049_v49  ;;  %v7651_v62 = vadd.f32 %v7650_v17, %v12512_v46  ;;  %v11135_v31 = vcombine.low %v1045_v53, %v1049_v49 }
 0x439   :  { %7584 = vmatpush1.bf16.msra.mxu1 %v11183_v51  ;;  %7544 = vmatprep.subr.bf16.mxu0 %v11048_v42  ;;  %v1177_v52 = vld [vmem:[#allocation5 + $0x1fb8] sm:$0xff]  ;;  %v7752_v54 = vadd.f32 1e-05, %v7744_v43  ;;  %v7633_v51 = vadd.f32 %v7632_v48, %v12455_v27 }
 0x43a   :  { %7585 = vmatprep.subr.bf16.mxu1 %v11176_v58  ;;  %v11264_v42 = vcombine.high %v1173_v20, %v1177_v52  ;;  %v1037_v58 = vld [vmem:[#allocation5 + $0x1b58] sm:$0xff]  ;;  %12036 = vrsqrt.f32 %v7750_v33  ;;  %v7652_v37 = vrot.slane %v7651_v62, 2 }
 0x43b   :  { %v1041_v60 = vld [vmem:[#allocation5 + $0x1b78] sm:$0xff]  ;;  %12038 = vrsqrt.f32 %v7752_v54 }
 0x43c   :  { %7545 = vmatpush1.bf16.msra.mxu0 %v11047_v5  ;;  %v1165_v59 = vld [vmem:[#allocation5 + $0x1f58] sm:$0xff]  ;;  %v11263_v5 = vcombine.low %v1173_v20, %v1177_v52  ;;  %v7653_v11 = vadd.f32 %v7652_v37, %v7651_v62  ;;  %v12528_v52 = vld [vmem:[#allocation7] sm:$0xff] }
 0x43d   :  { %7586 = vmatpush1.bf16.msra.mxu1 %v11175_v8  ;;  %7546 = vmatprep.subr.bf16.mxu0 %v11040_v10  ;;  %v1169_v0 = vld [vmem:[#allocation5 + $0x1f78] sm:$0xff]  ;;  %v11128_v8 = vcombine.high %v1037_v58, %v1041_v60  ;;  %v7634_v10 = vrot.slane %v7633_v51, 2 }
 0x43e   :  { %7587 = vmatprep.subr.bf16.mxu1 %v11168_v15  ;;  %v11256_v15 = vcombine.high %v1165_v59, %v1169_v0  ;;  %v1029_v63 = vld [vmem:[#allocation5 + $0x1b18] sm:$0xff]  ;;  %v7654_v43 = vrot.slane %v7653_v11, 1 }
 0x43f   :  { %v1033_v3 = vld [vmem:[#allocation5 + $0x1b38] sm:$0xff]  ;;  %v7635_v24 = vadd.f32 %v7634_v10, %v7633_v51 }
 0x440   :  { %7547 = vmatpush1.bf16.msra.mxu0 %v11039_v13  ;;  %v1157_v12 = vld [vmem:[#allocation5 + $0x1f18] sm:$0xff]  ;;  %v11127_v13 = vcombine.low %v1037_v58, %v1041_v60  ;;  %v7655_v51 = vadd.f32 %v7654_v43, %v7653_v11 }
 0x441   :  { %7588 = vmatpush1.bf16.msra.mxu1 %v11167_v14  ;;  %7548 = vmatprep.subr.bf16.mxu0 %v11032_v61  ;;  %v1161_v19 = vld [vmem:[#allocation5 + $0x1f38] sm:$0xff]  ;;  %v7774_v14 = vlaneseq  ;;  %v11255_v61 = vcombine.low %v1165_v59, %v1169_v0  ;;  %v7636_v38 = vrot.slane %v7635_v24, 1 }
 0x442   :  { %7589 = vmatprep.subr.bf16.mxu1 %v11160_v22  ;;  %v11120_v22 = vcombine.high %v1029_v63, %v1033_v3  ;;  %v11248_v25 = vcombine.high %v1157_v12, %v1161_v19  ;;  %v1021_v26 = vld [vmem:[#allocation5 + $0x1ad8] sm:$0xff]  ;;  %v11247_v6 = vcombine.low %v1157_v12, %v1161_v19 }
 0x443   :  { %v1025_v2 = vld [vmem:[#allocation5 + $0x1af8] sm:$0xff]  ;;  %v7637_v50 = vadd.f32 %v7636_v38, %v7635_v24 }
 0x444   :  { %7549 = vmatpush1.bf16.msra.mxu0 %v11031_v32  ;;  %v1149_v29 = vld [vmem:[#allocation5 + $0x1ed8] sm:$0xff]  ;;  %v11112_v39 = vcombine.high %v1021_v26, %v1025_v2  ;;  %v11111_v53 = vcombine.low %v1021_v26, %v1025_v2 }
 0x445   :  { %7590 = vmatpush1.bf16.msra.mxu1 %v11159_v34  ;;  %7550 = vmatprep.subr.bf16.mxu0 %v11024_v23  ;;  %v1153_v32 = vld [vmem:[#allocation5 + $0x1ef8] sm:$0xff]  ;;  %v7624_v34 = vrot.slane %v7623_v9, 1  ;;  %v11119_v23 = vcombine.low %v1029_v63, %v1033_v3  ;;  %v12536_v63 = vld [vmem:[#allocation8] sm:$0xff]  ;;  %v7674_v3 = vmul.f32 0.125, %v7655_v51 }
 0x446   :  { %7591 = vmatprep.subr.bf16.mxu1 %v11152_v36  ;;  %v12520_v36 = vshrl.u32 %v7774_v14, 7  ;;  %v11240_v41 = vcombine.high %v1149_v29, %v1153_v32  ;;  %v1013_v21 = vld [vmem:[#allocation5 + $0x1a98] sm:$0xff]  ;;  %v11239_v17 = vcombine.low %v1149_v29, %v1153_v32 }
 0x447   :  { %v1017_v7 = vld [vmem:[#allocation5 + $0x1ab8] sm:$0xff]  ;;  %v12037_v48 = vpop.eup %12036  ;;  %v12549_v2 = vsub.f32 %v12512_v46, %v7674_v3 }
 0x448   :  { %7551 = vmatpush1.bf16.msra.mxu0 %v11023_v40  ;;  %v1141_v40 = vld [vmem:[#allocation5 + $0x1e98] sm:$0xff]  ;;  %v12526_v49 = vsub.s32 3, %v12520_v36  ;;  %v12039_v33 = vpop.eup %12038  ;;  %v11104_v20 = vcombine.high %v1013_v21, %v1017_v7  ;;  %v11103_v0 = vcombine.low %v1013_v21, %v1017_v7  ;;  %v11623_v7 = vld [vmem:[#allocation10 + $0x2e0] ss:$16 sps:$4 sm:$0xff]  }
 0x449   :  { %7592 = vmatpush1.bf16.msra.mxu1 %v11151_v30  ;;  %7552 = vmatprep.subr.bf16.mxu0 %v11144_v16  ;;  %v1145_v30 = vld [vmem:[#allocation5 + $0x1eb8] sm:$0xff]  ;;  %v12523_v16 = vsub.s32 1, %v12520_v36  ;;  %v7768_v59 = vmul.f32 %v12039_v33, %v12498_v28  ;;  %v7690_v46 = vmul.f32 %v12549_v2, %v12549_v2 }
 0x44a   :  { %7593 = vmatprep.subr.bf16.mxu1 %v11272_v45  ;;  %v7625_v45 = vadd.f32 %v7624_v34, %v7623_v9  ;;  %v11232_v54 = vcombine.high %v1141_v40, %v1145_v30  ;;  %v1137_v58 = vld [vmem:[#allocation5 + $0x1e78] sm:$0xff]  ;;  %v7789_v1 = vrot.slane %v12528_v52, %v12526_v49 }
 0x44b   :  { %v7781_v60 = vrot.slane %v12528_v52, %v12523_v16  ;;  %v997_v10 = vld [vmem:[#allocation5 + $0x1a18] sm:$0xff]  ;;  %v7830_v19 = vrot.slane %v12536_v63, %v12523_v16 }
 0x44c   :  { %7553 = vmatpush2.bf16.msra.mxu0 %v11143_v55  ;;  %v1005_v55 = vld [vmem:[#allocation5 + $0x1a58] sm:$0xff]  ;;  %v7669_v62 = vmul.f32 0.125, %v7625_v45  ;;  %v7817_v14 = vmul.f32 %v7789_v1, %v7768_v59 }
 0x44d   :  { %7594 = vmatpush2.bf16.msra.mxu1 %v11271_v18  ;;  %7554 = vmatprep.subr.bf16.mxu0 %v11136_v56  ;;  %v1009_v18 = vld [vmem:[#allocation5 + $0x1a78] sm:$0xff]  ;;  %v7766_v56 = vmul.f32 %v12037_v48, %v12495_v57 }
 0x44e   :  { %7595 = vmatprep.subr.bf16.mxu1 %v11264_v42  ;;  %v1133_v42 = vld [vmem:[#allocation5 + $0x1e58] sm:$0xff]  ;;  %v12541_v9 = vsub.f32 %v12417_v4, %v7669_v62 }
 0x44f   :  { %v11224_v57 = vcombine.high %v1133_v42, %v1137_v58  ;;  %v1125_v37 = vld [vmem:[#allocation5 + $0x1e18] sm:$0xff]  ;;  %v7815_v28 = vmul.f32 %v7781_v60, %v7766_v56  ;;  %v11634_v56 = vld [vmem:[#allocation10 + $0xa4] ss:$16 sps:$4 sm:$0xff]  }
 0x450   :  { %7555 = vmatpush2.bf16.msra.mxu0 %v11135_v31  ;;  %v11231_v31 = vcombine.low %v1141_v40, %v1145_v30  ;;  %v1129_v12 = vld [vmem:[#allocation5 + $0x1e38] sm:$0xff]  ;;  %v7685_v11 = vmul.f32 %v12541_v9, %v12541_v9  ;;  %v11628_v40 = vld [vmem:[#allocation10 + $0xc4] ss:$16 sps:$4 sm:$0xff]   ;;  %v7723_v30 = vrot.slane %v7690_v46, 4 }
 0x451   :  { %7596 = vmatpush2.bf16.msra.mxu1 %v11263_v5  ;;  %7556 = vmatprep.subr.bf16.mxu0 %v11128_v8  ;;  %v11096_v5 = vcombine.high %v1005_v55, %v1009_v18  ;;  %v7671_v8 = vmul.f32 0.125, %v7637_v50  ;;  %v11216_v26 = vcombine.high %v1125_v37, %v1129_v12  ;;  %v7864_v4 = vadd.f32 %v7830_v19, %v7815_v28  ;;  %v11626_v50 = vld [vmem:[#allocation10 + $0xc0] ss:$16 sps:$4 sm:$0xff]   ;;  %v11646_v28 = vld [vmem:[#allocation10 + $0x64] ss:$16 sps:$4 sm:$0xff]  }
 0x452   :  { %7597 = vmatprep.subr.bf16.mxu1 %v11256_v15  ;;  %v1001_v15 = vld [vmem:[#allocation5 + $0x1a38] sm:$0xff]  ;;  %v11215_v34 = vcombine.low %v1125_v37, %v1129_v12  ;;  %v7693_v38 = vrot.slane %v7685_v11, 4  ;;  %v11638_v37 = vld [vmem:[#allocation10 + $0x80] ss:$16 sps:$4 sm:$0xff]  }
 0x453   :  { %v11088_v24 = vcombine.high %v997_v10, %v1001_v15  ;;  %v11087_v29 = vcombine.low %v997_v10, %v1001_v15  ;;  %v11643_v10 = vld [vmem:[#allocation10 + $0x284] ss:$16 sps:$4 sm:$0xff]   ;;  %v11641_v12 = vld [vmem:[#allocation10 + $0x280] ss:$16 sps:$4 sm:$0xff]  }
 0x454   :  { %7557 = vmatpush2.bf16.msra.mxu0 %v11127_v13  ;;  %v11095_v13 = vcombine.low %v1005_v55, %v1009_v18  ;;  %v7694_v33 = vadd.f32 %v7693_v38, %v7685_v11  ;;  %v11629_v18 = vld [vmem:[#allocation10 + $0x2c0] ss:$16 sps:$4 sm:$0xff]   ;;  %v11655_v11 = vld [vmem:[#allocation10 + $0x244] ss:$16 sps:$4 sm:$0xff]  }
 0x455   :  { %7598 = vmatpush2.bf16.msra.mxu1 %v11255_v61  ;;  %7558 = vmatprep.subr.bf16.mxu0 %v11120_v22  ;;  %v7838_v61 = vrot.slane %v12536_v63, %v12526_v49  ;;  %v11223_v22 = vcombine.low %v1133_v42, %v1137_v58  ;;  %v11637_v42 = vld [vmem:[#allocation10 + $0x2a4] ss:$16 sps:$4 sm:$0xff]   ;;  %v7724_v58 = vadd.f32 %v7723_v30, %v7690_v46 }
 0x456   :  { %7599 = vmatprep.subr.bf16.mxu1 %v11248_v25  ;;  %v12546_v25 = vsub.f32 %v12455_v27, %v7671_v8  ;;  %v7695_v62 = vrot.slane %v7694_v33, 2  ;;  %v11661_v46 = vld [vmem:[#allocation10 + $0x224] ss:$16 sps:$4 sm:$0xff]  }
 0x457   :  { %v7866_v32 = vadd.f32 %v7838_v61, %v7817_v14  ;;  %v7725_v15 = vrot.slane %v7724_v58, 2 }
 0x458   :  { %7559 = vmatpush2.bf16.msra.mxu0 %v11119_v23  ;;  %v11622_v23 = vld [vmem:[#allocation10 + $0xe4] ss:$16 sps:$4 sm:$0xff]   ;;  %v7687_v27 = vmul.f32 %v12546_v25, %v12546_v25  ;;  %v7696_v3 = vadd.f32 %v7695_v62, %v7694_v33  ;;  %v7644_v33 = vrot.slane %v12507_v35, 4  ;;  %v11674_v62 = vld [vmem:[#allocation10 + $0x1c0] ss:$16 sps:$4 sm:$0xff]  }
 0x459   :  { %7600 = vmatpush2.bf16.msra.mxu1 %v11247_v6  ;;  %7560 = vmatprep.subr.bf16.mxu0 %v11112_v39  ;;  %v11625_v6 = vld [vmem:[#allocation10 + $0x2e4] ss:$16 sps:$4 sm:$0xff]   ;;  %v7872_v39 = vmax.f32 %v7864_v4, 0.0  ;;  %v7874_v21 = vmax.f32 %v7866_v32, 0.0  ;;  %v7726_v14 = vadd.f32 %v7725_v15, %v7724_v58 }
 0x45a   :  { %7601 = vmatprep.subr.bf16.mxu1 %v11240_v41  ;;  %v11620_v41 = vld [vmem:[#allocation10 + $0xe0] ss:$16 sps:$4 sm:$0xff]   ;;  %v7705_v43 = vrot.slane %v7687_v27, 4  ;;  %v7697_v61 = vrot.slane %v7696_v3, 1  ;;  %v11676_v58 = vld [vmem:[#allocation10 + $0x1c4] ss:$16 sps:$4 sm:$0xff]  }
 0x45b   :  { %v12558_v45 = vpack.c.bf16 %v7872_v39, %v7872_v39  ;;  %v11691_v15 = vld [vmem:[#allocation10 + $0x384] ss:$16 sps:$4 sm:$0xff]  }
 0x45c   :  { %7561 = vmatpush2.bf16.msra.mxu0 %v11111_v53  ;;  %v11631_v53 = vld [vmem:[#allocation10 + $0x2c4] ss:$16 sps:$4 sm:$0xff]   ;;  %v7698_v32 = vadd.f32 %v7697_v61, %v7696_v3  ;;  %v11686_v3 = vld [vmem:[#allocation10 + $0x180] ss:$16 sps:$4 sm:$0xff]  }
 0x45d   :  { %7602 = vmatpush2.bf16.msra.mxu1 %v11239_v17  ;;  %7562 = vmatprep.subr.bf16.mxu0 %v11104_v20  ;;  %v12561_v20 = vpack.c.bf16 %v7874_v21, %v7874_v21  ;;  %v11659_v21 = vld [vmem:[#allocation10 + $0x220] ss:$16 sps:$4 sm:$0xff]   ;;  %v11697_v61 = vld [vmem:[#allocation10 + $0x364] ss:$16 sps:$4 sm:$0xff]  }
 0x45e   :  { %7603 = vmatprep.subr.bf16.mxu1 %v11232_v54  ;;  %v7741_v38 = vmul.f32 0.125, %v7698_v32 }
 0x460   :  { %7563 = vmatpush2.bf16.msra.mxu0 %v11103_v0  ;;  %v11632_v0 = vld [vmem:[#allocation10 + $0xa0] ss:$16 sps:$4 sm:$0xff]  }
 0x461   :  { %7604 = vmatpush2.bf16.msra.mxu1 %v11231_v31  ;;  %7564 = vmatprep.subr.bf16.mxu0 %v11096_v5  ;;  %v11635_v31 = vld [vmem:[#allocation10 + $0x2a0] ss:$16 sps:$4 sm:$0xff]   ;;  %v11640_v5 = vld [vmem:[#allocation10 + $0x84] ss:$16 sps:$4 sm:$0xff]  }
 0x462   :  { %7605 = vmatprep.subr.bf16.mxu1 %v11224_v57 }
 0x464   :  { %7565 = vmatpush2.bf16.msra.mxu0 %v11095_v13  ;;  %v11649_v13 = vld [vmem:[#allocation10 + $0x264] ss:$16 sps:$4 sm:$0xff]  }
 0x465   :  { %7606 = vmatpush2.bf16.msra.mxu1 %v11223_v22  ;;  %7566 = vmatprep.subr.bf16.mxu0 %v11088_v24  ;;  %v11644_v22 = vld [vmem:[#allocation10 + $0x60] ss:$16 sps:$4 sm:$0xff]  }
 0x466   :  { %7607 = vmatprep.subr.bf16.mxu1 %v11216_v26  ;;  %v11647_v24 = vld [vmem:[#allocation10 + $0x260] ss:$16 sps:$4 sm:$0xff]   ;;  %v11652_v26 = vld [vmem:[#allocation10 + $0x44] ss:$16 sps:$4 sm:$0xff]  }
 0x468   :  { %7567 = vmatpush2.bf16.msra.mxu0 %v11087_v29  ;;  %v7727_v29 = vrot.slane %v7726_v14, 1 }
 0x469   :  { %7608 = vmatpush2.bf16.msra.mxu1 %v11215_v34  ;;  %9423 = vmatprep.subr.bf16.mxu0 %v11622_v23  ;;  %v11650_v34 = vld [vmem:[#allocation10 + $0x40] ss:$16 sps:$4 sm:$0xff]  }
 0x46a   :  { %9464 = vmatprep.subr.bf16.mxu1 %v11625_v6  ;;  %v11653_v23 = vld [vmem:[#allocation10 + $0x240] ss:$16 sps:$4 sm:$0xff]   ;;  %v7728_v39 = vadd.f32 %v7727_v29, %v7726_v14  ;;  %v12575_v14 = vsub.s32 2, %v12520_v36 }
 0x46b   :  { %v7324_v48 = vpop.f32.mrf.mxu0  ;;  %7569 = vmatmul.mubr.bf16.vlgmr.msra.gmra.mxu0 %v12382_v44  ;;  %v7706_v44 = vadd.f32 %v7705_v43, %v7687_v27  ;;  %v11658_v27 = vld [vmem:[#allocation10 + $0x24] ss:$16 sps:$4 sm:$0xff]  }
 0x46c   :  { %v7365_v17 = vpop.f32.mrf.mxu1  ;;  %7610 = vmatmul.mubr.bf16.vlgmr.msra.gmra.mxu1 %v12384_v47  ;;  %9424 = vmatpush1.bf16.msra.mxu0 %v11620_v41  ;;  %v11656_v41 = vld [vmem:[#allocation10 + $0x20] ss:$16 sps:$4 sm:$0xff]   ;;  %v7746_v30 = vmul.f32 0.125, %v7728_v39 }
 0x46d   :  { %v12563_v54 = vadd.f32 %v7365_v17, %v7324_v48  ;;  %9455 = vmatprep.mubr.bf16.mxu0 %v12558_v45  ;;  %9465 = vmatpush1.bf16.msra.mxu1 %v11623_v7  ;;  %v7326_v55 = vpop.f32.mrf.mxu0  ;;  %v7707_v8 = vrot.slane %v7706_v44, 2  ;;  %v11664_v7 = vld [vmem:[#allocation10 + $0x4] ss:$16 sps:$4 sm:$0xff]   ;;  %v7749_v48 = vadd.f32 1e-05, %v7741_v38 }
 0x46e   :  { %9496 = vmatprep.mubr.bf16.mxu1 %v12561_v20  ;;  %v7367_v51 = vpop.f32.mrf.mxu1  ;;  %9425 = vmatprep.subr.bf16.mxu0 %v11628_v40  ;;  %v11667_v40 = vld [vmem:[#allocation10 + $0x204] ss:$16 sps:$4 sm:$0xff]   ;;  %v11665_v17 = vld [vmem:[#allocation10 + $0x200] ss:$16 sps:$4 sm:$0xff]  }
 0x46f   :  { %v12567_v47 = vadd.f32 %v7367_v51, %v7326_v55  ;;  %v7328_v60 = vpop.f32.mrf.mxu0  ;;  %9466 = vmatprep.subr.bf16.mxu1 %v11631_v53  ;;  %v7708_v19 = vadd.f32 %v7707_v8, %v7706_v44  ;;  %v11662_v53 = vld [vmem:[#allocation10] ss:$16 sps:$4 sm:$0xff]   ;;  %12040 = vrsqrt.f32 %v7749_v48  ;;  %v7645_v51 = vadd.f32 %v7644_v33, %v12507_v35 }
 0x470   :  { %v7369_v59 = vpop.f32.mrf.mxu1  ;;  %9426 = vmatpush1.bf16.msra.mxu0 %v11626_v50  ;;  %v11670_v50 = vld [vmem:[#allocation10 + $0x1e4] ss:$16 sps:$4 sm:$0xff]   ;;  %v11668_v44 = vld [vmem:[#allocation10 + $0x1e0] ss:$16 sps:$4 sm:$0xff]   ;;  %v7834_v48 = vrot.slane %v12536_v63, %v12575_v14 }
 0x471   :  { %9467 = vmatpush1.bf16.msra.mxu1 %v11629_v18  ;;  %v7329_v1 = vpop.f32.mrf.mxu0  ;;  %9427 = vmatprep.subr.bf16.mxu0 %v11634_v56  ;;  %v7709_v4 = vrot.slane %v7708_v19, 1  ;;  %v11673_v18 = vld [vmem:[#allocation10 + $0x3e4] ss:$16 sps:$4 sm:$0xff]   ;;  %v7754_v56 = vadd.f32 1e-05, %v7746_v30  ;;  %v7646_v59 = vrot.slane %v7645_v51, 2 }
 0x472   :  { %v7370_v57 = vpop.f32.mrf.mxu1  ;;  %9468 = vmatprep.subr.bf16.mxu1 %v11637_v42  ;;  %v11671_v42 = vld [vmem:[#allocation10 + $0x3e0] ss:$16 sps:$4 sm:$0xff]   ;;  %v11679_v60 = vld [vmem:[#allocation10 + $0x3c4] ss:$16 sps:$4 sm:$0xff]  }
 0x473   :  { %v7710_v6 = vadd.f32 %v7709_v4, %v7708_v19  ;;  %v11682_v1 = vld [vmem:[#allocation10 + $0x1a4] ss:$16 sps:$4 sm:$0xff]   ;;  %v7647_v8 = vadd.f32 %v7646_v59, %v7645_v51  ;;  %v11683_v57 = vld [vmem:[#allocation10 + $0x3a0] ss:$16 sps:$4 sm:$0xff]  }
 0x474   :  { %9428 = vmatpush1.bf16.msra.mxu0 %v11632_v0  ;;  %v11677_v0 = vld [vmem:[#allocation10 + $0x3c0] ss:$16 sps:$4 sm:$0xff]   ;;  %v11694_v19 = vld [vmem:[#allocation10 + $0x164] ss:$16 sps:$4 sm:$0xff]  }
 0x475   :  { %9469 = vmatpush1.bf16.msra.mxu1 %v11635_v31  ;;  %9429 = vmatprep.subr.bf16.mxu0 %v11640_v5  ;;  %v7743_v43 = vmul.f32 0.125, %v7710_v6  ;;  %v11685_v31 = vld [vmem:[#allocation10 + $0x3a4] ss:$16 sps:$4 sm:$0xff]   ;;  %v11680_v5 = vld [vmem:[#allocation10 + $0x1a0] ss:$16 sps:$4 sm:$0xff]   ;;  %v7785_v6 = vrot.slane %v12528_v52, %v12575_v14 }
 0x476   :  { %9470 = vmatprep.subr.bf16.mxu1 %v11643_v10  ;;  %v11688_v10 = vld [vmem:[#allocation10 + $0x184] ss:$16 sps:$4 sm:$0xff]   ;;  %v11692_v4 = vld [vmem:[#allocation10 + $0x160] ss:$16 sps:$4 sm:$0xff]  }
 0x477   :  { %v7751_v55 = vadd.f32 1e-05, %v7743_v43  ;;  %v11706_v43 = vld [vmem:[#allocation10 + $0x124] ss:$16 sps:$4 sm:$0xff]   ;;  %v11704_v33 = vld [vmem:[#allocation10 + $0x120] ss:$16 sps:$4 sm:$0xff]  }
 0x478   :  { %9430 = vmatpush1.bf16.msra.mxu0 %v11638_v37  ;;  %v12572_v37 = vsub.s32 0, %v12520_v36  ;;  %v11709_v30 = vld [vmem:[#allocation10 + $0x324] ss:$16 sps:$4 sm:$0xff]  }
 0x479   :  { %9471 = vmatpush1.bf16.msra.mxu1 %v11641_v12  ;;  %9431 = vmatprep.subr.bf16.mxu0 %v11646_v28  ;;  %12042 = vrsqrt.f32 %v7751_v55  ;;  %v7648_v12 = vrot.slane %v7647_v8, 1  ;;  %v11689_v28 = vld [vmem:[#allocation10 + $0x380] ss:$16 sps:$4 sm:$0xff]   ;;  %v11712_v55 = vld [vmem:[#allocation10 + $0x104] ss:$16 sps:$4 sm:$0xff]  }
 0x47a   :  { %9472 = vmatprep.subr.bf16.mxu1 %v11649_v13  ;;  %12044 = vrsqrt.f32 %v7754_v56  ;;  %v7777_v29 = vrot.slane %v12528_v52, %v12572_v37  ;;  %v11715_v56 = vld [vmem:[#allocation10 + $0x304] ss:$16 sps:$4 sm:$0xff]  }
 0x47b   :  { %v7649_v32 = vadd.f32 %v7648_v12, %v7647_v8  ;;  %v11721_v8 = vld [vmem:[#allocation10 + $0x4c4] ss:$16 sps:$4 sm:$0xff]  }
 0x47c   :  { %9432 = vmatpush1.bf16.msra.mxu0 %v11644_v22  ;;  %v12041_v13 = vpop.eup %12040 }
 0x47d   :  { %9473 = vmatpush1.bf16.msra.mxu1 %v11647_v24  ;;  %9433 = vmatprep.subr.bf16.mxu0 %v11652_v26  ;;  %v7796_v24 = vsub.s32 5, %v12520_v36 }
 0x47e   :  { %9474 = vmatprep.subr.bf16.mxu1 %v11655_v11  ;;  %v7765_v11 = vmul.f32 %v12041_v13, %v12541_v9  ;;  %v11698_v9 = vld [vmem:[#allocation10 + $0x140] ss:$16 sps:$4 sm:$0xff]  }
 0x47f   :  { %v7797_v38 = vrot.slane %v12528_v52, %v7796_v24 }
 0x480   :  { %9434 = vmatpush1.bf16.msra.mxu0 %v11650_v34  ;;  %v11695_v34 = vld [vmem:[#allocation10 + $0x360] ss:$16 sps:$4 sm:$0xff]  }
 0x481   :  { %9475 = vmatpush1.bf16.msra.mxu1 %v11653_v23  ;;  %9435 = vmatprep.subr.bf16.mxu0 %v11658_v27  ;;  %v11700_v23 = vld [vmem:[#allocation10 + $0x144] ss:$16 sps:$4 sm:$0xff]  }
 0x482   :  { %9476 = vmatprep.subr.bf16.mxu1 %v11661_v46  ;;  %v11703_v46 = vld [vmem:[#allocation10 + $0x344] ss:$16 sps:$4 sm:$0xff]  }
 0x484   :  { %9436 = vmatpush1.bf16.msra.mxu0 %v11656_v41  ;;  %v7814_v41 = vmul.f32 %v7777_v29, %v7765_v11 }
 0x485   :  { %9477 = vmatpush1.bf16.msra.mxu1 %v11659_v21  ;;  %9437 = vmatprep.subr.bf16.mxu0 %v11664_v7  ;;  %v7673_v21 = vmul.f32 0.125, %v7649_v32  ;;  %v11701_v7 = vld [vmem:[#allocation10 + $0x340] ss:$16 sps:$4 sm:$0xff]  }
 0x486   :  { %9478 = vmatprep.subr.bf16.mxu1 %v11667_v40  ;;  %v12043_v22 = vpop.eup %12042 }
 0x487   :  { %v12045_v26 = vpop.eup %12044  ;;  %v7767_v27 = vmul.f32 %v12043_v22, %v12546_v25  ;;  %v7826_v25 = vrot.slane %v12536_v63, %v12572_v37  ;;  %v11724_v22 = vld [vmem:[#allocation10 + $0x4a4] ss:$16 sps:$4 sm:$0xff]  }
 0x488   :  { %9438 = vmatpush1.bf16.msra.mxu0 %v11662_v53  ;;  %v7770_v39 = vmul.f32 %v12045_v26, %v12549_v2  ;;  %v7846_v53 = vrot.slane %v12536_v63, %v7796_v24  ;;  %v11815_v24 = vld [vmem:[#allocation10 + $0x6e0] ss:$16 sps:$4 sm:$0xff]  }
 0x489   :  { %9479 = vmatpush1.bf16.msra.mxu1 %v11665_v17  ;;  %9439 = vmatprep.subr.bf16.mxu0 %v11670_v50  ;;  %v7816_v40 = vmul.f32 %v7785_v6, %v7767_v27  ;;  %v12592_v17 = vsub.f32 %v12507_v35, %v7673_v21  ;;  %v11707_v50 = vld [vmem:[#allocation10 + $0x320] ss:$16 sps:$4 sm:$0xff]   ;;  %v11718_v35 = vld [vmem:[#allocation10 + $0x4e4] ss:$16 sps:$4 sm:$0xff]  }
 0x48a   :  { %9480 = vmatprep.subr.bf16.mxu1 %v11673_v18  ;;  %v7819_v2 = vmul.f32 %v7797_v38, %v7770_v39  ;;  %v7863_v18 = vadd.f32 %v7826_v25, %v7814_v41  ;;  %v11821_v39 = vld [vmem:[#allocation10 + $0x6c0] ss:$16 sps:$4 sm:$0xff]   ;;  %v11730_v21 = vld [vmem:[#allocation10 + $0x464] ss:$16 sps:$4 sm:$0xff]  }
 0x48b   :  { %v11835_v25 = vld [vmem:[#allocation10 + $0x684] ss:$16 sps:$4 sm:$0xff]  }
 0x48c   :  { %9440 = vmatpush2.bf16.msra.mxu0 %v11668_v44  ;;  %v7865_v44 = vadd.f32 %v7834_v48, %v7816_v40  ;;  %v7868_v51 = vadd.f32 %v7846_v53, %v7819_v2  ;;  %v11833_v48 = vld [vmem:[#allocation10 + $0x680] ss:$16 sps:$4 sm:$0xff]   ;;  %v11841_v53 = vld [vmem:[#allocation10 + $0x664] ss:$16 sps:$4 sm:$0xff]  }
 0x48d   :  { %9481 = vmatpush2.bf16.msra.mxu1 %v11671_v42  ;;  %9441 = vmatprep.subr.bf16.mxu0 %v11676_v58  ;;  %v11710_v42 = vld [vmem:[#allocation10 + $0x100] ss:$16 sps:$4 sm:$0xff]   ;;  %v7689_v58 = vmul.f32 %v12592_v17, %v12592_v17 }
 0x48e   :  { %9482 = vmatprep.subr.bf16.mxu1 %v11679_v60  ;;  %v11713_v60 = vld [vmem:[#allocation10 + $0x300] ss:$16 sps:$4 sm:$0xff]   ;;  %v7873_v59 = vmax.f32 %v7865_v44, 0.0 }
 0x48f   :  { %v11731_v2 = vld [vmem:[#allocation10 + $0x440] ss:$16 sps:$4 sm:$0xff]  }
 0x490   :  { %9442 = vmatpush2.bf16.msra.mxu0 %v11674_v62  ;;  %v7871_v62 = vmax.f32 %v7863_v18, 0.0  ;;  %v11734_v18 = vld [vmem:[#allocation10 + $0x420] ss:$16 sps:$4 sm:$0xff]  }
 0x491   :  { %9483 = vmatpush2.bf16.msra.mxu1 %v11677_v0  ;;  %9443 = vmatprep.subr.bf16.mxu0 %v11682_v1  ;;  %v7876_v0 = vmax.f32 %v7868_v51, 0.0  ;;  %v11716_v1 = vld [vmem:[#allocation10 + $0x4e0] ss:$16 sps:$4 sm:$0xff]   ;;  %v11739_v51 = vld [vmem:[#allocation10 + $0x404] ss:$16 sps:$4 sm:$0xff]  }
 0x492   :  { %9484 = vmatprep.subr.bf16.mxu1 %v11685_v31  ;;  %v7717_v31 = vrot.slane %v7689_v58, 4 }
 0x494   :  { %9444 = vmatpush2.bf16.msra.mxu0 %v11680_v5  ;;  %v12596_v5 = vpack.c.bf16 %v7871_v62, %v7871_v62  ;;  %v7718_v13 = vadd.f32 %v7717_v31, %v7689_v58  ;;  %v11737_v58 = vld [vmem:[#allocation10 + $0x400] ss:$16 sps:$4 sm:$0xff]   ;;  %v11745_v31 = vld [vmem:[#allocation10 + $0x5c4] ss:$16 sps:$4 sm:$0xff]  }
 0x495   :  { %9485 = vmatpush2.bf16.msra.mxu1 %v11683_v57  ;;  %9445 = vmatprep.subr.bf16.mxu0 %v11688_v10  ;;  %v12598_v57 = vpack.c.bf16 %v7873_v59, %v7873_v59  ;;  %v11851_v59 = vld [vmem:[#allocation10 + $0x620] ss:$16 sps:$4 sm:$0xff]  }
 0x496   :  { %9486 = vmatprep.subr.bf16.mxu1 %v11691_v15  ;;  %v12601_v15 = vpack.c.bf16 %v7876_v0, %v7876_v0  ;;  %v7719_v27 = vrot.slane %v7718_v13, 2  ;;  %v11740_v0 = vld [vmem:[#allocation10 + $0x5e0] ss:$16 sps:$4 sm:$0xff]  }
 0x498   :  { %9446 = vmatpush2.bf16.msra.mxu0 %v11686_v3  ;;  %v7720_v41 = vadd.f32 %v7719_v27, %v7718_v13  ;;  %v11871_v13 = vld [vmem:[#allocation10 + $0x7c4] ss:$16 sps:$4 sm:$0xff]  }
 0x499   :  { %9487 = vmatpush2.bf16.msra.mxu1 %v11689_v28  ;;  %9447 = vmatprep.subr.bf16.mxu0 %v11694_v19  ;;  %v11719_v28 = vld [vmem:[#allocation10 + $0x4c0] ss:$16 sps:$4 sm:$0xff]   ;;  %v11817_v19 = vld [vmem:[#allocation10 + $0x6e4] ss:$16 sps:$4 sm:$0xff]  }
 0x49a   :  { %9488 = vmatprep.subr.bf16.mxu1 %v11697_v61  ;;  %v7721_v40 = vrot.slane %v7720_v41, 1  ;;  %v11883_v27 = vld [vmem:[#allocation10 + $0x784] ss:$16 sps:$4 sm:$0xff]  }
 0x49c   :  { %9448 = vmatpush2.bf16.msra.mxu0 %v11692_v4 }
 0x49d   :  { %9489 = vmatpush2.bf16.msra.mxu1 %v11695_v34  ;;  %9449 = vmatprep.subr.bf16.mxu0 %v11700_v23  ;;  %v11722_v34 = vld [vmem:[#allocation10 + $0x4a0] ss:$16 sps:$4 sm:$0xff]   ;;  %v11823_v23 = vld [vmem:[#allocation10 + $0x6c4] ss:$16 sps:$4 sm:$0xff]  }
 0x49e   :  { %9490 = vmatprep.subr.bf16.mxu1 %v11703_v46  ;;  %v11727_v46 = vld [vmem:[#allocation10 + $0x484] ss:$16 sps:$4 sm:$0xff]  }
 0x4a0   :  { %9450 = vmatpush2.bf16.msra.mxu0 %v11698_v9  ;;  %v11829_v9 = vld [vmem:[#allocation10 + $0x6a4] ss:$16 sps:$4 sm:$0xff]  }
 0x4a1   :  { %9491 = vmatpush2.bf16.msra.mxu1 %v11701_v7  ;;  %9451 = vmatprep.subr.bf16.mxu0 %v11706_v43  ;;  %v11827_v7 = vld [vmem:[#allocation10 + $0x6a0] ss:$16 sps:$4 sm:$0xff]  }
 0x4a2   :  { %9492 = vmatprep.subr.bf16.mxu1 %v11709_v30  ;;  %v11728_v43 = vld [vmem:[#allocation10 + $0x460] ss:$16 sps:$4 sm:$0xff]   ;;  %v11733_v30 = vld [vmem:[#allocation10 + $0x444] ss:$16 sps:$4 sm:$0xff]  }
 0x4a4   :  { %9452 = vmatpush2.bf16.msra.mxu0 %v11704_v33  ;;  %v7722_v33 = vadd.f32 %v7721_v40, %v7720_v41 }
 0x4a5   :  { %9493 = vmatpush2.bf16.msra.mxu1 %v11707_v50  ;;  %9453 = vmatprep.subr.bf16.mxu0 %v11712_v55  ;;  %v11736_v50 = vld [vmem:[#allocation10 + $0x424] ss:$16 sps:$4 sm:$0xff]   ;;  %v11839_v55 = vld [vmem:[#allocation10 + $0x660] ss:$16 sps:$4 sm:$0xff]  }
 0x4a6   :  { %9494 = vmatprep.subr.bf16.mxu1 %v11715_v56  ;;  %v11847_v56 = vld [vmem:[#allocation10 + $0x644] ss:$16 sps:$4 sm:$0xff]   ;;  %v7745_v44 = vmul.f32 0.125, %v7722_v33 }
 0x4a8   :  { %9454 = vmatpush2.bf16.msra.mxu0 %v11710_v42  ;;  %v11845_v42 = vld [vmem:[#allocation10 + $0x640] ss:$16 sps:$4 sm:$0xff]   ;;  %v7753_v62 = vadd.f32 1e-05, %v7745_v44  ;;  %v11769_v44 = vld [vmem:[#allocation10 + $0xcc] ss:$16 sps:$4 sm:$0xff]  }
 0x4a9   :  { %9495 = vmatpush2.bf16.msra.mxu1 %v11713_v60  ;;  %9505 = vmatprep.subr.bf16.mxu0 %v11718_v35  ;;  %v11853_v60 = vld [vmem:[#allocation10 + $0x624] ss:$16 sps:$4 sm:$0xff]  }
 0x4aa   :  { %9546 = vmatprep.subr.bf16.mxu1 %v11817_v19  ;;  %v11742_v35 = vld [vmem:[#allocation10 + $0x5e4] ss:$16 sps:$4 sm:$0xff]   ;;  %12046 = vrsqrt.f32 %v7753_v62  ;;  %v11746_v19 = vld [vmem:[#allocation10 + $0x5a0] ss:$16 sps:$4 sm:$0xff]   ;;  %v11910_v62 = vld [vmem:[#allocation10 + $0x2ec] ss:$16 sps:$4 sm:$0xff]  }
 0x4ab   :  { %v7406_v10 = vpop.f32.mrf.mxu0  ;;  %9456 = vmatmul.mubr.bf16.vlgmr.msra.gmra.mxu0 %v12596_v5 }
 0x4ac   :  { %v7407_v3 = vadd.f32 %v7406_v10, %v12563_v54  ;;  %v7447_v12 = vpop.f32.mrf.mxu1  ;;  %9497 = vmatmul.mubr.bf16.vlgmr.msra.gmra.mxu1 %v12598_v57  ;;  %9506 = vmatpush1.bf16.msra.mxu0 %v11716_v1  ;;  %v11859_v1 = vld [vmem:[#allocation10 + $0x604] ss:$16 sps:$4 sm:$0xff]   ;;  %v11743_v10 = vld [vmem:[#allocation10 + $0x5c0] ss:$16 sps:$4 sm:$0xff]  }
 0x4ad   :  { %9537 = vmatprep.mubr.bf16.mxu0 %v12601_v15  ;;  %v7408_v61 = vpop.f32.mrf.mxu0  ;;  %9507 = vmatprep.subr.bf16.mxu0 %v11721_v8  ;;  %v11857_v8 = vld [vmem:[#allocation10 + $0x600] ss:$16 sps:$4 sm:$0xff]  }
 0x4ae   :  { %v12606_v26 = vadd.f32 %v7447_v12, %v7407_v3  ;;  %v7409_v4 = vadd.f32 %v7408_v61, %v12567_v47  ;;  %v7449_v11 = vpop.f32.mrf.mxu1  ;;  %9547 = vmatpush1.bf16.msra.mxu1 %v11815_v24  ;;  %v11725_v47 = vld [vmem:[#allocation10 + $0x480] ss:$16 sps:$4 sm:$0xff]   ;;  %v11865_v3 = vld [vmem:[#allocation10 + $0x7e4] ss:$16 sps:$4 sm:$0xff]  }
 0x4af   :  { %v7410_v54 = vpop.f32.mrf.mxu0  ;;  %9548 = vmatprep.subr.bf16.mxu1 %v11823_v23  ;;  %v11748_v12 = vld [vmem:[#allocation10 + $0x5a4] ss:$16 sps:$4 sm:$0xff]   ;;  %v11749_v24 = vld [vmem:[#allocation10 + $0x580] ss:$16 sps:$4 sm:$0xff]  }
 0x4b0   :  { %v12609_v29 = vadd.f32 %v7449_v11, %v7409_v4  ;;  %v7451_v32 = vpop.f32.mrf.mxu1  ;;  %9508 = vmatpush1.bf16.msra.mxu0 %v11719_v28  ;;  %v11863_v28 = vld [vmem:[#allocation10 + $0x7e0] ss:$16 sps:$4 sm:$0xff]   ;;  %v11751_v61 = vld [vmem:[#allocation10 + $0x584] ss:$16 sps:$4 sm:$0xff]   ;;  %v7792_v11 = vsub.s32 4, %v12520_v36 }
 0x4b1   :  { %v7411_v6 = vpop.f32.mrf.mxu0  ;;  %9509 = vmatprep.subr.bf16.mxu0 %v11724_v22  ;;  %v11869_v22 = vld [vmem:[#allocation10 + $0x7c0] ss:$16 sps:$4 sm:$0xff]   ;;  %v11877_v4 = vld [vmem:[#allocation10 + $0x7a4] ss:$16 sps:$4 sm:$0xff]  }
 0x4b2   :  { %v7452_v38 = vpop.f32.mrf.mxu1  ;;  %9549 = vmatpush1.bf16.msra.mxu1 %v11821_v39  ;;  %v11754_v54 = vld [vmem:[#allocation10 + $0x564] ss:$16 sps:$4 sm:$0xff]   ;;  %v11875_v32 = vld [vmem:[#allocation10 + $0x7a0] ss:$16 sps:$4 sm:$0xff]  }
 0x4b3   :  { %9550 = vmatprep.subr.bf16.mxu1 %v11829_v9  ;;  %v11752_v23 = vld [vmem:[#allocation10 + $0x560] ss:$16 sps:$4 sm:$0xff]   ;;  %v11757_v39 = vld [vmem:[#allocation10 + $0x544] ss:$16 sps:$4 sm:$0xff]  }
 0x4b4   :  { %9510 = vmatpush1.bf16.msra.mxu0 %v11722_v34  ;;  %v11881_v38 = vld [vmem:[#allocation10 + $0x780] ss:$16 sps:$4 sm:$0xff]   ;;  %v11889_v9 = vld [vmem:[#allocation10 + $0x764] ss:$16 sps:$4 sm:$0xff]  }
 0x4b5   :  { %9511 = vmatprep.subr.bf16.mxu0 %v11727_v46  ;;  %v7793_v46 = vrot.slane %v12528_v52, %v7792_v11  ;;  %v11763_v52 = vld [vmem:[#allocation10 + $0x504] ss:$16 sps:$4 sm:$0xff]  }
 0x4b6   :  { %9551 = vmatpush1.bf16.msra.mxu1 %v11827_v7  ;;  %v7842_v7 = vrot.slane %v12536_v63, %v7792_v11  ;;  %v11907_v63 = vld [vmem:[#allocation10 + $0x704] ss:$16 sps:$4 sm:$0xff]   ;;  %v11785_v11 = vld [vmem:[#allocation10 + $0x8] ss:$16 sps:$4 sm:$0xff]  }
 0x4b7   :  { %9552 = vmatprep.subr.bf16.mxu1 %v11835_v25  ;;  %v12047_v34 = vpop.eup %12046  ;;  %v11895_v25 = vld [vmem:[#allocation10 + $0x744] ss:$16 sps:$4 sm:$0xff]  }
 0x4b8   :  { %9512 = vmatpush1.bf16.msra.mxu0 %v11725_v47  ;;  %v7769_v6 = vmul.f32 %v12047_v34, %v12592_v17  ;;  %v11755_v47 = vld [vmem:[#allocation10 + $0x540] ss:$16 sps:$4 sm:$0xff]   ;;  %v11793_v34 = vld [vmem:[#allocation10 + $0x1cc] ss:$16 sps:$4 sm:$0xff]  }
 0x4b9   :  { %9513 = vmatprep.subr.bf16.mxu0 %v11730_v21  ;;  %v11760_v21 = vld [vmem:[#allocation10 + $0x524] ss:$16 sps:$4 sm:$0xff]   ;;  %v11758_v17 = vld [vmem:[#allocation10 + $0x520] ss:$16 sps:$4 sm:$0xff]  }
 0x4ba   :  { %9553 = vmatpush1.bf16.msra.mxu1 %v11833_v48  ;;  %v7818_v41 = vmul.f32 %v7793_v46, %v7769_v6  ;;  %v11899_v48 = vld [vmem:[#allocation10 + $0x720] ss:$16 sps:$4 sm:$0xff]   ;;  %v11794_v6 = vld [vmem:[#allocation10 + $0x1a8] ss:$16 sps:$4 sm:$0xff]   ;;  %v11799_v46 = vld [vmem:[#allocation10 + $0x18c] ss:$16 sps:$4 sm:$0xff]  }
 0x4bb   :  { %9554 = vmatprep.subr.bf16.mxu1 %v11841_v53  ;;  %v11761_v53 = vld [vmem:[#allocation10 + $0x500] ss:$16 sps:$4 sm:$0xff]  }
 0x4bc   :  { %9514 = vmatpush1.bf16.msra.mxu0 %v11728_v43  ;;  %v11887_v43 = vld [vmem:[#allocation10 + $0x760] ss:$16 sps:$4 sm:$0xff]   ;;  %v7867_v40 = vadd.f32 %v7842_v7, %v7818_v41  ;;  %v11803_v41 = vld [vmem:[#allocation10 + $0x148] ss:$16 sps:$4 sm:$0xff]  }
 0x4bd   :  { %9515 = vmatprep.subr.bf16.mxu0 %v11733_v30  ;;  %v11893_v30 = vld [vmem:[#allocation10 + $0x740] ss:$16 sps:$4 sm:$0xff]   ;;  %v11806_v7 = vld [vmem:[#allocation10 + $0x128] ss:$16 sps:$4 sm:$0xff]  }
 0x4be   :  { %9555 = vmatpush1.bf16.msra.mxu1 %v11839_v55  ;;  %v7875_v33 = vmax.f32 %v7867_v40, 0.0  ;;  %v11905_v55 = vld [vmem:[#allocation10 + $0x700] ss:$16 sps:$4 sm:$0xff]   ;;  %v11812_v40 = vld [vmem:[#allocation10 + $0x4e8] ss:$16 sps:$4 sm:$0xff]  }
 0x4bf   :  { %9556 = vmatprep.subr.bf16.mxu1 %v11847_v56 }
 0x4c0   :  { %9516 = vmatpush1.bf16.msra.mxu0 %v11731_v2  ;;  %v11901_v2 = vld [vmem:[#allocation10 + $0x724] ss:$16 sps:$4 sm:$0xff]   ;;  %v12615_v56 = vpack.c.bf16 %v7875_v33, %v7875_v33 }
 0x4c1   :  { %9517 = vmatprep.subr.bf16.mxu0 %v11736_v50  ;;  %v11766_v50 = vld [vmem:[#allocation10 + $0xec] ss:$16 sps:$4 sm:$0xff]  }
 0x4c2   :  { %9557 = vmatpush1.bf16.msra.mxu1 %v11845_v42 }
 0x4c3   :  { %9558 = vmatprep.subr.bf16.mxu1 %v11853_v60  ;;  %v11767_v60 = vld [vmem:[#allocation10 + $0xc8] ss:$16 sps:$4 sm:$0xff]  }
 0x4c4   :  { %9518 = vmatpush1.bf16.msra.mxu0 %v11734_v18  ;;  %v11764_v18 = vld [vmem:[#allocation10 + $0xe8] ss:$16 sps:$4 sm:$0xff]  }
 0x4c5   :  { %9519 = vmatprep.subr.bf16.mxu0 %v11739_v51 }
 0x4c6   :  { %9559 = vmatpush1.bf16.msra.mxu1 %v11851_v59  ;;  %v11772_v59 = vld [vmem:[#allocation10 + $0xac] ss:$16 sps:$4 sm:$0xff]  }
 0x4c7   :  { %9560 = vmatprep.subr.bf16.mxu1 %v11859_v1 }
 0x4c8   :  { %9520 = vmatpush1.bf16.msra.mxu0 %v11737_v58 }
 0x4c9   :  { %9521 = vmatprep.subr.bf16.mxu0 %v11742_v35 }
 0x4ca   :  { %9561 = vmatpush1.bf16.msra.mxu1 %v11857_v8 }
 0x4cb   :  { %9562 = vmatprep.subr.bf16.mxu1 %v11865_v3  ;;  %v11775_v3 = vld [vmem:[#allocation10 + $0x8c] ss:$16 sps:$4 sm:$0xff]  }
 0x4cc   :  { %9522 = vmatpush2.bf16.msra.mxu0 %v11740_v0 }
 0x4cd   :  { %9523 = vmatprep.subr.bf16.mxu0 %v11745_v31 }
 0x4ce   :  { %9563 = vmatpush2.bf16.msra.mxu1 %v11863_v28  ;;  %v11778_v28 = vld [vmem:[#allocation10 + $0x6c] ss:$16 sps:$4 sm:$0xff]  }
 0x4cf   :  { %9564 = vmatprep.subr.bf16.mxu1 %v11871_v13  ;;  %v11781_v13 = vld [vmem:[#allocation10 + $0x4c] ss:$16 sps:$4 sm:$0xff]  }
 0x4d0   :  { %9524 = vmatpush2.bf16.msra.mxu0 %v11743_v10  ;;  %v11770_v10 = vld [vmem:[#allocation10 + $0xa8] ss:$16 sps:$4 sm:$0xff]  }
 0x4d1   :  { %9525 = vmatprep.subr.bf16.mxu0 %v11748_v12 }
 0x4d2   :  { %9565 = vmatpush2.bf16.msra.mxu1 %v11869_v22  ;;  %v11784_v22 = vld [vmem:[#allocation10 + $0x2c] ss:$16 sps:$4 sm:$0xff]  }
 0x4d3   :  { %9566 = vmatprep.subr.bf16.mxu1 %v11877_v4  ;;  %v11787_v4 = vld [vmem:[#allocation10 + $0xc] ss:$16 sps:$4 sm:$0xff]  }
 0x4d4   :  { %9526 = vmatpush2.bf16.msra.mxu0 %v11746_v19  ;;  %v11776_v19 = vld [vmem:[#allocation10 + $0x68] ss:$16 sps:$4 sm:$0xff]  }
 0x4d5   :  { %9527 = vmatprep.subr.bf16.mxu0 %v11751_v61  ;;  %v11779_v61 = vld [vmem:[#allocation10 + $0x48] ss:$16 sps:$4 sm:$0xff]  }
 0x4d6   :  { %9567 = vmatpush2.bf16.msra.mxu1 %v11875_v32  ;;  %v11788_v32 = vld [vmem:[#allocation10 + $0x1e8] ss:$16 sps:$4 sm:$0xff]  }
 0x4d7   :  { %9568 = vmatprep.subr.bf16.mxu1 %v11883_v27  ;;  %v11796_v27 = vld [vmem:[#allocation10 + $0x1ac] ss:$16 sps:$4 sm:$0xff]  }
 0x4d8   :  { %9528 = vmatpush2.bf16.msra.mxu0 %v11749_v24  ;;  %v11782_v24 = vld [vmem:[#allocation10 + $0x28] ss:$16 sps:$4 sm:$0xff]  }
 0x4d9   :  { %9529 = vmatprep.subr.bf16.mxu0 %v11754_v54  ;;  %v11790_v54 = vld [vmem:[#allocation10 + $0x1ec] ss:$16 sps:$4 sm:$0xff]  }
 0x4da   :  { %9569 = vmatpush2.bf16.msra.mxu1 %v11881_v38  ;;  %v11802_v38 = vld [vmem:[#allocation10 + $0x16c] ss:$16 sps:$4 sm:$0xff]  }
 0x4db   :  { %9570 = vmatprep.subr.bf16.mxu1 %v11889_v9  ;;  %v11805_v9 = vld [vmem:[#allocation10 + $0x14c] ss:$16 sps:$4 sm:$0xff]  }
 0x4dc   :  { %9530 = vmatpush2.bf16.msra.mxu0 %v11752_v23  ;;  %v11791_v23 = vld [vmem:[#allocation10 + $0x1c8] ss:$16 sps:$4 sm:$0xff]  }
 0x4dd   :  { %9531 = vmatprep.subr.bf16.mxu0 %v11757_v39  ;;  %v11797_v39 = vld [vmem:[#allocation10 + $0x188] ss:$16 sps:$4 sm:$0xff]  }
 0x4de   :  { %9571 = vmatpush2.bf16.msra.mxu1 %v11887_v43  ;;  %v11811_v43 = vld [vmem:[#allocation10 + $0x10c] ss:$16 sps:$4 sm:$0xff]  }
 0x4df   :  { %9572 = vmatprep.subr.bf16.mxu1 %v11895_v25  ;;  %v11814_v25 = vld [vmem:[#allocation10 + $0x4ec] ss:$16 sps:$4 sm:$0xff]  }
 0x4e0   :  { %9532 = vmatpush2.bf16.msra.mxu0 %v11755_v47  ;;  %v11800_v47 = vld [vmem:[#allocation10 + $0x168] ss:$16 sps:$4 sm:$0xff]  }
 0x4e1   :  { %9533 = vmatprep.subr.bf16.mxu0 %v11760_v21  ;;  %v11808_v21 = vld [vmem:[#allocation10 + $0x12c] ss:$16 sps:$4 sm:$0xff]  }
 0x4e2   :  { %9573 = vmatpush2.bf16.msra.mxu1 %v11893_v30  ;;  %v11820_v30 = vld [vmem:[#allocation10 + $0x4cc] ss:$16 sps:$4 sm:$0xff]  }
 0x4e3   :  { %9574 = vmatprep.subr.bf16.mxu1 %v11901_v2 }
 0x4e4   :  { %9534 = vmatpush2.bf16.msra.mxu0 %v11758_v17  ;;  %v11809_v17 = vld [vmem:[#allocation10 + $0x108] ss:$16 sps:$4 sm:$0xff]  }
 0x4e5   :  { %9535 = vmatprep.subr.bf16.mxu0 %v11763_v52 }
 0x4e6   :  { %9575 = vmatpush2.bf16.msra.mxu1 %v11899_v48 }
 0x4e7   :  { %9576 = vmatprep.subr.bf16.mxu1 %v11907_v63 }
 0x4e8   :  { %9536 = vmatpush2.bf16.msra.mxu0 %v11761_v53 }
 0x4e9   :  { %9587 = vmatprep.subr.bf16.mxu0 %v11766_v50  ;;  %v11818_v50 = vld [vmem:[#allocation10 + $0x4c8] ss:$16 sps:$4 sm:$0xff]  }
 0x4ea   :  { %9577 = vmatpush2.bf16.msra.mxu1 %v11905_v55  ;;  %v11826_v55 = vld [vmem:[#allocation10 + $0x4ac] ss:$16 sps:$4 sm:$0xff]  }
 0x4eb   :  { %v7488_v51 = vpop.f32.mrf.mxu0  ;;  %9538 = vmatmul.mubr.bf16.vlgmr.msra.gmra.mxu0 %v12615_v56  ;;  %9628 = vmatprep.subr.bf16.mxu1 %v11910_v62 }
 0x4ec   :  { %v7489_v42 = vadd.f32 %v7488_v51, %v12606_v26  ;;  %v7529_v58 = vpop.f32.mrf.mxu1  ;;  %9588 = vmatpush1.bf16.msra.mxu0 %v11764_v18  ;;  %9619 = vmatprep.mubr.bf16.mxu0 %v12558_v45  ;;  %v11773_v45 = vld [vmem:[#allocation10 + $0x88] ss:$16 sps:$4 sm:$0xff]  }
 0x4ed   :  { %v12620_v35 = vpop.f32.mrf.mxu0  ;;  %9589 = vmatprep.subr.bf16.mxu0 %v11769_v44 }
 0x4ee   :  { %v12622_v0 = vadd.f32 %v7529_v58, %v7489_v42  ;;  %v12624_v1 = vpop.f32.mrf.mxu1  ;;  %v7491_v52 = vadd.f32 %v12620_v35, %v12609_v29  ;;  %v11832_v35 = vld [vmem:[#allocation10 + $0x48c] ss:$16 sps:$4 sm:$0xff]  }
 0x4ef   :  { %v7492_v31 = vpop.f32.mrf.mxu0 }
 0x4f0   :  { %v7533_v8 = vpop.f32.mrf.mxu1  ;;  %9590 = vmatpush1.bf16.msra.mxu0 %v11767_v60  ;;  %v7532_v2 = vadd.f32 %v12624_v1, %v7491_v52  ;;  %v11868_v52 = vld [vmem:[#allocation10 + $0x5cc] ss:$16 sps:$4 sm:$0xff]  }
 0x4f1   :  { %v7493_v26 = vpop.f32.mrf.mxu0  ;;  %9591 = vmatprep.subr.bf16.mxu0 %v11772_v59  ;;  %v11830_v8 = vld [vmem:[#allocation10 + $0x488] ss:$16 sps:$4 sm:$0xff]  }
 0x4f2   :  { %v7534_v12 = vpop.f32.mrf.mxu1 }
 0x4f4   :  { %9592 = vmatpush1.bf16.msra.mxu0 %v11770_v10  ;;  %v11838_v10 = vld [vmem:[#allocation10 + $0x46c] ss:$16 sps:$4 sm:$0xff]  }
 0x4f5   :  { %9593 = vmatprep.subr.bf16.mxu0 %v11775_v3 }
 0x4f8   :  { %9594 = vmatpush1.bf16.msra.mxu0 %v11773_v45 }
 0x4f9   :  { %9595 = vmatprep.subr.bf16.mxu0 %v11778_v28  ;;  %v11836_v28 = vld [vmem:[#allocation10 + $0x468] ss:$16 sps:$4 sm:$0xff]  }
 0x4fc   :  { %9596 = vmatpush1.bf16.msra.mxu0 %v11776_v19  ;;  %v11844_v19 = vld [vmem:[#allocation10 + $0x44c] ss:$16 sps:$4 sm:$0xff]  }
 0x4fd   :  { %9597 = vmatprep.subr.bf16.mxu0 %v11781_v13 }
 0x500   :  { %9598 = vmatpush1.bf16.msra.mxu0 %v11779_v61 }
 0x501   :  { %9599 = vmatprep.subr.bf16.mxu0 %v11784_v22 }
 0x504   :  { %9600 = vmatpush1.bf16.msra.mxu0 %v11782_v24 }
 0x505   :  { %9601 = vmatprep.subr.bf16.mxu0 %v11787_v4  ;;  %v11842_v4 = vld [vmem:[#allocation10 + $0x448] ss:$16 sps:$4 sm:$0xff]  }
 0x508   :  { %9602 = vmatpush1.bf16.msra.mxu0 %v11785_v11  ;;  %v11850_v11 = vld [vmem:[#allocation10 + $0x42c] ss:$16 sps:$4 sm:$0xff]  }
 0x509   :  { %9603 = vmatprep.subr.bf16.mxu0 %v11790_v54 }
 0x50c   :  { %9604 = vmatpush2.bf16.msra.mxu0 %v11788_v32 }
 0x50d   :  { %9605 = vmatprep.subr.bf16.mxu0 %v11793_v34 }
 0x510   :  { %9606 = vmatpush2.bf16.msra.mxu0 %v11791_v23 }
 0x511   :  { %9607 = vmatprep.subr.bf16.mxu0 %v11796_v27  ;;  %v11848_v27 = vld [vmem:[#allocation10 + $0x428] ss:$16 sps:$4 sm:$0xff]  }
 0x514   :  { %9608 = vmatpush2.bf16.msra.mxu0 %v11794_v6  ;;  %v11856_v6 = vld [vmem:[#allocation10 + $0x40c] ss:$16 sps:$4 sm:$0xff]  }
 0x515   :  { %9609 = vmatprep.subr.bf16.mxu0 %v11799_v46 }
 0x518   :  { %9610 = vmatpush2.bf16.msra.mxu0 %v11797_v39 }
 0x519   :  { %9611 = vmatprep.subr.bf16.mxu0 %v11802_v38 }
 0x51c   :  { %9612 = vmatpush2.bf16.msra.mxu0 %v11800_v47 }
 0x51d   :  { %9613 = vmatprep.subr.bf16.mxu0 %v11805_v9  ;;  %v11854_v9 = vld [vmem:[#allocation10 + $0x408] ss:$16 sps:$4 sm:$0xff]  }
 0x520   :  { %9614 = vmatpush2.bf16.msra.mxu0 %v11803_v41  ;;  %v11862_v41 = vld [vmem:[#allocation10 + $0x5ec] ss:$16 sps:$4 sm:$0xff]  }
 0x521   :  { %9615 = vmatprep.subr.bf16.mxu0 %v11808_v21 }
 0x524   :  { %9616 = vmatpush2.bf16.msra.mxu0 %v11806_v7 }
 0x525   :  { %9617 = vmatprep.subr.bf16.mxu0 %v11811_v43 }
 0x528   :  { %9618 = vmatpush2.bf16.msra.mxu0 %v11809_v17 }
 0x529   :  { %9669 = vmatprep.subr.bf16.mxu0 %v11814_v25  ;;  %v11860_v25 = vld [vmem:[#allocation10 + $0x5e8] ss:$16 sps:$4 sm:$0xff]  }
 0x52b   :  { %v7570_v48 = vpop.f32.mrf.mxu0  ;;  %9620 = vmatmul.mubr.bf16.vlgmr.msra.gmra.mxu0 %v12596_v5  ;;  %v11824_v5 = vld [vmem:[#allocation10 + $0x4a8] ss:$16 sps:$4 sm:$0xff]  }
 0x52c   :  { %v7571_v53 = vadd.f32 %v7570_v48, %v12622_v0  ;;  %v7611_v33 = vpop.f32.mrf.mxu1  ;;  %9670 = vmatpush1.bf16.msra.mxu0 %v11812_v40  ;;  %9701 = vmatprep.mubr.bf16.mxu0 %v12601_v15 }
 0x52d   :  { %v7572_v63 = vpop.f32.mrf.mxu0  ;;  %9671 = vmatprep.subr.bf16.mxu0 %v11820_v30 }
 0x52e   :  { %v7612_v29 = vadd.f32 %v7611_v33, %v7571_v53  ;;  %v7573_v18 = vadd.f32 %v7572_v63, %v7532_v2  ;;  %v7613_v44 = vpop.f32.mrf.mxu1  ;;  %v11866_v53 = vld [vmem:[#allocation10 + $0x5c8] ss:$16 sps:$4 sm:$0xff]   ;;  %v11874_v33 = vld [vmem:[#allocation10 + $0x5ac] ss:$16 sps:$4 sm:$0xff]  }
 0x52f   :  { %v7574_v51 = vpop.f32.mrf.mxu0 }
 0x530   :  { %v7656_v42 = vrot.slane %v7612_v29, 4  ;;  %v7614_v58 = vadd.f32 %v7613_v44, %v7573_v18  ;;  %v7615_v60 = vpop.f32.mrf.mxu1  ;;  %9672 = vmatpush1.bf16.msra.mxu0 %v11818_v50  ;;  %v11872_v18 = vld [vmem:[#allocation10 + $0x5a8] ss:$16 sps:$4 sm:$0xff]   ;;  %v11880_v44 = vld [vmem:[#allocation10 + $0x58c] ss:$16 sps:$4 sm:$0xff]  }
 0x531   :  { %v7575_v62 = vpop.f32.mrf.mxu0  ;;  %9673 = vmatprep.subr.bf16.mxu0 %v11826_v55  ;;  %v11884_v60 = vld [vmem:[#allocation10 + $0x568] ss:$16 sps:$4 sm:$0xff]  }
 0x532   :  { %v7657_v59 = vadd.f32 %v7656_v42, %v7612_v29  ;;  %v7662_v0 = vrot.slane %v7614_v58, 4  ;;  %v7616_v1 = vpop.f32.mrf.mxu1  ;;  %v11878_v42 = vld [vmem:[#allocation10 + $0x588] ss:$16 sps:$4 sm:$0xff]   ;;  %v7800_v62 = vsub.s32 6, %v12520_v36 }
 0x533   :  { %v12062_v1 = vld [vmem:[#allocation7] sm:$0xff] }
 0x534   :  { %v7658_v15 = vrot.slane %v7657_v59, 2  ;;  %v7663_v31 = vadd.f32 %v7662_v0, %v7614_v58  ;;  %9674 = vmatpush1.bf16.msra.mxu0 %v11824_v5  ;;  %v11892_v5 = vld [vmem:[#allocation10 + $0x54c] ss:$16 sps:$4 sm:$0xff]  }
 0x535   :  { %9675 = vmatprep.subr.bf16.mxu0 %v11832_v35  ;;  %v11890_v35 = vld [vmem:[#allocation10 + $0x548] ss:$16 sps:$4 sm:$0xff]   ;;  %v11898_v0 = vld [vmem:[#allocation10 + $0x52c] ss:$16 sps:$4 sm:$0xff]  }
 0x536   :  { %v7659_v26 = vadd.f32 %v7658_v15, %v7657_v59  ;;  %v7664_v3 = vrot.slane %v7663_v31, 2  ;;  %v7804_v59 = vsub.s32 7, %v12520_v36  ;;  %v7801_v15 = vrot.slane %v12062_v1, %v7800_v62  ;;  %v11902_v36 = vld [vmem:[#allocation10 + $0x508] ss:$16 sps:$4 sm:$0xff]  }
 0x538   :  { %v7660_v12 = vrot.slane %v7659_v26, 1  ;;  %v7665_v45 = vadd.f32 %v7664_v3, %v7663_v31  ;;  %9676 = vmatpush1.bf16.msra.mxu0 %v11830_v8  ;;  %v12063_v3 = vld [vmem:[#allocation8] sm:$0xff] }
 0x539   :  { %9677 = vmatprep.subr.bf16.mxu0 %v11838_v10  ;;  %v11896_v10 = vld [vmem:[#allocation10 + $0x528] ss:$16 sps:$4 sm:$0xff]  }
 0x53a   :  { %v7661_v13 = vadd.f32 %v7660_v12, %v7659_v26  ;;  %v7666_v61 = vrot.slane %v7665_v45, 1  ;;  %v7805_v26 = vrot.slane %v12062_v1, %v7804_v59  ;;  %v7850_v12 = vrot.slane %v12063_v3, %v7800_v62  ;;  %v11944_v62 = vld [vmem:[#allocation10 + $0x368] ss:$16 sps:$4 sm:$0xff]  }
 0x53b   :  { %v11950_v1 = vld [vmem:[#allocation10 + $0x328] ss:$16 sps:$4 sm:$0xff]  }
 0x53c   :  { %v7675_v22 = vmul.f32 0.125, %v7661_v13  ;;  %v7667_v24 = vadd.f32 %v7666_v61, %v7665_v45  ;;  %9678 = vmatpush1.bf16.msra.mxu0 %v11836_v28  ;;  %v11904_v28 = vld [vmem:[#allocation10 + $0x50c] ss:$16 sps:$4 sm:$0xff]   ;;  %v7854_v61 = vrot.slane %v12063_v3, %v7804_v59  ;;  %v11947_v59 = vld [vmem:[#allocation10 + $0x348] ss:$16 sps:$4 sm:$0xff]  }
 0x53d   :  { %9679 = vmatprep.subr.bf16.mxu0 %v11844_v19  ;;  %v11961_v3 = vld [vmem:[#allocation10 + $0x6cc] ss:$16 sps:$4 sm:$0xff]  }
 0x53e   :  { %v7683_v54 = vsub.f32 %v7612_v29, %v7675_v22  ;;  %v7676_v32 = vmul.f32 0.125, %v7667_v24 }
 0x540   :  { %v7691_v34 = vmul.f32 %v7683_v54, %v7683_v54  ;;  %v12632_v23 = vsub.f32 %v7614_v58, %v7676_v32  ;;  %9680 = vmatpush1.bf16.msra.mxu0 %v11842_v4  ;;  %v11886_v58 = vld [vmem:[#allocation10 + $0x56c] ss:$16 sps:$4 sm:$0xff]  }
 0x541   :  { %9681 = vmatprep.subr.bf16.mxu0 %v11850_v11 }
 0x542   :  { %v7729_v46 = vrot.slane %v7691_v34, 4  ;;  %v7692_v39 = vmul.f32 %v12632_v23, %v12632_v23 }
 0x544   :  { %v7730_v38 = vadd.f32 %v7729_v46, %v7691_v34  ;;  %v7735_v47 = vrot.slane %v7692_v39, 4  ;;  %9682 = vmatpush1.bf16.msra.mxu0 %v11848_v27  ;;  %v11908_v34 = vld [vmem:[#allocation10 + $0x2e8] ss:$16 sps:$4 sm:$0xff]   ;;  %v11913_v46 = vld [vmem:[#allocation10 + $0x2cc] ss:$16 sps:$4 sm:$0xff]  }
 0x545   :  { %9683 = vmatprep.subr.bf16.mxu0 %v11856_v6 }
 0x546   :  { %v7731_v21 = vrot.slane %v7730_v38, 2  ;;  %v7736_v7 = vadd.f32 %v7735_v47, %v7692_v39 }
 0x548   :  { %v7732_v43 = vadd.f32 %v7731_v21, %v7730_v38  ;;  %v7737_v17 = vrot.slane %v7736_v7, 2  ;;  %9684 = vmatpush1.bf16.msra.mxu0 %v11854_v9  ;;  %v11911_v9 = vld [vmem:[#allocation10 + $0x2c8] ss:$16 sps:$4 sm:$0xff]  }
 0x549   :  { %9685 = vmatprep.subr.bf16.mxu0 %v11862_v41 }
 0x54a   :  { %v7733_v40 = vrot.slane %v7732_v43, 1  ;;  %v7738_v30 = vadd.f32 %v7737_v17, %v7736_v7 }
 0x54c   :  { %v7734_v48 = vadd.f32 %v7733_v40, %v7732_v43  ;;  %v7739_v2 = vrot.slane %v7738_v30, 1  ;;  %9686 = vmatpush2.bf16.msra.mxu0 %v11860_v25  ;;  %v11914_v25 = vld [vmem:[#allocation10 + $0x2a8] ss:$16 sps:$4 sm:$0xff]  }
 0x54d   :  { %9687 = vmatprep.subr.bf16.mxu0 %v11868_v52  ;;  %v11919_v52 = vld [vmem:[#allocation10 + $0x28c] ss:$16 sps:$4 sm:$0xff]   ;;  %v11917_v40 = vld [vmem:[#allocation10 + $0x288] ss:$16 sps:$4 sm:$0xff]  }
 0x54e   :  { %v7747_v50 = vmul.f32 0.125, %v7734_v48  ;;  %v7740_v63 = vadd.f32 %v7739_v2, %v7738_v30  ;;  %v11922_v30 = vld [vmem:[#allocation10 + $0x26c] ss:$16 sps:$4 sm:$0xff]   ;;  %v11920_v48 = vld [vmem:[#allocation10 + $0x268] ss:$16 sps:$4 sm:$0xff]  }
 0x54f   :  { %v11923_v2 = vld [vmem:[#allocation10 + $0x248] ss:$16 sps:$4 sm:$0xff]  }
 0x550   :  { %v7755_v55 = vadd.f32 1e-05, %v7747_v50  ;;  %v7748_v29 = vmul.f32 0.125, %v7740_v63  ;;  %9688 = vmatpush2.bf16.msra.mxu0 %v11866_v53  ;;  %v11928_v53 = vld [vmem:[#allocation10 + $0x22c] ss:$16 sps:$4 sm:$0xff]  }
 0x551   :  { %9689 = vmatprep.subr.bf16.mxu0 %v11874_v33  ;;  %v11926_v33 = vld [vmem:[#allocation10 + $0x228] ss:$16 sps:$4 sm:$0xff]   ;;  %v11931_v50 = vld [vmem:[#allocation10 + $0x20c] ss:$16 sps:$4 sm:$0xff]  }
 0x552   :  { %12048 = vrsqrt.f32 %v7755_v55  ;;  %v7756_v51 = vadd.f32 1e-05, %v7748_v29  ;;  %v11929_v63 = vld [vmem:[#allocation10 + $0x208] ss:$16 sps:$4 sm:$0xff]   ;;  %v11934_v55 = vld [vmem:[#allocation10 + $0x3ec] ss:$16 sps:$4 sm:$0xff]  }
 0x553   :  { %v11932_v29 = vld [vmem:[#allocation10 + $0x3e8] ss:$16 sps:$4 sm:$0xff]  }
 0x554   :  { %12050 = vrsqrt.f32 %v7756_v51  ;;  %9690 = vmatpush2.bf16.msra.mxu0 %v11872_v18  ;;  %v11937_v18 = vld [vmem:[#allocation10 + $0x3cc] ss:$16 sps:$4 sm:$0xff]  }
 0x555   :  { %9691 = vmatprep.subr.bf16.mxu0 %v11880_v44  ;;  %v11935_v44 = vld [vmem:[#allocation10 + $0x3c8] ss:$16 sps:$4 sm:$0xff]   ;;  %v11940_v51 = vld [vmem:[#allocation10 + $0x3ac] ss:$16 sps:$4 sm:$0xff]  }
 0x558   :  { %9692 = vmatpush2.bf16.msra.mxu0 %v11878_v42  ;;  %v11938_v42 = vld [vmem:[#allocation10 + $0x3a8] ss:$16 sps:$4 sm:$0xff]  }
 0x559   :  { %9693 = vmatprep.subr.bf16.mxu0 %v11886_v58  ;;  %v11943_v58 = vld [vmem:[#allocation10 + $0x38c] ss:$16 sps:$4 sm:$0xff]  }
 0x55c   :  { %9694 = vmatpush2.bf16.msra.mxu0 %v11884_v60  ;;  %v11941_v60 = vld [vmem:[#allocation10 + $0x388] ss:$16 sps:$4 sm:$0xff]  }
 0x55d   :  { %9695 = vmatprep.subr.bf16.mxu0 %v11892_v5  ;;  %v11946_v5 = vld [vmem:[#allocation10 + $0x36c] ss:$16 sps:$4 sm:$0xff]  }
 0x55f   :  { %v12049_v31 = vpop.eup %12048 }
 0x560   :  { %v7771_v8 = vmul.f32 %v12049_v31, %v7683_v54  ;;  %9696 = vmatpush2.bf16.msra.mxu0 %v11890_v35  ;;  %v11949_v35 = vld [vmem:[#allocation10 + $0x34c] ss:$16 sps:$4 sm:$0xff]   ;;  %v11953_v31 = vld [vmem:[#allocation10 + $0x308] ss:$16 sps:$4 sm:$0xff]  }
 0x561   :  { %v12051_v45 = vpop.eup %12050  ;;  %9697 = vmatprep.subr.bf16.mxu0 %v11898_v0  ;;  %v11952_v0 = vld [vmem:[#allocation10 + $0x32c] ss:$16 sps:$4 sm:$0xff]  }
 0x562   :  { %v7820_v19 = vmul.f32 %v7801_v15, %v7771_v8  ;;  %v7772_v13 = vmul.f32 %v12051_v45, %v12632_v23  ;;  %v11955_v15 = vld [vmem:[#allocation10 + $0x30c] ss:$16 sps:$4 sm:$0xff]  }
 0x563   :  { %v11958_v8 = vld [vmem:[#allocation10 + $0x6ec] ss:$16 sps:$4 sm:$0xff]  }
 0x564   :  { %9698 = vmatpush2.bf16.msra.mxu0 %v11896_v10  ;;  %v7821_v22 = vmul.f32 %v7805_v26, %v7772_v13  ;;  %v7869_v24 = vadd.f32 %v7850_v12, %v7820_v19  ;;  %v11956_v10 = vld [vmem:[#allocation10 + $0x6e8] ss:$16 sps:$4 sm:$0xff]  }
 0x565   :  { %9699 = vmatprep.subr.bf16.mxu0 %v11904_v28  ;;  %v11959_v19 = vld [vmem:[#allocation10 + $0x6c8] ss:$16 sps:$4 sm:$0xff]  }
 0x566   :  { %v7870_v4 = vadd.f32 %v7854_v61, %v7821_v22  ;;  %v7877_v11 = vmax.f32 %v7869_v24, 0.0  ;;  %v11964_v61 = vld [vmem:[#allocation10 + $0x6ac] ss:$16 sps:$4 sm:$0xff]   ;;  %v11962_v22 = vld [vmem:[#allocation10 + $0x6a8] ss:$16 sps:$4 sm:$0xff]  }
 0x567   :  { %v11967_v24 = vld [vmem:[#allocation10 + $0x68c] ss:$16 sps:$4 sm:$0xff]  }
 0x568   :  { %9700 = vmatpush2.bf16.msra.mxu0 %v11902_v36  ;;  %v7878_v54 = vmax.f32 %v7870_v4, 0.0  ;;  %v12642_v6 = vpack.c.bf16 %v7877_v11, %v7877_v11  ;;  %v11965_v4 = vld [vmem:[#allocation10 + $0x688] ss:$16 sps:$4 sm:$0xff]  }
 0x569   :  { %v11968_v11 = vld [vmem:[#allocation10 + $0x668] ss:$16 sps:$4 sm:$0xff]  }
 0x56a   :  { %v12639_v32 = vpack.c.bf16 %v7878_v54, %v7878_v54  ;;  %v11973_v54 = vld [vmem:[#allocation10 + $0x64c] ss:$16 sps:$4 sm:$0xff]  }
 0x56b   :  { %v9457_v27 = vpop.f32.mrf.mxu0  ;;  %9702 = vmatmul.mubr.bf16.vlgmr.msra.gmra.mxu0 %v12615_v56  ;;  %v11916_v56 = vld [vmem:[#allocation10 + $0x2ac] ss:$16 sps:$4 sm:$0xff]  }
 0x56c   :  { %v9498_v23 = vpop.f32.mrf.mxu1  ;;  %9578 = vmatprep.mubr.bf16.mxu1 %v12639_v32 }
 0x56d   :  { %v12645_v39 = vadd.f32 %v9498_v23, %v9457_v27  ;;  %v9459_v38 = vpop.f32.mrf.mxu0  ;;  %9579 = vmatmul.mubr.bf16.vlgmr.msra.gmra.mxu1 %v12642_v6  ;;  %v11974_v27 = vld [vmem:[#allocation10 + $0x628] ss:$16 sps:$4 sm:$0xff]  }
 0x56e   :  { %v9500_v47 = vpop.f32.mrf.mxu1  ;;  %9629 = vmatpush1.bf16.msra.mxu1 %v11908_v34  ;;  %9660 = vmatprep.mubr.bf16.mxu1 %v12561_v20  ;;  %v11925_v20 = vld [vmem:[#allocation10 + $0x24c] ss:$16 sps:$4 sm:$0xff]   ;;  %v11971_v34 = vld [vmem:[#allocation10 + $0x648] ss:$16 sps:$4 sm:$0xff]  }
 0x56f   :  { %v12649_v41 = vadd.f32 %v9500_v47, %v9459_v38  ;;  %v9461_v21 = vpop.f32.mrf.mxu0  ;;  %9630 = vmatprep.subr.bf16.mxu1 %v11913_v46  ;;  %v11979_v46 = vld [vmem:[#allocation10 + $0x60c] ss:$16 sps:$4 sm:$0xff]   ;;  %v11977_v23 = vld [vmem:[#allocation10 + $0x608] ss:$16 sps:$4 sm:$0xff]  }
 0x570   :  { %v9502_v7 = vpop.f32.mrf.mxu1  ;;  %v11980_v38 = vld [vmem:[#allocation10 + $0x7e8] ss:$16 sps:$4 sm:$0xff]   ;;  %v11985_v47 = vld [vmem:[#allocation10 + $0x7cc] ss:$16 sps:$4 sm:$0xff]   ;;  %v12005_v21 = vld [vmem:[#allocation14 + $0x38] sm:$0xff]  }
 0x571   :  { %v9462_v43 = vpop.f32.mrf.mxu0  ;;  %v12006_v7 = vld [vmem:[#allocation14 + $0x70] sm:$0xff]  }
 0x572   :  { %v9503_v17 = vpop.f32.mrf.mxu1  ;;  %9631 = vmatpush1.bf16.msra.mxu1 %v11911_v9  ;;  %v12004_v9 = vld [vmem:[#allocation14 + $0x78] sm:$0xff]   ;;  %v11986_v43 = vld [vmem:[#allocation10 + $0x7a8] ss:$16 sps:$4 sm:$0xff]  }
 0x573   :  { %9632 = vmatprep.subr.bf16.mxu1 %v11916_v56  ;;  %v11988_v56 = vld [vmem:[#allocation10 + $0x7ac] ss:$16 sps:$4 sm:$0xff]   ;;  %11561 = vmatprep.subr.bf16.mxu0 %v12004_v9 }
 0x574   :  { %11562 = vmatpush3.bf16.msra.mxu0 %v12005_v21  ;;  %v12007_v17 = vld [vmem:[#allocation14 + $0x30] sm:$0xff]  }
 0x575   :  { %11563 = vmatprep.subr.bf16.mxu0 %v12006_v7 }
 0x576   :  { %9633 = vmatpush1.bf16.msra.mxu1 %v11914_v25  ;;  %v11991_v25 = vld [vmem:[#allocation10 + $0x78c] ss:$16 sps:$4 sm:$0xff]  }
 0x577   :  { %9634 = vmatprep.subr.bf16.mxu1 %v11919_v52  ;;  %v12008_v52 = vld [vmem:[#allocation14 + $0x68] sm:$0xff]  }
 0x578   :  { %11564 = vmatpush3.bf16.msra.mxu0 %v12007_v17 }
 0x579   :  { %11565 = vmatprep.subr.bf16.mxu0 %v12008_v52 }
 0x57a   :  { %9635 = vmatpush1.bf16.msra.mxu1 %v11917_v40  ;;  %v11989_v40 = vld [vmem:[#allocation10 + $0x788] ss:$16 sps:$4 sm:$0xff]  }
 0x57b   :  { %9636 = vmatprep.subr.bf16.mxu1 %v11922_v30  ;;  %v12009_v30 = vld [vmem:[#allocation14 + $0x28] sm:$0xff]  }
 0x57c   :  { %11566 = vmatpush3.bf16.msra.mxu0 %v12009_v30 }
 0x57e   :  { %9637 = vmatpush1.bf16.msra.mxu1 %v11920_v48  ;;  %v11994_v48 = vld [vmem:[#allocation10 + $0x76c] ss:$16 sps:$4 sm:$0xff]  }
 0x57f   :  { %9638 = vmatprep.subr.bf16.mxu1 %v11925_v20  ;;  %v12010_v20 = vld [vmem:[#allocation14 + $0x60] sm:$0xff]  }
 0x580   :  { %11567 = vmatprep.subr.bf16.mxu0 %v12010_v20  ;;  %v12020_v20 = vld [vmem:[#allocation14 + $0xf8] sm:$0xff]  }
 0x582   :  { %9639 = vmatpush1.bf16.msra.mxu1 %v11923_v2  ;;  %v11992_v2 = vld [vmem:[#allocation10 + $0x768] ss:$16 sps:$4 sm:$0xff]  }
 0x583   :  { %9640 = vmatprep.subr.bf16.mxu1 %v11928_v53  ;;  %v12011_v53 = vld [vmem:[#allocation14 + $0x20] sm:$0xff]  }
 0x584   :  { %11568 = vmatpush3.bf16.msra.mxu0 %v12011_v53 }
 0x586   :  { %9641 = vmatpush1.bf16.msra.mxu1 %v11926_v33  ;;  %v11997_v33 = vld [vmem:[#allocation10 + $0x74c] ss:$16 sps:$4 sm:$0xff]  }
 0x587   :  { %9642 = vmatprep.subr.bf16.mxu1 %v11931_v50  ;;  %v12012_v50 = vld [vmem:[#allocation14 + $0x58] sm:$0xff]  }
 0x588   :  { %11569 = vmatprep.subr.bf16.mxu0 %v12012_v50 }
 0x58a   :  { %9643 = vmatpush1.bf16.msra.mxu1 %v11929_v63  ;;  %v11995_v63 = vld [vmem:[#allocation10 + $0x748] ss:$16 sps:$4 sm:$0xff]  }
 0x58b   :  { %9644 = vmatprep.subr.bf16.mxu1 %v11934_v55  ;;  %v12013_v55 = vld [vmem:[#allocation14 + $0x18] sm:$0xff]  }
 0x58c   :  { %11570 = vmatpush3.bf16.msra.mxu0 %v12013_v55  ;;  %v12022_v55 = vld [vmem:[#allocation14 + $0xf0] sm:$0xff]  }
 0x58e   :  { %9645 = vmatpush2.bf16.msra.mxu1 %v11932_v29  ;;  %v12000_v29 = vld [vmem:[#allocation10 + $0x72c] ss:$16 sps:$4 sm:$0xff]  }
 0x58f   :  { %9646 = vmatprep.subr.bf16.mxu1 %v11937_v18  ;;  %v12014_v18 = vld [vmem:[#allocation14 + $0x50] sm:$0xff]  }
 0x590   :  { %11571 = vmatprep.subr.bf16.mxu0 %v12014_v18 }
 0x592   :  { %9647 = vmatpush2.bf16.msra.mxu1 %v11935_v44  ;;  %v11998_v44 = vld [vmem:[#allocation10 + $0x728] ss:$16 sps:$4 sm:$0xff]  }
 0x593   :  { %9648 = vmatprep.subr.bf16.mxu1 %v11940_v51  ;;  %v12015_v51 = vld [vmem:[#allocation14 + $0x10] sm:$0xff]  }
 0x594   :  { %11572 = vmatpush3.bf16.msra.mxu0 %v12015_v51  ;;  %v12025_v51 = vld [vmem:[#allocation14 + $0xa8] sm:$0xff]  }
 0x596   :  { %9649 = vmatpush2.bf16.msra.mxu1 %v11938_v42  ;;  %v12016_v42 = vld [vmem:[#allocation14 + $0x48] sm:$0xff]  }
 0x597   :  { %9650 = vmatprep.subr.bf16.mxu1 %v11943_v58  ;;  %v12003_v58 = vld [vmem:[#allocation10 + $0x70c] ss:$16 sps:$4 sm:$0xff]   ;;  %11573 = vmatprep.subr.bf16.mxu0 %v12016_v42 }
 0x598   :  { %v12026_v42 = vld [vmem:[#allocation14 + $0xe0] sm:$0xff]  }
 0x59a   :  { %9651 = vmatpush2.bf16.msra.mxu1 %v11941_v60  ;;  %v12017_v60 = vld [vmem:[#allocation14 + $0x8] sm:$0xff]  }
 0x59b   :  { %9652 = vmatprep.subr.bf16.mxu1 %v11946_v5  ;;  %v12018_v5 = vld [vmem:[#allocation14 + $0x40] sm:$0xff]   ;;  %11574 = vmatpush3.bf16.msra.mxu0 %v12017_v60  ;;  %v12670_v60 = vld [vmem:[#allocation11] sm:$0xf] }
 0x59c   :  { %11575 = vmatprep.subr.bf16.mxu0 %v12018_v5  ;;  %v12028_v5 = vld [vmem:[#allocation14 + $0xd8] sm:$0xff]  }
 0x59e   :  { %9653 = vmatpush2.bf16.msra.mxu1 %v11944_v62  ;;  %v12001_v62 = vld [vmem:[#allocation10 + $0x708] ss:$16 sps:$4 sm:$0xff]  }
 0x59f   :  { %9654 = vmatprep.subr.bf16.mxu1 %v11949_v35  ;;  %v12019_v35 = vld [vmem:[#allocation14] sm:$0xff]  }
 0x5a0   :  { %11576 = vmatpush3.bf16.msra.mxu0 %v12019_v35  ;;  %v12029_v35 = vld [vmem:[#allocation14 + $0x98] sm:$0xff]  }
 0x5a2   :  { %9655 = vmatpush2.bf16.msra.mxu1 %v11947_v59 }
 0x5a3   :  { %9656 = vmatprep.subr.bf16.mxu1 %v11952_v0 }
 0x5a6   :  { %9657 = vmatpush2.bf16.msra.mxu1 %v11950_v1 }
 0x5a7   :  { %9658 = vmatprep.subr.bf16.mxu1 %v11955_v15 }
 0x5aa   :  { %9659 = vmatpush2.bf16.msra.mxu1 %v11953_v31 }
 0x5ab   :  { %v9539_v26 = vpop.f32.mrf.mxu0  ;;  %9710 = vmatprep.subr.bf16.mxu1 %v11958_v8 }
 0x5ac   :  { %v12652_v12 = vadd.f32 %v9539_v26, %v12645_v39  ;;  %v11982_v39 = vld [vmem:[#allocation10 + $0x7ec] ss:$16 sps:$4 sm:$0xff]  }
 0x5ad   :  { %9661 = vmatmul.mubr.bf16.vlgmr.msra.gmra.mxu1 %v12598_v57  ;;  %v9541_v45 = vpop.f32.mrf.mxu0  ;;  %v11970_v57 = vld [vmem:[#allocation10 + $0x66c] ss:$16 sps:$4 sm:$0xff]  }
 0x5ae   :  { %v12656_v28 = vadd.f32 %v9541_v45, %v12649_v41  ;;  %9711 = vmatpush1.bf16.msra.mxu1 %v11956_v10  ;;  %9742 = vmatprep.mubr.bf16.mxu1 %v12639_v32  ;;  %v11976_v32 = vld [vmem:[#allocation10 + $0x62c] ss:$16 sps:$4 sm:$0xff]   ;;  %v11983_v41 = vld [vmem:[#allocation10 + $0x7c8] ss:$16 sps:$4 sm:$0xff]  }
 0x5af   :  { %v9543_v13 = vpop.f32.mrf.mxu0  ;;  %9712 = vmatprep.subr.bf16.mxu1 %v11961_v3 }
 0x5b1   :  { %v9544_v36 = vpop.f32.mrf.mxu0 }
 0x5b2   :  { %9713 = vmatpush1.bf16.msra.mxu1 %v11959_v19 }
 0x5b3   :  { %9714 = vmatprep.subr.bf16.mxu1 %v11964_v61 }
 0x5b6   :  { %9715 = vmatpush1.bf16.msra.mxu1 %v11962_v22 }
 0x5b7   :  { %9716 = vmatprep.subr.bf16.mxu1 %v11967_v24 }
 0x5ba   :  { %9717 = vmatpush1.bf16.msra.mxu1 %v11965_v4 }
 0x5bb   :  { %9718 = vmatprep.subr.bf16.mxu1 %v11970_v57 }
 0x5be   :  { %9719 = vmatpush1.bf16.msra.mxu1 %v11968_v11 }
 0x5bf   :  { %9720 = vmatprep.subr.bf16.mxu1 %v11973_v54 }
 0x5c2   :  { %9721 = vmatpush1.bf16.msra.mxu1 %v11971_v34 }
 0x5c3   :  { %9722 = vmatprep.subr.bf16.mxu1 %v11976_v32 }
 0x5c6   :  { %9723 = vmatpush1.bf16.msra.mxu1 %v11974_v27 }
 0x5c7   :  { %9724 = vmatprep.subr.bf16.mxu1 %v11979_v46 }
 0x5ca   :  { %9725 = vmatpush1.bf16.msra.mxu1 %v11977_v23 }
 0x5cb   :  { %9726 = vmatprep.subr.bf16.mxu1 %v11982_v39 }
 0x5ce   :  { %9727 = vmatpush2.bf16.msra.mxu1 %v11980_v38 }
 0x5cf   :  { %9728 = vmatprep.subr.bf16.mxu1 %v11985_v47 }
 0x5d2   :  { %9729 = vmatpush2.bf16.msra.mxu1 %v11983_v41 }
 0x5d3   :  { %9730 = vmatprep.subr.bf16.mxu1 %v11988_v56 }
 0x5d6   :  { %9731 = vmatpush2.bf16.msra.mxu1 %v11986_v43 }
 0x5d7   :  { %9732 = vmatprep.subr.bf16.mxu1 %v11991_v25 }
 0x5da   :  { %9733 = vmatpush2.bf16.msra.mxu1 %v11989_v40 }
 0x5db   :  { %9734 = vmatprep.subr.bf16.mxu1 %v11994_v48 }
 0x5de   :  { %9735 = vmatpush2.bf16.msra.mxu1 %v11992_v2  ;;  %v12021_v2 = vld [vmem:[#allocation14 + $0xb8] sm:$0xff]  }
 0x5df   :  { %9736 = vmatprep.subr.bf16.mxu1 %v11997_v33 }
 0x5e2   :  { %9737 = vmatpush2.bf16.msra.mxu1 %v11995_v63 }
 0x5e3   :  { %9738 = vmatprep.subr.bf16.mxu1 %v12000_v29  ;;  %v12023_v29 = vld [vmem:[#allocation14 + $0xb0] sm:$0xff]  }
 0x5e6   :  { %9739 = vmatpush2.bf16.msra.mxu1 %v11998_v44  ;;  %v12024_v44 = vld [vmem:[#allocation14 + $0xe8] sm:$0xff]  }
 0x5e7   :  { %9740 = vmatprep.subr.bf16.mxu1 %v12003_v58  ;;  %v12027_v58 = vld [vmem:[#allocation14 + $0xa0] sm:$0xff]  }
 0x5ea   :  { %9741 = vmatpush2.bf16.msra.mxu1 %v12001_v62  ;;  %v12672_v62 = vld [vmem:[#allocation13] sm:$0xf] }
 0x5eb   :  { %v12659_v59 = vpop.f32.mrf.mxu0  ;;  %11583 = vmatprep.subr.bf16.mxu1 %v12020_v20 }
 0x5ed   :  { %9743 = vmatmul.mubr.bf16.vlgmr.msra.gmra.mxu1 %v12642_v6  ;;  %v12662_v0 = vpop.f32.mrf.mxu0 }
 0x5ee   :  { %11584 = vmatpush3.bf16.msra.mxu1 %v12021_v2 }
 0x5ef   :  { %v9625_v1 = vpop.f32.mrf.mxu0  ;;  %11585 = vmatprep.subr.bf16.mxu1 %v12022_v55 }
 0x5f0   :  { %v9833_v1 = vrot.slane %v12670_v60, %v12572_v37 }
 0x5f1   :  { %v9626_v15 = vpop.f32.mrf.mxu0 }
 0x5f2   :  { %11586 = vmatpush3.bf16.msra.mxu1 %v12023_v29 }
 0x5f3   :  { %11587 = vmatprep.subr.bf16.mxu1 %v12024_v44 }
 0x5f6   :  { %11588 = vmatpush3.bf16.msra.mxu1 %v12025_v51 }
 0x5f7   :  { %11589 = vmatprep.subr.bf16.mxu1 %v12026_v42 }
 0x5fa   :  { %11590 = vmatpush3.bf16.msra.mxu1 %v12027_v58 }
 0x5fb   :  { %11591 = vmatprep.subr.bf16.mxu1 %v12028_v5 }
 0x5fe   :  { %11592 = vmatpush3.bf16.msra.mxu1 %v12029_v35 }
 0x62b   :  { %v12664_v31 = vpop.f32.mrf.mxu0 }
 0x62d   :  { %v9580_v8 = vpop.f32.mrf.mxu1  ;;  %v12666_v10 = vpop.f32.mrf.mxu0 }
 0x62e   :  { %v9581_v26 = vadd.f32 %v9580_v8, %v12652_v12 }
 0x62f   :  { %v9582_v3 = vpop.f32.mrf.mxu1  ;;  %v9707_v45 = vpop.f32.mrf.mxu0 }
 0x630   :  { %v9753_v19 = vrot.slane %v9581_v26, 4  ;;  %v9583_v13 = vadd.f32 %v9582_v3, %v12656_v28  ;;  %v9858_v3 = vrot.slane %v12672_v62, %v12572_v37  ;;  %v12030_v45 = vld [vmem:[#allocation14 + $0xd0] sm:$0xff]   ;;  %v12035_v37 = vld [vmem:[#allocation14 + $0x80] sm:$0xff]  }
 0x631   :  { %v9584_v61 = vpop.f32.mrf.mxu1  ;;  %v9708_v36 = vpop.f32.mrf.mxu0  ;;  %11593 = vmatprep.subr.bf16.mxu1 %v12030_v45 }
 0x632   :  { %v9754_v22 = vadd.f32 %v9753_v19, %v9581_v26  ;;  %v9759_v6 = vrot.slane %v9583_v13, 4 }
 0x633   :  { %v9585_v24 = vpop.f32.mrf.mxu1 }
 0x634   :  { %v9755_v4 = vrot.slane %v9754_v22, 2  ;;  %v9760_v57 = vadd.f32 %v9759_v6, %v9583_v13  ;;  %v12032_v6 = vld [vmem:[#allocation14 + $0xc8] sm:$0xff]  }
 0x635   :  { %v12033_v24 = vld [vmem:[#allocation14 + $0x88] sm:$0xff]  }
 0x636   :  { %v9756_v11 = vadd.f32 %v9755_v4, %v9754_v22  ;;  %v9761_v54 = vrot.slane %v9760_v57, 2  ;;  %v9862_v22 = vrot.slane %v12672_v62, %v12523_v16 }
 0x638   :  { %v9757_v34 = vrot.slane %v9756_v11, 1  ;;  %v9762_v32 = vadd.f32 %v9761_v54, %v9760_v57 }
 0x63a   :  { %v9758_v27 = vadd.f32 %v9757_v34, %v9756_v11  ;;  %v9763_v46 = vrot.slane %v9762_v32, 1  ;;  %v12034_v11 = vld [vmem:[#allocation14 + $0xc0] sm:$0xff]  }
 0x63c   :  { %v9777_v23 = vmul.f32 0.125, %v9758_v27  ;;  %v9764_v12 = vadd.f32 %v9763_v46, %v9762_v32 }
 0x63e   :  { %v9781_v39 = vsub.f32 %v9581_v26, %v9777_v23  ;;  %v9778_v38 = vmul.f32 0.125, %v9764_v12  ;;  %v9837_v26 = vrot.slane %v12670_v60, %v12523_v16 }
 0x640   :  { %v9785_v47 = vmul.f32 %v9781_v39, %v9781_v39  ;;  %v9782_v9 = vsub.f32 %v9583_v13, %v9778_v38  ;;  %v12031_v13 = vld [vmem:[#allocation14 + $0x90] sm:$0xff]  }
 0x641   :  { %11594 = vmatpush3.bf16.msra.mxu1 %v12031_v13 }
 0x642   :  { %v9789_v28 = vrot.slane %v9785_v47, 4  ;;  %v9786_v41 = vmul.f32 %v9782_v9, %v9782_v9  ;;  %11595 = vmatprep.subr.bf16.mxu1 %v12032_v6 }
 0x644   :  { %v9790_v21 = vadd.f32 %v9789_v28, %v9785_v47  ;;  %v9795_v56 = vrot.slane %v9786_v41, 4 }
 0x645   :  { %11596 = vmatpush3.bf16.msra.mxu1 %v12033_v24 }
 0x646   :  { %v9791_v7 = vrot.slane %v9790_v21, 2  ;;  %v9796_v43 = vadd.f32 %v9795_v56, %v9786_v41  ;;  %11597 = vmatprep.subr.bf16.mxu1 %v12034_v11 }
 0x648   :  { %v9792_v17 = vadd.f32 %v9791_v7, %v9790_v21  ;;  %v9797_v25 = vrot.slane %v9796_v43, 2 }
 0x649   :  { %11598 = vmatpush3.bf16.msra.mxu1 %v12035_v37  ;;  %v9870_v37 = vrot.slane %v12672_v62, %v12526_v49 }
 0x64a   :  { %v9793_v52 = vrot.slane %v9792_v17, 1  ;;  %v9798_v40 = vadd.f32 %v9797_v25, %v9796_v43 }
 0x64c   :  { %v9794_v30 = vadd.f32 %v9793_v52, %v9792_v17  ;;  %v9799_v48 = vrot.slane %v9798_v40, 1 }
 0x64e   :  { %v9813_v53 = vmul.f32 0.125, %v9794_v30  ;;  %v9800_v33 = vadd.f32 %v9799_v48, %v9798_v40 }
 0x650   :  { %v9817_v50 = vadd.f32 1e-05, %v9813_v53  ;;  %v9814_v63 = vmul.f32 0.125, %v9800_v33 }
 0x652   :  { %12052 = vrsqrt.f32 %v9817_v50  ;;  %v9818_v18 = vadd.f32 1e-05, %v9814_v63 }
 0x654   :  { %12054 = vrsqrt.f32 %v9818_v18 }
 0x65f   :  { %v12053_v15 = vpop.eup %12052 }
 0x660   :  { %v9825_v8 = vmul.f32 %v12053_v15, %v9781_v39 }
 0x661   :  { %v12055_v19 = vpop.eup %12054 }
 0x662   :  { %v9850_v61 = vmul.f32 %v9833_v1, %v9825_v8  ;;  %v9826_v36 = vmul.f32 %v12055_v19, %v9782_v9 }
 0x664   :  { %v9851_v4 = vmul.f32 %v9837_v26, %v9826_v36  ;;  %v9875_v57 = vadd.f32 %v9858_v3, %v9850_v61 }
 0x666   :  { %v9876_v54 = vadd.f32 %v9862_v22, %v9851_v4  ;;  %v9879_v34 = vmax.f32 %v9875_v57, 0.0  ;;  %v9841_v22 = vrot.slane %v12670_v60, %v12575_v14  ;;  %v9845_v4 = vrot.slane %v12670_v60, %v12526_v49 }
 0x667   :  { %v9866_v57 = vrot.slane %v12672_v62, %v12575_v14 }
 0x668   :  { %v9880_v32 = vmax.f32 %v9876_v54, 0.0  ;;  %v9883_v46 = vpack.c.bf16 %v9879_v34, %v9879_v34 }
 0x66a   :  { %v9884_v27 = vpack.c.bf16 %v9880_v32, %v9880_v32 }
 0x66c   :  { %10175 = vmatprep.mubr.bf16.mxu0 %v9884_v27 }
 0x66d   :  { %v9662_v23 = vpop.f32.mrf.mxu1  ;;  %10176 = vmatmul.mubr.bf16.vlgmr.msra.gmra.mxu0 %v9883_v46 }
 0x66e   :  { %v9663_v38 = vadd.f32 %v9662_v23, %v12659_v59 }
 0x66f   :  { %v9664_v16 = vpop.f32.mrf.mxu1 }
 0x670   :  { %v9665_v47 = vadd.f32 %v9664_v16, %v12662_v0  ;;  %v9704_v9 = vadd.f32 %v12664_v31, %v9663_v38 }
 0x671   :  { %v9666_v12 = vpop.f32.mrf.mxu1 }
 0x672   :  { %v9706_v21 = vadd.f32 %v12666_v10, %v9665_v47 }
 0x673   :  { %v9667_v39 = vpop.f32.mrf.mxu1 }
 0x6ad   :  { %v9744_v28 = vpop.f32.mrf.mxu1 }
 0x6ae   :  { %v9745_v41 = vadd.f32 %v9744_v28, %v9704_v9 }
 0x6af   :  { %v9746_v56 = vpop.f32.mrf.mxu1 }
 0x6b0   :  { %v9765_v7 = vrot.slane %v9745_v41, 4  ;;  %v9747_v43 = vadd.f32 %v9746_v56, %v9706_v21 }
 0x6b1   :  { %v9748_v17 = vpop.f32.mrf.mxu1 }
 0x6b2   :  { %v9766_v25 = vadd.f32 %v9765_v7, %v9745_v41  ;;  %v9771_v52 = vrot.slane %v9747_v43, 4 }
 0x6b3   :  { %v9749_v40 = vpop.f32.mrf.mxu1 }
 0x6b4   :  { %v9767_v30 = vrot.slane %v9766_v25, 2  ;;  %v9772_v48 = vadd.f32 %v9771_v52, %v9747_v43 }
 0x6b6   :  { %v9768_v20 = vadd.f32 %v9767_v30, %v9766_v25  ;;  %v9773_v2 = vrot.slane %v9772_v48, 2 }
 0x6b8   :  { %v9769_v59 = vrot.slane %v9768_v20, 1  ;;  %v9774_v53 = vadd.f32 %v9773_v2, %v9772_v48 }
 0x6ba   :  { %v9770_v0 = vadd.f32 %v9769_v59, %v9768_v20  ;;  %v9775_v33 = vrot.slane %v9774_v53, 1 }
 0x6bc   :  { %v9779_v31 = vmul.f32 0.125, %v9770_v0  ;;  %v9776_v50 = vadd.f32 %v9775_v33, %v9774_v53 }
 0x6be   :  { %v9783_v63 = vsub.f32 %v9745_v41, %v9779_v31  ;;  %v9780_v55 = vmul.f32 0.125, %v9776_v50 }
 0x6c0   :  { %v9787_v10 = vmul.f32 %v9783_v63, %v9783_v63  ;;  %v9784_v29 = vsub.f32 %v9747_v43, %v9780_v55 }
 0x6c2   :  { %v9801_v18 = vrot.slane %v9787_v10, 4  ;;  %v9788_v44 = vmul.f32 %v9784_v29, %v9784_v29 }
 0x6c4   :  { %v9802_v51 = vadd.f32 %v9801_v18, %v9787_v10  ;;  %v9807_v42 = vrot.slane %v9788_v44, 4 }
 0x6c6   :  { %v9803_v58 = vrot.slane %v9802_v51, 2  ;;  %v9808_v5 = vadd.f32 %v9807_v42, %v9788_v44 }
 0x6c8   :  { %v9804_v35 = vadd.f32 %v9803_v58, %v9802_v51  ;;  %v9809_v1 = vrot.slane %v9808_v5, 2 }
 0x6ca   :  { %v9805_v15 = vrot.slane %v9804_v35, 1  ;;  %v9810_v8 = vadd.f32 %v9809_v1, %v9808_v5 }
 0x6cc   :  { %v9806_v26 = vadd.f32 %v9805_v15, %v9804_v35  ;;  %v9811_v3 = vrot.slane %v9810_v8, 1 }
 0x6ce   :  { %v9815_v45 = vmul.f32 0.125, %v9806_v26  ;;  %v9812_v19 = vadd.f32 %v9811_v3, %v9810_v8 }
 0x6d0   :  { %v9819_v13 = vadd.f32 1e-05, %v9815_v45  ;;  %v9816_v61 = vmul.f32 0.125, %v9812_v19 }
 0x6d2   :  { %12056 = vrsqrt.f32 %v9819_v13  ;;  %v9820_v36 = vadd.f32 1e-05, %v9816_v61 }
 0x6d4   :  { %12058 = vrsqrt.f32 %v9820_v36 }
 0x6df   :  { %v12057_v6 = vpop.eup %12056 }
 0x6e0   :  { %v9827_v24 = vmul.f32 %v12057_v6, %v9783_v63 }
 0x6e1   :  { %v12059_v11 = vpop.eup %12058 }
 0x6e2   :  { %v9852_v54 = vmul.f32 %v9841_v22, %v9827_v24  ;;  %v9828_v34 = vmul.f32 %v12059_v11, %v9784_v29 }
 0x6e4   :  { %v9853_v32 = vmul.f32 %v9845_v4, %v9828_v34  ;;  %v9877_v27 = vadd.f32 %v9866_v57, %v9852_v54 }
 0x6e6   :  { %v9878_v46 = vadd.f32 %v9870_v37, %v9853_v32  ;;  %v9881_v23 = vmax.f32 %v9877_v27, 0.0 }
 0x6e8   :  { %v9882_v16 = vmax.f32 %v9878_v46, 0.0  ;;  %v9885_v39 = vpack.c.bf16 %v9881_v23, %v9881_v23 }
 0x6ea   :  { %v9886_v12 = vpack.c.bf16 %v9882_v16, %v9882_v16 }
 0x6ec   :  { %10215 = vmatprep.mubr.bf16.mxu1 %v9886_v12 }
 0x6ed   :  { %10216 = vmatmul.mubr.bf16.vlgmr.msra.gmra.mxu1 %v9885_v39 }
 0x72d   :  { %v11577_v38 = vpop.f32.mrf.mxu0 }
 0x72f   :  { %v11578_v60 = vpop.f32.mrf.mxu0 }
 0x730   :  { %v11579_v47 = vadd.f32 %v11578_v60, %v11577_v38 }
 0x731   :  { %v11580_v9 = vpop.f32.mrf.mxu0 }
 0x733   :  { %v11581_v14 = vpop.f32.mrf.mxu0 }
 0x7ad   :  { %v11599_v28 = vpop.f32.mrf.mxu1 }
 0x7af   :  { %v11600_v41 = vpop.f32.mrf.mxu1 }
 0x7b0   :  { %v11601_v21 = vadd.f32 %v11600_v41, %v11599_v28 }
 0x7b1   :  { %v11602_v56 = vpop.f32.mrf.mxu1 }
 0x7b2   :  { %v10218_v7 = vadd.f32 %v11601_v21, %v11579_v47 }
 0x7b3   :  { %v11603_v49 = vpop.f32.mrf.mxu1 }
 0x7b4   :  { %v10223_v62 = vmul.f32 %v10218_v7, %v10218_v7 }
 0x7b6   :  { %10224 = vadd.xlane.f32.xlu0 %v10223_v62 }
 0x83f   :  { %v10225_v43 = vpop.xlane.xlu0 %10224 }
 0x840   :  { %v10226_v17 = vmax.f32 %v10225_v43, 1e-24 }
 0x842   :  { %12060 = vrsqrt.f32 %v10226_v17 }
 0x84f   :  { %v12061_v25 = vpop.eup %12060 }
 0x850   :  { %v10228_v52 = vmul.f32 %v12061_v25, %v10218_v7 }
 0x852   :  { %10229 = vst [vmem:[#allocation16] sm:$0xff] %v10228_v52 }
 0x853   :  { %12235 = shalt.err (!%p12232_p2)
}
 0x854   :  { %10239 = dma.vmem_to_hbm [thread:$0]  %s10237_s7, 128, %s12705_s8, [#allocation4]  }
 0x855   :  { %12254 = dma.done.wait [#allocation4], 128  }
 0x856   :  { %12255 = vsyncadd [#allocation4], 4294967168 }
 0x857   :  { %10243 = vsyncpa [#allocation3], 1 }
 0x858   :  { %10244 = vsyncpa [#allocation6], 1 }
 0x859   :  { %10245 = vsyncpa [#allocation9], 1 }
 0x85a   :  { %10246 = vsyncpa [#allocation12], 1 }
 0x85b   :  { %10247 = vsyncpa [#allocation15], 1 }
 0x85c   :  { %10248 = vsyncpa [#allocation4], 1 }

</bundles_post_ra>
